<compile_context>
chip_gen: v5e
topology: v5e:2x2
jax: 0.10.0
libtpu: 0.0.40
codegen_flags: <defaults>
</compile_context>

<pallas_src>
import functools

import jax
import jax.numpy as jnp
from jax.experimental import pallas as pl
from jax.experimental.pallas import tpu as pltpu

# f32 matmuls everywhere (kernel + reference) — matches PyTorch fp32 semantics
# and keeps the numerical cross-check tight.
jax.config.update("jax_default_matmul_precision", "highest")

# ----------------------------- configuration ------------------------------
BATCH = 2
IN_CH = 6          # 3 RGB + 3 NPR channels (module rewires first conv to 6)
IMG = 16
STEM_C1 = 8
STEM_C2 = 16       # embedding dim D
HEADS = 2
D_HEAD = STEM_C2 // HEADS
MLP_HIDDEN = 2 * STEM_C2
OUT_DIM = 1
BN_EPS = 1e-5
HO1 = IMG // 2                     # conv1 output spatial size (8)
HO2 = IMG // 4                     # conv2 output spatial size (4)
N_TOK = HO2 * HO2                  # tokens per image after the 2-conv stem (16)
KTAPS = 9                          # 3x3 kernel taps
CONV1_K = IN_CH * 9                # 54
CONV1_K_PAD = 64                   # padded contraction dim for aligned loads
M2 = BATCH * N_TOK                 # 32 tokens total
M_ORD = KTAPS * M2                 # 288 ordered conv1 positions (tap-major)
NEG_BIG = -1e30                    # cross-batch attention mask value


def _hardswish(x):
    # x * relu6(x + 3) / 6  (torch.nn.Hardswish)
    return x * jnp.clip(x + 3.0, 0.0, 6.0) * (1.0 / 6.0)


# ------------------------------ fused kernel -------------------------------
def _levit_npr_fused_kernel(
    patches_ref, mask_ref, w1_ref, b1_ref,      # stem conv1 (composed im2col GEMM)
    w2_ref, b2_ref,                             # stem conv2 (per-tap weights)
    wqkv_ref, bqkv_ref, bias_ref,               # fused qkv + block-diag attention bias
    wproj_ref, bproj_ref,                       # attn output projection (per-head rows)
    wm1_ref, bm1_ref, wm2_ref, bm2_ref,         # MLP
    pool_ref, wcls_ref, bcls_ref,               # token-mean pool + classifier
    out_ref,                                    # output [B, OUT_DIM]
    *, scale,
):
    f32 = jnp.float32
    D, dh = STEM_C2, D_HEAD

    # ---- stem conv1: ONE GEMM over all 9*B*N tap-ordered positions ----
    h = jnp.dot(patches_ref[...], w1_ref[...], preferred_element_type=f32)
    h = _hardswish(h + b1_ref[...]) * mask_ref[...]        # [288, 8]; mask = conv2 zero-pad

    # ---- stem conv2: 9 tiny accumulating dots on static (tap-major) row slices ----
    acc = jnp.zeros((M2, STEM_C2), f32)
    for t in range(KTAPS):
        acc = acc + jnp.dot(h[t * M2:(t + 1) * M2, :], w2_ref[t],
                            preferred_element_type=f32)
    tokens = _hardswish(acc + b2_ref[...])                 # [32, 16]

    # ---- MHSA: one fused qkv matmul, per-head full-batch attention ----
    qkv = jnp.dot(tokens, wqkv_ref[...], preferred_element_type=f32) + bqkv_ref[...]  # [32,48]

    def head_attention(hh):
        # helper fn so per-head temporaries (q/k/v/s/p) die before the next head
        q = qkv[:, 0 * D + hh * dh: 0 * D + (hh + 1) * dh]            # [32, 8]
        k = qkv[:, 1 * D + hh * dh: 1 * D + (hh + 1) * dh]
        v = qkv[:, 2 * D + hh * dh: 2 * D + (hh + 1) * dh]
        # block-diagonal bias carries both the LeViT attention bias and the
        # cross-batch -1e30 mask, so one [32,8]@[8,32] matmul covers all batches.
        s = jax.lax.dot_general(q, k, (((1,), (1,)), ((), ())),
                                preferred_element_type=f32) * scale + bias_ref[hh]
        s = s - jnp.max(s, axis=-1, keepdims=True)
        p = jnp.exp(s)
        p = p * pl.reciprocal(jnp.sum(p, axis=-1, keepdims=True), approx=True)
        o = jnp.dot(p, v, preferred_element_type=f32)                  # [32, 8]
        return jnp.dot(o, wproj_ref[hh], preferred_element_type=f32)   # [32, 16]

    attn = head_attention(0)
    for hh in range(1, HEADS):
        attn = attn + head_attention(hh)
    xt = attn + bproj_ref[...] + tokens                    # proj bias + residual

    # ---- MLP block + residual ----
    hmid = _hardswish(jnp.dot(xt, wm1_ref[...], preferred_element_type=f32) + bm1_ref[...])
    xt = jnp.dot(hmid, wm2_ref[...], preferred_element_type=f32) + bm2_ref[...] + xt

    # ---- classifier first (16->1), then mean-pool as a matmul (commutes) ----
    logits = jnp.dot(xt, wcls_ref[...], preferred_element_type=f32)              # [32, 1]
    out = jnp.dot(pool_ref[...], logits, preferred_element_type=f32) + bcls_ref[...]
    out_ref[...] = out.astype(out_ref.dtype)


# ------------------------------ glue (plain JAX) ----------------------------
def im2col(x_nchw, k, s, p):
    """NCHW -> patch matrix [B, Ho, Wo, Cin*k*k] ordered to match torch conv weights."""
    B, C, H, W = x_nchw.shape
    xp = jnp.pad(x_nchw, ((0, 0), (0, 0), (p, p), (p, p)))
    Ho = (H + 2 * p - k) // s + 1
    Wo = (W + 2 * p - k) // s + 1
    cols = []
    for i in range(k):
        for j in range(k):
            cols.append(xp[:, :, i:i + s * Ho:s, j:j + s * Wo:s])   # [B, C, Ho, Wo]
    patches = jnp.stack(cols, axis=2)                               # [B, C, k*k, Ho, Wo]
    patches = patches.transpose(0, 3, 4, 1, 2).reshape(B, Ho, Wo, C * k * k)
    return patches, Ho, Wo


def build_conv2_ordered_patches(x):
    """Composed im2col: conv1 input patches in (tap, batch, token) order.

    Row t*B*N + b*N + oy*Wo2 + ox holds the 54-element conv1 patch at conv1
    output position (2*oy+di-1, 2*ox+dj-1) with tap t = di*3+dj; positions in
    conv2's zero padding get an all-zero row (and are masked after hardswish).
    Contraction dim is zero-padded 54 -> 64 for aligned operand loads.
    """
    pt1, Ho1, Wo1 = im2col(x, 3, 2, 1)                          # [B, 8, 8, 54]
    ptp = jnp.pad(pt1, ((0, 0), (1, 1), (1, 1), (0, 0)))        # conv2 pad=1 on conv1 grid
    taps = []
    for di in range(3):
        for dj in range(3):
            y = 2 * jnp.arange(HO2) + di                        # indices into padded grid
            xx = 2 * jnp.arange(HO2) + dj
            tap = ptp[:, y][:, :, xx]                           # [B, 4, 4, 54]
            taps.append(tap.reshape(M2, CONV1_K))
    patches = jnp.concatenate(taps, axis=0)                     # [288, 54]
    return jnp.pad(patches, ((0, 0), (0, CONV1_K_PAD - CONV1_K)))


def build_constants():
    """Shape-only constants: conv2 zero-pad validity mask and the pooling matrix."""
    masks = []
    for di in range(3):
        for dj in range(3):
            y1 = 2 * jnp.arange(HO2)[:, None] + di - 1
            x1 = 2 * jnp.arange(HO2)[None, :] + dj - 1
            valid = (y1 >= 0) & (y1 < HO1) & (x1 >= 0) & (x1 < HO1)     # [4, 4]
            masks.append(jnp.broadcast_to(valid[None], (BATCH, HO2, HO2)).reshape(-1))
    mask = jnp.concatenate(masks, axis=0).astype(jnp.float32)[:, None]  # [288, 1]

    rows = jnp.arange(BATCH)[:, None]
    cols = jnp.arange(M2)[None, :]
    pool_mat = jnp.where((cols // N_TOK) == rows, 1.0 / N_TOK, 0.0).astype(jnp.float32)
    return {"mask": mask, "pool_mat": pool_mat}


def fold_bn(w4d, gamma, beta, mean, var):
    """Fold eval-mode BatchNorm into the preceding (bias-free) conv; keep 4D weight."""
    scale = gamma / jnp.sqrt(var + BN_EPS)
    return w4d * scale[:, None, None, None], beta - mean * scale


def init_params(key):
    ks = iter(jax.random.split(key, 32))
    nrm = lambda shape, s=0.05: s * jax.random.normal(next(ks), shape, jnp.float32)

    p = {}
    # --- stem conv1: 3-channel weights duplicated to 6 (the NPR surgery) ---
    w3 = nrm((STEM_C1, 3, 3, 3))
    w6 = jnp.concatenate([w3, w3], axis=1)                      # [C1, 6, 3, 3]
    g1 = 1.0 + nrm((STEM_C1,)); b1 = nrm((STEM_C1,))
    m1 = nrm((STEM_C1,));       v1 = 1.0 + 0.1 * jnp.abs(nrm((STEM_C1,)))
    w1s, b1f = fold_bn(w6, g1, b1, m1, v1)
    p["conv1_w"] = w1s.reshape(STEM_C1, -1).T                   # [54, C1]  (c,i,j major)
    p["conv1_b"] = b1f.reshape(1, STEM_C1)
    # --- stem conv2 ---
    w2 = nrm((STEM_C2, STEM_C1, 3, 3))
    g2 = 1.0 + nrm((STEM_C2,)); b2 = nrm((STEM_C2,))
    m2 = nrm((STEM_C2,));       v2 = 1.0 + 0.1 * jnp.abs(nrm((STEM_C2,)))
    w2s, b2f = fold_bn(w2, g2, b2, m2, v2)
    p["conv2_w4"] = w2s                                         # [C2, C1, 3, 3] (BN folded)
    p["conv2_b"] = b2f.reshape(1, STEM_C2)

    D = STEM_C2
    # --- attention block ---
    p["qkv_w"] = nrm((D, 3 * D));        p["qkv_b"] = nrm((1, 3 * D))
    p["proj_w"] = nrm((D, D));           p["proj_b"] = nrm((1, D))
    p["attn_bias"] = nrm((HEADS, N_TOK, N_TOK))                 # LeViT attention bias
    # --- MLP block ---
    p["mlp1_w"] = nrm((D, MLP_HIDDEN));  p["mlp1_b"] = nrm((1, MLP_HIDDEN))
    p["mlp2_w"] = nrm((MLP_HIDDEN, D));  p["mlp2_b"] = nrm((1, D))
    # --- classifier head ---
    p["cls_w"] = nrm((D, OUT_DIM));      p["cls_b"] = nrm((1, OUT_DIM))
    return p


def prepare_kernel_params(p):
    """Repack module-style weights into the fused kernel's layout (done once)."""
    D, H, dh = STEM_C2, HEADS, D_HEAD
    kp = {}
    # conv1: zero-pad contraction dim 54 -> 64 (matches padded patches)
    kp["conv1_w"] = jnp.pad(p["conv1_w"], ((0, CONV1_K_PAD - CONV1_K), (0, 0)))   # [64, C1]
    kp["conv1_b"] = p["conv1_b"]
    # per-tap conv2 weights: [9, C1, C2], tap = di*3 + dj
    kp["conv2_w_taps"] = jnp.transpose(p["conv2_w4"], (2, 3, 1, 0)).reshape(KTAPS, STEM_C1, STEM_C2)
    kp["conv2_b"] = p["conv2_b"]
    # fused qkv (packed column order (qkv_idx, head, dh) — sliced per head in-kernel)
    kp["qkv_w"] = p["qkv_w"]
    kp["qkv_b"] = p["qkv_b"]
    # block-diagonal attention bias: valid blocks carry the LeViT bias,
    # cross-batch entries carry -1e30 so batch-merged softmax == per-batch softmax
    bias_bd = jnp.full((H, M2, M2), NEG_BIG, jnp.float32)
    for b in range(BATCH):
        sl = slice(b * N_TOK, (b + 1) * N_TOK)
        bias_bd = bias_bd.at[:, sl, sl].set(p["attn_bias"])
    kp["attn_bias_bd"] = bias_bd
    # per-head output-projection rows: [H, dh, D]
    kp["proj_w_split"] = jnp.stack([p["proj_w"][h * dh:(h + 1) * dh, :] for h in range(H)])
    kp["proj_b"] = p["proj_b"]
    kp["mlp1_w"] = p["mlp1_w"]; kp["mlp1_b"] = p["mlp1_b"]
    kp["mlp2_w"] = p["mlp2_w"]; kp["mlp2_b"] = p["mlp2_b"]
    kp["cls_w"] = p["cls_w"];   kp["cls_b"] = p["cls_b"]
    return kp


def forward(kp, aux, x):
    patches_ord = build_conv2_ordered_patches(x)               # [288, 64], depends only on x

    args = (
        patches_ord, aux["mask"],
        kp["conv1_w"], kp["conv1_b"],
        kp["conv2_w_taps"], kp["conv2_b"],
        kp["qkv_w"], kp["qkv_b"], kp["attn_bias_bd"],
        kp["proj_w_split"], kp["proj_b"],
        kp["mlp1_w"], kp["mlp1_b"], kp["mlp2_w"], kp["mlp2_b"],
        aux["pool_mat"],
        kp["cls_w"], kp["cls_b"],
    )

    flops = (
        2 * M_ORD * CONV1_K_PAD * STEM_C1
        + KTAPS * 2 * M2 * STEM_C1 * STEM_C2
        + 2 * M2 * STEM_C2 * (3 * STEM_C2)
        + HEADS * (2 * M2 * D_HEAD * M2 + 2 * M2 * M2 * D_HEAD + 2 * M2 * D_HEAD * STEM_C2)
        + 2 * M2 * STEM_C2 * MLP_HIDDEN + 2 * M2 * MLP_HIDDEN * STEM_C2
        + 2 * M2 * STEM_C2 * OUT_DIM + 2 * BATCH * M2 * OUT_DIM
    )
    bytes_accessed = 4 * (sum(int(a.size) for a in args) + BATCH * OUT_DIM)
    cost = pl.CostEstimate(flops=int(flops),
                           transcendentals=HEADS * M2 * M2 + HEADS * M2,
                           bytes_accessed=int(bytes_accessed))

    vmem = pl.BlockSpec(memory_space=pltpu.MemorySpace.VMEM)
    kernel = functools.partial(_levit_npr_fused_kernel, scale=1.0 / (D_HEAD ** 0.5))
    return pl.pallas_call(
        kernel,
        out_shape=jax.ShapeDtypeStruct((BATCH, OUT_DIM), jnp.float32),
        in_specs=[vmem] * len(args),
        out_specs=vmem,
        cost_estimate=cost,
    )(*args)


# ---------------------- pure-JAX reference (for checking) -------------------
def reference_forward(params, x):
    B, D, H, dh = BATCH, STEM_C2, HEADS, D_HEAD
    pt1, Ho1, Wo1 = im2col(x, 3, 2, 1)
    h = _hardswish(pt1.reshape(B * Ho1 * Wo1, -1) @ params["conv1_w"] + params["conv1_b"])
    h = h.reshape(B, Ho1, Wo1, STEM_C1).transpose(0, 3, 1, 2)           # NCHW
    pt2, Ho2, Wo2 = im2col(h, 3, 2, 1)
    w2_flat = params["conv2_w4"].reshape(STEM_C2, -1).T
    xt = _hardswish(pt2.reshape(B * Ho2 * Wo2, -1) @ w2_flat + params["conv2_b"])
    N = Ho2 * Wo2

    qkv = xt @ params["qkv_w"] + params["qkv_b"]
    qkv = qkv.reshape(B, N, 3, H, dh).transpose(2, 0, 3, 1, 4)
    q, k, v = qkv[0], qkv[1], qkv[2]                                    # [B,H,N,dh]
    s = jnp.einsum("bhqd,bhkd->bhqk", q, k) / (dh ** 0.5) + params["attn_bias"][None]
    p = jax.nn.softmax(s, axis=-1)
    o = jnp.einsum("bhqk,bhkd->bhqd", p, v)
    attn = o.transpose(0, 2, 1, 3).reshape(B * N, D)
    xt = attn @ params["proj_w"] + params["proj_b"] + xt

    hmid = _hardswish(xt @ params["mlp1_w"] + params["mlp1_b"])
    xt = hmid @ params["mlp2_w"] + params["mlp2_b"] + xt

    pooled = xt.reshape(B, N, D).mean(axis=1)                           # features.mean(dim=1)
    return pooled @ params["cls_w"] + params["cls_b"]


# ----------------------------------- main -----------------------------------
if __name__ == "__main__":
    key = jax.random.PRNGKey(0)
    k_param, k_data = jax.random.split(key)
    params = init_params(k_param)
    kparams = prepare_kernel_params(params)
    aux = build_constants()
    x = jax.random.normal(k_data, (BATCH, IN_CH, IMG, IMG), jnp.float32)

    out = jax.jit(forward)(kparams, aux, x)
    out = jax.block_until_ready(out)

    assert out.shape == (BATCH, OUT_DIM), out.shape
    assert bool(jnp.all(jnp.isfinite(out)))

    ref = reference_forward(params, x)
    # Tolerance loosened slightly vs v1 for the EUP approx reciprocal in softmax.
    assert bool(jnp.allclose(out, ref, rtol=2e-3, atol=5e-4)), (out, ref)
    print("KERNEL_OK")
</pallas_src>

<mosaic_0001>
module attributes {stable_mosaic.version = 11 : i64} {
  func.func @_levit_npr_fused_kernel(%arg0: memref<288x64xf32, #tpu.memory_space<vmem>>, %arg1: memref<288x1xf32, #tpu.memory_space<vmem>>, %arg2: memref<64x8xf32, #tpu.memory_space<vmem>>, %arg3: memref<1x8xf32, #tpu.memory_space<vmem>>, %arg4: memref<9x8x16xf32, #tpu.memory_space<vmem>>, %arg5: memref<1x16xf32, #tpu.memory_space<vmem>>, %arg6: memref<16x48xf32, #tpu.memory_space<vmem>>, %arg7: memref<1x48xf32, #tpu.memory_space<vmem>>, %arg8: memref<2x32x32xf32, #tpu.memory_space<vmem>>, %arg9: memref<2x8x16xf32, #tpu.memory_space<vmem>>, %arg10: memref<1x16xf32, #tpu.memory_space<vmem>>, %arg11: memref<16x32xf32, #tpu.memory_space<vmem>>, %arg12: memref<1x32xf32, #tpu.memory_space<vmem>>, %arg13: memref<32x16xf32, #tpu.memory_space<vmem>>, %arg14: memref<1x16xf32, #tpu.memory_space<vmem>>, %arg15: memref<2x32xf32, #tpu.memory_space<vmem>>, %arg16: memref<16x1xf32, #tpu.memory_space<vmem>>, %arg17: memref<1x1xf32, #tpu.memory_space<vmem>>, %arg18: memref<2x1xf32, #tpu.memory_space<vmem>>) attributes {dimension_semantics = [], scalar_prefetch = 0 : i64, scratch_operands = 0 : i64, tpu.core_type = #tpu.core_type<tc>} {
    %c0 = arith.constant 0 : index
    %c0_0 = arith.constant 0 : index
    %0 = vector.load %arg0[%c0, %c0_0] : memref<288x64xf32, #tpu.memory_space<vmem>>, vector<288x64xf32>
    %c0_1 = arith.constant 0 : index
    %c0_2 = arith.constant 0 : index
    %1 = vector.load %arg2[%c0_1, %c0_2] : memref<64x8xf32, #tpu.memory_space<vmem>>, vector<64x8xf32>
    %cst = arith.constant dense<0.000000e+00> : vector<288x8xf32>
    %2 = tpu.matmul %0, %1, %cst {dimension_numbers = #tpu.dot_dimension_numbers<[1], [0], [0], [1], [0, 0, 1, 1], [], []>, precision = #tpu.contract_precision<fp32>} : vector<288x64xf32>, vector<64x8xf32>, vector<288x8xf32> -> vector<288x8xf32>
    %c0_3 = arith.constant 0 : index
    %c0_4 = arith.constant 0 : index
    %3 = vector.load %arg3[%c0_3, %c0_4] : memref<1x8xf32, #tpu.memory_space<vmem>>, vector<1x8xf32>
    %4 = vector.broadcast %3 : vector<1x8xf32> to vector<288x8xf32>
    %5 = arith.addf %2, %4 : vector<288x8xf32>
    %cst_5 = arith.constant 3.000000e+00 : f32
    %6 = vector.broadcast %cst_5 : f32 to vector<288x8xf32>
    %7 = arith.addf %5, %6 : vector<288x8xf32>
    %cst_6 = arith.constant 0.000000e+00 : f32
    %cst_7 = arith.constant 6.000000e+00 : f32
    %8 = vector.broadcast %cst_6 : f32 to vector<288x8xf32>
    %9 = arith.maximumf %8, %7 : vector<288x8xf32>
    %10 = vector.broadcast %cst_7 : f32 to vector<288x8xf32>
    %11 = arith.minimumf %10, %9 : vector<288x8xf32>
    %12 = arith.mulf %5, %11 : vector<288x8xf32>
    %cst_8 = arith.constant 0.166666672 : f32
    %13 = vector.broadcast %cst_8 : f32 to vector<288x8xf32>
    %14 = arith.mulf %12, %13 : vector<288x8xf32>
    %c0_9 = arith.constant 0 : index
    %c0_10 = arith.constant 0 : index
    %15 = vector.load %arg1[%c0_9, %c0_10] : memref<288x1xf32, #tpu.memory_space<vmem>>, vector<288x1xf32>
    %16 = vector.broadcast %15 : vector<288x1xf32> to vector<288x8xf32>
    %17 = arith.mulf %14, %16 : vector<288x8xf32>
    %cst_11 = arith.constant 0.000000e+00 : f32
    %18 = vector.broadcast %cst_11 : f32 to vector<32x16xf32>
    %19 = vector.extract_strided_slice %17 {offsets = [0, 0], sizes = [32, 8], strides = [1, 1]} : vector<288x8xf32> to vector<32x8xf32>
    %c0_12 = arith.constant 0 : index
    %c0_13 = arith.constant 0 : index
    %c0_14 = arith.constant 0 : index
    %20 = vector.load %arg4[%c0_12, %c0_13, %c0_14] : memref<9x8x16xf32, #tpu.memory_space<vmem>>, vector<1x8x16xf32>
    %21 = vector.shape_cast %20 : vector<1x8x16xf32> to vector<8x16xf32>
    %cst_15 = arith.constant dense<0.000000e+00> : vector<32x16xf32>
    %22 = tpu.matmul %19, %21, %cst_15 {dimension_numbers = #tpu.dot_dimension_numbers<[1], [0], [0], [1], [0, 0, 1, 1], [], []>, precision = #tpu.contract_precision<fp32>} : vector<32x8xf32>, vector<8x16xf32>, vector<32x16xf32> -> vector<32x16xf32>
    %23 = arith.addf %18, %22 : vector<32x16xf32>
    %24 = vector.extract_strided_slice %17 {offsets = [32, 0], sizes = [32, 8], strides = [1, 1]} : vector<288x8xf32> to vector<32x8xf32>
    %c1 = arith.constant 1 : index
    %c0_16 = arith.constant 0 : index
    %c0_17 = arith.constant 0 : index
    %25 = vector.load %arg4[%c1, %c0_16, %c0_17] : memref<9x8x16xf32, #tpu.memory_space<vmem>>, vector<1x8x16xf32>
    %26 = vector.shape_cast %25 : vector<1x8x16xf32> to vector<8x16xf32>
    %cst_18 = arith.constant dense<0.000000e+00> : vector<32x16xf32>
    %27 = tpu.matmul %24, %26, %cst_18 {dimension_numbers = #tpu.dot_dimension_numbers<[1], [0], [0], [1], [0, 0, 1, 1], [], []>, precision = #tpu.contract_precision<fp32>} : vector<32x8xf32>, vector<8x16xf32>, vector<32x16xf32> -> vector<32x16xf32>
    %28 = arith.addf %23, %27 : vector<32x16xf32>
    %29 = vector.extract_strided_slice %17 {offsets = [64, 0], sizes = [32, 8], strides = [1, 1]} : vector<288x8xf32> to vector<32x8xf32>
    %c2 = arith.constant 2 : index
    %c0_19 = arith.constant 0 : index
    %c0_20 = arith.constant 0 : index
    %30 = vector.load %arg4[%c2, %c0_19, %c0_20] : memref<9x8x16xf32, #tpu.memory_space<vmem>>, vector<1x8x16xf32>
    %31 = vector.shape_cast %30 : vector<1x8x16xf32> to vector<8x16xf32>
    %cst_21 = arith.constant dense<0.000000e+00> : vector<32x16xf32>
    %32 = tpu.matmul %29, %31, %cst_21 {dimension_numbers = #tpu.dot_dimension_numbers<[1], [0], [0], [1], [0, 0, 1, 1], [], []>, precision = #tpu.contract_precision<fp32>} : vector<32x8xf32>, vector<8x16xf32>, vector<32x16xf32> -> vector<32x16xf32>
    %33 = arith.addf %28, %32 : vector<32x16xf32>
    %34 = vector.extract_strided_slice %17 {offsets = [96, 0], sizes = [32, 8], strides = [1, 1]} : vector<288x8xf32> to vector<32x8xf32>
    %c3 = arith.constant 3 : index
    %c0_22 = arith.constant 0 : index
    %c0_23 = arith.constant 0 : index
    %35 = vector.load %arg4[%c3, %c0_22, %c0_23] : memref<9x8x16xf32, #tpu.memory_space<vmem>>, vector<1x8x16xf32>
    %36 = vector.shape_cast %35 : vector<1x8x16xf32> to vector<8x16xf32>
    %cst_24 = arith.constant dense<0.000000e+00> : vector<32x16xf32>
    %37 = tpu.matmul %34, %36, %cst_24 {dimension_numbers = #tpu.dot_dimension_numbers<[1], [0], [0], [1], [0, 0, 1, 1], [], []>, precision = #tpu.contract_precision<fp32>} : vector<32x8xf32>, vector<8x16xf32>, vector<32x16xf32> -> vector<32x16xf32>
    %38 = arith.addf %33, %37 : vector<32x16xf32>
    %39 = vector.extract_strided_slice %17 {offsets = [128, 0], sizes = [32, 8], strides = [1, 1]} : vector<288x8xf32> to vector<32x8xf32>
    %c4 = arith.constant 4 : index
    %c0_25 = arith.constant 0 : index
    %c0_26 = arith.constant 0 : index
    %40 = vector.load %arg4[%c4, %c0_25, %c0_26] : memref<9x8x16xf32, #tpu.memory_space<vmem>>, vector<1x8x16xf32>
    %41 = vector.shape_cast %40 : vector<1x8x16xf32> to vector<8x16xf32>
    %cst_27 = arith.constant dense<0.000000e+00> : vector<32x16xf32>
    %42 = tpu.matmul %39, %41, %cst_27 {dimension_numbers = #tpu.dot_dimension_numbers<[1], [0], [0], [1], [0, 0, 1, 1], [], []>, precision = #tpu.contract_precision<fp32>} : vector<32x8xf32>, vector<8x16xf32>, vector<32x16xf32> -> vector<32x16xf32>
    %43 = arith.addf %38, %42 : vector<32x16xf32>
    %44 = vector.extract_strided_slice %17 {offsets = [160, 0], sizes = [32, 8], strides = [1, 1]} : vector<288x8xf32> to vector<32x8xf32>
    %c5 = arith.constant 5 : index
    %c0_28 = arith.constant 0 : index
    %c0_29 = arith.constant 0 : index
    %45 = vector.load %arg4[%c5, %c0_28, %c0_29] : memref<9x8x16xf32, #tpu.memory_space<vmem>>, vector<1x8x16xf32>
    %46 = vector.shape_cast %45 : vector<1x8x16xf32> to vector<8x16xf32>
    %cst_30 = arith.constant dense<0.000000e+00> : vector<32x16xf32>
    %47 = tpu.matmul %44, %46, %cst_30 {dimension_numbers = #tpu.dot_dimension_numbers<[1], [0], [0], [1], [0, 0, 1, 1], [], []>, precision = #tpu.contract_precision<fp32>} : vector<32x8xf32>, vector<8x16xf32>, vector<32x16xf32> -> vector<32x16xf32>
    %48 = arith.addf %43, %47 : vector<32x16xf32>
    %49 = vector.extract_strided_slice %17 {offsets = [192, 0], sizes = [32, 8], strides = [1, 1]} : vector<288x8xf32> to vector<32x8xf32>
    %c6 = arith.constant 6 : index
    %c0_31 = arith.constant 0 : index
    %c0_32 = arith.constant 0 : index
    %50 = vector.load %arg4[%c6, %c0_31, %c0_32] : memref<9x8x16xf32, #tpu.memory_space<vmem>>, vector<1x8x16xf32>
    %51 = vector.shape_cast %50 : vector<1x8x16xf32> to vector<8x16xf32>
    %cst_33 = arith.constant dense<0.000000e+00> : vector<32x16xf32>
    %52 = tpu.matmul %49, %51, %cst_33 {dimension_numbers = #tpu.dot_dimension_numbers<[1], [0], [0], [1], [0, 0, 1, 1], [], []>, precision = #tpu.contract_precision<fp32>} : vector<32x8xf32>, vector<8x16xf32>, vector<32x16xf32> -> vector<32x16xf32>
    %53 = arith.addf %48, %52 : vector<32x16xf32>
    %54 = vector.extract_strided_slice %17 {offsets = [224, 0], sizes = [32, 8], strides = [1, 1]} : vector<288x8xf32> to vector<32x8xf32>
    %c7 = arith.constant 7 : index
    %c0_34 = arith.constant 0 : index
    %c0_35 = arith.constant 0 : index
    %55 = vector.load %arg4[%c7, %c0_34, %c0_35] : memref<9x8x16xf32, #tpu.memory_space<vmem>>, vector<1x8x16xf32>
    %56 = vector.shape_cast %55 : vector<1x8x16xf32> to vector<8x16xf32>
    %cst_36 = arith.constant dense<0.000000e+00> : vector<32x16xf32>
    %57 = tpu.matmul %54, %56, %cst_36 {dimension_numbers = #tpu.dot_dimension_numbers<[1], [0], [0], [1], [0, 0, 1, 1], [], []>, precision = #tpu.contract_precision<fp32>} : vector<32x8xf32>, vector<8x16xf32>, vector<32x16xf32> -> vector<32x16xf32>
    %58 = arith.addf %53, %57 : vector<32x16xf32>
    %59 = vector.extract_strided_slice %17 {offsets = [256, 0], sizes = [32, 8], strides = [1, 1]} : vector<288x8xf32> to vector<32x8xf32>
    %c8 = arith.constant 8 : index
    %c0_37 = arith.constant 0 : index
    %c0_38 = arith.constant 0 : index
    %60 = vector.load %arg4[%c8, %c0_37, %c0_38] : memref<9x8x16xf32, #tpu.memory_space<vmem>>, vector<1x8x16xf32>
    %61 = vector.shape_cast %60 : vector<1x8x16xf32> to vector<8x16xf32>
    %cst_39 = arith.constant dense<0.000000e+00> : vector<32x16xf32>
    %62 = tpu.matmul %59, %61, %cst_39 {dimension_numbers = #tpu.dot_dimension_numbers<[1], [0], [0], [1], [0, 0, 1, 1], [], []>, precision = #tpu.contract_precision<fp32>} : vector<32x8xf32>, vector<8x16xf32>, vector<32x16xf32> -> vector<32x16xf32>
    %63 = arith.addf %58, %62 : vector<32x16xf32>
    %c0_40 = arith.constant 0 : index
    %c0_41 = arith.constant 0 : index
    %64 = vector.load %arg5[%c0_40, %c0_41] : memref<1x16xf32, #tpu.memory_space<vmem>>, vector<1x16xf32>
    %65 = vector.broadcast %64 : vector<1x16xf32> to vector<32x16xf32>
    %66 = arith.addf %63, %65 : vector<32x16xf32>
    %cst_42 = arith.constant 3.000000e+00 : f32
    %67 = vector.broadcast %cst_42 : f32 to vector<32x16xf32>
    %68 = arith.addf %66, %67 : vector<32x16xf32>
    %cst_43 = arith.constant 0.000000e+00 : f32
    %cst_44 = arith.constant 6.000000e+00 : f32
    %69 = vector.broadcast %cst_43 : f32 to vector<32x16xf32>
    %70 = arith.maximumf %69, %68 : vector<32x16xf32>
    %71 = vector.broadcast %cst_44 : f32 to vector<32x16xf32>
    %72 = arith.minimumf %71, %70 : vector<32x16xf32>
    %73 = arith.mulf %66, %72 : vector<32x16xf32>
    %cst_45 = arith.constant 0.166666672 : f32
    %74 = vector.broadcast %cst_45 : f32 to vector<32x16xf32>
    %75 = arith.mulf %73, %74 : vector<32x16xf32>
    %c0_46 = arith.constant 0 : index
    %c0_47 = arith.constant 0 : index
    %76 = vector.load %arg6[%c0_46, %c0_47] : memref<16x48xf32, #tpu.memory_space<vmem>>, vector<16x48xf32>
    %cst_48 = arith.constant dense<0.000000e+00> : vector<32x48xf32>
    %77 = tpu.matmul %75, %76, %cst_48 {dimension_numbers = #tpu.dot_dimension_numbers<[1], [0], [0], [1], [0, 0, 1, 1], [], []>, precision = #tpu.contract_precision<fp32>} : vector<32x16xf32>, vector<16x48xf32>, vector<32x48xf32> -> vector<32x48xf32>
    %c0_49 = arith.constant 0 : index
    %c0_50 = arith.constant 0 : index
    %78 = vector.load %arg7[%c0_49, %c0_50] : memref<1x48xf32, #tpu.memory_space<vmem>>, vector<1x48xf32>
    %79 = vector.broadcast %78 : vector<1x48xf32> to vector<32x48xf32>
    %80 = arith.addf %77, %79 : vector<32x48xf32>
    %81 = vector.extract_strided_slice %80 {offsets = [0, 0], sizes = [32, 8], strides = [1, 1]} : vector<32x48xf32> to vector<32x8xf32>
    %82 = vector.extract_strided_slice %80 {offsets = [0, 16], sizes = [32, 8], strides = [1, 1]} : vector<32x48xf32> to vector<32x8xf32>
    %83 = vector.extract_strided_slice %80 {offsets = [0, 32], sizes = [32, 8], strides = [1, 1]} : vector<32x48xf32> to vector<32x8xf32>
    %cst_51 = arith.constant dense<0.000000e+00> : vector<32x32xf32>
    %84 = tpu.matmul %81, %82, %cst_51 {dimension_numbers = #tpu.dot_dimension_numbers<[1], [1], [0], [0], [0, 0, 1, 0], [], []>, precision = #tpu.contract_precision<fp32>} : vector<32x8xf32>, vector<32x8xf32>, vector<32x32xf32> -> vector<32x32xf32>
    %cst_52 = arith.constant 0.353553385 : f32
    %85 = vector.broadcast %cst_52 : f32 to vector<32x32xf32>
    %86 = arith.mulf %84, %85 : vector<32x32xf32>
    %c0_53 = arith.constant 0 : index
    %c0_54 = arith.constant 0 : index
    %c0_55 = arith.constant 0 : index
    %87 = vector.load %arg8[%c0_53, %c0_54, %c0_55] : memref<2x32x32xf32, #tpu.memory_space<vmem>>, vector<1x32x32xf32>
    %88 = vector.shape_cast %87 : vector<1x32x32xf32> to vector<32x32xf32>
    %89 = arith.addf %86, %88 : vector<32x32xf32>
    %cst_56 = arith.constant dense<0xFF800000> : vector<32xf32>
    %90 = vector.multi_reduction <maximumf>, %89, %cst_56 [1] : vector<32x32xf32> to vector<32xf32>
    %91 = vector.shape_cast %90 : vector<32xf32> to vector<32x1xf32>
    %92 = vector.broadcast %91 : vector<32x1xf32> to vector<32x32xf32>
    %93 = arith.subf %89, %92 : vector<32x32xf32>
    %94 = math.exp %93 : vector<32x32xf32>
    %cst_57 = arith.constant dense<0.000000e+00> : vector<32xf32>
    %95 = vector.multi_reduction <add>, %94, %cst_57 [1] : vector<32x32xf32> to vector<32xf32>
    %96 = vector.shape_cast %95 : vector<32xf32> to vector<32x1xf32>
    %97 = tpu.reciprocal %96 {approx = true} : vector<32x1xf32> -> vector<32x1xf32>
    %98 = vector.broadcast %97 : vector<32x1xf32> to vector<32x32xf32>
    %99 = arith.mulf %94, %98 : vector<32x32xf32>
    %cst_58 = arith.constant dense<0.000000e+00> : vector<32x8xf32>
    %100 = tpu.matmul %99, %83, %cst_58 {dimension_numbers = #tpu.dot_dimension_numbers<[1], [0], [0], [1], [0, 0, 1, 1], [], []>, precision = #tpu.contract_precision<fp32>} : vector<32x32xf32>, vector<32x8xf32>, vector<32x8xf32> -> vector<32x8xf32>
    %c0_59 = arith.constant 0 : index
    %c0_60 = arith.constant 0 : index
    %c0_61 = arith.constant 0 : index
    %101 = vector.load %arg9[%c0_59, %c0_60, %c0_61] : memref<2x8x16xf32, #tpu.memory_space<vmem>>, vector<1x8x16xf32>
    %102 = vector.shape_cast %101 : vector<1x8x16xf32> to vector<8x16xf32>
    %cst_62 = arith.constant dense<0.000000e+00> : vector<32x16xf32>
    %103 = tpu.matmul %100, %102, %cst_62 {dimension_numbers = #tpu.dot_dimension_numbers<[1], [0], [0], [1], [0, 0, 1, 1], [], []>, precision = #tpu.contract_precision<fp32>} : vector<32x8xf32>, vector<8x16xf32>, vector<32x16xf32> -> vector<32x16xf32>
    %104 = vector.extract_strided_slice %80 {offsets = [0, 8], sizes = [32, 8], strides = [1, 1]} : vector<32x48xf32> to vector<32x8xf32>
    %105 = vector.extract_strided_slice %80 {offsets = [0, 24], sizes = [32, 8], strides = [1, 1]} : vector<32x48xf32> to vector<32x8xf32>
    %106 = vector.extract_strided_slice %80 {offsets = [0, 40], sizes = [32, 8], strides = [1, 1]} : vector<32x48xf32> to vector<32x8xf32>
    %cst_63 = arith.constant dense<0.000000e+00> : vector<32x32xf32>
    %107 = tpu.matmul %104, %105, %cst_63 {dimension_numbers = #tpu.dot_dimension_numbers<[1], [1], [0], [0], [0, 0, 1, 0], [], []>, precision = #tpu.contract_precision<fp32>} : vector<32x8xf32>, vector<32x8xf32>, vector<32x32xf32> -> vector<32x32xf32>
    %cst_64 = arith.constant 0.353553385 : f32
    %108 = vector.broadcast %cst_64 : f32 to vector<32x32xf32>
    %109 = arith.mulf %107, %108 : vector<32x32xf32>
    %c1_65 = arith.constant 1 : index
    %c0_66 = arith.constant 0 : index
    %c0_67 = arith.constant 0 : index
    %110 = vector.load %arg8[%c1_65, %c0_66, %c0_67] : memref<2x32x32xf32, #tpu.memory_space<vmem>>, vector<1x32x32xf32>
    %111 = vector.shape_cast %110 : vector<1x32x32xf32> to vector<32x32xf32>
    %112 = arith.addf %109, %111 : vector<32x32xf32>
    %cst_68 = arith.constant dense<0xFF800000> : vector<32xf32>
    %113 = vector.multi_reduction <maximumf>, %112, %cst_68 [1] : vector<32x32xf32> to vector<32xf32>
    %114 = vector.shape_cast %113 : vector<32xf32> to vector<32x1xf32>
    %115 = vector.broadcast %114 : vector<32x1xf32> to vector<32x32xf32>
    %116 = arith.subf %112, %115 : vector<32x32xf32>
    %117 = math.exp %116 : vector<32x32xf32>
    %cst_69 = arith.constant dense<0.000000e+00> : vector<32xf32>
    %118 = vector.multi_reduction <add>, %117, %cst_69 [1] : vector<32x32xf32> to vector<32xf32>
    %119 = vector.shape_cast %118 : vector<32xf32> to vector<32x1xf32>
    %120 = tpu.reciprocal %119 {approx = true} : vector<32x1xf32> -> vector<32x1xf32>
    %121 = vector.broadcast %120 : vector<32x1xf32> to vector<32x32xf32>
    %122 = arith.mulf %117, %121 : vector<32x32xf32>
    %cst_70 = arith.constant dense<0.000000e+00> : vector<32x8xf32>
    %123 = tpu.matmul %122, %106, %cst_70 {dimension_numbers = #tpu.dot_dimension_numbers<[1], [0], [0], [1], [0, 0, 1, 1], [], []>, precision = #tpu.contract_precision<fp32>} : vector<32x32xf32>, vector<32x8xf32>, vector<32x8xf32> -> vector<32x8xf32>
    %c1_71 = arith.constant 1 : index
    %c0_72 = arith.constant 0 : index
    %c0_73 = arith.constant 0 : index
    %124 = vector.load %arg9[%c1_71, %c0_72, %c0_73] : memref<2x8x16xf32, #tpu.memory_space<vmem>>, vector<1x8x16xf32>
    %125 = vector.shape_cast %124 : vector<1x8x16xf32> to vector<8x16xf32>
    %cst_74 = arith.constant dense<0.000000e+00> : vector<32x16xf32>
    %126 = tpu.matmul %123, %125, %cst_74 {dimension_numbers = #tpu.dot_dimension_numbers<[1], [0], [0], [1], [0, 0, 1, 1], [], []>, precision = #tpu.contract_precision<fp32>} : vector<32x8xf32>, vector<8x16xf32>, vector<32x16xf32> -> vector<32x16xf32>
    %127 = arith.addf %103, %126 : vector<32x16xf32>
    %c0_75 = arith.constant 0 : index
    %c0_76 = arith.constant 0 : index
    %128 = vector.load %arg10[%c0_75, %c0_76] : memref<1x16xf32, #tpu.memory_space<vmem>>, vector<1x16xf32>
    %129 = vector.broadcast %128 : vector<1x16xf32> to vector<32x16xf32>
    %130 = arith.addf %127, %129 : vector<32x16xf32>
    %131 = arith.addf %130, %75 : vector<32x16xf32>
    %c0_77 = arith.constant 0 : index
    %c0_78 = arith.constant 0 : index
    %132 = vector.load %arg11[%c0_77, %c0_78] : memref<16x32xf32, #tpu.memory_space<vmem>>, vector<16x32xf32>
    %cst_79 = arith.constant dense<0.000000e+00> : vector<32x32xf32>
    %133 = tpu.matmul %131, %132, %cst_79 {dimension_numbers = #tpu.dot_dimension_numbers<[1], [0], [0], [1], [0, 0, 1, 1], [], []>, precision = #tpu.contract_precision<fp32>} : vector<32x16xf32>, vector<16x32xf32>, vector<32x32xf32> -> vector<32x32xf32>
    %c0_80 = arith.constant 0 : index
    %c0_81 = arith.constant 0 : index
    %134 = vector.load %arg12[%c0_80, %c0_81] : memref<1x32xf32, #tpu.memory_space<vmem>>, vector<1x32xf32>
    %135 = vector.broadcast %134 : vector<1x32xf32> to vector<32x32xf32>
    %136 = arith.addf %133, %135 : vector<32x32xf32>
    %cst_82 = arith.constant 3.000000e+00 : f32
    %137 = vector.broadcast %cst_82 : f32 to vector<32x32xf32>
    %138 = arith.addf %136, %137 : vector<32x32xf32>
    %cst_83 = arith.constant 0.000000e+00 : f32
    %cst_84 = arith.constant 6.000000e+00 : f32
    %139 = vector.broadcast %cst_83 : f32 to vector<32x32xf32>
    %140 = arith.maximumf %139, %138 : vector<32x32xf32>
    %141 = vector.broadcast %cst_84 : f32 to vector<32x32xf32>
    %142 = arith.minimumf %141, %140 : vector<32x32xf32>
    %143 = arith.mulf %136, %142 : vector<32x32xf32>
    %cst_85 = arith.constant 0.166666672 : f32
    %144 = vector.broadcast %cst_85 : f32 to vector<32x32xf32>
    %145 = arith.mulf %143, %144 : vector<32x32xf32>
    %c0_86 = arith.constant 0 : index
    %c0_87 = arith.constant 0 : index
    %146 = vector.load %arg13[%c0_86, %c0_87] : memref<32x16xf32, #tpu.memory_space<vmem>>, vector<32x16xf32>
    %cst_88 = arith.constant dense<0.000000e+00> : vector<32x16xf32>
    %147 = tpu.matmul %145, %146, %cst_88 {dimension_numbers = #tpu.dot_dimension_numbers<[1], [0], [0], [1], [0, 0, 1, 1], [], []>, precision = #tpu.contract_precision<fp32>} : vector<32x32xf32>, vector<32x16xf32>, vector<32x16xf32> -> vector<32x16xf32>
    %c0_89 = arith.constant 0 : index
    %c0_90 = arith.constant 0 : index
    %148 = vector.load %arg14[%c0_89, %c0_90] : memref<1x16xf32, #tpu.memory_space<vmem>>, vector<1x16xf32>
    %149 = vector.broadcast %148 : vector<1x16xf32> to vector<32x16xf32>
    %150 = arith.addf %147, %149 : vector<32x16xf32>
    %151 = arith.addf %150, %131 : vector<32x16xf32>
    %c0_91 = arith.constant 0 : index
    %c0_92 = arith.constant 0 : index
    %152 = vector.load %arg16[%c0_91, %c0_92] : memref<16x1xf32, #tpu.memory_space<vmem>>, vector<16x1xf32>
    %cst_93 = arith.constant dense<0.000000e+00> : vector<32x1xf32>
    %153 = tpu.matmul %151, %152, %cst_93 {dimension_numbers = #tpu.dot_dimension_numbers<[1], [0], [0], [1], [0, 0, 1, 1], [], []>, precision = #tpu.contract_precision<fp32>} : vector<32x16xf32>, vector<16x1xf32>, vector<32x1xf32> -> vector<32x1xf32>
    %c0_94 = arith.constant 0 : index
    %c0_95 = arith.constant 0 : index
    %154 = vector.load %arg15[%c0_94, %c0_95] : memref<2x32xf32, #tpu.memory_space<vmem>>, vector<2x32xf32>
    %cst_96 = arith.constant dense<0.000000e+00> : vector<2x1xf32>
    %155 = tpu.matmul %154, %153, %cst_96 {dimension_numbers = #tpu.dot_dimension_numbers<[1], [0], [0], [1], [0, 0, 1, 1], [], []>, precision = #tpu.contract_precision<fp32>} : vector<2x32xf32>, vector<32x1xf32>, vector<2x1xf32> -> vector<2x1xf32>
    %c0_97 = arith.constant 0 : index
    %c0_98 = arith.constant 0 : index
    %156 = vector.load %arg17[%c0_97, %c0_98] : memref<1x1xf32, #tpu.memory_space<vmem>>, vector<1x1xf32>
    %157 = vector.broadcast %156 : vector<1x1xf32> to vector<2x1xf32>
    %158 = arith.addf %155, %157 : vector<2x1xf32>
    %c0_99 = arith.constant 0 : index
    %c0_100 = arith.constant 0 : index
    %159 = vector.load %arg18[%c0_99, %c0_100] : memref<2x1xf32, #tpu.memory_space<vmem>>, vector<2x1xf32>
    tpu.vector_store %arg18[%c0_99, %c0_100], %158 {strides = array<i32>} : memref<2x1xf32, #tpu.memory_space<vmem>>, vector<2x1xf32>,
    return
  }
}

</mosaic_0001>

<bundles_post_ra>
// kernel: forward.1
= control target key start
LH: loop header
LB: loop body
LE: loop exit
PB: predicated region body
PF: predicated region fallthrough
CT: control target
= control target key end

     0   :  { %vm109_vm0 = vcmask 523264   ;;  %vm1975_vm1 = vcmask 64512   ;;  %vm4311_vm2 = vcmask 130048   ;;  %s7549_s22 = smov 96   ;;  %vm4894_vm3 = vcmask 261120   ;;  %s7550_s28 = smov 104   ;;  %s10469_s2 = inlined_call_operand.vmem [shape: f32[64,8], index: 2, kind: input, shape index: {}]   ;;  %s10470_s0 = inlined_call_operand.vmem [shape: f32[288,64], index: 0, kind: input, shape index: {}]   ;;  %s10471_s3 = inlined_call_operand.vmem [shape: f32[1,8], index: 3, kind: input, shape index: {}]   ;;  %s10472_s4 = inlined_call_operand.vmem [shape: f32[9,8,16], index: 4, kind: input, shape index: {}]   ;;  %s10473_s1 = inlined_call_operand.vmem [shape: f32[288,1], index: 1, kind: input, shape index: {}]   ;;  %s10474_s5 = inlined_call_operand.vmem [shape: f32[1,16], index: 5, kind: input, shape index: {}]   ;;  %s10475_s6 = inlined_call_operand.vmem [shape: f32[16,48], index: 6, kind: input, shape index: {}]   ;;  %s10476_s7 = inlined_call_operand.vmem [shape: f32[1,48], index: 7, kind: input, shape index: {}]   ;;  %s10477_s8 = inlined_call_operand.vmem [shape: f32[2,32,32], index: 8, kind: input, shape index: {}]   ;;  %s10478_s9 = inlined_call_operand.vmem [shape: f32[2,8,16], index: 9, kind: input, shape index: {}]   ;;  %s10479_s10 = inlined_call_operand.vmem [shape: f32[1,16], index: 10, kind: input, shape index: {}]   ;;  %s10480_s11 = inlined_call_operand.vmem [shape: f32[16,32], index: 11, kind: input, shape index: {}]   ;;  %s10481_s12 = inlined_call_operand.vmem [shape: f32[1,32], index: 12, kind: input, shape index: {}]   ;;  %s10482_s13 = inlined_call_operand.vmem [shape: f32[32,16], index: 13, kind: input, shape index: {}]   ;;  %s10483_s14 = inlined_call_operand.vmem [shape: f32[1,16], index: 14, kind: input, shape index: {}]   ;;  %s10484_s16 = inlined_call_operand.vmem [shape: f32[16,1], index: 16, kind: input, shape index: {}]   ;;  %s10485_s15 = inlined_call_operand.vmem [shape: f32[2,32], index: 15, kind: input, shape index: {}]   ;;  %s10486_s17 = inlined_call_operand.<no memory space> [shape: f32[1,1], index: 17, kind: input, shape index: {}]   ;;  %s10487_s18 = inlined_call_operand.vmem [shape: f32[2,1], index: 18, kind: output, shape index: {}]  }
   0x1   :  { %10579 = sst [smem:[#allocation79_spill]] %s10469_s2  ;;  %s7551_s30 = smov 120   ;;  %vm7478_vm4 = vcmask 1024  }
   0x2   :  { %10580 = sst [smem:[#allocation80_spill]] %s10470_s0 }
   0x3   :  { %10581 = sst [smem:[#allocation81_spill]] %s10471_s3 }
   0x4   :  { %s10582_s29 = sld [smem:[#allocation79_spill]] }
   0x5   :  { %s10583_s19 = sld [smem:[#allocation80_spill]] }
   0x6   :  { %s10584_s27 = sld [smem:[#allocation81_spill]] }
   0xa   :  { %v104_v0 = vld [vmem:[%s10582_s29 + $0x38] sm:$0xff]  ;;  %v103_v1 = vld [vmem:[%s10582_s29 + $0x30] sm:$0xff]  ;;  %v102_v2 = vld [vmem:[%s10582_s29 + $0x28] sm:$0xff] }
   0xb   :  { %v7657_v3 = vand.u32 4294901760, %v104_v0  ;;  %v7659_v4 = vand.u32 4294901760, %v103_v1  ;;  %v7661_v5 = vand.u32 4294901760, %v102_v2  ;;  %v101_v6 = vld [vmem:[%s10582_s29 + $0x20] sm:$0xff]  ;;  %v100_v7 = vld [vmem:[%s10582_s29 + $0x18] sm:$0xff]  ;;  %v99_v8 = vld [vmem:[%s10582_s29 + $0x10] sm:$0xff] }
   0xc   :  { %v7672_v9 = vand.u32 4294901760, %v101_v6  ;;  %v7674_v10 = vand.u32 4294901760, %v100_v7  ;;  %v7676_v11 = vand.u32 4294901760, %v99_v8  ;;  %v98_v12 = vld [vmem:[%s10582_s29 + $0x8] sm:$0xff]  ;;  %v97_v13 = vld [vmem:[%s10582_s29] sm:$0xff]  ;;  %v63_v37 = vld [vmem:[%s10583_s19 + $0x10] sm:$0xff] }
   0xd   :  { %v61_v14 = vld [vmem:[%s10583_s19] sm:$0xff]  ;;  %227 = vmatpush.msra.mxu0 %v7657_v3  ;;  %v7689_v15 = vsub.f32 %v104_v0, %v7657_v3  ;;  %v7692_v16 = vsub.f32 %v103_v1, %v7659_v4  ;;  %954 = vmatpush.msra.mxu3 %v7657_v3  ;;  %v7696_v17 = vsub.f32 %v102_v2, %v7661_v5  ;;  %v7698_v18 = vand.u32 4294901760, %v98_v12  ;;  %v62_v36 = vld [vmem:[%s10583_s19 + $0x8] sm:$0xff]  ;;  %v64_v59 = vld [vmem:[%s10583_s19 + $0x18] sm:$0xff] }
   0xe   :  { %v7701_v19 = vsub.f32 %v101_v6, %v7672_v9  ;;  %v7704_v20 = vsub.f32 %v100_v7, %v7674_v10  ;;  %v7706_v21 = vand.u32 4294901760, %v97_v13  ;;  %v7709_v22 = vsub.f32 %v99_v8, %v7676_v11 }
   0xf   :  { %229 = vmatpush.msra.mxu0 %v7659_v4  ;;  %742 = vmatpush.msra.mxu2 %v7689_v15  ;;  %v541_v23 = vand.u32 4294901760, %v7689_v15  ;;  %v547_v24 = vand.u32 4294901760, %v7692_v16  ;;  %v553_v25 = vand.u32 4294901760, %v7696_v17  ;;  %v111_v26 = vsel %vm109_vm0, %v61_v14, 0 }
  0x10   :  { %956 = vmatpush.msra.mxu3 %v7659_v4  ;;  %v559_v27 = vand.u32 4294901760, %v7701_v19  ;;  %v7719_v28 = vand.u32 4294901760, %v111_v26  ;;  %v565_v29 = vand.u32 4294901760, %v7704_v20  ;;  %v7723_v30 = vsub.f32 %v98_v12, %v7698_v18  ;;  %v65_v12 = vld [vmem:[%s10583_s19 + $0x20] sm:$0xff] }
  0x11   :  { %231 = vmatpush.msra.mxu0 %v7661_v5  ;;  %745 = vmatpush.msra.mxu2 %v7692_v16  ;;  %v542_v31 = vsub.f32 %v7689_v15, %v541_v23  ;;  %v548_v32 = vsub.f32 %v7692_v16, %v547_v24  ;;  %v554_v33 = vsub.f32 %v7696_v17, %v553_v25  ;;  %v571_v35 = vand.u32 4294901760, %v7709_v22 }
  0x12   :  { %958 = vmatpush.msra.mxu3 %v7661_v5  ;;  %v243_v34 = vsub.f32 %v111_v26, %v7719_v28  ;;  %v560_v40 = vsub.f32 %v7701_v19, %v559_v27  ;;  %v7751_v41 = vsub.f32 %v97_v13, %v7706_v21  ;;  %v566_v43 = vsub.f32 %v7704_v20, %v565_v29 }
  0x13   :  { %233 = vmatpush.msra.mxu0 %v7672_v9  ;;  %v543_v38 = vand.u32 4294901760, %v542_v31  ;;  %748 = vmatpush.msra.mxu2 %v7696_v17  ;;  %v549_v39 = vand.u32 4294901760, %v548_v32  ;;  %v555_v44 = vand.u32 4294901760, %v554_v33  ;;  %v577_v45 = vand.u32 4294901760, %v7723_v30 }
  0x14   :  { %960 = vmatpush.msra.mxu3 %v7672_v9  ;;  %v244_v42 = vand.u32 4294901760, %v243_v34  ;;  %v114_v46 = vsel %vm109_vm0, %v62_v36, 0  ;;  %v117_v47 = vsel %vm109_vm0, %v63_v37, 0  ;;  %v561_v50 = vand.u32 4294901760, %v560_v40 }
  0x15   :  { %235 = vmatpush.msra.mxu0 %v7674_v10  ;;  %544 = vmatpush.msra.mxu1 %v543_v38  ;;  %v7763_v49 = vand.u32 4294901760, %v114_v46  ;;  %v572_v51 = vsub.f32 %v7709_v22, %v571_v35  ;;  %v583_v52 = vand.u32 4294901760, %v7751_v41  ;;  %v7773_v55 = vand.u32 4294901760, %v117_v47 }
  0x16   :  { %751 = vmatpush.msra.mxu2 %v7701_v19  ;;  %962 = vmatpush.msra.mxu3 %v7674_v10  ;;  %v245_v48 = vsub.f32 %v243_v34, %v244_v42  ;;  %v567_v56 = vand.u32 4294901760, %v566_v43  ;;  %v578_v57 = vsub.f32 %v7723_v30, %v577_v45  ;;  %v120_v1 = vsel %vm109_vm0, %v64_v59, 0 }
  0x17   :  { %237 = vmatpush.msra.mxu0 %v7676_v11  ;;  %550 = vmatpush.msra.mxu1 %v549_v39  ;;  %v251_v54 = vsub.f32 %v114_v46, %v7763_v49  ;;  %v573_v60 = vand.u32 4294901760, %v572_v51  ;;  %v584_v61 = vsub.f32 %v7751_v41, %v583_v52  ;;  %v259_v63 = vsub.f32 %v117_v47, %v7773_v55 }
  0x18   :  { %754 = vmatpush.msra.mxu2 %v7704_v20  ;;  %v246_v53 = vand.u32 4294901760, %v245_v48  ;;  %964 = vmatpush.msra.mxu3 %v7676_v11  ;;  %v579_v0 = vand.u32 4294901760, %v578_v57  ;;  %v7793_v8 = vand.u32 4294901760, %v120_v1  ;;  %v123_v26 = vsel %vm109_vm0, %v65_v12, 0 }
  0x19   :  { %239 = vmatpush.msra.mxu0 %v7698_v18  ;;  %556 = vmatpush.msra.mxu1 %v555_v44  ;;  %v252_v58 = vand.u32 4294901760, %v251_v54  ;;  %v585_v2 = vand.u32 4294901760, %v584_v61  ;;  %v260_v7 = vand.u32 4294901760, %v259_v63 }
  0x1a   :  { %757 = vmatpush.msra.mxu2 %v7709_v22  ;;  %966 = vmatpush.msra.mxu3 %v7698_v18  ;;  %v267_v14 = vsub.f32 %v120_v1, %v7793_v8  ;;  %v73_v1 = vld [vmem:[%s10583_s19 + $0x60] sm:$0xff] }
  0x1b   :  { %241 = vmatpush.msra.mxu0 %v7706_v21  ;;  %562 = vmatpush.msra.mxu1 %v561_v50  ;;  %v253_v62 = vsub.f32 %v251_v54, %v252_v58  ;;  %v261_v13 = vsub.f32 %v259_v63, %v260_v7  ;;  %v71_v50 = vld [vmem:[%s10583_s19 + $0x50] sm:$0xff] }
  0x1c   :  { %247 = vmatmul.f32.vlgmr.msra.gmra.mxu0 %v246_v53  ;;  %760 = vmatpush.msra.mxu2 %v7723_v30  ;;  %v268_v16 = vand.u32 4294901760, %v267_v14  ;;  %v141_v53 = vsel %vm109_vm0, %v71_v50, 0 }
  0x1d   :  { %568 = vmatpush.msra.mxu1 %v567_v56  ;;  %968 = vmatpush.msra.mxu3 %v7706_v21  ;;  %v254_v6 = vand.u32 4294901760, %v253_v62  ;;  %v262_v15 = vand.u32 4294901760, %v261_v13  ;;  %v7873_v57 = vand.u32 4294901760, %v141_v53 }
  0x1e   :  { %763 = vmatpush.msra.mxu2 %v7751_v41  ;;  %972 = vmatmul.f32.vlgmr.msra.gmra.mxu3 %v244_v42  ;;  %v70_v42 = vld [vmem:[%s10583_s19 + $0x48] sm:$0xff] }
  0x1f   :  { %574 = vmatpush.msra.mxu1 %v573_v60  ;;  %766 = vmatmul.f32.vlgmr.msra.gmra.mxu2 %v243_v34  ;;  %v323_v60 = vsub.f32 %v141_v53, %v7873_v57 }
  0x20   :  { %1197 = vmatpush.msrb.mxu0 %v541_v23  ;;  %v7809_v23 = vand.u32 4294901760, %v123_v26 }
  0x21   :  { %580 = vmatpush.msra.mxu1 %v579_v0 }
  0x22   :  { %1201 = vmatpush.msrb.mxu0 %v547_v24  ;;  %v275_v17 = vsub.f32 %v123_v26, %v7809_v23  ;;  %v74_v26 = vld [vmem:[%s10583_s19 + $0x68] sm:$0xff] }
  0x23   :  { %586 = vmatpush.msra.mxu1 %v585_v2 }
  0x24   :  { %255 = vmatmul.f32.gmra.mxu0 %v254_v6  ;;  %588 = vmatmul.f32.vlgmr.msra.gmra.mxu1 %v7719_v28  ;;  %v276_v20 = vand.u32 4294901760, %v275_v17 }
  0x25   :  { %1380 = vmatpush.msrb.mxu1 %v7657_v3  ;;  %1205 = vmatpush.msrb.mxu0 %v553_v25  ;;  %v66_v3 = vld [vmem:[%s10583_s19 + $0x28] sm:$0xff] }
  0x26   :  { %978 = vmatmul.f32.gmra.mxu3 %v252_v58  ;;  %v126_v19 = vsel %vm109_vm0, %v66_v3, 0  ;;  %v72_v58 = vld [vmem:[%s10583_s19 + $0x58] sm:$0xff]  ;;  %v150_v3 = vsel %vm109_vm0, %v74_v26, 0 }
  0x27   :  { %771 = vmatmul.f32.gmra.mxu2 %v251_v54  ;;  %1382 = vmatpush.msrb.mxu1 %v7659_v4  ;;  %v269_v4 = vsub.f32 %v267_v14, %v268_v16  ;;  %v144_v61 = vsel %vm109_vm0, %v72_v58, 0 }
  0x28   :  { %1209 = vmatpush.msrb.mxu0 %v559_v27  ;;  %v7881_v0 = vand.u32 4294901760, %v144_v61 }
  0x29   :  { %1384 = vmatpush.msrb.mxu1 %v7661_v5  ;;  %v270_v5 = vand.u32 4294901760, %v269_v4 }
  0x2a   :  { %1213 = vmatpush.msrb.mxu0 %v565_v29  ;;  %v68_v29 = vld [vmem:[%s10583_s19 + $0x38] sm:$0xff]  ;;  %v331_v6 = vsub.f32 %v144_v61, %v7881_v0 }
  0x2b   :  { %1386 = vmatpush.msrb.mxu1 %v7672_v9  ;;  %v7827_v9 = vand.u32 4294901760, %v126_v19  ;;  %v132_v31 = vsel %vm109_vm0, %v68_v29, 0 }
  0x2c   :  { %263 = vmatmul.f32.gmra.mxu0 %v262_v15  ;;  %592 = vmatmul.f32.gmra.mxu1 %v7763_v49  ;;  %v7849_v34 = vand.u32 4294901760, %v132_v31  ;;  %v332_v13 = vand.u32 4294901760, %v331_v6 }
  0x2d   :  { %1388 = vmatpush.msrb.mxu1 %v7674_v10  ;;  %1217 = vmatpush.msrb.mxu0 %v571_v35  ;;  %v67_v10 = vld [vmem:[%s10583_s19 + $0x30] sm:$0xff]  ;;  %v283_v22 = vsub.f32 %v126_v19, %v7827_v9  ;;  %v69_v35 = vld [vmem:[%s10583_s19 + $0x40] sm:$0xff]  ;;  %v7897_v19 = vand.u32 4294901760, %v150_v3 }
  0x2e   :  { %984 = vmatmul.f32.gmra.mxu3 %v260_v7  ;;  %v129_v24 = vsel %vm109_vm0, %v67_v10, 0  ;;  %v299_v37 = vsub.f32 %v132_v31, %v7849_v34  ;;  %v135_v38 = vsel %vm109_vm0, %v69_v35, 0  ;;  %v147_v7 = vsel %vm109_vm0, %v73_v1, 0  ;;  %v77_v35 = vld [vmem:[%s10583_s19 + $0x80] sm:$0xff] }
  0x2f   :  { %776 = vmatmul.f32.gmra.mxu2 %v259_v63  ;;  %1390 = vmatpush.msrb.mxu1 %v7676_v11  ;;  %v277_v11 = vsub.f32 %v275_v17, %v276_v20  ;;  %v284_v25 = vand.u32 4294901760, %v283_v22  ;;  %v7841_v27 = vand.u32 4294901760, %v129_v24  ;;  %v7857_v41 = vand.u32 4294901760, %v135_v38 }
  0x30   :  { %1221 = vmatpush.msrb.mxu0 %v577_v45  ;;  %v300_v40 = vand.u32 4294901760, %v299_v37  ;;  %v138_v45 = vsel %vm109_vm0, %v70_v42, 0  ;;  %v324_v63 = vand.u32 4294901760, %v323_v60  ;;  %v333_v15 = vsub.f32 %v331_v6, %v332_v13 }
  0x31   :  { %1392 = vmatpush.msrb.mxu1 %v7698_v18  ;;  %v278_v18 = vand.u32 4294901760, %v277_v11  ;;  %v291_v30 = vsub.f32 %v129_v24, %v7841_v27  ;;  %v307_v44 = vsub.f32 %v135_v38, %v7857_v41  ;;  %v7865_v48 = vand.u32 4294901760, %v138_v45 }
  0x32   :  { %1225 = vmatpush.msrb.mxu0 %v583_v52  ;;  %v301_v43 = vsub.f32 %v299_v37, %v300_v40  ;;  %v325_v2 = vsub.f32 %v323_v60, %v324_v63  ;;  %v334_v4 = vand.u32 4294901760, %v333_v15  ;;  %v347_v10 = vsub.f32 %v150_v3, %v7897_v19 }
  0x33   :  { %1394 = vmatpush.msrb.mxu1 %v7706_v21  ;;  %v285_v21 = vsub.f32 %v283_v22, %v284_v25  ;;  %v292_v33 = vand.u32 4294901760, %v291_v30  ;;  %v308_v47 = vand.u32 4294901760, %v307_v44  ;;  %v315_v52 = vsub.f32 %v138_v45, %v7865_v48 }
  0x34   :  { %271 = vmatmul.f32.gmra.mxu0 %v270_v5  ;;  %596 = vmatmul.f32.gmra.mxu1 %v7773_v55  ;;  %v302_v46 = vand.u32 4294901760, %v301_v43  ;;  %v326_v12 = vand.u32 4294901760, %v325_v2  ;;  %v75_v5 = vld [vmem:[%s10583_s19 + $0x70] sm:$0xff]  ;;  %v348_v24 = vand.u32 4294901760, %v347_v10  ;;  %v159_v38 = vsel %vm109_vm0, %v77_v35, 0  ;;  %v78_v43 = vld [vmem:[%s10583_s19 + $0x88] sm:$0xff] }
  0x35   :  { %v286_v32 = vand.u32 4294901760, %v285_v21  ;;  %v293_v36 = vsub.f32 %v291_v30, %v292_v33  ;;  %v309_v51 = vsub.f32 %v307_v44, %v308_v47  ;;  %v316_v56 = vand.u32 4294901760, %v315_v52 }
  0x36   :  { %990 = vmatmul.f32.gmra.mxu3 %v268_v16  ;;  %v153_v11 = vsel %vm109_vm0, %v75_v5, 0  ;;  %v349_v29 = vsub.f32 %v347_v10, %v348_v24  ;;  %v7921_v42 = vand.u32 4294901760, %v159_v38  ;;  %v81_v5 = vld [vmem:[%s10583_s19 + $0xa0] sm:$0xff] }
  0x37   :  { %781 = vmatmul.f32.gmra.mxu2 %v267_v14  ;;  %v294_v39 = vand.u32 4294901760, %v293_v36  ;;  %v310_v54 = vand.u32 4294901760, %v309_v51  ;;  %v317_v59 = vsub.f32 %v315_v52, %v316_v56  ;;  %v7889_v14 = vand.u32 4294901760, %v147_v7 }
  0x38   :  { %v350_v31 = vand.u32 4294901760, %v349_v29  ;;  %v371_v45 = vsub.f32 %v159_v38, %v7921_v42  ;;  %v82_v38 = vld [vmem:[%s10583_s19 + $0xa8] sm:$0xff] }
  0x39   :  { %v318_v62 = vand.u32 4294901760, %v317_v59  ;;  %v339_v16 = vsub.f32 %v147_v7, %v7889_v14 }
  0x3a   :  { %v372_v50 = vand.u32 4294901760, %v371_v45 }
  0x3c   :  { %279 = vmatmul.f32.gmra.mxu0 %v278_v18  ;;  %600 = vmatmul.f32.gmra.mxu1 %v7793_v8  ;;  %v7905_v18 = vand.u32 4294901760, %v153_v11  ;;  %v373_v53 = vsub.f32 %v371_v45, %v372_v50 }
  0x3e   :  { %996 = vmatmul.f32.gmra.mxu3 %v276_v20  ;;  %v355_v21 = vsub.f32 %v153_v11, %v7905_v18  ;;  %v374_v58 = vand.u32 4294901760, %v373_v53 }
  0x3f   :  { %786 = vmatmul.f32.gmra.mxu2 %v275_v17  ;;  %v340_v17 = vand.u32 4294901760, %v339_v16 }
  0x41   :  { %v341_v20 = vsub.f32 %v339_v16, %v340_v17 }
  0x44   :  { %287 = vmatmul.f32.gmra.mxu0 %v286_v32  ;;  %604 = vmatmul.f32.gmra.mxu1 %v7809_v23  ;;  %v356_v32 = vand.u32 4294901760, %v355_v21 }
  0x46   :  { %1002 = vmatmul.f32.gmra.mxu3 %v284_v25  ;;  %v76_v25 = vld [vmem:[%s10583_s19 + $0x78] sm:$0xff]  ;;  %v357_v36 = vsub.f32 %v355_v21, %v356_v32 }
  0x47   :  { %791 = vmatmul.f32.gmra.mxu2 %v283_v22  ;;  %v342_v22 = vand.u32 4294901760, %v341_v20 }
  0x4c   :  { %295 = vmatmul.f32.gmra.mxu0 %v294_v39  ;;  %608 = vmatmul.f32.gmra.mxu1 %v7827_v9  ;;  %v358_v39 = vand.u32 4294901760, %v357_v36 }
  0x4e   :  { %1008 = vmatmul.f32.gmra.mxu3 %v292_v33 }
  0x4f   :  { %796 = vmatmul.f32.gmra.mxu2 %v291_v30  ;;  %v156_v30 = vsel %vm109_vm0, %v76_v25, 0 }
  0x50   :  { %v7913_v33 = vand.u32 4294901760, %v156_v30 }
  0x54   :  { %303 = vmatmul.f32.gmra.mxu0 %v302_v46  ;;  %612 = vmatmul.f32.gmra.mxu1 %v7841_v27  ;;  %v162_v46 = vsel %vm109_vm0, %v78_v43, 0 }
  0x55   :  { %v7929_v51 = vand.u32 4294901760, %v162_v46 }
  0x56   :  { %1014 = vmatmul.f32.gmra.mxu3 %v300_v40 }
  0x57   :  { %801 = vmatmul.f32.gmra.mxu2 %v299_v37  ;;  %v363_v37 = vsub.f32 %v156_v30, %v7913_v33 }
  0x59   :  { %v364_v40 = vand.u32 4294901760, %v363_v37 }
  0x5c   :  { %311 = vmatmul.f32.gmra.mxu0 %v310_v54  ;;  %616 = vmatmul.f32.gmra.mxu1 %v7849_v34  ;;  %v379_v54 = vsub.f32 %v162_v46, %v7929_v51 }
  0x5e   :  { %1020 = vmatmul.f32.gmra.mxu3 %v308_v47  ;;  %v380_v59 = vand.u32 4294901760, %v379_v54 }
  0x5f   :  { %806 = vmatmul.f32.gmra.mxu2 %v307_v44  ;;  %v365_v44 = vsub.f32 %v363_v37, %v364_v40 }
  0x60   :  { %v381_v1 = vsub.f32 %v379_v54, %v380_v59 }
  0x61   :  { %v366_v47 = vand.u32 4294901760, %v365_v44  ;;  %v174_v44 = vsel %vm109_vm0, %v82_v38, 0 }
  0x64   :  { %319 = vmatmul.f32.gmra.mxu0 %v318_v62  ;;  %620 = vmatmul.f32.gmra.mxu1 %v7857_v41  ;;  %v7942_v62 = vld [vmem:[%s10584_s27] ss:$0 sm:$0xff] }
  0x66   :  { %1026 = vmatmul.f32.gmra.mxu3 %v316_v56 }
  0x67   :  { %811 = vmatmul.f32.gmra.mxu2 %v315_v52  ;;  %v79_v52 = vld [vmem:[%s10583_s19 + $0x90] sm:$0xff] }
  0x68   :  { %v165_v56 = vsel %vm109_vm0, %v79_v52, 0  ;;  %v7973_v52 = vand.u32 4294901760, %v174_v44 }
  0x6c   :  { %327 = vmatmul.f32.gmra.mxu0 %v326_v12  ;;  %624 = vmatmul.f32.gmra.mxu1 %v7865_v48  ;;  %v382_v12 = vand.u32 4294901760, %v381_v1 }
  0x6e   :  { %1032 = vmatmul.f32.gmra.mxu3 %v324_v63  ;;  %v80_v63 = vld [vmem:[%s10583_s19 + $0x98] sm:$0xff] }
  0x6f   :  { %816 = vmatmul.f32.gmra.mxu2 %v323_v60  ;;  %v7937_v60 = vand.u32 4294901760, %v165_v56 }
  0x71   :  { %v387_v2 = vsub.f32 %v165_v56, %v7937_v60 }
  0x74   :  { %335 = vmatmul.f32.gmra.mxu0 %v334_v4  ;;  %628 = vmatmul.f32.gmra.mxu1 %v7873_v57 }
  0x76   :  { %1038 = vmatmul.f32.gmra.mxu3 %v332_v13  ;;  %v388_v13 = vand.u32 4294901760, %v387_v2 }
  0x77   :  { %821 = vmatmul.f32.gmra.mxu2 %v331_v6  ;;  %v168_v6 = vsel %vm109_vm0, %v80_v63, 0 }
  0x78   :  { %v7951_v26 = vand.u32 4294901760, %v168_v6 }
  0x7a   :  { %v395_v11 = vsub.f32 %v168_v6, %v7951_v26 }
  0x7c   :  { %343 = vmatmul.f32.gmra.mxu0 %v342_v22  ;;  %632 = vmatmul.f32.gmra.mxu1 %v7881_v0  ;;  %v171_v22 = vsel %vm109_vm0, %v81_v5, 0 }
  0x7d   :  { %v7962_v30 = vand.u32 4294901760, %v171_v22 }
  0x7e   :  { %1044 = vmatmul.f32.gmra.mxu3 %v340_v17 }
  0x7f   :  { %826 = vmatmul.f32.gmra.mxu2 %v339_v16  ;;  %v403_v43 = vsub.f32 %v171_v22, %v7962_v30 }
  0x84   :  { %351 = vmatmul.f32.gmra.mxu0 %v350_v31  ;;  %636 = vmatmul.f32.gmra.mxu1 %v7889_v14 }
  0x86   :  { %1050 = vmatmul.f32.gmra.mxu3 %v348_v24 }
  0x87   :  { %831 = vmatmul.f32.gmra.mxu2 %v347_v10  ;;  %v389_v10 = vsub.f32 %v387_v2, %v388_v13 }
  0x89   :  { %v390_v29 = vand.u32 4294901760, %v389_v10  ;;  %v84_v10 = vld [vmem:[%s10583_s19 + $0xb8] sm:$0xff] }
  0x8c   :  { %359 = vmatmul.f32.gmra.mxu0 %v358_v39  ;;  %640 = vmatmul.f32.gmra.mxu1 %v7897_v19 }
  0x8e   :  { %1056 = vmatmul.f32.gmra.mxu3 %v356_v32 }
  0x8f   :  { %836 = vmatmul.f32.gmra.mxu2 %v355_v21  ;;  %v396_v21 = vand.u32 4294901760, %v395_v11 }
  0x94   :  { %367 = vmatmul.f32.gmra.mxu0 %v366_v47  ;;  %644 = vmatmul.f32.gmra.mxu1 %v7905_v18 }
  0x96   :  { %1062 = vmatmul.f32.gmra.mxu3 %v364_v40  ;;  %v397_v40 = vsub.f32 %v395_v11, %v396_v21 }
  0x97   :  { %841 = vmatmul.f32.gmra.mxu2 %v363_v37 }
  0x98   :  { %v398_v47 = vand.u32 4294901760, %v397_v40 }
  0x99   :  { %v248_v61 = vpop.f32.mrf.mxu0 }
  0x9a   :  { %v249_v7 = vadd.f32 %v7942_v62, %v248_v61  ;;  %v83_v61 = vld [vmem:[%s10583_s19 + $0xb0] sm:$0xff] }
  0x9b   :  { %v177_v6 = vsel %vm109_vm0, %v83_v61, 0 }
  0x9c   :  { %375 = vmatmul.f32.gmra.mxu0 %v374_v58  ;;  %648 = vmatmul.f32.gmra.mxu1 %v7913_v33 }
  0x9e   :  { %1068 = vmatmul.f32.gmra.mxu3 %v372_v50  ;;  %v404_v50 = vand.u32 4294901760, %v403_v43 }
  0x9f   :  { %846 = vmatmul.f32.gmra.mxu2 %v371_v45 }
  0xa0   :  { %v405_v1 = vsub.f32 %v403_v43, %v404_v50 }
  0xa1   :  { %v256_v15 = vpop.f32.mrf.mxu0  ;;  %v589_v16 = vpop.f32.mrf.mxu1 }
  0xa2   :  { %v590_v3 = vadd.f32 %v589_v16, %v249_v7  ;;  %v767_v4 = vpop.f32.mrf.mxu2  ;;  %v973_v17 = vpop.f32.mrf.mxu3  ;;  %v257_v24 = vadd.f32 %v7942_v62, %v256_v15  ;;  %v7984_v16 = vand.u32 4294901760, %v177_v6 }
  0xa4   :  { %v768_v20 = vadd.f32 %v767_v4, %v590_v3  ;;  %383 = vmatmul.f32.gmra.mxu0 %v382_v12  ;;  %652 = vmatmul.f32.gmra.mxu1 %v7921_v42 }
  0xa6   :  { %v7960_v25 = vadd.f32 %v973_v17, %v768_v20  ;;  %1074 = vmatmul.f32.gmra.mxu3 %v380_v59 }
  0xa7   :  { %851 = vmatmul.f32.gmra.mxu2 %v379_v54 }
  0xa9   :  { %v264_v31 = vpop.f32.mrf.mxu0  ;;  %v593_v32 = vpop.f32.mrf.mxu1 }
  0xaa   :  { %v594_v35 = vadd.f32 %v593_v32, %v257_v24  ;;  %v772_v36 = vpop.f32.mrf.mxu2  ;;  %v979_v37 = vpop.f32.mrf.mxu3  ;;  %v265_v45 = vadd.f32 %v7942_v62, %v264_v31 }
  0xac   :  { %v773_v39 = vadd.f32 %v772_v36, %v594_v35  ;;  %391 = vmatmul.f32.gmra.mxu0 %v390_v29  ;;  %656 = vmatmul.f32.gmra.mxu1 %v7929_v51  ;;  %v180_v29 = vsel %vm109_vm0, %v84_v10, 0 }
  0xad   :  { %v7995_v36 = vand.u32 4294901760, %v180_v29 }
  0xae   :  { %v7971_v46 = vadd.f32 %v979_v37, %v773_v39  ;;  %1080 = vmatmul.f32.gmra.mxu3 %v388_v13  ;;  %v406_v13 = vand.u32 4294901760, %v405_v1 }
  0xaf   :  { %856 = vmatmul.f32.gmra.mxu2 %v387_v2  ;;  %v411_v2 = vsub.f32 %v174_v44, %v7973_v52 }
  0xb0   :  { %10585 = vst [vmem:[#allocation3_spill] sm:$0xff] %v7971_v46 }
  0xb1   :  { %v272_v53 = vpop.f32.mrf.mxu0  ;;  %v597_v54 = vpop.f32.mrf.mxu1  ;;  %v412_v15 = vand.u32 4294901760, %v411_v2 }
  0xb2   :  { %v598_v56 = vadd.f32 %v597_v54, %v265_v45  ;;  %v777_v58 = vpop.f32.mrf.mxu2  ;;  %v985_v59 = vpop.f32.mrf.mxu3  ;;  %v273_v7 = vadd.f32 %v7942_v62, %v272_v53  ;;  %v85_v45 = vld [vmem:[%s10583_s19 + $0xc0] sm:$0xff] }
  0xb3   :  { %v413_v24 = vsub.f32 %v411_v2, %v412_v15 }
  0xb4   :  { %v778_v63 = vadd.f32 %v777_v58, %v598_v56  ;;  %399 = vmatmul.f32.gmra.mxu0 %v398_v47  ;;  %660 = vmatmul.f32.gmra.mxu1 %v7937_v60 }
  0xb5   :  { %v414_v32 = vand.u32 4294901760, %v413_v24 }
  0xb6   :  { %v7982_v12 = vadd.f32 %v985_v59, %v778_v63  ;;  %1086 = vmatmul.f32.gmra.mxu3 %v396_v21 }
  0xb7   :  { %861 = vmatmul.f32.gmra.mxu2 %v395_v11  ;;  %v419_v11 = vsub.f32 %v177_v6, %v7984_v16 }
  0xb8   :  { %10586 = vst [vmem:[#allocation4_spill] sm:$0xff] %v7982_v12 }
  0xb9   :  { %v280_v3 = vpop.f32.mrf.mxu0  ;;  %v601_v4 = vpop.f32.mrf.mxu1  ;;  %v420_v35 = vand.u32 4294901760, %v419_v11 }
  0xba   :  { %v602_v17 = vadd.f32 %v601_v4, %v273_v7  ;;  %v782_v5 = vpop.f32.mrf.mxu2  ;;  %v991_v20 = vpop.f32.mrf.mxu3  ;;  %v281_v21 = vadd.f32 %v7942_v62, %v280_v3  ;;  %v86_v3 = vld [vmem:[%s10583_s19 + $0xc8] sm:$0xff] }
  0xbb   :  { %v421_v53 = vsub.f32 %v419_v11, %v420_v35 }
  0xbc   :  { %v783_v22 = vadd.f32 %v782_v5, %v602_v17  ;;  %407 = vmatmul.f32.gmra.mxu0 %v406_v13  ;;  %664 = vmatmul.f32.gmra.mxu1 %v7951_v26 }
  0xbd   :  { %v422_v58 = vand.u32 4294901760, %v421_v53 }
  0xbe   :  { %v7993_v31 = vadd.f32 %v991_v20, %v783_v22  ;;  %1092 = vmatmul.f32.gmra.mxu3 %v404_v50  ;;  %v183_v50 = vsel %vm109_vm0, %v85_v45, 0 }
  0xbf   :  { %866 = vmatmul.f32.gmra.mxu2 %v403_v43  ;;  %v427_v43 = vsub.f32 %v180_v29, %v7995_v36  ;;  %v8006_v61 = vand.u32 4294901760, %v183_v50 }
  0xc0   :  { %10587 = vst [vmem:[#allocation5_spill] sm:$0xff] %v7993_v31 }
  0xc1   :  { %v288_v37 = vpop.f32.mrf.mxu0  ;;  %v605_v38 = vpop.f32.mrf.mxu1  ;;  %v428_v59 = vand.u32 4294901760, %v427_v43 }
  0xc2   :  { %v606_v39 = vadd.f32 %v605_v38, %v281_v21  ;;  %v787_v40 = vpop.f32.mrf.mxu2  ;;  %v997_v44 = vpop.f32.mrf.mxu3  ;;  %v289_v54 = vadd.f32 %v7942_v62, %v288_v37 }
  0xc3   :  { %v429_v17 = vsub.f32 %v427_v43, %v428_v59 }
  0xc4   :  { %v788_v47 = vadd.f32 %v787_v40, %v606_v39  ;;  %415 = vmatmul.f32.gmra.mxu0 %v414_v32  ;;  %668 = vmatmul.f32.gmra.mxu1 %v7962_v30  ;;  %v87_v39 = vld [vmem:[%s10583_s19 + $0xd0] sm:$0xff] }
  0xc5   :  { %v430_v10 = vand.u32 4294901760, %v429_v17  ;;  %v189_v45 = vsel %vm109_vm0, %v87_v39, 0 }
  0xc6   :  { %v8004_v56 = vadd.f32 %v997_v44, %v788_v47  ;;  %1098 = vmatmul.f32.gmra.mxu3 %v412_v15  ;;  %v186_v15 = vsel %vm109_vm0, %v86_v3, 0 }
  0xc7   :  { %871 = vmatmul.f32.gmra.mxu2 %v411_v2  ;;  %v435_v2 = vsub.f32 %v183_v50, %v8006_v61  ;;  %v8017_v24 = vand.u32 4294901760, %v186_v15 }
  0xc9   :  { %v296_v63 = vpop.f32.mrf.mxu0  ;;  %v609_v1 = vpop.f32.mrf.mxu1  ;;  %v436_v22 = vand.u32 4294901760, %v435_v2 }
  0xca   :  { %v610_v6 = vadd.f32 %v609_v1, %v289_v54  ;;  %v792_v7 = vpop.f32.mrf.mxu2  ;;  %v1003_v13 = vpop.f32.mrf.mxu3  ;;  %v297_v5 = vadd.f32 %v7942_v62, %v296_v63  ;;  %v8036_v1 = vand.u32 4294901760, %v189_v45 }
  0xcb   :  { %v437_v44 = vsub.f32 %v435_v2, %v436_v22 }
  0xcc   :  { %v793_v4 = vadd.f32 %v792_v7, %v610_v6  ;;  %423 = vmatmul.f32.gmra.mxu0 %v422_v58  ;;  %672 = vmatmul.f32.gmra.mxu1 %v7973_v52 }
  0xcd   :  { %v438_v58 = vand.u32 4294901760, %v437_v44 }
  0xce   :  { %v8015_v20 = vadd.f32 %v1003_v13, %v793_v4  ;;  %1104 = vmatmul.f32.gmra.mxu3 %v420_v35  ;;  %v7484_v35 = vld [vmem:[%s10472_s4 + $0x8] sm:$0xff] }
  0xcf   :  { %876 = vmatmul.f32.gmra.mxu2 %v419_v11  ;;  %v443_v11 = vsub.f32 %v186_v15, %v8017_v24  ;;  %v8028_v47 = vand.u32 4294901760, %v7484_v35 }
  0xd1   :  { %v304_v29 = vpop.f32.mrf.mxu0  ;;  %v613_v21 = vpop.f32.mrf.mxu1  ;;  %v8034_v54 = vsub.f32 %v7484_v35, %v8028_v47  ;;  %v444_v63 = vand.u32 4294901760, %v443_v11  ;;  %2004 = vmatpush.msrb.mxu2 %v8028_v47 }
  0xd2   :  { %v614_v32 = vadd.f32 %v613_v21, %v297_v5  ;;  %v797_v37 = vpop.f32.mrf.mxu2  ;;  %v1009_v38 = vpop.f32.mrf.mxu3  ;;  %v305_v53 = vadd.f32 %v7942_v62, %v304_v29 }
  0xd3   :  { %v10491_v13 = vand.u32 4294901760, %v8034_v54  ;;  %2093 = vmatpush.msra.mxu2 %v8034_v54  ;;  %v445_v5 = vsub.f32 %v443_v11, %v444_v63 }
  0xd4   :  { %v798_v40 = vadd.f32 %v797_v37, %v614_v32  ;;  %431 = vmatmul.f32.gmra.mxu0 %v430_v10  ;;  %676 = vmatmul.f32.gmra.mxu1 %v7984_v16  ;;  %v451_v10 = vsub.f32 %v189_v45, %v8036_v1 }
  0xd6   :  { %v8031_v50 = vadd.f32 %v1009_v38, %v798_v40  ;;  %1110 = vmatmul.f32.gmra.mxu3 %v428_v59  ;;  %v2056_v59 = vsub.f32 %v8034_v54, %v10491_v13  ;;  %v446_v38 = vand.u32 4294901760, %v445_v5  ;;  %v452_v39 = vand.u32 4294901760, %v451_v10 }
  0xd7   :  { %881 = vmatmul.f32.gmra.mxu2 %v427_v43  ;;  %v88_v43 = vld [vmem:[%s10583_s19 + $0xd8] sm:$0xff] }
  0xd8   :  { %v192_v29 = vsel %vm109_vm0, %v88_v43, 0  ;;  %v2057_v21 = vand.u32 4294901760, %v2056_v59 }
  0xd9   :  { %v312_v6 = vpop.f32.mrf.mxu0  ;;  %v617_v7 = vpop.f32.mrf.mxu1  ;;  %v8053_v40 = vand.u32 4294901760, %v192_v29 }
  0xda   :  { %v618_v3 = vadd.f32 %v617_v7, %v305_v53  ;;  %v802_v4 = vpop.f32.mrf.mxu2  ;;  %v1015_v17 = vpop.f32.mrf.mxu3  ;;  %v313_v32 = vadd.f32 %v7942_v62, %v312_v6  ;;  %2058 = vmatpush.msrb.mxu3 %v2057_v21  ;;  %v89_v6 = vld [vmem:[%s10583_s19 + $0xe0] sm:$0xff] }
  0xdc   :  { %v803_v15 = vadd.f32 %v802_v4, %v618_v3  ;;  %439 = vmatmul.f32.gmra.mxu0 %v438_v58  ;;  %680 = vmatmul.f32.gmra.mxu1 %v7995_v36  ;;  %v195_v3 = vsel %vm109_vm0, %v89_v6, 0 }
  0xdd   :  { %2131 = vmatpush.msra.mxu3 %v8028_v47 }
  0xde   :  { %v8051_v37 = vadd.f32 %v1015_v17, %v803_v15  ;;  %1116 = vmatmul.f32.gmra.mxu3 %v436_v22  ;;  %v459_v22 = vsub.f32 %v192_v29, %v8053_v40  ;;  %v8065_v15 = vand.u32 4294901760, %v195_v3  ;;  %v90_v29 = vld [vmem:[%s10583_s19 + $0xe8] sm:$0xff] }
  0xdf   :  { %886 = vmatmul.f32.gmra.mxu2 %v435_v2  ;;  %v453_v2 = vsub.f32 %v451_v10, %v452_v39 }
  0xe0   :  { %v460_v59 = vand.u32 4294901760, %v459_v22 }
  0xe1   :  { %v320_v44 = vpop.f32.mrf.mxu0  ;;  %v621_v35 = vpop.f32.mrf.mxu1  ;;  %v454_v43 = vand.u32 4294901760, %v453_v2 }
  0xe2   :  { %v622_v53 = vadd.f32 %v621_v35, %v313_v32  ;;  %v807_v45 = vpop.f32.mrf.mxu2  ;;  %v1021_v58 = vpop.f32.mrf.mxu3  ;;  %v321_v4 = vadd.f32 %v7942_v62, %v320_v44  ;;  %v461_v44 = vsub.f32 %v459_v22, %v460_v59 }
  0xe4   :  { %v808_v7 = vadd.f32 %v807_v45, %v622_v53  ;;  %447 = vmatmul.f32.gmra.mxu0 %v446_v38  ;;  %684 = vmatmul.f32.gmra.mxu1 %v8006_v61  ;;  %v462_v6 = vand.u32 4294901760, %v461_v44 }
  0xe6   :  { %v8063_v17 = vadd.f32 %v1021_v58, %v808_v7  ;;  %1122 = vmatmul.f32.gmra.mxu3 %v444_v63  ;;  %v198_v63 = vsel %vm109_vm0, %v90_v29, 0 }
  0xe7   :  { %891 = vmatmul.f32.gmra.mxu2 %v443_v11  ;;  %v467_v11 = vsub.f32 %v195_v3, %v8065_v15  ;;  %v8076_v2 = vand.u32 4294901760, %v198_v63  ;;  %v91_v3 = vld [vmem:[%s10583_s19 + $0xf0] sm:$0xff] }
  0xe9   :  { %v328_v5 = vpop.f32.mrf.mxu0  ;;  %v625_v21 = vpop.f32.mrf.mxu1  ;;  %v468_v7 = vand.u32 4294901760, %v467_v11 }
  0xea   :  { %v626_v32 = vadd.f32 %v625_v21, %v321_v4  ;;  %v812_v38 = vpop.f32.mrf.mxu2  ;;  %v1027_v35 = vpop.f32.mrf.mxu3  ;;  %v329_v45 = vadd.f32 %v7942_v62, %v328_v5 }
  0xeb   :  { %v469_v5 = vsub.f32 %v467_v11, %v468_v7 }
  0xec   :  { %v813_v53 = vadd.f32 %v812_v38, %v626_v32  ;;  %455 = vmatmul.f32.gmra.mxu0 %v454_v43  ;;  %688 = vmatmul.f32.gmra.mxu1 %v8017_v24 }
  0xed   :  { %v470_v44 = vand.u32 4294901760, %v469_v5 }
  0xee   :  { %v8074_v58 = vadd.f32 %v1027_v35, %v813_v53  ;;  %1128 = vmatmul.f32.gmra.mxu3 %v452_v39  ;;  %v201_v39 = vsel %vm109_vm0, %v91_v3, 0 }
  0xef   :  { %896 = vmatmul.f32.gmra.mxu2 %v451_v10  ;;  %v475_v10 = vsub.f32 %v198_v63, %v8076_v2  ;;  %v92_v63 = vld [vmem:[%s10583_s19 + $0xf8] sm:$0xff] }
  0xf0   :  { %10588 = vst [vmem:[#allocation6_spill] sm:$0xff] %v8074_v58 }
  0xf1   :  { %v336_v4 = vpop.f32.mrf.mxu0  ;;  %v629_v21 = vpop.f32.mrf.mxu1 }
  0xf2   :  { %v630_v43 = vadd.f32 %v629_v21, %v329_v45  ;;  %v817_v32 = vpop.f32.mrf.mxu2  ;;  %v1033_v38 = vpop.f32.mrf.mxu3  ;;  %v337_v35 = vadd.f32 %v7942_v62, %v336_v4  ;;  %v476_v45 = vand.u32 4294901760, %v475_v10  ;;  %v8087_v21 = vand.u32 4294901760, %v201_v39 }
  0xf4   :  { %v818_v29 = vadd.f32 %v817_v32, %v630_v43  ;;  %463 = vmatmul.f32.gmra.mxu0 %v462_v6  ;;  %692 = vmatmul.f32.gmra.mxu1 %v8036_v1  ;;  %10590 = vst [vmem:[#allocation8_spill] sm:$0xff] %v8087_v21  ;;  %v477_v62 = vsub.f32 %v475_v10, %v476_v45 }
  0xf6   :  { %v8085_v53 = vadd.f32 %v1033_v38, %v818_v29  ;;  %1134 = vmatmul.f32.gmra.mxu3 %v460_v59  ;;  %v204_v59 = vsel %vm109_vm0, %v92_v63, 0  ;;  %v478_v38 = vand.u32 4294901760, %v477_v62 }
  0xf7   :  { %901 = vmatmul.f32.gmra.mxu2 %v459_v22  ;;  %v483_v22 = vsub.f32 %v201_v39, %v8087_v21  ;;  %v8099_v5 = vand.u32 4294901760, %v204_v59 }
  0xf8   :  { %10589 = vst [vmem:[#allocation7_spill] sm:$0xff] %v8085_v53 }
  0xf9   :  { %v8089_v13 = vpop.f32.mrf.mxu0  ;;  %v633_v6 = vpop.f32.mrf.mxu1  ;;  %v484_v29 = vand.u32 4294901760, %v483_v22 }
  0xfa   :  { %v634_v43 = vadd.f32 %v633_v6, %v337_v35  ;;  %v822_v32 = vpop.f32.mrf.mxu2  ;;  %v1039_v3 = vpop.f32.mrf.mxu3 }
  0xfc   :  { %v823_v58 = vadd.f32 %v822_v32, %v634_v43  ;;  %471 = vmatmul.f32.gmra.mxu0 %v470_v44  ;;  %696 = vmatmul.f32.gmra.mxu1 %v8053_v40  ;;  %v93_v44 = vld [vmem:[%s10583_s19 + $0x100] sm:$0xff]  ;;  %v7547_v43 = vmov 0  }
  0xfd   :  { %7503 = vset.pattern.permute.xlu0 %v7547_v43  ;;  %7504 = vset.pattern.permute.xlu1 %v7547_v43  ;;  %v207_v39 = vsel %vm109_vm0, %v93_v44, 0 }
  0xfe   :  { %v8097_v4 = vadd.f32 %v1039_v3, %v823_v58  ;;  %1140 = vmatmul.f32.gmra.mxu3 %v468_v7  ;;  %v1724_v58 = vld [vmem:[%s10473_s1 + $0x20] sm:$0xff]  ;;  %7505 = vset.pattern.permute.xlu2 %v7547_v43  ;;  %v491_v7 = vsub.f32 %v204_v59, %v8099_v5  ;;  %v8114_v3 = vand.u32 4294901760, %v207_v39  ;;  %v1725_v59 = vld [vmem:[%s10473_s1 + $0x28] sm:$0xff] }
  0xff   :  { %906 = vmatmul.f32.gmra.mxu2 %v467_v11  ;;  %1778 = vperm.xlu0 %7503, %v1724_v58   ;;  %v485_v11 = vsub.f32 %v483_v22, %v484_v29 }
 0x100   :  { %v492_v63 = vand.u32 4294901760, %v491_v7 }
 0x101   :  { %v8101_v35 = vpop.f32.mrf.mxu0  ;;  %v8103_v6 = vpop.f32.mrf.mxu1  ;;  %v486_v32 = vand.u32 4294901760, %v485_v11 }
 0x104   :  { %479 = vmatmul.f32.gmra.mxu0 %v478_v38  ;;  %700 = vmatmul.f32.gmra.mxu1 %v8065_v15  ;;  %v94_v38 = vld [vmem:[%s10583_s19 + $0x108] sm:$0xff] }
 0x105   :  { %v210_v44 = vsel %vm109_vm0, %v94_v38, 0 }
 0x106   :  { %1146 = vmatmul.f32.gmra.mxu3 %v476_v45  ;;  %v499_v45 = vsub.f32 %v207_v39, %v8114_v3  ;;  %v8129_v11 = vand.u32 4294901760, %v210_v44  ;;  %v1726_v39 = vld [vmem:[%s10473_s1 + $0x30] sm:$0xff] }
 0x107   :  { %911 = vmatmul.f32.gmra.mxu2 %v475_v10  ;;  %1783 = vperm.xlu0 %7503, %v1725_v59   ;;  %v493_v10 = vsub.f32 %v491_v7, %v492_v63 }
 0x108   :  { %v500_v58 = vand.u32 4294901760, %v499_v45  ;;  %1788 = vperm.xlu1 %7504, %v1726_v39   ;;  %v507_v38 = vsub.f32 %v210_v44, %v8129_v11  ;;  %v1727_v44 = vld [vmem:[%s10473_s1 + $0x38] sm:$0xff] }
 0x109   :  { %v8116_v62 = vpop.f32.mrf.mxu0  ;;  %v8118_v53 = vpop.f32.mrf.mxu1  ;;  %v494_v43 = vand.u32 4294901760, %v493_v10 }
 0x10a   :  { %10591 = vst [vmem:[#allocation9_spill] sm:$0xff] %v8116_v62 }
 0x10c   :  { %487 = vmatmul.f32.gmra.mxu0 %v486_v32  ;;  %704 = vmatmul.f32.gmra.mxu1 %v8076_v2  ;;  %v95_v32 = vld [vmem:[%s10583_s19 + $0x110] sm:$0xff] }
 0x10d   :  { %v213_v59 = vsel %vm109_vm0, %v95_v32, 0 }
 0x10e   :  { %1152 = vmatmul.f32.gmra.mxu3 %v484_v29  ;;  %v501_v29 = vsub.f32 %v499_v45, %v500_v58  ;;  %v8147_v46 = vand.u32 4294901760, %v213_v59 }
 0x10f   :  { %916 = vmatmul.f32.gmra.mxu2 %v483_v22  ;;  %v1722_v22 = vld [vmem:[%s10473_s1 + $0x10] sm:$0xff] }
 0x110   :  { %1768 = vperm.xlu0 %7503, %v1722_v22   ;;  %v502_v10 = vand.u32 4294901760, %v501_v29  ;;  %1793 = vperm.xlu1 %7504, %v1727_v44   ;;  %v515_v32 = vsub.f32 %v213_v59, %v8147_v46  ;;  %v1732_v59 = vld [vmem:[%s10473_s1 + $0x60] sm:$0xff] }
 0x111   :  { %v8131_v31 = vpop.f32.mrf.mxu0  ;;  %v8133_v12 = vpop.f32.mrf.mxu1 }
 0x112   :  { %10592 = vst [vmem:[#allocation10_spill] sm:$0xff] %v8131_v31  ;;  %v508_v31 = vand.u32 4294901760, %v507_v38  ;;  %v516_v29 = vand.u32 4294901760, %v515_v32 }
 0x113   :  { %10593 = vst [vmem:[#allocation11_spill] sm:$0xff] %v8133_v12 }
 0x114   :  { %495 = vmatmul.f32.gmra.mxu0 %v494_v43  ;;  %708 = vmatmul.f32.gmra.mxu1 %v8087_v21  ;;  %v96_v43 = vld [vmem:[%s10583_s19 + $0x118] sm:$0xff] }
 0x115   :  { %v216_v39 = vsel %vm109_vm0, %v96_v43, 0 }
 0x116   :  { %1158 = vmatmul.f32.gmra.mxu3 %v492_v63  ;;  %v509_v63 = vsub.f32 %v507_v38, %v508_v31 }
 0x117   :  { %921 = vmatmul.f32.gmra.mxu2 %v491_v7  ;;  %v1729_v7 = vld [vmem:[%s10473_s1 + $0x48] sm:$0xff] }
 0x118   :  { %1803 = vperm.xlu0 %7503, %v1729_v7   ;;  %v510_v22 = vand.u32 4294901760, %v509_v63 }
 0x119   :  { %v8149_v12 = vpop.f32.mrf.mxu0  ;;  %v8151_v62 = vpop.f32.mrf.mxu1 }
 0x11a   :  { %10594 = vst [vmem:[#allocation12_spill] sm:$0xff] %v8149_v12  ;;  %v8165_v12 = vand.u32 4294901760, %v216_v39 }
 0x11b   :  { %10595 = vst [vmem:[#allocation13_spill] sm:$0xff] %v8151_v62 }
 0x11c   :  { %503 = vmatmul.f32.gmra.mxu0 %v502_v10  ;;  %712 = vmatmul.f32.gmra.mxu1 %v8099_v5  ;;  %v1723_v10 = vld [vmem:[%s10473_s1 + $0x18] sm:$0xff] }
 0x11d   :  { %1773 = vperm.xlu1 %7504, %v1723_v10  }
 0x11e   :  { %1164 = vmatmul.f32.gmra.mxu3 %v500_v58  ;;  %v523_v58 = vsub.f32 %v216_v39, %v8165_v12 }
 0x11f   :  { %926 = vmatmul.f32.gmra.mxu2 %v499_v45  ;;  %v517_v45 = vsub.f32 %v515_v32, %v516_v29 }
 0x120   :  { %1818 = vperm.xlu0 %7503, %v1732_v59   ;;  %v524_v44 = vand.u32 4294901760, %v523_v58  ;;  %v1733_v59 = vld [vmem:[%s10473_s1 + $0x68] sm:$0xff] }
 0x121   :  { %v8167_v62 = vpop.f32.mrf.mxu0  ;;  %v8169_v21 = vpop.f32.mrf.mxu1  ;;  %v518_v43 = vand.u32 4294901760, %v517_v45  ;;  %v1736_v45 = vld [vmem:[%s10473_s1 + $0x80] sm:$0xff] }
 0x122   :  { %10596 = vst [vmem:[#allocation14_spill] sm:$0xff] %v8167_v62  ;;  %v1730_v62 = vld [vmem:[%s10473_s1 + $0x50] sm:$0xff] }
 0x124   :  { %511 = vmatmul.f32.gmra.mxu0 %v510_v22  ;;  %716 = vmatmul.f32.gmra.mxu1 %v8114_v3  ;;  %v1735_v22 = vld [vmem:[%s10473_s1 + $0x78] sm:$0xff] }
 0x125   :  { %1808 = vperm.xlu1 %7504, %v1730_v62   ;;  %v1738_v62 = vld [vmem:[%s10473_s1 + $0x90] sm:$0xff] }
 0x126   :  { %1170 = vmatmul.f32.gmra.mxu3 %v508_v31  ;;  %v525_v31 = vsub.f32 %v523_v58, %v524_v44 }
 0x127   :  { %931 = vmatmul.f32.gmra.mxu2 %v507_v38 }
 0x128   :  { %1833 = vperm.xlu0 %7503, %v1735_v22   ;;  %v526_v38 = vand.u32 4294901760, %v525_v31  ;;  %v1739_v22 = vld [vmem:[%s10473_s1 + $0x98] sm:$0xff]  ;;  %v1744_v31 = vld [vmem:[%s10473_s1 + $0xc0] sm:$0xff] }
 0x129   :  { %v8179_v7 = vpop.f32.mrf.mxu0  ;;  %v8181_v63 = vpop.f32.mrf.mxu1 }
 0x12a   :  { %10597 = vst [vmem:[#allocation15_spill] sm:$0xff] %v8179_v7 }
 0x12c   :  { %519 = vmatmul.f32.gmra.mxu0 %v518_v43  ;;  %720 = vmatmul.f32.gmra.mxu1 %v8129_v11  ;;  %v1741_v43 = vld [vmem:[%s10473_s1 + $0xa8] sm:$0xff] }
 0x12d   :  { %1823 = vperm.xlu1 %7504, %v1733_v59  }
 0x12e   :  { %1176 = vmatmul.f32.gmra.mxu3 %v516_v29 }
 0x12f   :  { %936 = vmatmul.f32.gmra.mxu2 %v515_v32 }
 0x130   :  { %1848 = vperm.xlu0 %7503, %v1738_v62   ;;  %v1742_v62 = vld [vmem:[%s10473_s1 + $0xb0] sm:$0xff] }
 0x131   :  { %v8190_v39 = vpop.f32.mrf.mxu0  ;;  %v8192_v10 = vpop.f32.mrf.mxu1 }
 0x132   :  { %10598 = vst [vmem:[#allocation16_spill] sm:$0xff] %v8190_v39 }
 0x133   :  { %10599 = vst [vmem:[#allocation17_spill] sm:$0xff] %v8192_v10 }
 0x134   :  { %527 = vmatmul.f32.gmra.mxu0 %v526_v38  ;;  %724 = vmatmul.f32.gmra.mxu1 %v8147_v46 }
 0x135   :  { %1838 = vperm.xlu1 %7504, %v1736_v45   ;;  %v1747_v45 = vld [vmem:[%s10473_s1 + $0xd8] sm:$0xff] }
 0x136   :  { %1182 = vmatmul.f32.gmra.mxu3 %v524_v44 }
 0x137   :  { %941 = vmatmul.f32.gmra.mxu2 %v523_v58 }
 0x138   :  { %1863 = vperm.xlu0 %7503, %v1741_v43  }
 0x139   :  { %v8201_v32 = vpop.f32.mrf.mxu0  ;;  %v8203_v29 = vpop.f32.mrf.mxu1 }
 0x13a   :  { %10600 = vst [vmem:[#allocation18_spill] sm:$0xff] %v8201_v32 }
 0x13b   :  { %10601 = vst [vmem:[#allocation19_spill] sm:$0xff] %v8203_v29 }
 0x13c   :  { %728 = vmatmul.f32.gmra.mxu1 %v8165_v12  ;;  %1227 = vmatmul.f32.vlgmr.msrb.gmra.mxu0 %v7719_v28 }
 0x13d   :  { %1853 = vperm.xlu1 %7504, %v1739_v22   ;;  %v1745_v22 = vld [vmem:[%s10473_s1 + $0xc8] sm:$0xff] }
 0x140   :  { %1878 = vperm.xlu0 %7503, %v1744_v31   ;;  %v1750_v31 = vld [vmem:[%s10473_s1 + $0xf0] sm:$0xff] }
 0x141   :  { %v8213_v44 = vpop.f32.mrf.mxu0  ;;  %v8215_v58 = vpop.f32.mrf.mxu1 }
 0x142   :  { %10602 = vst [vmem:[#allocation20_spill] sm:$0xff] %v8213_v44 }
 0x143   :  { %10603 = vst [vmem:[#allocation21_spill] sm:$0xff] %v8215_v58 }
 0x144   :  { %1231 = vmatmul.f32.gmra.mxu0 %v7763_v49  ;;  %1396 = vmatmul.f32.vlgmr.msrb.gmra.mxu1 %v7719_v28 }
 0x145   :  { %1868 = vperm.xlu1 %7504, %v1742_v62   ;;  %v1720_v62 = vld [vmem:[%s10473_s1] sm:$0xff] }
 0x146   :  { %1758 = vperm.xlu2 %7505, %v1720_v62   ;;  %v1751_v62 = vld [vmem:[%s10473_s1 + $0xf8] sm:$0xff] }
 0x148   :  { %1893 = vperm.xlu0 %7503, %v1747_v45  }
 0x149   :  { %v8225_v38 = vpop.f32.mrf.mxu0  ;;  %v8227_v59 = vpop.f32.mrf.mxu1 }
 0x14a   :  { %10604 = vst [vmem:[#allocation22_spill] sm:$0xff] %v8225_v38 }
 0x14b   :  { %10605 = vst [vmem:[#allocation23_spill] sm:$0xff] %v8227_v59  ;;  %v1755_v59 = vld [vmem:[%s10473_s1 + $0x118] sm:$0xff] }
 0x14c   :  { %1235 = vmatmul.f32.gmra.mxu0 %v7773_v55  ;;  %1400 = vmatmul.f32.gmra.mxu1 %v7763_v49 }
 0x14d   :  { %1883 = vperm.xlu1 %7504, %v1745_v22   ;;  %v1721_v22 = vld [vmem:[%s10473_s1 + $0x8] sm:$0xff] }
 0x14e   :  { %1763 = vperm.xlu2 %7505, %v1721_v22  }
 0x150   :  { %1908 = vperm.xlu0 %7503, %v1750_v31  }
 0x151   :  { %v8237_v43 = vpop.f32.mrf.mxu0  ;;  %v8239_v28 = vpop.f32.mrf.mxu1 }
 0x152   :  { %10606 = vst [vmem:[#allocation24_spill] sm:$0xff] %v8237_v43  ;;  %v1748_v43 = vld [vmem:[%s10473_s1 + $0xe0] sm:$0xff] }
 0x153   :  { %10607 = vst [vmem:[#allocation25_spill] sm:$0xff] %v8239_v28  ;;  %v1753_v28 = vld [vmem:[%s10473_s1 + $0x108] sm:$0xff] }
 0x154   :  { %1239 = vmatmul.f32.gmra.mxu0 %v7793_v8  ;;  %1404 = vmatmul.f32.gmra.mxu1 %v7773_v55 }
 0x155   :  { %1898 = vperm.xlu1 %7504, %v1748_v43  }
 0x158   :  { %1923 = vperm.xlu0 %7503, %v1753_v28  }
 0x159   :  { %v8252_v49 = vpop.f32.mrf.mxu0  ;;  %v8254_v45 = vpop.f32.mrf.mxu1 }
 0x15a   :  { %10608 = vst [vmem:[#allocation26_spill] sm:$0xff] %v8252_v49  ;;  %v1752_v49 = vld [vmem:[%s10473_s1 + $0x100] sm:$0xff] }
 0x15b   :  { %10609 = vst [vmem:[#allocation27_spill] sm:$0xff] %v8254_v45 }
 0x15c   :  { %1243 = vmatmul.f32.gmra.mxu0 %v7809_v23  ;;  %1408 = vmatmul.f32.gmra.mxu1 %v7793_v8  ;;  %v1754_v8 = vld [vmem:[%s10473_s1 + $0x110] sm:$0xff] }
 0x15d   :  { %1913 = vperm.xlu1 %7504, %v1751_v62  }
 0x161   :  { %v8267_v55 = vpop.f32.mrf.mxu0  ;;  %v8269_v31 = vpop.f32.mrf.mxu1 }
 0x162   :  { %10610 = vst [vmem:[#allocation28_spill] sm:$0xff] %v8267_v55 }
 0x163   :  { %10611 = vst [vmem:[#allocation29_spill] sm:$0xff] %v8269_v31 }
 0x164   :  { %1247 = vmatmul.f32.gmra.mxu0 %v7827_v9  ;;  %1412 = vmatmul.f32.gmra.mxu1 %v7809_v23 }
 0x165   :  { %1928 = vperm.xlu1 %7504, %v1754_v8  }
 0x169   :  { %v8276_v43 = vpop.f32.mrf.mxu0  ;;  %v8278_v28 = vpop.f32.mrf.mxu1 }
 0x16a   :  { %10612 = vst [vmem:[#allocation30_spill] sm:$0xff] %v8276_v43 }
 0x16b   :  { %10613 = vst [vmem:[#allocation31_spill] sm:$0xff] %v8278_v28 }
 0x16c   :  { %1251 = vmatmul.f32.gmra.mxu0 %v7841_v27  ;;  %1416 = vmatmul.f32.gmra.mxu1 %v7827_v9  ;;  %v8303_v9 = vpop.f32.mrf.mxu3 }
 0x171   :  { %v8285_v22 = vpop.f32.mrf.mxu0  ;;  %v8287_v62 = vpop.f32.mrf.mxu1 }
 0x172   :  { %10614 = vst [vmem:[#allocation32_spill] sm:$0xff] %v8285_v22 }
 0x173   :  { %10615 = vst [vmem:[#allocation33_spill] sm:$0xff] %v8287_v62 }
 0x174   :  { %1255 = vmatmul.f32.gmra.mxu0 %v7849_v34  ;;  %1420 = vmatmul.f32.gmra.mxu1 %v7841_v27 }
 0x179   :  { %v8291_v23 = vpop.f32.mrf.mxu0  ;;  %v8293_v43 = vpop.f32.mrf.mxu1 }
 0x17a   :  { %10616 = vst [vmem:[#allocation34_spill] sm:$0xff] %v8291_v23 }
 0x17b   :  { %10617 = vst [vmem:[#allocation35_spill] sm:$0xff] %v8293_v43  ;;  %v1728_v43 = vld [vmem:[%s10473_s1 + $0x40] sm:$0xff] }
 0x17c   :  { %1259 = vmatmul.f32.gmra.mxu0 %v7857_v41  ;;  %1424 = vmatmul.f32.gmra.mxu1 %v7849_v34  ;;  %v8314_v34 = vpop.f32.mrf.mxu2 }
 0x17d   :  { %1798 = vperm.xlu2 %7505, %v1728_v43  }
 0x181   :  { %v8297_v8 = vpop.f32.mrf.mxu0  ;;  %v8299_v28 = vpop.f32.mrf.mxu1 }
 0x182   :  { %10618 = vst [vmem:[#allocation36_spill] sm:$0xff] %v8297_v8 }
 0x183   :  { %10619 = vst [vmem:[#allocation37_spill] sm:$0xff] %v8299_v28  ;;  %v8320_v28 = vpop.f32.mrf.mxu3 }
 0x184   :  { %1263 = vmatmul.f32.gmra.mxu0 %v7865_v48  ;;  %1428 = vmatmul.f32.gmra.mxu1 %v7857_v41 }
 0x189   :  { %v8305_v22 = vpop.f32.mrf.mxu0  ;;  %v8307_v27 = vpop.f32.mrf.mxu1 }
 0x18a   :  { %10620 = vst [vmem:[#allocation38_spill] sm:$0xff] %v8305_v22  ;;  %v1731_v22 = vld [vmem:[%s10473_s1 + $0x58] sm:$0xff] }
 0x18b   :  { %10621 = vst [vmem:[#allocation39_spill] sm:$0xff] %v8307_v27  ;;  %1813 = vperm.xlu2 %7505, %v1731_v22   ;;  %v8331_v27 = vpop.f32.mrf.mxu2 }
 0x18c   :  { %1267 = vmatmul.f32.gmra.mxu0 %v7873_v57  ;;  %1432 = vmatmul.f32.gmra.mxu1 %v7865_v48 }
 0x191   :  { %v8316_v8 = vpop.f32.mrf.mxu0  ;;  %v8318_v41 = vpop.f32.mrf.mxu1 }
 0x192   :  { %10622 = vst [vmem:[#allocation40_spill] sm:$0xff] %v8316_v8  ;;  %v1734_v8 = vld [vmem:[%s10473_s1 + $0x70] sm:$0xff] }
 0x193   :  { %10623 = vst [vmem:[#allocation41_spill] sm:$0xff] %v8318_v41  ;;  %1828 = vperm.xlu2 %7505, %v1734_v8   ;;  %v8336_v41 = vpop.f32.mrf.mxu3 }
 0x194   :  { %1271 = vmatmul.f32.gmra.mxu0 %v7881_v0  ;;  %1436 = vmatmul.f32.gmra.mxu1 %v7873_v57 }
 0x199   :  { %v8327_v43 = vpop.f32.mrf.mxu0  ;;  %v8329_v48 = vpop.f32.mrf.mxu1 }
 0x19a   :  { %10624 = vst [vmem:[#allocation42_spill] sm:$0xff] %v8327_v43  ;;  %v1737_v43 = vld [vmem:[%s10473_s1 + $0x88] sm:$0xff] }
 0x19b   :  { %10625 = vst [vmem:[#allocation43_spill] sm:$0xff] %v8329_v48  ;;  %1843 = vperm.xlu2 %7505, %v1737_v43   ;;  %v8347_v48 = vpop.f32.mrf.mxu2  ;;  %v8351_v8 = vpop.f32.mrf.mxu3 }
 0x19c   :  { %1275 = vmatmul.f32.gmra.mxu0 %v7889_v14  ;;  %1440 = vmatmul.f32.gmra.mxu1 %v7881_v0 }
 0x1a1   :  { %v8340_v22 = vpop.f32.mrf.mxu0  ;;  %v8342_v57 = vpop.f32.mrf.mxu1 }
 0x1a2   :  { %10626 = vst [vmem:[#allocation44_spill] sm:$0xff] %v8340_v22  ;;  %v1740_v22 = vld [vmem:[%s10473_s1 + $0xa0] sm:$0xff] }
 0x1a3   :  { %10627 = vst [vmem:[#allocation45_spill] sm:$0xff] %v8342_v57  ;;  %1858 = vperm.xlu2 %7505, %v1740_v22   ;;  %v8362_v43 = vpop.f32.mrf.mxu2  ;;  %v8364_v57 = vpop.f32.mrf.mxu3 }
 0x1a4   :  { %1279 = vmatmul.f32.gmra.mxu0 %v7897_v19  ;;  %1444 = vmatmul.f32.gmra.mxu1 %v7889_v14 }
 0x1a9   :  { %v8353_v23 = vpop.f32.mrf.mxu0  ;;  %v8355_v0 = vpop.f32.mrf.mxu1 }
 0x1aa   :  { %10628 = vst [vmem:[#allocation46_spill] sm:$0xff] %v8353_v23  ;;  %v1743_v23 = vld [vmem:[%s10473_s1 + $0xb8] sm:$0xff] }
 0x1ab   :  { %10629 = vst [vmem:[#allocation47_spill] sm:$0xff] %v8355_v0  ;;  %1873 = vperm.xlu2 %7505, %v1743_v23   ;;  %v8375_v22 = vpop.f32.mrf.mxu2  ;;  %v8381_v55 = vpop.f32.mrf.mxu3 }
 0x1ac   :  { %1283 = vmatmul.f32.gmra.mxu0 %v7905_v18  ;;  %1448 = vmatmul.f32.gmra.mxu1 %v7897_v19  ;;  %10633 = vst [vmem:[#allocation51_spill] sm:$0xff] %v8381_v55 }
 0x1b1   :  { %v8366_v14 = vpop.f32.mrf.mxu0  ;;  %v8368_v62 = vpop.f32.mrf.mxu1 }
 0x1b2   :  { %10630 = vst [vmem:[#allocation48_spill] sm:$0xff] %v8366_v14  ;;  %v1746_v14 = vld [vmem:[%s10473_s1 + $0xd0] sm:$0xff] }
 0x1b3   :  { %10631 = vst [vmem:[#allocation49_spill] sm:$0xff] %v8368_v62  ;;  %1888 = vperm.xlu2 %7505, %v1746_v14   ;;  %v8392_v62 = vpop.f32.mrf.mxu2  ;;  %v8397_v31 = vpop.f32.mrf.mxu3 }
 0x1b4   :  { %1287 = vmatmul.f32.gmra.mxu0 %v7913_v33  ;;  %1452 = vmatmul.f32.gmra.mxu1 %v7905_v18  ;;  %10634 = vst [vmem:[#allocation52_spill] sm:$0xff] %v8392_v62 }
 0x1b5   :  { %10635 = vst [vmem:[#allocation53_spill] sm:$0xff] %v8397_v31 }
 0x1b9   :  { %v8377_v19 = vpop.f32.mrf.mxu1  ;;  %v8379_v0 = vpop.f32.mrf.mxu0 }
 0x1ba   :  { %10632 = vst [vmem:[#allocation50_spill] sm:$0xff] %v8377_v19  ;;  %v1749_v19 = vld [vmem:[%s10473_s1 + $0xe8] sm:$0xff] }
 0x1bb   :  { %1903 = vperm.xlu2 %7505, %v1749_v19   ;;  %v8408_v45 = vpop.f32.mrf.mxu2  ;;  %v8412_v19 = vpop.f32.mrf.mxu3 }
 0x1bc   :  { %1291 = vmatmul.f32.gmra.mxu0 %v7921_v42  ;;  %1456 = vmatmul.f32.gmra.mxu1 %v7913_v33  ;;  %10636 = vst [vmem:[#allocation54_spill] sm:$0xff] %v8408_v45 }
 0x1bd   :  { %10637 = vst [vmem:[#allocation55_spill] sm:$0xff] %v8412_v19 }
 0x1c1   :  { %v8388_v23 = vpop.f32.mrf.mxu0  ;;  %v8390_v18 = vpop.f32.mrf.mxu1 }
 0x1c3   :  { %1918 = vperm.xlu2 %7505, %v1752_v49   ;;  %v8423_v49 = vpop.f32.mrf.mxu2  ;;  %v8425_v44 = vpop.f32.mrf.mxu3 }
 0x1c4   :  { %1295 = vmatmul.f32.gmra.mxu0 %v7929_v51  ;;  %1460 = vmatmul.f32.gmra.mxu1 %v7921_v42  ;;  %10638 = vst [vmem:[#allocation56_spill] sm:$0xff] %v8423_v49 }
 0x1c5   :  { %10639 = vst [vmem:[#allocation57_spill] sm:$0xff] %v8425_v44 }
 0x1c9   :  { %v8401_v14 = vpop.f32.mrf.mxu0  ;;  %v8403_v33 = vpop.f32.mrf.mxu1 }
 0x1cb   :  { %1933 = vperm.xlu2 %7505, %v1755_v59   ;;  %v8431_v19 = vpop.f32.mrf.mxu2  ;;  %v8434_v45 = vpop.f32.mrf.mxu3 }
 0x1cc   :  { %1299 = vmatmul.f32.gmra.mxu0 %v7937_v60  ;;  %1464 = vmatmul.f32.gmra.mxu1 %v7929_v51  ;;  %10640 = vst [vmem:[#allocation58_spill] sm:$0xff] %v8431_v19 }
 0x1cd   :  { %10641 = vst [vmem:[#allocation59_spill] sm:$0xff] %v8434_v45 }
 0x1d1   :  { %v8414_v38 = vpop.f32.mrf.mxu0  ;;  %v8416_v42 = vpop.f32.mrf.mxu1 }
 0x1d3   :  { %v8439_v10 = vpop.f32.mrf.mxu2  ;;  %v8441_v62 = vpop.f32.mrf.mxu3 }
 0x1d4   :  { %1303 = vmatmul.f32.gmra.mxu0 %v7951_v26  ;;  %1468 = vmatmul.f32.gmra.mxu1 %v7937_v60  ;;  %10642 = vst [vmem:[#allocation60_spill] sm:$0xff] %v8439_v10  ;;  %v1789_v10 = vpop.permute.xlu1 %1788 }
 0x1d5   :  { %10643 = vst [vmem:[#allocation61_spill] sm:$0xff] %v8441_v62 }
 0x1d9   :  { %v1244_v51 = vpop.f32.mrf.mxu0  ;;  %v8427_v29 = vpop.f32.mrf.mxu1 }
 0x1da   :  { %v1245_v31 = vadd.f32 %v1244_v51, %v8004_v56  ;;  %v1779_v51 = vpop.permute.xlu0 %1778 }
 0x1dc   :  { %1307 = vmatmul.f32.gmra.mxu0 %v7962_v30  ;;  %1472 = vmatmul.f32.gmra.mxu1 %v7951_v26 }
 0x1e1   :  { %v1248_v59 = vpop.f32.mrf.mxu0  ;;  %v1413_v58 = vpop.f32.mrf.mxu1 }
 0x1e2   :  { %v1414_v60 = vadd.f32 %v1413_v58, %v1245_v31  ;;  %v1249_v49 = vadd.f32 %v1248_v59, %v8015_v20 }
 0x1e4   :  { %v1544_v39 = vadd.f32 3.0, %v1414_v60  ;;  %1311 = vmatmul.f32.gmra.mxu0 %v7973_v52  ;;  %1476 = vmatmul.f32.gmra.mxu1 %v7962_v30 }
 0x1e6   :  { %v1580_v44 = vmax.f32 %v1544_v39, 0.0 }
 0x1e8   :  { %v1616_v55 = vmin.f32 %v1580_v44, 6.0 }
 0x1e9   :  { %v1252_v32 = vpop.f32.mrf.mxu0  ;;  %v1417_v26 = vpop.f32.mrf.mxu1 }
 0x1ea   :  { %v1652_v19 = vmul.f32 %v1616_v55, %v1414_v60  ;;  %v1418_v56 = vadd.f32 %v1417_v26, %v1249_v49  ;;  %v1253_v44 = vadd.f32 %v1252_v32, %v8031_v50  ;;  %v1784_v50 = vpop.permute.xlu0 %1783 }
 0x1ec   :  { %v1688_v45 = vmul.f32 0.16666667, %v1652_v19  ;;  %v1545_v58 = vadd.f32 3.0, %v1418_v56  ;;  %1315 = vmatmul.f32.gmra.mxu0 %v7984_v16  ;;  %1480 = vmatmul.f32.gmra.mxu1 %v7973_v52  ;;  %v8453_v52 = vpop.f32.mrf.mxu2 }
 0x1ed   :  { %10644 = vst [vmem:[#allocation62_spill] sm:$0xff] %v8453_v52 }
 0x1ee   :  { %v1940_v30 = vmul.f32 %v1779_v51, %v1688_v45  ;;  %v1581_v39 = vmax.f32 %v1545_v58, 0.0 }
 0x1f0   :  { %v1977_v20 = vsel %vm1975_vm1, %v1940_v30, 0  ;;  %v1617_v31 = vmin.f32 %v1581_v39, 6.0 }
 0x1f1   :  { %v1256_v59 = vpop.f32.mrf.mxu0  ;;  %v1421_v55 = vpop.f32.mrf.mxu1  ;;  %v8447_v49 = vand.u32 4294901760, %v1977_v20 }
 0x1f2   :  { %v1653_v60 = vmul.f32 %v1617_v31, %v1418_v56  ;;  %v1422_v26 = vadd.f32 %v1421_v55, %v1253_v44  ;;  %v8459_v56 = vpop.f32.mrf.mxu3  ;;  %v1257_v44 = vadd.f32 %v1256_v59, %v8051_v37  ;;  %v10646_v59 = vand.u32 4294901760, %v8034_v54  ;;  %v7486_v54 = vld [vmem:[%s10472_s4 + $0x18] sm:$0xff] }
 0x1f3   :  { %2060 = vmatmul.f32.vlgmr.msrb.gmra.mxu3 %v8447_v49  ;;  %v8451_v19 = vsub.f32 %v1977_v20, %v8447_v49  ;;  %10645 = vst [vmem:[#allocation63_spill] sm:$0xff] %v8459_v56  ;;  %v8468_v56 = vpop.permute.xlu2 %1758 }
 0x1f4   :  { %v1689_v45 = vmul.f32 0.16666667, %v1653_v60  ;;  %v1546_v51 = vadd.f32 3.0, %v1422_v26  ;;  %1319 = vmatmul.f32.gmra.mxu0 %v7995_v36  ;;  %1484 = vmatmul.f32.gmra.mxu1 %v7984_v16 }
 0x1f5   :  { %v10495_v32 = vand.u32 4294901760, %v8451_v19  ;;  %2209 = vmatpush.msrb.mxu3 %v8028_v47 }
 0x1f6   :  { %v1941_v58 = vmul.f32 %v1784_v50, %v1689_v45  ;;  %v1582_v30 = vmax.f32 %v1546_v51, 0.0 }
 0x1f7   :  { %v2008_v39 = vsub.f32 %v8451_v19, %v10495_v32 }
 0x1f8   :  { %v1980_v20 = vsel %vm1975_vm1, %v1941_v58, 0  ;;  %v1618_v31 = vmin.f32 %v1582_v30, 6.0 }
 0x1f9   :  { %v1260_v55 = vpop.f32.mrf.mxu0  ;;  %v1425_v16 = vpop.f32.mrf.mxu1  ;;  %v2009_v60 = vand.u32 4294901760, %v2008_v39  ;;  %v8466_v62 = vand.u32 4294901760, %v1980_v20 }
 0x1fa   :  { %v1654_v52 = vmul.f32 %v1618_v31, %v1422_v26  ;;  %v1426_v47 = vadd.f32 %v1425_v16, %v1257_v44  ;;  %v8479_v26 = vpop.f32.mrf.mxu2  ;;  %v1261_v44 = vadd.f32 %v1260_v55, %v8063_v17 }
 0x1fb   :  { %2010 = vmatmul.f32.vlgmr.msrb.gmra.mxu2 %v2009_v60  ;;  %2064 = vmatmul.f32.gmra.mxu3 %v8466_v62  ;;  %v8472_v45 = vsub.f32 %v1980_v20, %v8466_v62  ;;  %10647 = vst [vmem:[#allocation64_spill] sm:$0xff] %v8479_v26  ;;  %v8484_v20 = vpop.f32.mrf.mxu3 }
 0x1fc   :  { %v1690_v51 = vmul.f32 0.16666667, %v1654_v52  ;;  %v1547_v50 = vadd.f32 3.0, %v1426_v47  ;;  %1323 = vmatmul.f32.gmra.mxu0 %v8006_v61  ;;  %1488 = vmatmul.f32.gmra.mxu1 %v7995_v36  ;;  %10648 = vst [vmem:[#allocation65_spill] sm:$0xff] %v8484_v20 }
 0x1fd   :  { %v10494_v37 = vand.u32 4294901760, %v8472_v45  ;;  %2175 = vmatpush.msrb.mxu2 %v10646_v59 }
 0x1fe   :  { %v1942_v58 = vmul.f32 %v1789_v10, %v1690_v51  ;;  %v1583_v30 = vmax.f32 %v1547_v50, 0.0  ;;  %v8495_v51 = vand.u32 4294901760, %v7486_v54 }
 0x1ff   :  { %v2016_v39 = vsub.f32 %v8472_v45, %v10494_v37  ;;  %v8506_v37 = vpop.permute.xlu2 %1763 }
 0x200   :  { %v1983_v52 = vsel %vm1975_vm1, %v1942_v58, 0  ;;  %v1619_v36 = vmin.f32 %v1583_v30, 6.0  ;;  %v8502_v55 = vsub.f32 %v7486_v54, %v8495_v51  ;;  %2765 = vmatpush.msra.mxu0 %v8495_v51 }
 0x201   :  { %v8491_v31 = vpop.f32.mrf.mxu0  ;;  %v1429_v16 = vpop.f32.mrf.mxu1  ;;  %v2017_v10 = vand.u32 4294901760, %v2016_v39  ;;  %v8493_v60 = vand.u32 4294901760, %v1983_v52 }
 0x202   :  { %10649 = vst [vmem:[#allocation66_spill] sm:$0xff] %v8491_v31  ;;  %v1655_v50 = vmul.f32 %v1619_v36, %v1426_v47  ;;  %v1430_v59 = vadd.f32 %v1429_v16, %v1261_v44  ;;  %v1794_v39 = vpop.permute.xlu1 %1793  ;;  %v2816_v44 = vand.u32 4294901760, %v8502_v55 }
 0x203   :  { %2018 = vmatmul.f32.gmra.mxu2 %v2017_v10  ;;  %2068 = vmatmul.f32.gmra.mxu3 %v8493_v60  ;;  %v8499_v17 = vsub.f32 %v1983_v52, %v8493_v60  ;;  %10650 = vst [vmem:[#allocation67_spill] sm:$0xff] %v8502_v55  ;;  %v8513_v10 = vpop.f32.mrf.mxu2 }
 0x204   :  { %v1691_v58 = vmul.f32 0.16666667, %v1655_v50  ;;  %v1548_v30 = vadd.f32 3.0, %v1430_v59  ;;  %1327 = vmatmul.f32.gmra.mxu0 %v8017_v24  ;;  %1492 = vmatmul.f32.gmra.mxu1 %v8006_v61  ;;  %v2817_v16 = vsub.f32 %v8502_v55, %v2816_v44 }
 0x205   :  { %v2023_v47 = vand.u32 4294901760, %v8499_v17  ;;  %2936 = vmatpush.msrb.mxu0 %v2816_v44 }
 0x206   :  { %v1943_v52 = vmul.f32 %v1794_v39, %v1691_v58  ;;  %v1584_v36 = vmax.f32 %v1548_v30, 0.0  ;;  %v2818_v7 = vand.u32 4294901760, %v2817_v16  ;;  %v8522_v58 = vpop.f32.mrf.mxu3 }
 0x207   :  { %v2024_v54 = vsub.f32 %v8499_v17, %v2023_v47  ;;  %10651 = vst [vmem:[#allocation68_spill] sm:$0xff] %v8522_v58 }
 0x208   :  { %v1986_v61 = vsel %vm1975_vm1, %v1943_v52, 0  ;;  %v1620_v50 = vmin.f32 %v1584_v36, 6.0  ;;  %v1799_v52 = vpop.permute.xlu2 %1798  ;;  %2819 = vmatpush.msra.mxu1 %v2818_v7 }
 0x209   :  { %v8516_v32 = vpop.f32.mrf.mxu0  ;;  %v8518_v20 = vpop.f32.mrf.mxu1  ;;  %v2025_v26 = vand.u32 4294901760, %v2024_v54  ;;  %v8520_v31 = vand.u32 4294901760, %v1986_v61 }
 0x20a   :  { %v1656_v30 = vmul.f32 %v1620_v50, %v1430_v59  ;;  %2970 = vmatpush.msrb.mxu1 %v8495_v51 }
 0x20b   :  { %2026 = vmatmul.f32.gmra.mxu2 %v2025_v26  ;;  %2072 = vmatmul.f32.gmra.mxu3 %v8520_v31  ;;  %v8526_v39 = vsub.f32 %v1986_v61, %v8520_v31  ;;  %v8537_v50 = vpop.f32.mrf.mxu2 }
 0x20c   :  { %v1692_v44 = vmul.f32 0.16666667, %v1656_v30  ;;  %1331 = vmatmul.f32.gmra.mxu0 %v8036_v1  ;;  %1496 = vmatmul.f32.gmra.mxu1 %v8017_v24  ;;  %10652 = vst [vmem:[#allocation69_spill] sm:$0xff] %v8537_v50  ;;  %v10653_v30 = vand.u32 4294901760, %v8451_v19 }
 0x20d   :  { %v2031_v36 = vand.u32 4294901760, %v8526_v39 }
 0x20e   :  { %v8531_v54 = vmul.f32 %v1799_v52, %v1692_v44  ;;  %v8541_v24 = vpop.f32.mrf.mxu3 }
 0x20f   :  { %v2032_v26 = vsub.f32 %v8526_v39, %v2031_v36  ;;  %10654 = vst [vmem:[#allocation70_spill] sm:$0xff] %v8541_v24 }
 0x211   :  { %v1272_v59 = vpop.f32.mrf.mxu0  ;;  %v8535_v16 = vpop.f32.mrf.mxu1  ;;  %v2033_v61 = vand.u32 4294901760, %v2032_v26  ;;  %v8549_v26 = vld [vmem:[%s10584_s27] ss:$0 sm:$0xff] }
 0x212   :  { %v1273_v7 = vadd.f32 %v1272_v59, %v8097_v4 }
 0x213   :  { %2034 = vmatmul.f32.gmra.mxu2 %v2033_v61  ;;  %2135 = vmatmul.f32.vlgmr.msra.gmra.mxu3 %v10653_v30  ;;  %v345_v61 = vadd.f32 %v8549_v26, %v8089_v13  ;;  %v10655_v30 = vand.u32 4294901760, %v8472_v45  ;;  %v8556_v24 = vpop.f32.mrf.mxu2 }
 0x214   :  { %1335 = vmatmul.f32.gmra.mxu0 %v8053_v40  ;;  %1500 = vmatmul.f32.gmra.mxu1 %v8036_v1  ;;  %10656 = vst [vmem:[#allocation71_spill] sm:$0xff] %v8556_v24 }
 0x216   :  { %v8560_v4 = vpop.f32.mrf.mxu3 }
 0x217   :  { %10657 = vst [vmem:[#allocation72_spill] sm:$0xff] %v8560_v4 }
 0x219   :  { %v1276_v44 = vpop.f32.mrf.mxu0  ;;  %v1441_v52 = vpop.f32.mrf.mxu1 }
 0x21a   :  { %v1442_v55 = vadd.f32 %v1441_v52, %v1273_v7  ;;  %v638_v7 = vadd.f32 %v8103_v6, %v345_v61 }
 0x21b   :  { %2096 = vmatmul.f32.vlgmr.msra.gmra.mxu2 %v8451_v19  ;;  %2141 = vmatmul.f32.gmra.mxu3 %v10655_v30  ;;  %v353_v19 = vadd.f32 %v8549_v26, %v8101_v35  ;;  %v1972_v35 = vld [vmem:[%s10472_s4] sm:$0xff] }
 0x21c   :  { %v1551_v1 = vadd.f32 3.0, %v1442_v55  ;;  %1339 = vmatmul.f32.gmra.mxu0 %v8065_v15  ;;  %1504 = vmatmul.f32.gmra.mxu1 %v8053_v40  ;;  %v828_v30 = vadd.f32 %v8314_v34, %v638_v7  ;;  %v1814_v40 = vpop.permute.xlu2 %1813 }
 0x21d   :  { %v642_v61 = vadd.f32 %v8118_v53, %v353_v19  ;;  %v10659_v53 = vld [vmem:[#allocation9_spill] sm:$0xff] }
 0x21e   :  { %v1587_v59 = vmax.f32 %v1551_v1, 0.0  ;;  %v8569_v1 = vpop.f32.mrf.mxu2  ;;  %v8578_v34 = vpop.f32.mrf.mxu3  ;;  %v361_v7 = vadd.f32 %v8549_v26, %v10659_v53 }
 0x21f   :  { %10658 = vst [vmem:[#allocation73_spill] sm:$0xff] %v8578_v34 }
 0x220   :  { %v1623_v52 = vmin.f32 %v1587_v59, 6.0 }
 0x221   :  { %v1280_v58 = vpop.f32.mrf.mxu0  ;;  %v1445_v13 = vpop.f32.mrf.mxu1 }
 0x222   :  { %v1659_v50 = vmul.f32 %v1623_v52, %v1442_v55  ;;  %v1046_v55 = vadd.f32 %v8303_v9, %v828_v30  ;;  %v833_v52 = vadd.f32 %v8331_v27, %v642_v61  ;;  %v10661_v27 = vld [vmem:[#allocation11_spill] sm:$0xff] }
 0x223   :  { %2101 = vmatmul.f32.gmra.mxu2 %v8472_v45  ;;  %2147 = vmatmul.f32.gmra.mxu3 %v2023_v47  ;;  %v1229_v45 = vadd.f32 %v8379_v0, %v7960_v25  ;;  %v8582_v47 = vand.u32 4294901760, %v1972_v35  ;;  %v10660_v25 = vld [vmem:[#allocation8_spill] sm:$0xff] }
 0x224   :  { %v1695_v24 = vmul.f32 0.16666667, %v1659_v50  ;;  %1343 = vmatmul.f32.gmra.mxu0 %v8076_v2  ;;  %1508 = vmatmul.f32.gmra.mxu1 %v8065_v15  ;;  %v1277_v15 = vadd.f32 %v1276_v44, %v1046_v55 }
 0x225   :  { %v8586_v9 = vsub.f32 %v1972_v35, %v8582_v47  ;;  %2255 = vmatpush.msra.mxu2 %v8582_v47 }
 0x226   :  { %v8571_v6 = vmul.f32 %v1814_v40, %v1695_v24  ;;  %v1398_v24 = vadd.f32 %v8390_v18, %v1229_v45  ;;  %v1446_v19 = vadd.f32 %v1445_v13, %v1277_v15  ;;  %v8596_v18 = vpop.permute.xlu0 %1768  ;;  %v1052_v40 = vadd.f32 %v8320_v28, %v833_v52  ;;  %v8607_v15 = vpop.f32.mrf.mxu3 }
 0x227   :  { %v10497_v0 = vand.u32 4294901760, %v8586_v9  ;;  %v646_v13 = vadd.f32 %v10661_v27, %v361_v7 }
 0x228   :  { %v1540_v44 = vadd.f32 3.0, %v1398_v24  ;;  %v1552_v55 = vadd.f32 3.0, %v1446_v19  ;;  %v1281_v35 = vadd.f32 %v1280_v58, %v1052_v40 }
 0x229   :  { %v1284_v50 = vpop.f32.mrf.mxu0  ;;  %v1449_v59 = vpop.f32.mrf.mxu1  ;;  %v2307_v30 = vsub.f32 %v8586_v9, %v10497_v0  ;;  %v10663_v0 = vld [vmem:[#allocation10_spill] sm:$0xff]  ;;  %v838_v7 = vadd.f32 %v8347_v48, %v646_v13  ;;  %v10664_v48 = vld [vmem:[#allocation13_spill] sm:$0xff] }
 0x22a   :  { %v1576_v53 = vmax.f32 %v1540_v44, 0.0  ;;  %v369_v28 = vadd.f32 %v8549_v26, %v10663_v0  ;;  %v1588_v52 = vmax.f32 %v1552_v55, 0.0  ;;  %v1450_v27 = vadd.f32 %v1449_v59, %v1281_v35 }
 0x22b   :  { %2106 = vmatmul.f32.gmra.mxu2 %v8499_v17  ;;  %2153 = vmatmul.f32.gmra.mxu3 %v2031_v36  ;;  %v8603_v17 = vpop.f32.mrf.mxu2  ;;  %v10662_v36 = vld [vmem:[#allocation3_spill] sm:$0xff]  ;;  %v1058_v0 = vadd.f32 %v8336_v41, %v838_v7 }
 0x22c   :  { %1347 = vmatmul.f32.gmra.mxu0 %v10660_v25  ;;  %1512 = vmatmul.f32.gmra.mxu1 %v8076_v2  ;;  %v1233_v61 = vadd.f32 %v8388_v23, %v10662_v36  ;;  %v2308_v2 = vand.u32 4294901760, %v2307_v30  ;;  %v8618_v23 = vpop.permute.xlu1 %1773  ;;  %v650_v44 = vadd.f32 %v10664_v48, %v369_v28  ;;  %v1624_v59 = vmin.f32 %v1588_v52, 6.0 }
 0x22d   :  { %v1553_v30 = vadd.f32 3.0, %v1450_v27  ;;  %v1285_v55 = vadd.f32 %v1284_v50, %v1058_v0 }
 0x22e   :  { %v1402_v4 = vadd.f32 %v8403_v33, %v1233_v61  ;;  %2309 = vmatpush.msra.mxu3 %v2308_v2  ;;  %v1612_v33 = vmin.f32 %v1576_v53, 6.0  ;;  %v8622_v40 = vpop.permute.xlu0 %1803  ;;  %v843_v35 = vadd.f32 %v8362_v43, %v650_v44  ;;  %v1660_v53 = vmul.f32 %v1624_v59, %v1446_v19  ;;  %v8632_v52 = vpop.f32.mrf.mxu3 }
 0x22f   :  { %v1589_v41 = vmax.f32 %v1553_v30, 0.0  ;;  %10666 = vst [vmem:[#allocation9_spill] sm:$0xff] %v8632_v52 }
 0x230   :  { %v1541_v58 = vadd.f32 3.0, %v1402_v4  ;;  %v1648_v61 = vmul.f32 %v1612_v33, %v1398_v24  ;;  %v1064_v24 = vadd.f32 %v8351_v8, %v843_v35  ;;  %v1696_v19 = vmul.f32 0.16666667, %v1660_v53 }
 0x231   :  { %v1453_v45 = vpop.f32.mrf.mxu1  ;;  %v1288_v34 = vpop.f32.mrf.mxu0 }
 0x232   :  { %v1454_v7 = vadd.f32 %v1453_v45, %v1285_v55  ;;  %v1684_v43 = vmul.f32 0.16666667, %v1648_v61  ;;  %v1625_v45 = vmin.f32 %v1589_v41, 6.0  ;;  %v1289_v48 = vadd.f32 %v1288_v34, %v1064_v24 }
 0x233   :  { %2111 = vmatmul.f32.gmra.mxu2 %v8526_v39  ;;  %2211 = vmatmul.f32.vlgmr.msrb.gmra.mxu3 %v8447_v49  ;;  %v10665_v39 = vld [vmem:[#allocation4_spill] sm:$0xff]  ;;  %v8626_v36 = vpop.f32.mrf.mxu2 }
 0x234   :  { %1351 = vmatmul.f32.gmra.mxu0 %v8099_v5  ;;  %1516 = vmatmul.f32.gmra.mxu1 %v10660_v25  ;;  %v1237_v13 = vadd.f32 %v8401_v14, %v10665_v39  ;;  %v1577_v25 = vmax.f32 %v1541_v58, 0.0  ;;  %v8640_v33 = vpop.permute.xlu1 %1808  ;;  %v10667_v58 = vld [vmem:[#allocation5_spill] sm:$0xff]  ;;  %v1661_v55 = vmul.f32 %v1625_v45, %v1450_v27 }
 0x235   :  { %2382 = vmatpush.msrb.mxu3 %v8582_v47  ;;  %v1241_v0 = vadd.f32 %v8414_v38, %v10667_v58 }
 0x236   :  { %v1406_v2 = vadd.f32 %v8416_v42, %v1237_v13  ;;  %v1613_v42 = vmin.f32 %v1577_v25, 6.0  ;;  %v1819_v44 = vpop.permute.xlu0 %1818 }
 0x237   :  { %v1410_v39 = vadd.f32 %v8427_v29, %v1241_v0  ;;  %v1948_v13 = vmul.f32 %v1819_v44, %v1696_v19 }
 0x238   :  { %v1542_v50 = vadd.f32 3.0, %v1406_v2  ;;  %v1649_v30 = vmul.f32 %v1613_v42, %v1402_v4 }
 0x239   :  { %v1457_v28 = vpop.f32.mrf.mxu1  ;;  %v8636_v14 = vpop.f32.mrf.mxu0  ;;  %v1543_v27 = vadd.f32 3.0, %v1410_v39  ;;  %v2738_v35 = vsel %vm1975_vm1, %v1948_v13, 0 }
 0x23a   :  { %v1578_v59 = vmax.f32 %v1542_v50, 0.0  ;;  %v1458_v8 = vadd.f32 %v1457_v28, %v1289_v48  ;;  %v1685_v34 = vmul.f32 0.16666667, %v1649_v30  ;;  %v8663_v19 = vand.u32 4294901760, %v2738_v35 }
 0x23b   :  { %2177 = vmatmul.f32.vlgmr.msrb.gmra.mxu2 %v8447_v49  ;;  %2215 = vmatmul.f32.gmra.mxu3 %v8466_v62  ;;  %v1554_v49 = vadd.f32 3.0, %v1454_v7  ;;  %v8648_v61 = vpop.f32.mrf.mxu2  ;;  %v1579_v24 = vmax.f32 %v1543_v27, 0.0 }
 0x23c   :  { %1355 = vmatmul.f32.gmra.mxu0 %v8114_v3  ;;  %1520 = vmatmul.f32.gmra.mxu1 %v8099_v5  ;;  %v1936_v5 = vmul.f32 %v8468_v56, %v1684_v43  ;;  %v8654_v56 = vpop.f32.mrf.mxu3  ;;  %v1614_v4 = vmin.f32 %v1578_v59, 6.0  ;;  %v1555_v41 = vadd.f32 3.0, %v1458_v8  ;;  %v1824_v43 = vpop.permute.xlu1 %1823  ;;  %v1937_v50 = vmul.f32 %v8506_v37, %v1685_v34 }
 0x23d   :  { %2344 = vmatpush.msrb.mxu2 %v8586_v9  ;;  %v1590_v25 = vmax.f32 %v1554_v49, 0.0  ;;  %10668 = vst [vmem:[#allocation8_spill] sm:$0xff] %v8654_v56  ;;  %v1615_v44 = vmin.f32 %v1579_v24, 6.0  ;;  %v1829_v34 = vpop.permute.xlu2 %1828 }
 0x23e   :  { %v2228_v29 = vsel %vm1975_vm1, %v1936_v5, 0  ;;  %v1591_v58 = vmax.f32 %v1555_v41, 0.0  ;;  %v2231_v48 = vsel %vm1975_vm1, %v1937_v50, 0 }
 0x23f   :  { %v1626_v53 = vmin.f32 %v1590_v25, 6.0  ;;  %v8660_v42 = vand.u32 4294901760, %v2228_v29 }
 0x240   :  { %v1627_v59 = vmin.f32 %v1591_v58, 6.0 }
 0x241   :  { %v8652_v38 = vpop.f32.mrf.mxu1  ;;  %v8658_v28 = vpop.f32.mrf.mxu0  ;;  %v1662_v49 = vmul.f32 %v1626_v53, %v1454_v7  ;;  %v8670_v0 = vsub.f32 %v2228_v29, %v8660_v42  ;;  %v8676_v7 = vsub.f32 %v2738_v35, %v8663_v19 }
 0x242   :  { %v1663_v53 = vmul.f32 %v1627_v59, %v1458_v8 }
 0x243   :  { %2181 = vmatmul.f32.gmra.mxu2 %v8466_v62  ;;  %2219 = vmatmul.f32.gmra.mxu3 %v8493_v60  ;;  %v1697_v62 = vmul.f32 0.16666667, %v1661_v55  ;;  %10670 = vst [vmem:[#allocation3_spill] sm:$0xff] %v8676_v7  ;;  %v1698_v5 = vmul.f32 0.16666667, %v1662_v49  ;;  %v8684_v55 = vand.u32 4294901760, %v2231_v48 }
 0x244   :  { %1359 = vmatmul.f32.gmra.mxu0 %v8129_v11  ;;  %1524 = vmatmul.f32.gmra.mxu1 %v8114_v3  ;;  %v1650_v3 = vmul.f32 %v1614_v4, %v1406_v2  ;;  %v8672_v2 = vpop.f32.mrf.mxu2  ;;  %v8681_v13 = vpop.f32.mrf.mxu3  ;;  %v1651_v4 = vmul.f32 %v1615_v44, %v1410_v39  ;;  %v10499_v27 = vand.u32 4294901760, %v8676_v7 }
 0x245   :  { %v1949_v45 = vmul.f32 %v1824_v43, %v1697_v62  ;;  %10669 = vst [vmem:[#allocation11_spill] sm:$0xff] %v8672_v2  ;;  %v1950_v62 = vmul.f32 %v1829_v34, %v1698_v5  ;;  %v8700_v39 = vsub.f32 %v2231_v48, %v8684_v55  ;;  %v10675_v34 = vand.u32 4294901760, %v8586_v9 }
 0x246   :  { %v1686_v37 = vmul.f32 0.16666667, %v1650_v3  ;;  %10671 = vst [vmem:[#allocation10_spill] sm:$0xff] %v8681_v13  ;;  %v1687_v8 = vmul.f32 0.16666667, %v1651_v4 }
 0x247   :  { %v1699_v3 = vmul.f32 0.16666667, %v1663_v53 }
 0x248   :  { %v1938_v29 = vmul.f32 %v8596_v18, %v1686_v37  ;;  %v1834_v37 = vpop.permute.xlu0 %1833  ;;  %v1939_v48 = vmul.f32 %v8618_v23, %v1687_v8 }
 0x249   :  { %v8679_v30 = vpop.f32.mrf.mxu1  ;;  %v8686_v25 = vpop.f32.mrf.mxu0  ;;  %v1951_v59 = vmul.f32 %v1834_v37, %v1699_v3 }
 0x24a   :  { %v2234_v41 = vsel %vm1975_vm1, %v1938_v29, 0 }
 0x24b   :  { %2185 = vmatmul.f32.gmra.mxu2 %v8493_v60  ;;  %2223 = vmatmul.f32.gmra.mxu3 %v8520_v31  ;;  %v2741_v60 = vsel %vm1975_vm1, %v1949_v45, 0  ;;  %v8716_v49 = vand.u32 4294901760, %v2234_v41 }
 0x24c   :  { %1363 = vmatmul.f32.gmra.mxu0 %v8147_v46  ;;  %1528 = vmatmul.f32.gmra.mxu1 %v8129_v11  ;;  %v10501_v11 = vand.u32 4294901760, %v8670_v0  ;;  %v8690_v35 = vand.u32 4294901760, %v2741_v60  ;;  %v8711_v50 = vpop.f32.mrf.mxu2  ;;  %v8718_v58 = vpop.f32.mrf.mxu3 }
 0x24d   :  { %10673 = vst [vmem:[#allocation4_spill] sm:$0xff] %v8711_v50  ;;  %v8732_v23 = vsub.f32 %v2234_v41, %v8716_v49 }
 0x24e   :  { %v2259_v18 = vsub.f32 %v8670_v0, %v10501_v11  ;;  %v8708_v43 = vsub.f32 %v2741_v60, %v8690_v35  ;;  %10674 = vst [vmem:[#allocation5_spill] sm:$0xff] %v8718_v58 }
 0x250   :  { %10672 = vst [vmem:[#allocation13_spill] sm:$0xff] %v8708_v43  ;;  %v2260_v24 = vand.u32 4294901760, %v2259_v18  ;;  %v10498_v5 = vand.u32 4294901760, %v8708_v43 }
 0x251   :  { %v8713_v45 = vpop.f32.mrf.mxu1  ;;  %v8724_v29 = vpop.f32.mrf.mxu0 }
 0x252   :  { %v2777_v53 = vsub.f32 %v8708_v43, %v10498_v5 }
 0x253   :  { %2189 = vmatmul.f32.gmra.mxu2 %v8520_v31  ;;  %2311 = vmatmul.f32.vlgmr.msra.gmra.mxu3 %v8660_v42  ;;  %v2769_v31 = vsub.f32 %v8676_v7, %v10499_v27  ;;  %v10699_v7 = vld [vmem:[#allocation58_spill] sm:$0xff] }
 0x254   :  { %1367 = vmatmul.f32.gmra.mxu0 %v8165_v12  ;;  %1532 = vmatmul.f32.gmra.mxu1 %v8147_v46  ;;  %v2744_v46 = vsel %vm1975_vm1, %v1950_v62, 0  ;;  %v2237_v62 = vsel %vm1975_vm1, %v1939_v48, 0  ;;  %v8747_v41 = vpop.f32.mrf.mxu2 }
 0x255   :  { %2460 = vmatpush.msra.mxu3 %v8582_v47  ;;  %v10500_v47 = vand.u32 4294901760, %v8700_v39  ;;  %v8721_v44 = vand.u32 4294901760, %v2744_v46  ;;  %v2770_v60 = vand.u32 4294901760, %v2769_v31  ;;  %v10502_v31 = vand.u32 4294901760, %v8732_v23  ;;  %10677 = vst [vmem:[#allocation75_spill] sm:$0xff] %v8747_v41 }
 0x256   :  { %v8745_v3 = vand.u32 4294901760, %v2237_v62 }
 0x257   :  { %v2267_v4 = vsub.f32 %v8700_v39, %v10500_v47  ;;  %v8741_v18 = vsub.f32 %v2744_v46, %v8721_v44  ;;  %v8755_v46 = vpop.f32.mrf.mxu3 }
 0x258   :  { %10678 = vst [vmem:[#allocation76_spill] sm:$0xff] %v8755_v46 }
 0x259   :  { %10676 = vst [vmem:[#allocation74_spill] sm:$0xff] %v8741_v18  ;;  %v2268_v8 = vand.u32 4294901760, %v2267_v4  ;;  %v10503_v37 = vand.u32 4294901760, %v8741_v18  ;;  %v8752_v48 = vpop.f32.mrf.mxu1  ;;  %v8764_v4 = vsub.f32 %v2237_v62, %v8745_v3 }
 0x25b   :  { %2261 = vmatmul.f32.vlgmr.msra.gmra.mxu2 %v2260_v24  ;;  %2315 = vmatmul.f32.gmra.mxu3 %v8684_v55  ;;  %v2778_v24 = vand.u32 4294901760, %v2777_v53  ;;  %v10504_v27 = vand.u32 4294901760, %v8764_v4 }
 0x25c   :  { %1536 = vmatmul.f32.gmra.mxu1 %v8165_v12  ;;  %2771 = vmatmul.f32.vlgmr.msra.gmra.mxu0 %v2770_v60  ;;  %v2747_v12 = vsel %vm1975_vm1, %v1951_v59, 0  ;;  %v8758_v60 = vpop.f32.mrf.mxu0  ;;  %v2275_v59 = vsub.f32 %v8732_v23, %v10502_v31  ;;  %v8778_v62 = vpop.f32.mrf.mxu2 }
 0x25d   :  { %2426 = vmatpush.msra.mxu2 %v10675_v34  ;;  %v8749_v9 = vand.u32 4294901760, %v2747_v12  ;;  %v2785_v34 = vsub.f32 %v8741_v18, %v10503_v37  ;;  %v10697_v18 = vld [vmem:[#allocation53_spill] sm:$0xff] }
 0x25e   :  { %v2276_v5 = vand.u32 4294901760, %v2275_v59  ;;  %v2283_v59 = vsub.f32 %v8764_v4, %v10504_v27  ;;  %v10684_v27 = vand.u32 4294901760, %v8670_v0 }
 0x25f   :  { %v8770_v53 = vsub.f32 %v2747_v12, %v8749_v9  ;;  %v2786_v47 = vand.u32 4294901760, %v2785_v34 }
 0x260   :  { %v2284_v37 = vand.u32 4294901760, %v2283_v59 }
 0x261   :  { %10679 = vst [vmem:[#allocation77_spill] sm:$0xff] %v8770_v53  ;;  %v10505_v11 = vand.u32 4294901760, %v8770_v53  ;;  %v8781_v12 = vpop.f32.mrf.mxu1 }
 0x263   :  { %2269 = vmatmul.f32.gmra.mxu2 %v2268_v8  ;;  %2319 = vmatmul.f32.gmra.mxu3 %v8716_v49  ;;  %v10680_v8 = vld [vmem:[#allocation12_spill] sm:$0xff] }
 0x264   :  { %2779 = vmatmul.f32.gmra.mxu0 %v2778_v24  ;;  %2821 = vmatmul.f32.vlgmr.msra.gmra.mxu1 %v8663_v19  ;;  %v377_v24 = vadd.f32 %v8549_v26, %v10680_v8  ;;  %10681 = vst [vmem:[#allocation12_spill] sm:$0xff] %v8778_v62  ;;  %v8786_v8 = vpop.f32.mrf.mxu3 }
 0x265   :  { %10682 = vst [vmem:[#allocation78_spill] sm:$0xff] %v8786_v8 }
 0x266   :  { %v654_v31 = vadd.f32 %v8169_v21, %v377_v24  ;;  %v2793_v21 = vsub.f32 %v8770_v53, %v10505_v11 }
 0x268   :  { %v848_v24 = vadd.f32 %v8375_v22, %v654_v31  ;;  %v2794_v46 = vand.u32 4294901760, %v2793_v21  ;;  %v8804_v31 = vpop.f32.mrf.mxu2 }
 0x26a   :  { %v1070_v62 = vadd.f32 %v8364_v57, %v848_v24  ;;  %v7487_v57 = vld [vmem:[%s10472_s4 + $0x20] sm:$0xff] }
 0x26b   :  { %2277 = vmatmul.f32.gmra.mxu2 %v2276_v5  ;;  %2323 = vmatmul.f32.gmra.mxu3 %v8745_v3  ;;  %v10683_v5 = vld [vmem:[#allocation14_spill] sm:$0xff] }
 0x26c   :  { %2787 = vmatmul.f32.gmra.mxu0 %v2786_v47  ;;  %2825 = vmatmul.f32.gmra.mxu1 %v8690_v35  ;;  %v385_v34 = vadd.f32 %v8549_v26, %v10683_v5  ;;  %v8794_v47 = vpop.f32.mrf.mxu0  ;;  %v1293_v11 = vadd.f32 %v8636_v14, %v1070_v62  ;;  %v10685_v5 = vld [vmem:[#allocation15_spill] sm:$0xff]  ;;  %10686 = vst [vmem:[#allocation14_spill] sm:$0xff] %v8804_v31  ;;  %v10690_v62 = vld [vmem:[#allocation17_spill] sm:$0xff] }
 0x26d   :  { %v393_v22 = vadd.f32 %v8549_v26, %v10685_v5  ;;  %v10691_v5 = vld [vmem:[#allocation18_spill] sm:$0xff]  ;;  %v10692_v31 = vld [vmem:[#allocation51_spill] sm:$0xff] }
 0x26e   :  { %v658_v58 = vadd.f32 %v8181_v63, %v385_v34  ;;  %v10687_v63 = vld [vmem:[#allocation52_spill] sm:$0xff]  ;;  %v1462_v21 = vadd.f32 %v8652_v38, %v1293_v11  ;;  %v409_v8 = vadd.f32 %v8549_v26, %v10691_v5  ;;  %v10693_v38 = vand.u32 4294901760, %v8700_v39 }
 0x26f   :  { %v662_v24 = vadd.f32 %v10690_v62, %v393_v22  ;;  %v10694_v22 = vld [vmem:[#allocation16_spill] sm:$0xff]  ;;  %v10695_v62 = vld [vmem:[#allocation54_spill] sm:$0xff] }
 0x271   :  { %v858_v5 = vadd.f32 %v10695_v62, %v662_v24 }
 0x273   :  { %2285 = vmatmul.f32.gmra.mxu2 %v2284_v37  ;;  %2386 = vmatmul.f32.vlgmr.msrb.gmra.mxu3 %v10684_v27  ;;  %v853_v37 = vadd.f32 %v10687_v63, %v658_v58  ;;  %v8811_v27 = vpop.f32.mrf.mxu1  ;;  %v1556_v63 = vadd.f32 3.0, %v1462_v21 }
 0x274   :  { %2795 = vmatmul.f32.gmra.mxu0 %v2794_v46  ;;  %2829 = vmatmul.f32.gmra.mxu1 %v8721_v44  ;;  %v8813_v46 = vand.u32 4294901760, %v7487_v57  ;;  %v8815_v34 = vpop.f32.mrf.mxu0 }
 0x275   :  { %v1076_v58 = vadd.f32 %v10692_v31, %v853_v37  ;;  %v10696_v31 = vld [vmem:[#allocation21_spill] sm:$0xff]  ;;  %v1592_v13 = vmax.f32 %v1556_v63, 0.0 }
 0x276   :  { %v2061_v59 = vpop.f32.mrf.mxu3  ;;  %10688 = vst [vmem:[#allocation15_spill] sm:$0xff] %v8813_v46  ;;  %v8818_v14 = vsub.f32 %v7487_v57, %v8813_v46  ;;  %3149 = vmatpush.msra.mxu1 %v8813_v46  ;;  %v401_v57 = vadd.f32 %v8549_v26, %v10694_v22  ;;  %v670_v37 = vadd.f32 %v10696_v31, %v409_v8  ;;  %v10700_v22 = vld [vmem:[#allocation20_spill] sm:$0xff] }
 0x277   :  { %v1297_v11 = vadd.f32 %v8658_v28, %v1076_v58  ;;  %v1082_v28 = vadd.f32 %v10697_v18, %v858_v5  ;;  %v10698_v58 = vld [vmem:[#allocation19_spill] sm:$0xff]  ;;  %v417_v24 = vadd.f32 %v8549_v26, %v10700_v22  ;;  %v1628_v62 = vmin.f32 %v1592_v13, 6.0  ;;  %v10702_v18 = vld [vmem:[#allocation56_spill] sm:$0xff] }
 0x278   :  { %10689 = vst [vmem:[#allocation52_spill] sm:$0xff] %v8818_v14  ;;  %3111 = vmatpush.msra.mxu0 %v8818_v14  ;;  %v666_v43 = vadd.f32 %v10698_v58, %v401_v57  ;;  %v868_v14 = vadd.f32 %v10699_v7, %v670_v37  ;;  %v10704_v5 = vld [vmem:[#allocation23_spill] sm:$0xff] }
 0x279   :  { %v1664_v37 = vmul.f32 %v1628_v62, %v1462_v21 }
 0x27a   :  { %v863_v7 = vadd.f32 %v10702_v18, %v666_v43 }
 0x27b   :  { %2347 = vmatmul.f32.vlgmr.msrb.gmra.mxu2 %v8670_v0  ;;  %2392 = vmatmul.f32.gmra.mxu3 %v10693_v38  ;;  %v1466_v38 = vadd.f32 %v8679_v30, %v1297_v11  ;;  %v8839_v53 = vpop.f32.mrf.mxu1  ;;  %v10701_v30 = vand.u32 4294901760, %v8732_v23 }
 0x27c   :  { %2833 = vmatmul.f32.gmra.mxu1 %v8749_v9  ;;  %2938 = vmatmul.f32.vlgmr.msrb.gmra.mxu0 %v8663_v19  ;;  %v8846_v31 = vpop.f32.mrf.mxu0 }
 0x27d   :  { %v1557_v8 = vadd.f32 3.0, %v1466_v38 }
 0x27e   :  { %v2011_v41 = vpop.f32.mrf.mxu2  ;;  %v2065_v0 = vpop.f32.mrf.mxu3 }
 0x27f   :  { %v8837_v50 = vadd.f32 %v2061_v59, %v2011_v41  ;;  %v1301_v41 = vadd.f32 %v8686_v25, %v1082_v28  ;;  %v10703_v59 = vld [vmem:[#allocation57_spill] sm:$0xff]  ;;  %v1593_v58 = vmax.f32 %v1557_v8, 0.0  ;;  %v10706_v28 = vld [vmem:[#allocation55_spill] sm:$0xff] }
 0x280   :  { %v1094_v63 = vadd.f32 %v10703_v59, %v868_v14  ;;  %v7485_v25 = vld [vmem:[%s10472_s4 + $0x10] sm:$0xff]  ;;  %v10705_v14 = vld [vmem:[#allocation22_spill] sm:$0xff] }
 0x281   :  { %v8857_v13 = vadd.f32 %v8713_v45, %v1301_v41  ;;  %v8866_v43 = vand.u32 4294901760, %v7485_v25  ;;  %v425_v45 = vadd.f32 %v8549_v26, %v10705_v14  ;;  %v1629_v8 = vmin.f32 %v1593_v58, 6.0 }
 0x283   :  { %2352 = vmatmul.f32.gmra.mxu2 %v8700_v39  ;;  %2398 = vmatmul.f32.gmra.mxu3 %v10701_v30  ;;  %v674_v39 = vadd.f32 %v10704_v5, %v417_v24  ;;  %v1088_v30 = vadd.f32 %v10706_v28, %v863_v7  ;;  %v1558_v41 = vadd.f32 3.0, %v8857_v13  ;;  %v10707_v24 = vld [vmem:[#allocation60_spill] sm:$0xff]  ;;  %v8880_v18 = vpop.f32.mrf.mxu1  ;;  %v10708_v7 = vand.u32 4294901760, %v8764_v4  ;;  %v1839_v5 = vpop.permute.xlu1 %1838 }
 0x284   :  { %2942 = vmatmul.f32.gmra.mxu0 %v8690_v35  ;;  %2972 = vmatmul.f32.vlgmr.msrb.gmra.mxu1 %v8663_v19  ;;  %v1309_v19 = vadd.f32 %v8758_v60, %v1094_v63  ;;  %v1700_v60 = vmul.f32 0.16666667, %v1664_v37  ;;  %v10709_v63 = vld [vmem:[#allocation25_spill] sm:$0xff]  ;;  %v10711_v37 = vld [vmem:[#allocation66_spill] sm:$0xff] }
 0x285   :  { %2508 = vmatpush.msrb.mxu2 %v8866_v43  ;;  %v873_v62 = vadd.f32 %v10707_v24, %v674_v39  ;;  %v1305_v59 = vadd.f32 %v8724_v29, %v1088_v30  ;;  %v10710_v39 = vld [vmem:[#allocation6_spill] sm:$0xff]  ;;  %v10712_v30 = vld [vmem:[#allocation59_spill] sm:$0xff] }
 0x286   :  { %v2019_v11 = vpop.f32.mrf.mxu2  ;;  %v2069_v57 = vpop.f32.mrf.mxu3  ;;  %v8873_v21 = vadd.f32 %v8781_v12, %v1309_v19  ;;  %v1265_v58 = vadd.f32 %v10711_v37, %v10710_v39  ;;  %v1952_v24 = vmul.f32 %v1839_v5, %v1700_v60  ;;  %v10714_v37 = vld [vmem:[#allocation62_spill] sm:$0xff]  ;;  %v10716_v60 = vld [vmem:[#allocation27_spill] sm:$0xff] }
 0x287   :  { %v8860_v22 = vadd.f32 %v2065_v0, %v2019_v11  ;;  %v8876_v0 = vsub.f32 %v7485_v25, %v8866_v43  ;;  %v678_v11 = vadd.f32 %v10709_v63, %v425_v45  ;;  %v8892_v25 = vpop.f32.mrf.mxu0  ;;  %v8895_v19 = vadd.f32 %v8752_v48, %v1305_v59  ;;  %v10713_v48 = vld [vmem:[#allocation24_spill] sm:$0xff] }
 0x288   :  { %v1560_v29 = vadd.f32 3.0, %v8873_v21  ;;  %v1100_v45 = vadd.f32 %v10712_v30, %v873_v62  ;;  %v8905_v39 = vadd.f32 %v8518_v20, %v1265_v58  ;;  %v433_v59 = vadd.f32 %v8549_v26, %v10713_v48  ;;  %v10715_v26 = vld [vmem:[#allocation61_spill] sm:$0xff] }
 0x289   :  { %v10518_v12 = vand.u32 4294901760, %v8876_v0  ;;  %v878_v46 = vadd.f32 %v10714_v37, %v678_v11  ;;  %v1844_v11 = vpop.permute.xlu2 %1843 }
 0x28a   :  { %v1313_v56 = vadd.f32 %v8794_v47, %v1100_v45  ;;  %v1596_v52 = vmax.f32 %v1560_v29, 0.0  ;;  %v1549_v20 = vadd.f32 3.0, %v8905_v39 }
 0x28b   :  { %2357 = vmatmul.f32.gmra.mxu2 %v8732_v23  ;;  %2404 = vmatmul.f32.gmra.mxu3 %v10708_v7  ;;  %v1594_v23 = vmax.f32 %v1558_v41, 0.0  ;;  %v1665_v7 = vmul.f32 %v1629_v8, %v1466_v38  ;;  %v2995_v38 = vsel %vm1975_vm1, %v1952_v24, 0  ;;  %v1106_v47 = vadd.f32 %v10715_v26, %v878_v46  ;;  %v8923_v5 = vpop.f32.mrf.mxu1  ;;  %v1849_v26 = vpop.permute.xlu0 %1848 }
 0x28c   :  { %2946 = vmatmul.f32.gmra.mxu0 %v8721_v44  ;;  %2976 = vmatmul.f32.gmra.mxu1 %v8690_v35  ;;  %v2560_v35 = vsub.f32 %v8876_v0, %v10518_v12  ;;  %v1559_v12 = vadd.f32 3.0, %v8895_v19  ;;  %v8914_v62 = vadd.f32 %v8811_v27, %v1313_v56  ;;  %v682_v8 = vadd.f32 %v10716_v60, %v433_v59 }
 0x28d   :  { %v1630_v2 = vmin.f32 %v1594_v23, 6.0  ;;  %v8926_v56 = vand.u32 4294901760, %v2995_v38  ;;  %v1632_v58 = vmin.f32 %v1596_v52, 6.0  ;;  %v1585_v24 = vmax.f32 %v1549_v20, 0.0 }
 0x28e   :  { %v2027_v14 = vpop.f32.mrf.mxu2  ;;  %v2073_v28 = vpop.f32.mrf.mxu3  ;;  %v2561_v41 = vand.u32 4294901760, %v2560_v35  ;;  %v1595_v27 = vmax.f32 %v1559_v12, 0.0  ;;  %v1561_v46 = vadd.f32 3.0, %v8914_v62  ;;  %v1317_v12 = vadd.f32 %v8815_v34, %v1106_v47 }
 0x28f   :  { %v8902_v63 = vadd.f32 %v2069_v57, %v2027_v14  ;;  %v1701_v57 = vmul.f32 0.16666667, %v1665_v7  ;;  %v10717_v14 = vld [vmem:[#allocation7_spill] sm:$0xff]  ;;  %v8932_v30 = vpop.f32.mrf.mxu0  ;;  %v1668_v59 = vmul.f32 %v1632_v58, %v8873_v21  ;;  %v1621_v20 = vmin.f32 %v1585_v24, 6.0 }
 0x290   :  { %2562 = vmatpush.msrb.mxu3 %v2561_v41  ;;  %v7488_v7 = vld [vmem:[%s10472_s4 + $0x28] sm:$0xff]  ;;  %v8947_v41 = vsub.f32 %v2995_v38, %v8926_v56  ;;  %v1597_v37 = vmax.f32 %v1561_v46, 0.0 }
 0x291   :  { %v1953_v35 = vmul.f32 %v1844_v11, %v1701_v57  ;;  %v8951_v57 = vadd.f32 %v8839_v53, %v1317_v12  ;;  %v10719_v38 = vld [vmem:[#allocation63_spill] sm:$0xff]  ;;  %v1859_v24 = vpop.permute.xlu2 %1858 }
 0x293   :  { %2362 = vmatmul.f32.gmra.mxu2 %v8764_v4  ;;  %2462 = vmatmul.f32.vlgmr.msra.gmra.mxu3 %v8660_v42  ;;  %v1666_v4 = vmul.f32 %v1630_v2, %v8857_v13  ;;  %v10718_v2 = vld [vmem:[#allocation64_spill] sm:$0xff]  ;;  %v1562_v58 = vadd.f32 3.0, %v8951_v57 }
 0x294   :  { %2950 = vmatmul.f32.gmra.mxu0 %v8749_v9  ;;  %2980 = vmatmul.f32.gmra.mxu1 %v8721_v44  ;;  %v1269_v44 = vadd.f32 %v8516_v32, %v10717_v14  ;;  %v883_v13 = vadd.f32 %v10718_v2, %v682_v8  ;;  %v8944_v32 = vand.u32 4294901760, %v7488_v7  ;;  %v1704_v8 = vmul.f32 0.16666667, %v1668_v59 }
 0x295   :  { %2635 = vmatpush.msra.mxu3 %v8866_v43  ;;  %v1702_v48 = vmul.f32 0.16666667, %v1666_v4 }
 0x296   :  { %v2035_v23 = vpop.f32.mrf.mxu2  ;;  %v2136_v29 = vpop.f32.mrf.mxu3  ;;  %v8941_v52 = vadd.f32 %v8535_v16, %v1269_v44  ;;  %v2998_v16 = vsel %vm1975_vm1, %v1953_v35, 0  ;;  %v8957_v34 = vsub.f32 %v7488_v7, %v8944_v32  ;;  %v1112_v21 = vadd.f32 %v10719_v38, %v883_v13  ;;  %3279 = vmatpush.msrb.mxu0 %v8944_v32 }
 0x297   :  { %v8934_v45 = vadd.f32 %v2073_v28, %v2035_v23  ;;  %v1631_v28 = vmin.f32 %v1595_v27, 6.0  ;;  %v1954_v47 = vmul.f32 %v1849_v26, %v1702_v48  ;;  %v1633_v27 = vmin.f32 %v1597_v37, 6.0  ;;  %v8970_v23 = vpop.f32.mrf.mxu1  ;;  %v8976_v7 = vpop.f32.mrf.mxu0 }
 0x298   :  { %v1550_v53 = vadd.f32 3.0, %v8941_v52  ;;  %v1657_v35 = vmul.f32 %v1621_v20, %v8905_v39  ;;  %v1956_v48 = vmul.f32 %v1859_v24, %v1704_v8  ;;  %v1598_v37 = vmax.f32 %v1562_v58, 0.0  ;;  %v1864_v58 = vpop.permute.xlu0 %1863 }
 0x299   :  { %v1667_v60 = vmul.f32 %v1631_v28, %v8895_v19  ;;  %v1321_v19 = vadd.f32 %v8846_v31, %v1112_v21  ;;  %v1669_v59 = vmul.f32 %v1633_v27, %v8914_v62  ;;  %v3001_v31 = vsel %vm1975_vm1, %v1954_v47, 0 }
 0x29a   :  { %v1586_v46 = vmax.f32 %v1550_v53, 0.0  ;;  %v1693_v62 = vmul.f32 0.16666667, %v1657_v35  ;;  %v8995_v26 = vand.u32 4294901760, %v3001_v31 }
 0x29b   :  { %2428 = vmatmul.f32.vlgmr.msra.gmra.mxu2 %v8660_v42  ;;  %2466 = vmatmul.f32.gmra.mxu3 %v8684_v55  ;;  %v3330_v42 = vand.u32 4294901760, %v8957_v34  ;;  %v1703_v12 = vmul.f32 0.16666667, %v1667_v60  ;;  %v1490_v39 = vadd.f32 %v8880_v18, %v1321_v19  ;;  %v3252_v18 = vsel %vm1975_vm1, %v1956_v48, 0 }
 0x29c   :  { %2984 = vmatmul.f32.gmra.mxu1 %v8749_v9  ;;  %3114 = vmatmul.f32.vlgmr.msra.gmra.mxu0 %v8947_v41  ;;  %v8967_v9 = vand.u32 4294901760, %v2998_v16  ;;  %v1622_v20 = vmin.f32 %v1586_v46, 6.0  ;;  %10720 = vst [vmem:[#allocation17_spill] sm:$0xff] %v8995_v26  ;;  %v1705_v53 = vmul.f32 0.16666667, %v1669_v59  ;;  %v9010_v35 = vsub.f32 %v3001_v31, %v8995_v26 }
 0x29d   :  { %2597 = vmatpush.msra.mxu2 %v8876_v0  ;;  %v3331_v44 = vsub.f32 %v8957_v34, %v3330_v42  ;;  %3450 = vmatpush.msra.mxu0 %v3330_v42  ;;  %v1634_v42 = vmin.f32 %v1598_v37, 6.0  ;;  %v1563_v47 = vadd.f32 3.0, %v1490_v39 }
 0x29e   :  { %v2097_v11 = vpop.f32.mrf.mxu2  ;;  %v2142_v4 = vpop.f32.mrf.mxu3  ;;  %v8981_v28 = vsub.f32 %v2998_v16, %v8967_v9  ;;  %v2481_v16 = vsel %vm1975_vm1, %v8531_v54, 0  ;;  %v1658_v54 = vmul.f32 %v1622_v20, %v8941_v52  ;;  %10721 = vst [vmem:[#allocation18_spill] sm:$0xff] %v9010_v35  ;;  %v1957_v24 = vmul.f32 %v1864_v58, %v1705_v53 }
 0x29f   :  { %v2098_v14 = vadd.f32 %v2097_v11, %v8837_v50  ;;  %v3332_v13 = vand.u32 4294901760, %v3331_v44  ;;  %v10524_v50 = vand.u32 4294901760, %v8947_v41  ;;  %v8999_v8 = vand.u32 4294901760, %v2481_v16  ;;  %v9002_v11 = vpop.f32.mrf.mxu1 }
 0x2a0   :  { %v9007_v44 = vand.u32 4294901760, %v3252_v18  ;;  %v10522_v46 = vand.u32 4294901760, %v8981_v28  ;;  %v1599_v19 = vmax.f32 %v1563_v47, 0.0  ;;  %v3255_v37 = vsel %vm1975_vm1, %v1957_v24, 0 }
 0x2a1   :  { %v8978_v2 = vadd.f32 %v2136_v29, %v2098_v14  ;;  %v1854_v29 = vpop.permute.xlu1 %1853  ;;  %3333 = vmatpush.msrb.mxu1 %v3332_v13  ;;  %v1945_v14 = vmul.f32 %v8622_v40, %v1693_v62  ;;  %v9014_v13 = vpop.f32.mrf.mxu0  ;;  %v9023_v40 = vsub.f32 %v2481_v16, %v8999_v8 }
 0x2a2   :  { %v1955_v38 = vmul.f32 %v1854_v29, %v1703_v12  ;;  %v9027_v12 = vsub.f32 %v3252_v18, %v9007_v44  ;;  %v1635_v29 = vmin.f32 %v1599_v19, 6.0 }
 0x2a3   :  { %2432 = vmatmul.f32.gmra.mxu2 %v8684_v55  ;;  %2470 = vmatmul.f32.gmra.mxu3 %v8716_v49  ;;  %v10528_v62 = vand.u32 4294901760, %v9023_v40 }
 0x2a4   :  { %3119 = vmatmul.f32.gmra.mxu0 %v8981_v28  ;;  %3153 = vmatmul.f32.vlgmr.msra.gmra.mxu1 %v10524_v50  ;;  %v3004_v52 = vsel %vm1975_vm1, %v1955_v38, 0  ;;  %10722 = vst [vmem:[#allocation51_spill] sm:$0xff] %v9027_v12  ;;  %v10519_v53 = vand.u32 4294901760, %v9027_v12 }
 0x2a5   :  { %3484 = vmatpush.msra.mxu1 %v8944_v32  ;;  %v9029_v59 = vand.u32 4294901760, %v3004_v52 }
 0x2a6   :  { %v2102_v55 = vpop.f32.mrf.mxu2  ;;  %v2148_v21 = vpop.f32.mrf.mxu3 }
 0x2a7   :  { %v2103_v60 = vadd.f32 %v2102_v55, %v8860_v22  ;;  %v1670_v22 = vmul.f32 %v1634_v42, %v8951_v57  ;;  %v2484_v57 = vsel %vm1975_vm1, %v1945_v14, 0  ;;  %10723 = vst [vmem:[#allocation16_spill] sm:$0xff] %v9029_v59  ;;  %v9040_v42 = vand.u32 4294901760, %v3255_v37  ;;  %v9046_v58 = vpop.f32.mrf.mxu1 }
 0x2a8   :  { %v9035_v38 = vand.u32 4294901760, %v2484_v57  ;;  %v9043_v47 = vsub.f32 %v3004_v52, %v9029_v59  ;;  %v10733_v59 = vld [vmem:[#allocation31_spill] sm:$0xff] }
 0x2a9   :  { %v9004_v27 = vadd.f32 %v2142_v4, %v2103_v60  ;;  %v1694_v4 = vmul.f32 0.16666667, %v1658_v54  ;;  %v1706_v31 = vmul.f32 0.16666667, %v1670_v22  ;;  %v1869_v18 = vpop.permute.xlu1 %1868  ;;  %v10520_v60 = vand.u32 4294901760, %v9010_v35 }
 0x2aa   :  { %10724 = vst [vmem:[#allocation54_spill] sm:$0xff] %v9043_v47  ;;  %v9059_v14 = vsub.f32 %v2484_v57, %v9035_v38  ;;  %v3283_v22 = vsub.f32 %v9027_v12, %v10519_v53  ;;  %v9067_v19 = vsub.f32 %v3255_v37, %v9040_v42 }
 0x2ab   :  { %2436 = vmatmul.f32.gmra.mxu2 %v8716_v49  ;;  %2474 = vmatmul.f32.gmra.mxu3 %v8745_v3  ;;  %v1946_v16 = vmul.f32 %v8640_v33, %v1694_v4  ;;  %v1958_v54 = vmul.f32 %v1869_v18, %v1706_v31  ;;  %v2512_v33 = vsub.f32 %v9023_v40, %v10528_v62  ;;  %v10521_v18 = vand.u32 4294901760, %v9043_v47 }
 0x2ac   :  { %3124 = vmatmul.f32.gmra.mxu0 %v9010_v35  ;;  %3159 = vmatmul.f32.gmra.mxu1 %v10522_v46  ;;  %10725 = vst [vmem:[#allocation21_spill] sm:$0xff] %v9067_v19  ;;  %v10527_v31 = vand.u32 4294901760, %v9059_v14  ;;  %v3284_v53 = vand.u32 4294901760, %v3283_v22  ;;  %v10523_v37 = vand.u32 4294901760, %v9067_v19 }
 0x2ad   :  { %v3258_v52 = vsel %vm1975_vm1, %v1958_v54, 0  ;;  %v2513_v57 = vand.u32 4294901760, %v2512_v33  ;;  %v2490_v33 = vsel %vm1975_vm1, %v8571_v6, 0 }
 0x2ae   :  { %v2107_v48 = vpop.f32.mrf.mxu2  ;;  %v2154_v49 = vpop.f32.mrf.mxu3 }
 0x2af   :  { %v2108_v20 = vadd.f32 %v2107_v48, %v8902_v63  ;;  %v1671_v63 = vmul.f32 %v1635_v29, %v1490_v39 }
 0x2b1   :  { %v9037_v55 = vadd.f32 %v2148_v21, %v2108_v20  ;;  %v9056_v21 = vpop.f32.mrf.mxu0  ;;  %v1707_v4 = vmul.f32 0.16666667, %v1671_v63  ;;  %v1874_v20 = vpop.permute.xlu2 %1873  ;;  %v10726_v63 = vand.u32 4294901760, %v8876_v0 }
 0x2b3   :  { %2440 = vmatmul.f32.gmra.mxu2 %v8745_v3  ;;  %2564 = vmatmul.f32.vlgmr.msrb.gmra.mxu3 %v8999_v8  ;;  %v2487_v3 = vsel %vm1975_vm1, %v1946_v16, 0  ;;  %v9076_v16 = vand.u32 4294901760, %v3258_v52 }
 0x2b4   :  { %3129 = vmatmul.f32.gmra.mxu0 %v9043_v47  ;;  %3165 = vmatmul.f32.gmra.mxu1 %v10520_v60  ;;  %v1959_v60 = vmul.f32 %v1874_v20, %v1707_v4 }
 0x2b5   :  { %2713 = vmatpush.msrb.mxu3 %v8866_v43  ;;  %v9072_v43 = vand.u32 4294901760, %v2487_v3  ;;  %v9099_v4 = vsub.f32 %v3258_v52, %v9076_v16 }
 0x2b6   :  { %v2112_v39 = vpop.f32.mrf.mxu2  ;;  %v2212_v24 = vpop.f32.mrf.mxu3 }
 0x2b7   :  { %v2113_v48 = vadd.f32 %v2112_v39, %v8934_v45  ;;  %v9083_v45 = vpop.f32.mrf.mxu1  ;;  %v9089_v54 = vsub.f32 %v2487_v3, %v9072_v43  ;;  %10727 = vst [vmem:[#allocation53_spill] sm:$0xff] %v9099_v4 }
 0x2b9   :  { %v9074_v29 = vadd.f32 %v2154_v49, %v2113_v48  ;;  %v2520_v49 = vsub.f32 %v9059_v14, %v10527_v31  ;;  %v3261_v48 = vsel %vm1975_vm1, %v1959_v60, 0  ;;  %v10525_v20 = vand.u32 4294901760, %v9089_v54 }
 0x2bb   :  { %2514 = vmatmul.f32.vlgmr.msrb.gmra.mxu2 %v2513_v57  ;;  %2568 = vmatmul.f32.gmra.mxu3 %v9035_v38  ;;  %v9102_v57 = vpop.f32.mrf.mxu0  ;;  %v2521_v0 = vand.u32 4294901760, %v2520_v49 }
 0x2bc   :  { %3171 = vmatmul.f32.gmra.mxu1 %v10521_v18  ;;  %3285 = vmatmul.f32.vlgmr.msrb.gmra.mxu0 %v3284_v53  ;;  %v3291_v53 = vsub.f32 %v9067_v19, %v10523_v37  ;;  %v9110_v18 = vand.u32 4294901760, %v3261_v48  ;;  %v10526_v37 = vand.u32 4294901760, %v9099_v4 }
 0x2bd   :  { %2679 = vmatpush.msrb.mxu2 %v10726_v63  ;;  %v9106_v63 = vand.u32 4294901760, %v2490_v33 }
 0x2be   :  { %v2178_v39 = vpop.f32.mrf.mxu2  ;;  %v2216_v22 = vpop.f32.mrf.mxu3  ;;  %v3292_v46 = vand.u32 4294901760, %v3291_v53  ;;  %v3299_v49 = vsub.f32 %v9099_v4, %v10526_v37  ;;  %v10729_v53 = vld [vmem:[#allocation26_spill] sm:$0xff]  ;;  %v10730_v4 = vld [vmem:[#allocation29_spill] sm:$0xff] }
 0x2bf   :  { %v2179_v3 = vadd.f32 %v2178_v39, %v8978_v2  ;;  %v2528_v2 = vsub.f32 %v9089_v54, %v10525_v20  ;;  %v9119_v60 = vsub.f32 %v2490_v33, %v9106_v63  ;;  %v9125_v39 = vsub.f32 %v3261_v48, %v9110_v18 }
 0x2c0   :  { %v3300_v48 = vand.u32 4294901760, %v3299_v49  ;;  %v10731_v49 = vld [vmem:[#allocation28_spill] sm:$0xff] }
 0x2c1   :  { %v9108_v6 = vadd.f32 %v2212_v24, %v2179_v3  ;;  %10728 = vst [vmem:[#allocation19_spill] sm:$0xff] %v9125_v39  ;;  %v2529_v20 = vand.u32 4294901760, %v2528_v2  ;;  %v10535_v37 = vand.u32 4294901760, %v9119_v60  ;;  %v10544_v62 = vand.u32 4294901760, %v9125_v39 }
 0x2c3   :  { %2522 = vmatmul.f32.gmra.mxu2 %v2521_v0  ;;  %2572 = vmatmul.f32.gmra.mxu3 %v9072_v43  ;;  %v9134_v0 = vpop.f32.mrf.mxu1  ;;  %v9137_v50 = vpop.f32.mrf.mxu0 }
 0x2c4   :  { %3293 = vmatmul.f32.gmra.mxu0 %v3292_v46  ;;  %3335 = vmatmul.f32.vlgmr.msrb.gmra.mxu1 %v9007_v44  ;;  %v9130_v46 = vld [vmem:[%s10584_s27] ss:$0 sm:$0xff] }
 0x2c5   :  { %v441_v3 = vadd.f32 %v9130_v46, %v10729_v53  ;;  %v449_v53 = vadd.f32 %v9130_v46, %v10731_v49 }
 0x2c6   :  { %v2182_v24 = vpop.f32.mrf.mxu2  ;;  %v2220_v52 = vpop.f32.mrf.mxu3 }
 0x2c7   :  { %v2183_v33 = vadd.f32 %v2182_v24, %v9004_v27  ;;  %v686_v19 = vadd.f32 %v10730_v4, %v441_v3  ;;  %v2536_v27 = vsub.f32 %v9119_v60, %v10535_v37  ;;  %v10732_v37 = vld [vmem:[#allocation65_spill] sm:$0xff]  ;;  %v690_v35 = vadd.f32 %v10733_v59, %v449_v53  ;;  %v10740_v53 = vld [vmem:[#allocation34_spill] sm:$0xff] }
 0x2c8   :  { %v7489_v59 = vld [vmem:[%s10472_s4 + $0x30] sm:$0xff] }
 0x2c9   :  { %v9140_v31 = vadd.f32 %v2216_v22, %v2183_v33  ;;  %v3307_v22 = vsub.f32 %v9125_v39, %v10544_v62  ;;  %v888_v4 = vadd.f32 %v8513_v10, %v686_v19  ;;  %v2537_v33 = vand.u32 4294901760, %v2536_v27  ;;  %v10736_v27 = vld [vmem:[#allocation69_spill] sm:$0xff] }
 0x2ca   :  { %v10734_v62 = vand.u32 4294901760, %v9023_v40 }
 0x2cb   :  { %2530 = vmatmul.f32.gmra.mxu2 %v2529_v20  ;;  %2576 = vmatmul.f32.gmra.mxu3 %v9106_v63  ;;  %v9156_v3 = vpop.f32.mrf.mxu1  ;;  %v3308_v12 = vand.u32 4294901760, %v3307_v22  ;;  %v1118_v47 = vadd.f32 %v10732_v37, %v888_v4  ;;  %v9162_v26 = vpop.f32.mrf.mxu0  ;;  %v9177_v22 = vand.u32 4294901760, %v7489_v59  ;;  %v473_v4 = vadd.f32 %v9130_v46, %v10740_v53 }
 0x2cc   :  { %3301 = vmatmul.f32.gmra.mxu0 %v3300_v48  ;;  %3339 = vmatmul.f32.gmra.mxu1 %v9040_v42 }
 0x2cd   :  { %v1325_v10 = vadd.f32 %v8892_v25, %v1118_v47  ;;  %10737 = vst [vmem:[#allocation58_spill] sm:$0xff] %v9177_v22  ;;  %3663 = vmatpush.msrb.mxu1 %v9177_v22  ;;  %v10739_v47 = vld [vmem:[#allocation33_spill] sm:$0xff] }
 0x2ce   :  { %v2186_v2 = vpop.f32.mrf.mxu2  ;;  %v2224_v24 = vpop.f32.mrf.mxu3 }
 0x2cf   :  { %v2187_v20 = vadd.f32 %v2186_v2, %v9037_v55  ;;  %v10735_v55 = vld [vmem:[#allocation30_spill] sm:$0xff]  ;;  %v893_v2 = vadd.f32 %v10736_v27, %v690_v35  ;;  %v10746_v27 = vld [vmem:[#allocation37_spill] sm:$0xff] }
 0x2d0   :  { %v457_v19 = vadd.f32 %v9130_v46, %v10735_v55  ;;  %v10743_v55 = vld [vmem:[#allocation67_spill] sm:$0xff] }
 0x2d1   :  { %v9158_v48 = vadd.f32 %v2220_v52, %v2187_v20  ;;  %v10741_v20 = vld [vmem:[#allocation68_spill] sm:$0xff] }
 0x2d2   :  { %v694_v49 = vadd.f32 %v10739_v47, %v457_v19  ;;  %v1124_v35 = vadd.f32 %v10741_v20, %v893_v2  ;;  %v10744_v19 = vld [vmem:[#allocation32_spill] sm:$0xff]  ;;  %v702_v2 = vadd.f32 %v10746_v27, %v473_v4 }
 0x2d3   :  { %2538 = vmatmul.f32.gmra.mxu2 %v2537_v33  ;;  %2639 = vmatmul.f32.vlgmr.msra.gmra.mxu3 %v10734_v62  ;;  %v1494_v62 = vadd.f32 %v8923_v5, %v1325_v10  ;;  %v9189_v5 = vpop.f32.mrf.mxu1  ;;  %v9197_v10 = vpop.f32.mrf.mxu0 }
 0x2d4   :  { %3309 = vmatmul.f32.gmra.mxu0 %v3308_v12  ;;  %3343 = vmatmul.f32.gmra.mxu1 %v9076_v16 }
 0x2d5   :  { %2892 = vmatpush.msra.mxu3 %v8495_v51  ;;  %v9182_v51 = vsub.f32 %v7489_v59, %v9177_v22  ;;  %v1564_v33 = vadd.f32 3.0, %v1494_v62  ;;  %v10745_v59 = vld [vmem:[#allocation71_spill] sm:$0xff]  ;;  %v10749_v22 = vld [vmem:[#allocation36_spill] sm:$0xff] }
 0x2d6   :  { %v2190_v52 = vpop.f32.mrf.mxu2  ;;  %v2312_v37 = vpop.f32.mrf.mxu3 }
 0x2d7   :  { %v2191_v12 = vadd.f32 %v2190_v52, %v9074_v29  ;;  %10738 = vst [vmem:[#allocation20_spill] sm:$0xff] %v9182_v51  ;;  %v10742_v29 = vand.u32 4294901760, %v9059_v14  ;;  %3625 = vmatpush.msrb.mxu0 %v9182_v51  ;;  %v465_v52 = vadd.f32 %v9130_v46, %v10744_v19  ;;  %v1600_v53 = vmax.f32 %v1564_v33, 0.0  ;;  %v10748_v51 = vld [vmem:[#allocation35_spill] sm:$0xff] }
 0x2d8   :  { %v481_v19 = vadd.f32 %v9130_v46, %v10749_v22  ;;  %v10750_v33 = vand.u32 4294901760, %v9089_v54  ;;  %v10751_v22 = vld [vmem:[#allocation73_spill] sm:$0xff] }
 0x2d9   :  { %v9179_v25 = vadd.f32 %v2224_v24, %v2191_v12  ;;  %v1329_v24 = vadd.f32 %v8932_v30, %v1124_v35 }
 0x2db   :  { %2600 = vmatmul.f32.vlgmr.msra.gmra.mxu2 %v9023_v40  ;;  %2645 = vmatmul.f32.gmra.mxu3 %v10742_v29  ;;  %v898_v40 = vadd.f32 %v10745_v59, %v694_v49  ;;  %v1498_v20 = vadd.f32 %v8970_v23, %v1329_v24  ;;  %v10747_v29 = vld [vmem:[#allocation70_spill] sm:$0xff]  ;;  %v908_v49 = vadd.f32 %v8603_v17, %v702_v2  ;;  %v1636_v59 = vmin.f32 %v1600_v53, 6.0  ;;  %v10752_v17 = vld [vmem:[#allocation39_spill] sm:$0xff]  ;;  %v10753_v53 = vld [vmem:[#allocation72_spill] sm:$0xff] }
 0x2dc   :  { %3347 = vmatmul.f32.gmra.mxu1 %v9110_v18  ;;  %3452 = vmatmul.f32.vlgmr.msra.gmra.mxu0 %v9007_v44  ;;  %v706_v24 = vadd.f32 %v10752_v17, %v481_v19 }
 0x2dd   :  { %2854 = vmatpush.msra.mxu2 %v10743_v55  ;;  %v1130_v39 = vadd.f32 %v10747_v29, %v898_v40  ;;  %v698_v55 = vadd.f32 %v10748_v51, %v465_v52  ;;  %v1565_v4 = vadd.f32 3.0, %v1498_v20  ;;  %v1142_v51 = vadd.f32 %v10751_v22, %v908_v49 }
 0x2de   :  { %v2262_v12 = vpop.f32.mrf.mxu2  ;;  %v2316_v47 = vpop.f32.mrf.mxu3  ;;  %v1672_v27 = vmul.f32 %v1636_v59, %v1494_v62 }
 0x2df   :  { %v2263_v30 = vadd.f32 %v2262_v12, %v9108_v6  ;;  %v1333_v23 = vadd.f32 %v8976_v7, %v1130_v39  ;;  %v9220_v6 = vpop.f32.mrf.mxu1  ;;  %v1601_v2 = vmax.f32 %v1565_v4, 0.0  ;;  %v9226_v12 = vpop.f32.mrf.mxu0 }
 0x2e0   :  { %v1708_v62 = vmul.f32 0.16666667, %v1672_v27 }
 0x2e1   :  { %v9207_v35 = vadd.f32 %v2312_v37, %v2263_v30  ;;  %v903_v37 = vadd.f32 %v8569_v1, %v698_v55  ;;  %v1502_v52 = vadd.f32 %v9002_v11, %v1333_v23  ;;  %v913_v30 = vadd.f32 %v8626_v36, %v706_v24  ;;  %v10754_v11 = vld [vmem:[#allocation38_spill] sm:$0xff]  ;;  %v1879_v36 = vpop.permute.xlu0 %1878  ;;  %v10757_v24 = vld [vmem:[#allocation40_spill] sm:$0xff] }
 0x2e2   :  { %v489_v19 = vadd.f32 %v9130_v46, %v10754_v11  ;;  %v1637_v49 = vmin.f32 %v1601_v2, 6.0  ;;  %v1960_v22 = vmul.f32 %v1879_v36, %v1708_v62  ;;  %v10760_v36 = vld [vmem:[#allocation11_spill] sm:$0xff] }
 0x2e3   :  { %2605 = vmatmul.f32.gmra.mxu2 %v9059_v14  ;;  %2651 = vmatmul.f32.gmra.mxu3 %v10750_v33  ;;  %v1136_v1 = vadd.f32 %v10753_v53, %v903_v37  ;;  %v1566_v29 = vadd.f32 3.0, %v1502_v52  ;;  %v10756_v37 = vld [vmem:[#allocation41_spill] sm:$0xff] }
 0x2e4   :  { %3456 = vmatmul.f32.gmra.mxu0 %v9040_v42  ;;  %3486 = vmatmul.f32.vlgmr.msra.gmra.mxu1 %v9007_v44  ;;  %v1341_v44 = vadd.f32 %v9056_v21, %v1142_v51  ;;  %v1673_v51 = vmul.f32 %v1637_v49, %v1498_v20  ;;  %v3509_v20 = vsel %vm1975_vm1, %v1960_v22, 0  ;;  %v10759_v49 = vld [vmem:[#allocation9_spill] sm:$0xff] }
 0x2e5   :  { %v1337_v21 = vadd.f32 %v9014_v13, %v1136_v1 }
 0x2e6   :  { %v2270_v14 = vpop.f32.mrf.mxu2  ;;  %v2320_v40 = vpop.f32.mrf.mxu3  ;;  %v1510_v55 = vadd.f32 %v9083_v45, %v1341_v44  ;;  %v1602_v45 = vmax.f32 %v1566_v29, 0.0  ;;  %v1709_v53 = vmul.f32 0.16666667, %v1673_v51 }
 0x2e7   :  { %v2271_v7 = vadd.f32 %v2270_v14, %v9140_v31  ;;  %v10755_v31 = vand.u32 4294901760, %v9119_v60  ;;  %v1506_v59 = vadd.f32 %v9046_v58, %v1337_v21  ;;  %v9246_v17 = vpop.f32.mrf.mxu1 }
 0x2e8   :  { %v1568_v4 = vadd.f32 3.0, %v1510_v55  ;;  %v1638_v58 = vmin.f32 %v1602_v45, 6.0 }
 0x2e9   :  { %v9230_v39 = vadd.f32 %v2316_v47, %v2271_v7  ;;  %v1148_v47 = vadd.f32 %v8607_v15, %v913_v30  ;;  %v9252_v15 = vpop.f32.mrf.mxu0  ;;  %v1567_v2 = vadd.f32 3.0, %v1506_v59  ;;  %v9264_v30 = vand.u32 4294901760, %v3509_v20 }
 0x2ea   :  { %v1604_v7 = vmax.f32 %v1568_v4, 0.0  ;;  %v1674_v29 = vmul.f32 %v1638_v58, %v1502_v52  ;;  %v10762_v58 = vld [vmem:[#allocation15_spill] sm:$0xff] }
 0x2eb   :  { %2610 = vmatmul.f32.gmra.mxu2 %v9089_v54  ;;  %2657 = vmatmul.f32.gmra.mxu3 %v10755_v31  ;;  %v710_v54 = vadd.f32 %v10756_v37, %v489_v19  ;;  %v1345_v14 = vadd.f32 %v9102_v57, %v1148_v47  ;;  %v10758_v57 = vld [vmem:[#allocation43_spill] sm:$0xff]  ;;  %v9280_v37 = vsub.f32 %v3509_v20, %v9264_v30 }
 0x2ec   :  { %3460 = vmatmul.f32.gmra.mxu0 %v9076_v16  ;;  %3490 = vmatmul.f32.gmra.mxu1 %v9040_v42  ;;  %v497_v42 = vadd.f32 %v9130_v46, %v10757_v24  ;;  %v1640_v11 = vmin.f32 %v1604_v7, 6.0 }
 0x2ed   :  { %v918_v44 = vadd.f32 %v8648_v61, %v710_v54  ;;  %v1514_v1 = vadd.f32 %v9134_v0, %v1345_v14  ;;  %v1603_v61 = vmax.f32 %v1567_v2, 0.0  ;;  %v1710_v54 = vmul.f32 0.16666667, %v1674_v29  ;;  %v1889_v14 = vpop.permute.xlu2 %1888 }
 0x2ee   :  { %v2278_v33 = vpop.f32.mrf.mxu2  ;;  %v2324_v23 = vpop.f32.mrf.mxu3 }
 0x2ef   :  { %v2279_v13 = vadd.f32 %v2278_v33, %v9158_v48  ;;  %v714_v48 = vadd.f32 %v10758_v57, %v497_v42  ;;  %v1154_v0 = vadd.f32 %v10759_v49, %v918_v44  ;;  %v9273_v4 = vpop.f32.mrf.mxu1  ;;  %v1639_v22 = vmin.f32 %v1603_v61, 6.0  ;;  %v10761_v42 = vld [vmem:[#allocation8_spill] sm:$0xff] }
 0x2f1   :  { %v9254_v27 = vadd.f32 %v2320_v40, %v2279_v13  ;;  %v1884_v40 = vpop.permute.xlu1 %1883  ;;  %v923_v47 = vadd.f32 %v10760_v36, %v714_v48  ;;  %v1349_v45 = vadd.f32 %v9137_v50, %v1154_v0  ;;  %v9283_v24 = vpop.f32.mrf.mxu0  ;;  %v1675_v2 = vmul.f32 %v1639_v22, %v1506_v59 }
 0x2f2   :  { %v1961_v31 = vmul.f32 %v1884_v40, %v1709_v53 }
 0x2f3   :  { %2615 = vmatmul.f32.gmra.mxu2 %v9119_v60  ;;  %2715 = vmatmul.f32.vlgmr.msrb.gmra.mxu3 %v8999_v8  ;;  %v1569_v60 = vadd.f32 3.0, %v1514_v1  ;;  %v1518_v13 = vadd.f32 %v9156_v3, %v1349_v45  ;;  %v1711_v49 = vmul.f32 0.16666667, %v1675_v2 }
 0x2f4   :  { %3464 = vmatmul.f32.gmra.mxu0 %v9110_v18  ;;  %3494 = vmatmul.f32.gmra.mxu1 %v9076_v16  ;;  %v7490_v16 = vld [vmem:[%s10472_s4 + $0x38] sm:$0xff]  ;;  %v3512_v50 = vsel %vm1975_vm1, %v1961_v31, 0  ;;  %v10557_v31 = vand.u32 4294901760, %v9280_v37 }
 0x2f5   :  { %v9277_v33 = vand.u32 4294901760, %v7490_v16  ;;  %v1605_v51 = vmax.f32 %v1569_v60, 0.0  ;;  %v9297_v53 = vand.u32 4294901760, %v3512_v50 }
 0x2f6   :  { %v2286_v19 = vpop.f32.mrf.mxu2  ;;  %v2387_v62 = vpop.f32.mrf.mxu3 }
 0x2f7   :  { %v2287_v21 = vadd.f32 %v2286_v19, %v9179_v25  ;;  %v1676_v25 = vmul.f32 %v1640_v11, %v1510_v55  ;;  %v1160_v55 = vadd.f32 %v10761_v42, %v923_v47  ;;  %3793 = vmatpush.msra.mxu0 %v9277_v33  ;;  %v1641_v57 = vmin.f32 %v1605_v51, 6.0  ;;  %v1904_v42 = vpop.permute.xlu2 %1903 }
 0x2f8   :  { %v9305_v0 = vsub.f32 %v3512_v50, %v9297_v53 }
 0x2f9   :  { %v9275_v52 = vadd.f32 %v2324_v23, %v2287_v21  ;;  %v9289_v23 = vsub.f32 %v7490_v16, %v9277_v33  ;;  %v1712_v7 = vmul.f32 0.16666667, %v1676_v25  ;;  %v1899_v29 = vpop.permute.xlu1 %1898  ;;  %v1353_v61 = vadd.f32 %v9162_v26, %v1160_v55  ;;  %v9309_v16 = vpop.f32.mrf.mxu1 }
 0x2fa   :  { %v1677_v60 = vmul.f32 %v1641_v57, %v1514_v1  ;;  %v9317_v36 = vpop.f32.mrf.mxu0 }
 0x2fb   :  { %2681 = vmatmul.f32.vlgmr.msrb.gmra.mxu2 %v8999_v8  ;;  %2719 = vmatmul.f32.gmra.mxu3 %v9035_v38  ;;  %v3844_v3 = vand.u32 4294901760, %v9289_v23  ;;  %v1962_v8 = vmul.f32 %v1889_v14, %v1710_v54  ;;  %v1964_v59 = vmul.f32 %v1899_v29, %v1712_v7 }
 0x2fc   :  { %3498 = vmatmul.f32.gmra.mxu1 %v9110_v18  ;;  %3628 = vmatmul.f32.vlgmr.msrb.gmra.mxu0 %v9280_v37  ;;  %v1570_v18 = vadd.f32 3.0, %v1518_v13 }
 0x2fd   :  { %3022 = vmatpush.msrb.mxu2 %v10762_v58  ;;  %v3845_v40 = vsub.f32 %v9289_v23, %v3844_v3  ;;  %3964 = vmatpush.msrb.mxu0 %v3844_v3  ;;  %v3515_v26 = vsel %vm1975_vm1, %v1962_v8, 0  ;;  %v10556_v3 = vand.u32 4294901760, %v9305_v0 }
 0x2fe   :  { %v2348_v44 = vpop.f32.mrf.mxu2  ;;  %v2393_v20 = vpop.f32.mrf.mxu3  ;;  %v1606_v21 = vmax.f32 %v1570_v18, 0.0  ;;  %v9320_v54 = vand.u32 4294901760, %v3515_v26 }
 0x2ff   :  { %v2349_v48 = vadd.f32 %v2348_v44, %v9207_v35  ;;  %v3846_v19 = vand.u32 4294901760, %v3845_v40  ;;  %v1522_v35 = vadd.f32 %v9189_v5, %v1353_v61  ;;  %v3766_v5 = vsel %vm1975_vm1, %v1964_v59, 0 }
 0x300   :  { %v1642_v22 = vmin.f32 %v1606_v21, 6.0  ;;  %v9326_v55 = vand.u32 4294901760, %v3766_v5  ;;  %v9329_v14 = vsub.f32 %v3515_v26, %v9320_v54 }
 0x301   :  { %v9302_v11 = vadd.f32 %v2387_v62, %v2349_v48  ;;  %v1894_v62 = vpop.permute.xlu0 %1893  ;;  %3847 = vmatpush.msra.mxu1 %v3846_v19  ;;  %v1571_v25 = vadd.f32 3.0, %v1522_v35  ;;  %v9339_v57 = vpop.f32.mrf.mxu1 }
 0x302   :  { %v1963_v1 = vmul.f32 %v1894_v62, %v1711_v49  ;;  %v1678_v2 = vmul.f32 %v1642_v22, %v1518_v13  ;;  %v9342_v18 = vsub.f32 %v3766_v5, %v9326_v55  ;;  %v9348_v49 = vpop.f32.mrf.mxu0 }
 0x303   :  { %2685 = vmatmul.f32.gmra.mxu2 %v9035_v38  ;;  %2723 = vmatmul.f32.gmra.mxu3 %v9072_v43  ;;  %v1713_v38 = vmul.f32 0.16666667, %v1677_v60  ;;  %v1607_v7 = vmax.f32 %v1571_v25, 0.0  ;;  %v10765_v25 = vld [vmem:[#allocation3_spill] sm:$0xff] }
 0x304   :  { %3633 = vmatmul.f32.gmra.mxu0 %v9305_v0  ;;  %3667 = vmatmul.f32.vlgmr.msrb.gmra.mxu1 %v10557_v31  ;;  %v3518_v44 = vsel %vm1975_vm1, %v1963_v1, 0  ;;  %10764 = vst [vmem:[#allocation56_spill] sm:$0xff] %v9342_v18  ;;  %v1714_v61 = vmul.f32 0.16666667, %v1678_v2  ;;  %v10552_v62 = vand.u32 4294901760, %v9342_v18 }
 0x305   :  { %3998 = vmatpush.msrb.mxu1 %v9277_v33  ;;  %v1965_v8 = vmul.f32 %v1904_v42, %v1713_v38  ;;  %v9344_v40 = vand.u32 4294901760, %v3518_v44  ;;  %v1643_v19 = vmin.f32 %v1607_v7, 6.0 }
 0x306   :  { %v2353_v47 = vpop.f32.mrf.mxu2  ;;  %v2399_v45 = vpop.f32.mrf.mxu3  ;;  %v3797_v42 = vsub.f32 %v9342_v18, %v10552_v62 }
 0x307   :  { %v2354_v51 = vadd.f32 %v2353_v47, %v9230_v39  ;;  %v10763_v39 = vld [vmem:[#allocation52_spill] sm:$0xff]  ;;  %v3769_v29 = vsel %vm1975_vm1, %v1965_v8, 0  ;;  %v9357_v5 = vsub.f32 %v3518_v44, %v9344_v40  ;;  %v10555_v47 = vand.u32 4294901760, %v9329_v14 }
 0x308   :  { %v9354_v1 = vand.u32 4294901760, %v3769_v29  ;;  %v1679_v22 = vmul.f32 %v1643_v19, %v1522_v35 }
 0x309   :  { %v9324_v50 = vadd.f32 %v2393_v20, %v2354_v51  ;;  %v3073_v20 = vand.u32 4294901760, %v10763_v39  ;;  %v1909_v26 = vpop.permute.xlu0 %1908  ;;  %v9374_v2 = vpop.f32.mrf.mxu1 }
 0x30a   :  { %v1966_v38 = vmul.f32 %v1909_v26, %v1714_v61  ;;  %v9371_v35 = vsub.f32 %v3769_v29, %v9354_v1  ;;  %v1715_v8 = vmul.f32 0.16666667, %v1679_v22  ;;  %v9377_v44 = vpop.f32.mrf.mxu0  ;;  %v3798_v61 = vand.u32 4294901760, %v3797_v42 }
 0x30b   :  { %2689 = vmatmul.f32.gmra.mxu2 %v9072_v43  ;;  %2727 = vmatmul.f32.gmra.mxu3 %v9106_v63  ;;  %v3074_v43 = vsub.f32 %v10763_v39, %v3073_v20 }
 0x30c   :  { %3638 = vmatmul.f32.gmra.mxu0 %v9329_v14  ;;  %3673 = vmatmul.f32.gmra.mxu1 %v10556_v3  ;;  %10767 = vst [vmem:[#allocation57_spill] sm:$0xff] %v9371_v35  ;;  %v10551_v29 = vand.u32 4294901760, %v9371_v35  ;;  %v10781_v3 = vld [vmem:[#allocation47_spill] sm:$0xff] }
 0x30d   :  { %v3075_v60 = vand.u32 4294901760, %v3074_v43  ;;  %v10553_v43 = vand.u32 4294901760, %v9357_v5 }
 0x30e   :  { %v2358_v13 = vpop.f32.mrf.mxu2  ;;  %v2405_v48 = vpop.f32.mrf.mxu3  ;;  %v3805_v26 = vsub.f32 %v9371_v35, %v10551_v29  ;;  %v10793_v35 = vld [vmem:[#allocation17_spill] sm:$0xff] }
 0x30f   :  { %v2359_v59 = vadd.f32 %v2358_v13, %v9254_v27  ;;  %3076 = vmatpush.msrb.mxu3 %v3075_v60  ;;  %v10766_v27 = vand.u32 4294901760, %v10765_v25 }
 0x311   :  { %v9351_v21 = vadd.f32 %v2399_v45, %v2359_v59  ;;  %v10768_v59 = vld [vmem:[#allocation13_spill] sm:$0xff] }
 0x312   :  { %v10769_v60 = vand.u32 4294901760, %v10768_v59 }
 0x313   :  { %2693 = vmatmul.f32.gmra.mxu2 %v9106_v63  ;;  %2896 = vmatmul.f32.vlgmr.msra.gmra.mxu3 %v10766_v27  ;;  %v3772_v63 = vsel %vm1975_vm1, %v1966_v38, 0  ;;  %v9398_v27 = vpop.f32.mrf.mxu1 }
 0x314   :  { %3643 = vmatmul.f32.gmra.mxu0 %v9357_v5  ;;  %3679 = vmatmul.f32.gmra.mxu1 %v10555_v47  ;;  %v9381_v13 = vand.u32 4294901760, %v3772_v63 }
 0x315   :  { %3227 = vmatpush.msra.mxu3 %v10762_v58  ;;  %v1914_v58 = vpop.permute.xlu1 %1913 }
 0x316   :  { %v2363_v45 = vpop.f32.mrf.mxu2  ;;  %v2463_v51 = vpop.f32.mrf.mxu3  ;;  %v1967_v19 = vmul.f32 %v1914_v58, %v1715_v8  ;;  %v9394_v38 = vsub.f32 %v3772_v63, %v9381_v13  ;;  %v10771_v58 = vld [vmem:[#allocation74_spill] sm:$0xff] }
 0x317   :  { %v2364_v7 = vadd.f32 %v2363_v45, %v9275_v52  ;;  %v10772_v63 = vand.u32 4294901760, %v10771_v58 }
 0x318   :  { %10770 = vst [vmem:[#allocation23_spill] sm:$0xff] %v9394_v38  ;;  %v3775_v22 = vsel %vm1975_vm1, %v1967_v19, 0  ;;  %v10554_v8 = vand.u32 4294901760, %v9394_v38 }
 0x319   :  { %v9379_v39 = vadd.f32 %v2405_v48, %v2364_v7  ;;  %v9402_v42 = vand.u32 4294901760, %v3775_v22  ;;  %v9405_v7 = vpop.f32.mrf.mxu0 }
 0x31b   :  { %2857 = vmatmul.f32.vlgmr.msra.gmra.mxu2 %v10765_v25  ;;  %2902 = vmatmul.f32.gmra.mxu3 %v10769_v60  ;;  %v3813_v60 = vsub.f32 %v9394_v38, %v10554_v8  ;;  %v9424_v62 = vpop.f32.mrf.mxu1 }
 0x31c   :  { %3685 = vmatmul.f32.gmra.mxu1 %v10553_v43  ;;  %3799 = vmatmul.f32.vlgmr.msra.gmra.mxu0 %v3798_v61 }
 0x31d   :  { %3193 = vmatpush.msra.mxu2 %v3073_v20  ;;  %v3806_v20 = vand.u32 4294901760, %v3805_v26 }
 0x31e   :  { %v2429_v52 = vpop.f32.mrf.mxu2  ;;  %v2467_v48 = vpop.f32.mrf.mxu3 }
 0x31f   :  { %v2430_v25 = vadd.f32 %v2429_v52, %v9302_v11  ;;  %v10773_v11 = vld [vmem:[#allocation42_spill] sm:$0xff]  ;;  %v9417_v52 = vsub.f32 %v3775_v22, %v9402_v42 }
 0x320   :  { %v505_v61 = vadd.f32 %v9130_v46, %v10773_v11  ;;  %v10776_v11 = vld [vmem:[#allocation77_spill] sm:$0xff] }
 0x321   :  { %v9400_v45 = vadd.f32 %v2463_v51, %v2430_v25  ;;  %10774 = vst [vmem:[#allocation22_spill] sm:$0xff] %v9417_v52  ;;  %v10775_v25 = vld [vmem:[#allocation45_spill] sm:$0xff]  ;;  %v10558_v29 = vand.u32 4294901760, %v9417_v52  ;;  %v10777_v43 = vand.u32 4294901760, %v10776_v11  ;;  %v9430_v22 = vpop.f32.mrf.mxu0 }
 0x323   :  { %2862 = vmatmul.f32.gmra.mxu2 %v10768_v59  ;;  %2908 = vmatmul.f32.gmra.mxu3 %v10772_v63  ;;  %v3814_v63 = vand.u32 4294901760, %v3813_v60  ;;  %v10779_v60 = vld [vmem:[#allocation44_spill] sm:$0xff] }
 0x324   :  { %3807 = vmatmul.f32.gmra.mxu0 %v3806_v20  ;;  %3849 = vmatmul.f32.vlgmr.msra.gmra.mxu1 %v9326_v55  ;;  %v718_v20 = vadd.f32 %v10775_v25, %v505_v61  ;;  %v3821_v61 = vsub.f32 %v9417_v52, %v10558_v29  ;;  %v513_v25 = vadd.f32 %v9130_v46, %v10779_v60 }
 0x326   :  { %v2433_v51 = vpop.f32.mrf.mxu2  ;;  %v2471_v19 = vpop.f32.mrf.mxu3  ;;  %v3822_v47 = vand.u32 4294901760, %v3821_v61  ;;  %v722_v31 = vadd.f32 %v10781_v3, %v513_v25  ;;  %v10784_v61 = vld [vmem:[#allocation75_spill] sm:$0xff] }
 0x327   :  { %v2434_v59 = vadd.f32 %v2433_v51, %v9324_v50  ;;  %v10778_v50 = vld [vmem:[#allocation4_spill] sm:$0xff] }
 0x328   :  { %v933_v60 = vadd.f32 %v10784_v61, %v722_v31 }
 0x329   :  { %v9420_v26 = vadd.f32 %v2467_v48, %v2434_v59  ;;  %v928_v48 = vadd.f32 %v10778_v50, %v718_v20  ;;  %v9447_v50 = vpop.f32.mrf.mxu1  ;;  %v9460_v25 = vpop.f32.mrf.mxu0 }
 0x32b   :  { %2867 = vmatmul.f32.gmra.mxu2 %v10771_v58  ;;  %2914 = vmatmul.f32.gmra.mxu3 %v10777_v43  ;;  %v10780_v43 = vld [vmem:[#allocation10_spill] sm:$0xff] }
 0x32c   :  { %3815 = vmatmul.f32.gmra.mxu0 %v3814_v63  ;;  %3853 = vmatmul.f32.gmra.mxu1 %v9354_v1  ;;  %v1166_v63 = vadd.f32 %v10780_v43, %v928_v48 }
 0x32e   :  { %v2437_v51 = vpop.f32.mrf.mxu2  ;;  %v2475_v59 = vpop.f32.mrf.mxu3  ;;  %v1357_v20 = vadd.f32 %v9197_v10, %v1166_v63  ;;  %v10783_v10 = vld [vmem:[#allocation46_spill] sm:$0xff] }
 0x32f   :  { %v2438_v58 = vadd.f32 %v2437_v51, %v9351_v21  ;;  %v10782_v21 = vand.u32 4294901760, %v8947_v41 }
 0x330   :  { %v1526_v48 = vadd.f32 %v9220_v6, %v1357_v20  ;;  %v10786_v20 = vld [vmem:[#allocation5_spill] sm:$0xff] }
 0x331   :  { %v9439_v8 = vadd.f32 %v2471_v19, %v2438_v58  ;;  %v3026_v19 = vsub.f32 %v8947_v41, %v10782_v21  ;;  %v1172_v21 = vadd.f32 %v10786_v20, %v933_v60  ;;  %v10790_v60 = vld [vmem:[#allocation12_spill] sm:$0xff]  ;;  %v9486_v20 = vpop.f32.mrf.mxu1 }
 0x332   :  { %v1572_v63 = vadd.f32 3.0, %v1526_v48 }
 0x333   :  { %2872 = vmatmul.f32.gmra.mxu2 %v10776_v11  ;;  %3078 = vmatmul.f32.vlgmr.msrb.gmra.mxu3 %v8926_v56  ;;  %v7491_v11 = vld [vmem:[%s10472_s4 + $0x40] sm:$0xff]  ;;  %v3027_v6 = vand.u32 4294901760, %v3026_v19  ;;  %v1361_v31 = vadd.f32 %v9226_v12, %v1172_v21  ;;  %v9490_v21 = vpop.f32.mrf.mxu0  ;;  %s7552_s4 = smov 88  }
 0x334   :  { %3823 = vmatmul.f32.gmra.mxu0 %v3822_v47  ;;  %3857 = vmatmul.f32.gmra.mxu1 %v9381_v13  ;;  %v521_v47 = vadd.f32 %v9130_v46, %v10783_v10  ;;  %v9463_v41 = vand.u32 4294901760, %v7491_v11  ;;  %v10787_v10 = vld [vmem:[#allocation49_spill] sm:$0xff]  ;;  %v1608_v19 = vmax.f32 %v1572_v63, 0.0  ;;  %v10792_v63 = vld [vmem:[#allocation50_spill] sm:$0xff] }
 0x335   :  { %3406 = vmatpush.msrb.mxu3 %v8944_v32 }
 0x336   :  { %v2441_v3 = vpop.f32.mrf.mxu2  ;;  %v2565_v51 = vpop.f32.mrf.mxu3  ;;  %v9468_v43 = vsub.f32 %v7491_v11, %v9463_v41  ;;  %4177 = vmatpush.msra.mxu1 %v9463_v41  ;;  %v726_v29 = vadd.f32 %v10787_v10, %v521_v47  ;;  %v10789_v47 = vld [vmem:[#allocation48_spill] sm:$0xff]  ;;  %v1644_v10 = vmin.f32 %v1608_v19, 6.0 }
 0x337   :  { %v2442_v58 = vadd.f32 %v2441_v3, %v9379_v39  ;;  %v10788_v39 = vand.u32 4294901760, %v8981_v28  ;;  %v529_v61 = vadd.f32 %v9130_v46, %v10789_v47 }
 0x338   :  { %10785 = vst [vmem:[#allocation55_spill] sm:$0xff] %v9468_v43  ;;  %4139 = vmatpush.msra.mxu0 %v9468_v43 }
 0x339   :  { %v9465_v32 = vadd.f32 %v2475_v59, %v2442_v58  ;;  %v3034_v59 = vsub.f32 %v8981_v28, %v10788_v39  ;;  %v938_v58 = vadd.f32 %v10790_v60, %v726_v29  ;;  %v10791_v39 = vld [vmem:[#allocation76_spill] sm:$0xff]  ;;  %v730_v52 = vadd.f32 %v10792_v63, %v529_v61  ;;  %v10797_v63 = vld [vmem:[#allocation78_spill] sm:$0xff] }
 0x33b   :  { %3028 = vmatmul.f32.vlgmr.msrb.gmra.mxu2 %v3027_v6  ;;  %3082 = vmatmul.f32.gmra.mxu3 %v8967_v9  ;;  %v1530_v6 = vadd.f32 %v9246_v17, %v1361_v31  ;;  %v3035_v28 = vand.u32 4294901760, %v3034_v59  ;;  %v10794_v17 = vld [vmem:[#allocation18_spill] sm:$0xff]  ;;  %v1680_v31 = vmul.f32 %v1644_v10, %v1526_v48  ;;  %v9508_v43 = vpop.f32.mrf.mxu0  ;;  %v10798_v48 = vld [vmem:[#allocation16_spill] sm:$0xff] }
 0x33c   :  { %3861 = vmatmul.f32.gmra.mxu1 %v9402_v42  ;;  %3966 = vmatmul.f32.vlgmr.msrb.gmra.mxu0 %v9326_v55  ;;  %v10795_v29 = vand.u32 4294901760, %v10794_v17 }
 0x33d   :  { %3368 = vmatpush.msrb.mxu2 %v8957_v34  ;;  %v1178_v34 = vadd.f32 %v10791_v39, %v938_v58  ;;  %v1573_v38 = vadd.f32 3.0, %v1530_v6 }
 0x33e   :  { %v2515_v3 = vpop.f32.mrf.mxu2  ;;  %v2569_v11 = vpop.f32.mrf.mxu3 }
 0x33f   :  { %v9488_v12 = vadd.f32 %v2565_v51, %v2515_v3  ;;  %v1365_v46 = vadd.f32 %v9252_v15, %v1178_v34  ;;  %v3042_v51 = vsub.f32 %v10794_v17, %v10795_v29  ;;  %v10796_v3 = vld [vmem:[#allocation14_spill] sm:$0xff]  ;;  %v1609_v61 = vmax.f32 %v1573_v38, 0.0 }
 0x340   :  { %v943_v47 = vadd.f32 %v10796_v3, %v730_v52  ;;  %v10799_v52 = vld [vmem:[#allocation54_spill] sm:$0xff] }
 0x341   :  { %v1534_v60 = vadd.f32 %v9273_v4, %v1365_v46  ;;  %v3043_v39 = vand.u32 4294901760, %v3042_v51  ;;  %v1645_v34 = vmin.f32 %v1609_v61, 6.0  ;;  %v1919_v4 = vpop.permute.xlu2 %1918 }
 0x342   :  { %v1184_v15 = vadd.f32 %v10797_v63, %v943_v47 }
 0x343   :  { %3036 = vmatmul.f32.gmra.mxu2 %v3035_v28  ;;  %3086 = vmatmul.f32.gmra.mxu3 %v10793_v35  ;;  %v9505_v28 = vpop.f32.mrf.mxu1  ;;  %v1574_v18 = vadd.f32 3.0, %v1534_v60  ;;  %v1681_v51 = vmul.f32 %v1645_v34, %v1530_v6  ;;  %v9526_v6 = vpop.f32.mrf.mxu0 }
 0x344   :  { %3970 = vmatmul.f32.gmra.mxu0 %v9354_v1  ;;  %4000 = vmatmul.f32.vlgmr.msrb.gmra.mxu1 %v9326_v55  ;;  %v1716_v55 = vmul.f32 0.16666667, %v1680_v31  ;;  %v1369_v38 = vadd.f32 %v9283_v24, %v1184_v15 }
 0x345   :  { %v1610_v31 = vmax.f32 %v1574_v18, 0.0  ;;  %v1924_v18 = vpop.permute.xlu0 %1923 }
 0x346   :  { %v2523_v59 = vpop.f32.mrf.mxu2  ;;  %v2573_v19 = vpop.f32.mrf.mxu3  ;;  %v1968_v46 = vmul.f32 %v1919_v4, %v1716_v55 }
 0x347   :  { %v9503_v58 = vadd.f32 %v2569_v11, %v2523_v59  ;;  %v10800_v11 = vand.u32 4294901760, %v10799_v52  ;;  %v1538_v59 = vadd.f32 %v9309_v16, %v1369_v38 }
 0x348   :  { %v4023_v61 = vsel %vm1975_vm1, %v1968_v46, 0  ;;  %v1929_v46 = vpop.permute.xlu1 %1928 }
 0x349   :  { %v3050_v10 = vsub.f32 %v10799_v52, %v10800_v11  ;;  %v1575_v63 = vadd.f32 3.0, %v1538_v59  ;;  %v9528_v16 = vand.u32 4294901760, %v4023_v61 }
 0x34b   :  { %3044 = vmatmul.f32.gmra.mxu2 %v3043_v39  ;;  %3090 = vmatmul.f32.gmra.mxu3 %v10798_v48  ;;  %v3051_v47 = vand.u32 4294901760, %v3050_v10  ;;  %v1646_v39 = vmin.f32 %v1610_v31, 6.0  ;;  %v9521_v24 = vpop.f32.mrf.mxu1  ;;  %v1611_v4 = vmax.f32 %v1575_v63, 0.0  ;;  %v9533_v52 = vsub.f32 %v4023_v61, %v9528_v16 }
 0x34c   :  { %3974 = vmatmul.f32.gmra.mxu0 %v9381_v13  ;;  %4004 = vmatmul.f32.gmra.mxu1 %v9354_v1  ;;  %v1717_v1 = vmul.f32 0.16666667, %v1681_v51 }
 0x34d   :  { %v1682_v34 = vmul.f32 %v1646_v39, %v1534_v60  ;;  %v1647_v10 = vmin.f32 %v1611_v4, 6.0  ;;  %v10570_v63 = vand.u32 4294901760, %v9533_v52 }
 0x34e   :  { %v2531_v17 = vpop.f32.mrf.mxu2  ;;  %v2577_v29 = vpop.f32.mrf.mxu3  ;;  %v1969_v15 = vmul.f32 %v1924_v18, %v1717_v1 }
 0x34f   :  { %v9518_v3 = vadd.f32 %v2573_v19, %v2531_v17  ;;  %v1718_v11 = vmul.f32 0.16666667, %v1682_v34  ;;  %v10801_v17 = vld [vmem:[#allocation58_spill] sm:$0xff]  ;;  %v1683_v61 = vmul.f32 %v1647_v10, %v1538_v59  ;;  %v9546_v1 = vpop.f32.mrf.mxu0 }
 0x351   :  { %v1719_v18 = vmul.f32 0.16666667, %v1683_v61 }
 0x353   :  { %3052 = vmatmul.f32.gmra.mxu2 %v3051_v47  ;;  %3229 = vmatmul.f32.vlgmr.msra.gmra.mxu3 %v8926_v56  ;;  %v9540_v60 = vpop.f32.mrf.mxu1  ;;  %v1970_v47 = vmul.f32 %v1929_v46, %v1718_v11 }
 0x354   :  { %3978 = vmatmul.f32.gmra.mxu0 %v9402_v42  ;;  %4008 = vmatmul.f32.gmra.mxu1 %v9381_v13  ;;  %v4026_v13 = vsel %vm1975_vm1, %v1969_v15, 0 }
 0x355   :  { %v9543_v31 = vand.u32 4294901760, %v4026_v13 }
 0x356   :  { %v2539_v19 = vpop.f32.mrf.mxu2  ;;  %v2640_v55 = vpop.f32.mrf.mxu3 }
 0x357   :  { %v9530_v38 = vadd.f32 %v2577_v29, %v2539_v19  ;;  %v4029_v19 = vsel %vm1975_vm1, %v1970_v47, 0  ;;  %v9563_v10 = vpop.f32.mrf.mxu0 }
 0x358   :  { %v9558_v15 = vand.u32 4294901760, %v4029_v19 }
 0x35a   :  { %10802 = vst [vmem:[#allocation60_spill] sm:$0xff] %v9558_v15 }
 0x35b   :  { %3195 = vmatmul.f32.vlgmr.msra.gmra.mxu2 %v8926_v56  ;;  %3233 = vmatmul.f32.gmra.mxu3 %v8967_v9  ;;  %v9561_v11 = vpop.f32.mrf.mxu1 }
 0x35c   :  { %4012 = vmatmul.f32.gmra.mxu1 %v9402_v42  ;;  %4142 = vmatmul.f32.vlgmr.msra.gmra.mxu0 %v9533_v52  ;;  %v9549_v42 = vsub.f32 %v4026_v13, %v9543_v31  ;;  %v9566_v13 = vsub.f32 %v4029_v19, %v9558_v15 }
 0x35d   :  { %3536 = vmatpush.msra.mxu2 %v10801_v17 }
 0x35e   :  { %v2601_v29 = vpop.f32.mrf.mxu2  ;;  %v2646_v51 = vpop.f32.mrf.mxu3  ;;  %10803 = vst [vmem:[#allocation25_spill] sm:$0xff] %v9566_v13  ;;  %v10569_v46 = vand.u32 4294901760, %v9549_v42 }
 0x35f   :  { %v2602_v56 = vadd.f32 %v2601_v29, %v9488_v12  ;;  %v1934_v12 = vpop.permute.xlu2 %1933  ;;  %v9589_v15 = vpop.f32.mrf.mxu0 }
 0x360   :  { %v1971_v34 = vmul.f32 %v1934_v12, %v1719_v18 }
 0x361   :  { %v2641_v39 = vadd.f32 %v2640_v55, %v2602_v56 }
 0x362   :  { %v4032_v29 = vsel %vm1975_vm1, %v1971_v34, 0 }
 0x363   :  { %3199 = vmatmul.f32.gmra.mxu2 %v8967_v9  ;;  %3237 = vmatmul.f32.gmra.mxu3 %v10793_v35  ;;  %v9576_v56 = vand.u32 4294901760, %v4032_v29 }
 0x364   :  { %4147 = vmatmul.f32.gmra.mxu0 %v9549_v42  ;;  %4181 = vmatmul.f32.vlgmr.msra.gmra.mxu1 %v10570_v63 }
 0x365   :  { %10805 = vst [vmem:[#allocation6_spill] sm:$0xff] %v9576_v56  ;;  %v9583_v34 = vsub.f32 %v4032_v29, %v9576_v56 }
 0x366   :  { %v2606_v59 = vpop.f32.mrf.mxu2  ;;  %v2652_v55 = vpop.f32.mrf.mxu3 }
 0x367   :  { %v2607_v4 = vadd.f32 %v2606_v59, %v9503_v58  ;;  %v10804_v58 = vld [vmem:[#allocation20_spill] sm:$0xff]  ;;  %v9580_v59 = vpop.f32.mrf.mxu1 }
 0x369   :  { %v2647_v9 = vadd.f32 %v2646_v51, %v2607_v4  ;;  %v3587_v51 = vand.u32 4294901760, %v10804_v58  ;;  %v10573_v4 = vand.u32 4294901760, %v9566_v13 }
 0x36b   :  { %3203 = vmatmul.f32.gmra.mxu2 %v10793_v35  ;;  %3241 = vmatmul.f32.gmra.mxu3 %v10798_v48  ;;  %v3588_v18 = vsub.f32 %v10804_v58, %v3587_v51 }
 0x36c   :  { %4152 = vmatmul.f32.gmra.mxu0 %v9566_v13  ;;  %4187 = vmatmul.f32.gmra.mxu1 %v10569_v46  ;;  %v10806_v46 = vld [vmem:[#allocation51_spill] sm:$0xff] }
 0x36d   :  { %v3589_v35 = vand.u32 4294901760, %v3588_v18  ;;  %v10807_v63 = vand.u32 4294901760, %v10806_v46 }
 0x36e   :  { %v2611_v47 = vpop.f32.mrf.mxu2  ;;  %v2658_v61 = vpop.f32.mrf.mxu3 }
 0x36f   :  { %v2612_v19 = vadd.f32 %v2611_v47, %v9518_v3  ;;  %3590 = vmatpush.msra.mxu3 %v3589_v35  ;;  %v10578_v47 = vand.u32 4294901760, %v9583_v34  ;;  %v9600_v18 = vpop.f32.mrf.mxu1 }
 0x371   :  { %v2653_v12 = vadd.f32 %v2652_v55, %v2612_v19 }
 0x373   :  { %3207 = vmatmul.f32.gmra.mxu2 %v10798_v48  ;;  %3410 = vmatmul.f32.vlgmr.msrb.gmra.mxu3 %v10807_v63  ;;  %v10808_v48 = vld [vmem:[#allocation21_spill] sm:$0xff] }
 0x374   :  { %4157 = vmatmul.f32.gmra.mxu0 %v9583_v34  ;;  %4193 = vmatmul.f32.gmra.mxu1 %v10573_v4  ;;  %v10809_v63 = vand.u32 4294901760, %v10808_v48 }
 0x375   :  { %3741 = vmatpush.msrb.mxu3 %v10801_v17 }
 0x376   :  { %v2616_v3 = vpop.f32.mrf.mxu2  ;;  %v2716_v55 = vpop.f32.mrf.mxu3 }
 0x377   :  { %v2617_v29 = vadd.f32 %v2616_v3, %v9530_v38 }
 0x379   :  { %v2659_v58 = vadd.f32 %v2658_v61, %v2617_v29  ;;  %v10810_v61 = vld [vmem:[#allocation53_spill] sm:$0xff] }
 0x37a   :  { %v10811_v3 = vand.u32 4294901760, %v10810_v61 }
 0x37b   :  { %3371 = vmatmul.f32.vlgmr.msrb.gmra.mxu2 %v10806_v46  ;;  %3416 = vmatmul.f32.gmra.mxu3 %v10809_v63 }
 0x37c   :  { %4199 = vmatmul.f32.gmra.mxu1 %v10578_v47  ;;  %3707 = vmatpush.msrb.mxu2 %v3587_v51  ;;  %v10812_v51 = vld [vmem:[#allocation19_spill] sm:$0xff] }
 0x37d   :  { %v10813_v47 = vand.u32 4294901760, %v10812_v51 }
 0x37e   :  { %v2682_v19 = vpop.f32.mrf.mxu2  ;;  %v2720_v17 = vpop.f32.mrf.mxu3 }
 0x37f   :  { %v2683_v35 = vadd.f32 %v2682_v19, %v2641_v39 }
 0x381   :  { %v2717_v4 = vadd.f32 %v2716_v55, %v2683_v35 }
 0x383   :  { %v2731_v38 = vadd.f32 %v2717_v4, %v9400_v45  ;;  %3376 = vmatmul.f32.gmra.mxu2 %v10808_v48  ;;  %3422 = vmatmul.f32.gmra.mxu3 %v10811_v3 }
 0x386   :  { %v2686_v46 = vpop.f32.mrf.mxu2  ;;  %v2724_v29 = vpop.f32.mrf.mxu3 }
 0x387   :  { %v2687_v63 = vadd.f32 %v2686_v46, %v2647_v9  ;;  %v10814_v9 = vand.u32 4294901760, %v9280_v37 }
 0x389   :  { %v2721_v56 = vadd.f32 %v2720_v17, %v2687_v63 }
 0x38b   :  { %v2732_v13 = vadd.f32 %v2721_v56, %v9420_v26  ;;  %3381 = vmatmul.f32.gmra.mxu2 %v10810_v61  ;;  %3428 = vmatmul.f32.gmra.mxu3 %v10813_v47  ;;  %v3540_v26 = vsub.f32 %v9280_v37, %v10814_v9 }
 0x38d   :  { %v3541_v35 = vand.u32 4294901760, %v3540_v26 }
 0x38e   :  { %v2690_v39 = vpop.f32.mrf.mxu2  ;;  %v2728_v55 = vpop.f32.mrf.mxu3 }
 0x38f   :  { %v2691_v19 = vadd.f32 %v2690_v39, %v2653_v12 }
 0x391   :  { %v2725_v45 = vadd.f32 %v2724_v29, %v2691_v19 }
 0x393   :  { %v2733_v4 = vadd.f32 %v2725_v45, %v9439_v8  ;;  %3386 = vmatmul.f32.gmra.mxu2 %v10812_v51  ;;  %3592 = vmatmul.f32.vlgmr.msra.gmra.mxu3 %v9264_v30  ;;  %v2823_v8 = vadd.f32 %v9339_v57, %v9317_v36  ;;  %v10816_v36 = vand.u32 4294901760, %v9329_v14 }
 0x394   :  { %3920 = vmatpush.msra.mxu3 %v9277_v33  ;;  %v10815_v33 = vand.u32 4294901760, %v9305_v0 }
 0x395   :  { %v3556_v57 = vsub.f32 %v9329_v14, %v10816_v36 }
 0x396   :  { %v2694_v56 = vpop.f32.mrf.mxu2  ;;  %v2897_v48 = vpop.f32.mrf.mxu3  ;;  %v3548_v61 = vsub.f32 %v9305_v0, %v10815_v33 }
 0x397   :  { %v2695_v17 = vadd.f32 %v2694_v56, %v2659_v58  ;;  %v3557_v45 = vand.u32 4294901760, %v3556_v57 }
 0x398   :  { %v3549_v29 = vand.u32 4294901760, %v3548_v61 }
 0x399   :  { %v2729_v47 = vadd.f32 %v2728_v55, %v2695_v17 }
 0x39b   :  { %v2734_v12 = vadd.f32 %v2729_v47, %v9465_v32  ;;  %3542 = vmatmul.f32.vlgmr.msra.gmra.mxu2 %v3541_v35  ;;  %3596 = vmatmul.f32.gmra.mxu3 %v9297_v53 }
 0x39c   :  { %3882 = vmatpush.msra.mxu2 %v9289_v23  ;;  %v2827_v23 = vadd.f32 %v9374_v2, %v9348_v49  ;;  %v2831_v49 = vadd.f32 %v9398_v27, %v9377_v44  ;;  %v2835_v44 = vadd.f32 %v9424_v62, %v9405_v7 }
 0x39e   :  { %v2858_v37 = vpop.f32.mrf.mxu2  ;;  %v2903_v3 = vpop.f32.mrf.mxu3 }
 0x39f   :  { %v2859_v46 = vadd.f32 %v2858_v37, %v2823_v8  ;;  %v9663_v37 = vpop.f32.mrf.mxu0 }
 0x3a1   :  { %v2898_v58 = vadd.f32 %v2897_v48, %v2859_v46 }
 0x3a3   :  { %v2940_v63 = vadd.f32 %v9430_v22, %v2898_v58  ;;  %3550 = vmatmul.f32.gmra.mxu2 %v3549_v29  ;;  %3600 = vmatmul.f32.gmra.mxu3 %v9320_v54 }
 0x3a5   :  { %v2974_v32 = vadd.f32 %v9447_v50, %v2940_v63  ;;  %v10817_v50 = vand.u32 4294901760, %v9357_v5 }
 0x3a6   :  { %v2863_v0 = vpop.f32.mrf.mxu2  ;;  %v2909_v51 = vpop.f32.mrf.mxu3 }
 0x3a7   :  { %v2864_v39 = vadd.f32 %v2863_v0, %v2827_v23  ;;  %v9635_v55 = vadd.f32 %v2974_v32, %v2731_v38  ;;  %v3564_v14 = vsub.f32 %v9357_v5, %v10817_v50  ;;  %v9671_v63 = vpop.f32.mrf.mxu0  ;;  %v10819_v23 = vld [vmem:[#allocation56_spill] sm:$0xff] }
 0x3a8   :  { %v10820_v32 = vand.u32 4294901760, %v10819_v23 }
 0x3a9   :  { %v2904_v19 = vadd.f32 %v2903_v3, %v2864_v39  ;;  %v3565_v17 = vand.u32 4294901760, %v3564_v14  ;;  %v9668_v3 = vpop.f32.mrf.mxu1  ;;  %v10821_v39 = vld [vmem:[#allocation57_spill] sm:$0xff] }
 0x3ab   :  { %v2944_v22 = vadd.f32 %v9460_v25, %v2904_v19  ;;  %3558 = vmatmul.f32.gmra.mxu2 %v3557_v45  ;;  %3604 = vmatmul.f32.gmra.mxu3 %v9344_v40  ;;  %v10822_v19 = vand.u32 4294901760, %v10821_v39 }
 0x3ad   :  { %v2978_v2 = vadd.f32 %v9486_v20, %v2944_v22 }
 0x3ae   :  { %v2868_v9 = vpop.f32.mrf.mxu2  ;;  %v2915_v26 = vpop.f32.mrf.mxu3 }
 0x3af   :  { %v2869_v38 = vadd.f32 %v2868_v9, %v2831_v49  ;;  %v9645_v56 = vadd.f32 %v2978_v2, %v2732_v13  ;;  %v9683_v45 = vpop.f32.mrf.mxu0  ;;  %v10823_v9 = vld [vmem:[#allocation23_spill] sm:$0xff] }
 0x3b1   :  { %v2910_v48 = vadd.f32 %v2909_v51, %v2869_v38  ;;  %v9677_v57 = vpop.f32.mrf.mxu1 }
 0x3b3   :  { %v2948_v25 = vadd.f32 %v9490_v21, %v2910_v48  ;;  %3566 = vmatmul.f32.gmra.mxu2 %v3565_v17  ;;  %3743 = vmatmul.f32.vlgmr.msrb.gmra.mxu3 %v9264_v30 }
 0x3b5   :  { %v2982_v27 = vadd.f32 %v9505_v28, %v2948_v25 }
 0x3b6   :  { %v2873_v20 = vpop.f32.mrf.mxu2  ;;  %v3079_v47 = vpop.f32.mrf.mxu3 }
 0x3b7   :  { %v2874_v5 = vadd.f32 %v2873_v20, %v2835_v44  ;;  %v9652_v35 = vadd.f32 %v2982_v27, %v2733_v4  ;;  %v9696_v17 = vpop.f32.mrf.mxu0  ;;  %v10827_v20 = vld [vmem:[#allocation22_spill] sm:$0xff] }
 0x3b9   :  { %v2916_v8 = vadd.f32 %v2915_v26, %v2874_v5  ;;  %v9686_v2 = vpop.f32.mrf.mxu1  ;;  %v10824_v26 = vand.u32 4294901760, %v10823_v9 }
 0x3bb   :  { %v2952_v13 = vadd.f32 %v9508_v43, %v2916_v8  ;;  %3709 = vmatmul.f32.vlgmr.msrb.gmra.mxu2 %v9264_v30  ;;  %3747 = vmatmul.f32.gmra.mxu3 %v9297_v53  ;;  %v10818_v30 = vld [vmem:[#allocation55_spill] sm:$0xff] }
 0x3bc   :  { %4050 = vmatpush.msrb.mxu2 %v9463_v41 }
 0x3bd   :  { %v2986_v21 = vadd.f32 %v9521_v24, %v2952_v13  ;;  %v4101_v24 = vand.u32 4294901760, %v10818_v30 }
 0x3be   :  { %v3029_v33 = vpop.f32.mrf.mxu2  ;;  %v3083_v62 = vpop.f32.mrf.mxu3 }
 0x3bf   :  { %v3080_v7 = vadd.f32 %v3079_v47, %v3029_v33  ;;  %v9659_v28 = vadd.f32 %v2986_v21, %v2734_v12  ;;  %v4102_v58 = vsub.f32 %v10818_v30, %v4101_v24  ;;  %v10828_v47 = vand.u32 4294901760, %v10827_v20  ;;  %v9708_v21 = vpop.f32.mrf.mxu0 }
 0x3c1   :  { %v4103_v29 = vand.u32 4294901760, %v4102_v58  ;;  %v3116_v51 = vadd.f32 %v9526_v6, %v3080_v7 }
 0x3c3   :  { %3713 = vmatmul.f32.gmra.mxu2 %v9297_v53  ;;  %3751 = vmatmul.f32.gmra.mxu3 %v9320_v54 }
 0x3c4   :  { %4104 = vmatpush.msrb.mxu3 %v4103_v29 }
 0x3c6   :  { %v3037_v4 = vpop.f32.mrf.mxu2  ;;  %v3087_v61 = vpop.f32.mrf.mxu3 }
 0x3c7   :  { %v3084_v43 = vadd.f32 %v3083_v62, %v3037_v4 }
 0x3c9   :  { %v3121_v50 = vadd.f32 %v9546_v1, %v3084_v43  ;;  %v9699_v1 = vpop.f32.mrf.mxu1 }
 0x3ca   :  { %10825 = vst [vmem:[#allocation66_spill] sm:$0xff] %v9699_v1 }
 0x3cb   :  { %3717 = vmatmul.f32.gmra.mxu2 %v9320_v54  ;;  %3755 = vmatmul.f32.gmra.mxu3 %v9344_v40  ;;  %v3161_v38 = vadd.f32 %v9561_v11, %v3121_v50 }
 0x3ce   :  { %v3045_v46 = vpop.f32.mrf.mxu2  ;;  %v3091_v12 = vpop.f32.mrf.mxu3 }
 0x3cf   :  { %v3088_v53 = vadd.f32 %v3087_v61, %v3045_v46 }
 0x3d1   :  { %v3126_v44 = vadd.f32 %v9563_v10, %v3088_v53 }
 0x3d3   :  { %3721 = vmatmul.f32.gmra.mxu2 %v9344_v40  ;;  %3924 = vmatmul.f32.vlgmr.msra.gmra.mxu3 %v10820_v32  ;;  %v3155_v40 = vadd.f32 %v9540_v60, %v3116_v51  ;;  %v3167_v11 = vadd.f32 %v9580_v59, %v3126_v44  ;;  %v10830_v59 = vand.u32 4294901760, %v9533_v52 }
 0x3d4   :  { %4255 = vmatpush.msra.mxu3 %v9463_v41 }
 0x3d5   :  { %v4054_v4 = vsub.f32 %v9533_v52, %v10830_v59 }
 0x3d6   :  { %v3053_v54 = vpop.f32.mrf.mxu2  ;;  %v3230_v36 = vpop.f32.mrf.mxu3 }
 0x3d7   :  { %v3092_v0 = vadd.f32 %v3091_v12, %v3053_v54 }
 0x3d9   :  { %v3131_v10 = vadd.f32 %v9589_v15, %v3092_v0 }
 0x3db   :  { %3885 = vmatmul.f32.vlgmr.msra.gmra.mxu2 %v10819_v23  ;;  %3930 = vmatmul.f32.gmra.mxu3 %v10822_v19  ;;  %v3173_v7 = vadd.f32 %v9600_v18, %v3131_v10  ;;  %v10832_v18 = vand.u32 4294901760, %v9549_v42  ;;  %v10833_v23 = vld [vmem:[#allocation60_spill] sm:$0xff]  ;;  %v10838_v19 = vld [vmem:[#allocation6_spill] sm:$0xff] }
 0x3dc   :  { %4221 = vmatpush.msra.mxu2 %v4101_v24  ;;  %v4055_v24 = vand.u32 4294901760, %v4054_v4 }
 0x3dd   :  { %v4062_v12 = vsub.f32 %v9549_v42, %v10832_v18 }
 0x3de   :  { %v3196_v22 = vpop.f32.mrf.mxu2  ;;  %v3234_v49 = vpop.f32.mrf.mxu3 }
 0x3df   :  { %v3197_v41 = vadd.f32 %v3196_v22, %v3155_v40  ;;  %v4063_v29 = vand.u32 4294901760, %v4062_v12  ;;  %v10839_v40 = vand.u32 4294901760, %v9583_v34 }
 0x3e1   :  { %v3231_v14 = vadd.f32 %v3230_v36, %v3197_v41  ;;  %v4078_v22 = vsub.f32 %v9583_v34, %v10839_v40 }
 0x3e3   :  { %v9690_v6 = vadd.f32 %v3231_v14, %v9635_v55  ;;  %3890 = vmatmul.f32.gmra.mxu2 %v10821_v39  ;;  %3936 = vmatmul.f32.gmra.mxu3 %v10824_v26  ;;  %v4079_v14 = vand.u32 4294901760, %v4078_v22 }
 0x3e6   :  { %v3200_v48 = vpop.f32.mrf.mxu2  ;;  %v3238_v60 = vpop.f32.mrf.mxu3 }
 0x3e7   :  { %v3201_v25 = vadd.f32 %v3200_v48, %v3161_v38 }
 0x3e9   :  { %v3235_v27 = vadd.f32 %v3234_v49, %v3201_v25 }
 0x3eb   :  { %v9702_v55 = vadd.f32 %v3235_v27, %v9645_v56  ;;  %3895 = vmatmul.f32.gmra.mxu2 %v10823_v9  ;;  %3942 = vmatmul.f32.gmra.mxu3 %v10828_v47  ;;  %v9716_v56 = vpop.f32.mrf.mxu1 }
 0x3ed   :  { %10826 = vst [vmem:[#allocation59_spill] sm:$0xff] %v9702_v55 }
 0x3ee   :  { %v3204_v5 = vpop.f32.mrf.mxu2  ;;  %v3242_v8 = vpop.f32.mrf.mxu3 }
 0x3ef   :  { %v3205_v13 = vadd.f32 %v3204_v5, %v3167_v11 }
 0x3f1   :  { %v3239_v33 = vadd.f32 %v3238_v60, %v3205_v13 }
 0x3f3   :  { %v9712_v62 = vadd.f32 %v3239_v33, %v9652_v35  ;;  %3900 = vmatmul.f32.gmra.mxu2 %v10827_v20  ;;  %4106 = vmatmul.f32.vlgmr.msrb.gmra.mxu3 %v9528_v16  ;;  %v9724_v35 = vpop.f32.mrf.mxu0  ;;  %v9737_v53 = vpop.f32.mrf.mxu1 }
 0x3f5   :  { %10829 = vst [vmem:[#allocation24_spill] sm:$0xff] %v9712_v62 }
 0x3f6   :  { %v3208_v61 = vpop.f32.mrf.mxu2  ;;  %v9722_v43 = vpop.f32.mrf.mxu3 }
 0x3f7   :  { %v3209_v15 = vadd.f32 %v3208_v61, %v3173_v7 }
 0x3f9   :  { %v3243_v30 = vadd.f32 %v3242_v8, %v3209_v15 }
 0x3fb   :  { %v9727_v46 = vadd.f32 %v3243_v30, %v9659_v28  ;;  %4056 = vmatmul.f32.vlgmr.msrb.gmra.mxu2 %v4055_v24  ;;  %4110 = vmatmul.f32.gmra.mxu3 %v9543_v31  ;;  %v9740_v32 = vpop.f32.mrf.mxu0  ;;  %v10835_v28 = vld [vmem:[#allocation25_spill] sm:$0xff]  ;;  %v9749_v42 = vpop.f32.mrf.mxu1 }
 0x3fc   :  { %10834 = vst [vmem:[#allocation61_spill] sm:$0xff] %v9740_v32  ;;  %v10836_v54 = vand.u32 4294901760, %v10835_v28 }
 0x3fd   :  { %10831 = vst [vmem:[#allocation62_spill] sm:$0xff] %v9727_v46 }
 0x3fe   :  { %v9733_v58 = vpop.f32.mrf.mxu2  ;;  %v9735_v52 = vpop.f32.mrf.mxu3  ;;  %v4070_v36 = vsub.f32 %v10835_v28, %v10836_v54  ;;  %10837 = vst [vmem:[#allocation27_spill] sm:$0xff] %v9749_v42 }
 0x400   :  { %v4071_v39 = vand.u32 4294901760, %v4070_v36 }
 0x403   :  { %4064 = vmatmul.f32.gmra.mxu2 %v4063_v29  ;;  %4114 = vmatmul.f32.gmra.mxu3 %v10833_v23  ;;  %v9759_v50 = vpop.f32.mrf.mxu0  ;;  %v9761_v9 = vpop.f32.mrf.mxu1 }
 0x404   :  { %10841 = vst [vmem:[#allocation64_spill] sm:$0xff] %v9759_v50 }
 0x405   :  { %10842 = vst [vmem:[#allocation63_spill] sm:$0xff] %v9761_v9 }
 0x406   :  { %v9745_v0 = vpop.f32.mrf.mxu2  ;;  %v9747_v51 = vpop.f32.mrf.mxu3 }
 0x40b   :  { %4072 = vmatmul.f32.gmra.mxu2 %v4071_v39  ;;  %4118 = vmatmul.f32.gmra.mxu3 %v10838_v19  ;;  %v9768_v48 = vpop.f32.mrf.mxu0  ;;  %v9772_v34 = vpop.f32.mrf.mxu1 }
 0x40e   :  { %v9755_v49 = vpop.f32.mrf.mxu2  ;;  %v9757_v41 = vpop.f32.mrf.mxu3 }
 0x40f   :  { %10840 = vst [vmem:[#allocation7_spill] sm:$0xff] %v9757_v41 }
 0x413   :  { %4080 = vmatmul.f32.gmra.mxu2 %v4079_v14  ;;  %4257 = vmatmul.f32.vlgmr.msra.gmra.mxu3 %v9528_v16  ;;  %v9778_v44 = vpop.f32.mrf.mxu0  ;;  %v9786_v47 = vpop.f32.mrf.mxu1 }
 0x416   :  { %v9764_v26 = vpop.f32.mrf.mxu2  ;;  %v9766_v38 = vpop.f32.mrf.mxu3 }
 0x417   :  { %10843 = vst [vmem:[#allocation26_spill] sm:$0xff] %v9764_v26 }
 0x41b   :  { %4223 = vmatmul.f32.vlgmr.msra.gmra.mxu2 %v9528_v16  ;;  %4261 = vmatmul.f32.gmra.mxu3 %v9543_v31  ;;  %v9790_v16 = vpop.f32.mrf.mxu0  ;;  %v9796_v8 = vpop.f32.mrf.mxu1 }
 0x41c   :  { %10845 = vst [vmem:[#allocation28_spill] sm:$0xff] %v9796_v8 }
 0x41e   :  { %v9774_v60 = vpop.f32.mrf.mxu2  ;;  %v9776_v25 = vpop.f32.mrf.mxu3 }
 0x423   :  { %4227 = vmatmul.f32.gmra.mxu2 %v9543_v31  ;;  %4265 = vmatmul.f32.gmra.mxu3 %v10833_v23  ;;  %v9803_v10 = vpop.f32.mrf.mxu0  ;;  %v9805_v33 = vpop.f32.mrf.mxu1 }
 0x424   :  { %10847 = vst [vmem:[#allocation31_spill] sm:$0xff] %v9803_v10 }
 0x425   :  { %10848 = vst [vmem:[#allocation30_spill] sm:$0xff] %v9805_v33 }
 0x426   :  { %v9782_v27 = vpop.f32.mrf.mxu2  ;;  %v9784_v20 = vpop.f32.mrf.mxu3 }
 0x42b   :  { %4231 = vmatmul.f32.gmra.mxu2 %v10833_v23  ;;  %4269 = vmatmul.f32.gmra.mxu3 %v10838_v19  ;;  %v3800_v4 = vpop.f32.mrf.mxu0  ;;  %v3850_v61 = vpop.f32.mrf.mxu1 }
 0x42c   :  { %v3851_v1 = vadd.f32 %v3850_v61, %v3800_v4 }
 0x42e   :  { %v9792_v11 = vpop.f32.mrf.mxu2  ;;  %v9794_v5 = vpop.f32.mrf.mxu3 }
 0x42f   :  { %10844 = vst [vmem:[#allocation29_spill] sm:$0xff] %v9794_v5 }
 0x433   :  { %4235 = vmatmul.f32.gmra.mxu2 %v10838_v19  ;;  %v9815_v24 = vpop.f32.mrf.mxu0  ;;  %v9821_v29 = vpop.f32.mrf.mxu1 }
 0x436   :  { %v9799_v31 = vpop.f32.mrf.mxu2  ;;  %v9801_v13 = vpop.f32.mrf.mxu3 }
 0x437   :  { %10846 = vst [vmem:[#allocation65_spill] sm:$0xff] %v9799_v31 }
 0x43b   :  { %v9823_v23 = vpop.f32.mrf.mxu0  ;;  %v9829_v36 = vpop.f32.mrf.mxu1 }
 0x43e   :  { %v9807_v7 = vpop.f32.mrf.mxu2  ;;  %v9809_v59 = vpop.f32.mrf.mxu3 }
 0x43f   :  { %10849 = vst [vmem:[#allocation69_spill] sm:$0xff] %v9809_v59 }
 0x443   :  { %v9833_v40 = vpop.f32.mrf.mxu0  ;;  %v9835_v22 = vpop.f32.mrf.mxu1 }
 0x444   :  { %10854 = vst [vmem:[#allocation32_spill] sm:$0xff] %v9833_v40 }
 0x445   :  { %10855 = vst [vmem:[#allocation71_spill] sm:$0xff] %v9835_v22 }
 0x446   :  { %v9811_v15 = vpop.f32.mrf.mxu2  ;;  %v9813_v30 = vpop.f32.mrf.mxu3 }
 0x447   :  { %10850 = vst [vmem:[#allocation33_spill] sm:$0xff] %v9813_v30 }
 0x44b   :  { %v9843_v9 = vpop.f32.mrf.mxu1 }
 0x44e   :  { %v9817_v18 = vpop.f32.mrf.mxu2  ;;  %v9819_v12 = vpop.f32.mrf.mxu3 }
 0x44f   :  { %10851 = vst [vmem:[#allocation34_spill] sm:$0xff] %v9817_v18 }
 0x450   :  { %10852 = vst [vmem:[#allocation68_spill] sm:$0xff] %v9819_v12  ;;  %v9841_v12 = vpop.f32.mrf.mxu0 }
 0x453   :  { %v9853_v10 = vpop.f32.mrf.mxu1 }
 0x454   :  { %10859 = vst [vmem:[#allocation36_spill] sm:$0xff] %v9853_v10 }
 0x456   :  { %v9825_v28 = vpop.f32.mrf.mxu2  ;;  %v9827_v54 = vpop.f32.mrf.mxu3 }
 0x457   :  { %10853 = vst [vmem:[#allocation67_spill] sm:$0xff] %v9825_v28 }
 0x458   :  { %v9849_v50 = vpop.f32.mrf.mxu0 }
 0x45b   :  { %v9859_v22 = vpop.f32.mrf.mxu1 }
 0x45c   :  { %10861 = vst [vmem:[#allocation39_spill] sm:$0xff] %v9859_v22  ;;  %v3337_v22 = vadd.f32 %v9668_v3, %v9663_v37 }
 0x45e   :  { %v3886_v39 = vpop.f32.mrf.mxu2  ;;  %v9831_v19 = vpop.f32.mrf.mxu3  ;;  %v3373_v59 = vadd.f32 %v9733_v58, %v3337_v22 }
 0x460   :  { %v9855_v41 = vpop.f32.mrf.mxu0 }
 0x461   :  { %10860 = vst [vmem:[#allocation73_spill] sm:$0xff] %v9855_v41  ;;  %v4305_v41 = vld [vmem:[%s10475_s6] sm:$0xff] }
 0x462   :  { %v4340_v5 = vand.u32 4294901760, %v4305_v41 }
 0x463   :  { %v9875_v26 = vpop.f32.mrf.mxu1 }
 0x464   :  { %10864 = vst [vmem:[#allocation41_spill] sm:$0xff] %v9875_v26  ;;  %v3412_v26 = vadd.f32 %v9722_v43, %v3373_v59 }
 0x466   :  { %v9837_v14 = vpop.f32.mrf.mxu2  ;;  %v9839_v46 = vpop.f32.mrf.mxu3 }
 0x467   :  { %10856 = vst [vmem:[#allocation37_spill] sm:$0xff] %v9839_v46 }
 0x46b   :  { %v4182_v59 = vpop.f32.mrf.mxu1 }
 0x46e   :  { %v9845_v28 = vpop.f32.mrf.mxu2  ;;  %v9847_v33 = vpop.f32.mrf.mxu3 }
 0x46f   :  { %10857 = vst [vmem:[#allocation70_spill] sm:$0xff] %v9847_v33  ;;  %v4306_v33 = vld [vmem:[%s10475_s6 + $0x8] sm:$0xff] }
 0x470   :  { %v4338_v8 = vand.u32 4294901760, %v4306_v33 }
 0x472   :  { %v4390_v10 = vsub.f32 %v4306_v33, %v4338_v8  ;;  %4339 = vmatpush.msrb.mxu0 %v4338_v8  ;;  %4474 = vmatpush.msrb.mxu3 %v4338_v8 }
 0x474   :  { %v4391_v31 = vand.u32 4294901760, %v4390_v10  ;;  %4434 = vmatpush.msrb.mxu2 %v4390_v10  ;;  %4476 = vmatpush.msrb.mxu3 %v4340_v5 }
 0x475   :  { %4341 = vmatpush.msrb.mxu0 %v4340_v5 }
 0x476   :  { %v9851_v62 = vpop.f32.mrf.mxu2  ;;  %v4107_v30 = vpop.f32.mrf.mxu3  ;;  %v4392_v55 = vsub.f32 %v4390_v10, %v4391_v31 }
 0x477   :  { %10858 = vst [vmem:[#allocation35_spill] sm:$0xff] %v9851_v62  ;;  %v9868_v62 = vpop.f32.mrf.mxu0  ;;  %4519 = vmatpush.msra.mxu0 %v4391_v31 }
 0x478   :  { %10863 = vst [vmem:[#allocation38_spill] sm:$0xff] %v9868_v62  ;;  %v3594_v62 = vadd.f32 %v9766_v38, %v9774_v60  ;;  %v4393_v37 = vand.u32 4294901760, %v4392_v55  ;;  %v3887_v38 = vadd.f32 %v3886_v39, %v3851_v1  ;;  %v3454_v55 = vadd.f32 %v9708_v21, %v3412_v26 }
 0x47a   :  { %v3630_v22 = vadd.f32 %v9768_v48, %v3594_v62  ;;  %4394 = vmatpush.msrb.mxu1 %v4393_v37  ;;  %v3488_v26 = vadd.f32 %v9716_v56, %v3454_v55  ;;  %v3602_v56 = vadd.f32 %v9784_v20, %v9792_v11  ;;  %v10869_v37 = vld [vmem:[#allocation26_spill] sm:$0xff] }
 0x47e   :  { %v4057_v42 = vpop.f32.mrf.mxu2  ;;  %v9857_v18 = vpop.f32.mrf.mxu3 }
 0x47f   :  { %v4143_v10 = vpop.f32.mrf.mxu0  ;;  %v4108_v43 = vadd.f32 %v4107_v30, %v4057_v42 }
 0x486   :  { %v9861_v40 = vpop.f32.mrf.mxu2  ;;  %v9863_v46 = vpop.f32.mrf.mxu3 }
 0x487   :  { %10862 = vst [vmem:[#allocation72_spill] sm:$0xff] %v9863_v46  ;;  %v4396_v46 = vsub.f32 %v4305_v41, %v4340_v5  ;;  %v3341_v41 = vadd.f32 %v9677_v57, %v9671_v63  ;;  %v3669_v63 = vadd.f32 %v9772_v34, %v3630_v22  ;;  %v3926_v57 = vadd.f32 %v9827_v54, %v3887_v38  ;;  %v10872_v38 = vld [vmem:[#allocation28_spill] sm:$0xff] }
 0x488   :  { %v3345_v34 = vadd.f32 %v9686_v2, %v9683_v45 }
 0x489   :  { %v4397_v33 = vand.u32 4294901760, %v4396_v46  ;;  %4437 = vmatpush.msrb.mxu2 %v4396_v46  ;;  %v3378_v31 = vadd.f32 %v9745_v0, %v3341_v41  ;;  %v3855_v0 = vadd.f32 %v9821_v29, %v9815_v24  ;;  %v3711_v21 = vadd.f32 %v9807_v7, %v3669_v63  ;;  %v4148_v7 = vpop.f32.mrf.mxu0  ;;  %v10871_v41 = vld [vmem:[#allocation29_spill] sm:$0xff] }
 0x48a   :  { %v3968_v42 = vadd.f32 %v9841_v12, %v3926_v57  ;;  %v4188_v12 = vpop.f32.mrf.mxu1 }
 0x48b   :  { %v4398_v3 = vsub.f32 %v4396_v46, %v4397_v33  ;;  %4523 = vmatpush.msra.mxu0 %v4397_v33  ;;  %v3598_v46 = vadd.f32 %v9776_v25, %v9782_v27  ;;  %v3418_v1 = vadd.f32 %v9735_v52, %v3378_v31  ;;  %v3892_v25 = vadd.f32 %v9837_v14, %v3855_v0  ;;  %v10877_v0 = vld [vmem:[#allocation71_spill] sm:$0xff] }
 0x48c   :  { %v4144_v52 = vadd.f32 %v4143_v10, %v4108_v43  ;;  %v3745_v4 = vadd.f32 %v9801_v13, %v3711_v21  ;;  %v4002_v2 = vadd.f32 %v9843_v9, %v3968_v42  ;;  %v3640_v9 = vadd.f32 %v9790_v16, %v3602_v56  ;;  %v10868_v16 = vld [vmem:[#allocation69_spill] sm:$0xff]  ;;  %v10881_v56 = vld [vmem:[#allocation31_spill] sm:$0xff] }
 0x48d   :  { %v4399_v60 = vand.u32 4294901760, %v4398_v3  ;;  %v3635_v48 = vadd.f32 %v9778_v44, %v3598_v46  ;;  %v3458_v27 = vadd.f32 %v9724_v35, %v3418_v1  ;;  %v3502_v44 = vadd.f32 %v3488_v26, %v9690_v6  ;;  %v10870_v3 = vld [vmem:[#allocation65_spill] sm:$0xff]  ;;  %v10874_v46 = vld [vmem:[#allocation36_spill] sm:$0xff] }
 0x48e   :  { %v9880_v32 = vpop.f32.mrf.mxu2  ;;  %v9885_v58 = vpop.f32.mrf.mxu3  ;;  %v3932_v61 = vadd.f32 %v9831_v19, %v3892_v25  ;;  %v4112_v35 = vadd.f32 %v9857_v18, %v9861_v40  ;;  %v4183_v30 = vadd.f32 %v4182_v59, %v4144_v52  ;;  %v10867_v40 = vld [vmem:[#allocation59_spill] sm:$0xff]  ;;  %v3606_v22 = vadd.f32 %v10871_v41, %v10870_v3  ;;  %v10873_v10 = vld [vmem:[#allocation37_spill] sm:$0xff]  ;;  %v10876_v1 = vld [vmem:[#allocation32_spill] sm:$0xff] }
 0x48f   :  { %4400 = vmatpush.msrb.mxu1 %v4399_v60  ;;  %v3675_v45 = vadd.f32 %v9786_v47, %v3635_v48  ;;  %v3492_v13 = vadd.f32 %v9737_v53, %v3458_v27  ;;  %v3759_v11 = vadd.f32 %v3745_v4, %v3502_v44  ;;  %v9928_v53 = vld [vmem:[%s10474_s5] ss:$0 sm:$0xff]  ;;  %v3681_v60 = vadd.f32 %v10872_v38, %v3640_v9  ;;  %v10879_v25 = vld [vmem:[#allocation27_spill] sm:$0xff] }
 0x490   :  { %v3972_v18 = vadd.f32 %v9849_v50, %v3932_v61  ;;  %v4149_v54 = vadd.f32 %v4148_v7, %v4112_v35  ;;  %v3863_v21 = vadd.f32 %v10877_v0, %v10876_v1  ;;  %v10878_v48 = vld [vmem:[#allocation34_spill] sm:$0xff]  ;;  %v10880_v4 = vld [vmem:[#allocation7_spill] sm:$0xff]  ;;  %v3645_v44 = vadd.f32 %v10881_v56, %v3606_v22 }
 0x491   :  { %4556 = vmatpush.msra.mxu1 %v4338_v8  ;;  %v3383_v8 = vadd.f32 %v9755_v49, %v3345_v34  ;;  %v3859_v49 = vadd.f32 %v9829_v36, %v9823_v23  ;;  %v3715_v6 = vadd.f32 %v9811_v15, %v3675_v45  ;;  %v4016_v39 = vadd.f32 %v4002_v2, %v3759_v11  ;;  %v10866_v15 = vld [vmem:[#allocation61_spill] sm:$0xff]  ;;  %v4153_v26 = vpop.f32.mrf.mxu0  ;;  %v10883_v2 = vld [vmem:[#allocation35_spill] sm:$0xff] }
 0x492   :  { %v3503_v14 = vadd.f32 %v3492_v13, %v10867_v40  ;;  %v4006_v63 = vadd.f32 %v10874_v46, %v3972_v18  ;;  %v4189_v59 = vadd.f32 %v4188_v12, %v4149_v54  ;;  %v3719_v34 = vadd.f32 %v10878_v48, %v3681_v60  ;;  %v10887_v54 = vld [vmem:[#allocation30_spill] sm:$0xff] }
 0x493   :  { %4558 = vmatpush.msra.mxu1 %v4340_v5  ;;  %v3424_v20 = vadd.f32 %v9747_v51, %v3383_v8  ;;  %v3897_v29 = vadd.f32 %v9845_v28, %v3859_v49  ;;  %v10865_v51 = vld [vmem:[#allocation66_spill] sm:$0xff]  ;;  %v3749_v33 = vadd.f32 %v10868_v16, %v3715_v6  ;;  %v3902_v61 = vadd.f32 %v10883_v2, %v3863_v21  ;;  %v10885_v6 = vld [vmem:[#allocation24_spill] sm:$0xff] }
 0x494   :  { %v3349_v23 = vadd.f32 %v10865_v51, %v9696_v17  ;;  %v10875_v17 = vld [vmem:[#allocation72_spill] sm:$0xff]  ;;  %v10894_v48 = vld [vmem:[#allocation62_spill] sm:$0xff] }
 0x495   :  { %v3462_v36 = vadd.f32 %v10866_v15, %v3424_v20  ;;  %v3938_v31 = vadd.f32 %v10873_v10, %v3897_v29  ;;  %v4116_v57 = vadd.f32 %v10875_v17, %v9880_v32  ;;  %v3760_v27 = vadd.f32 %v3749_v33, %v3503_v14  ;;  %v10882_v32 = vld [vmem:[#allocation73_spill] sm:$0xff]  ;;  %v10886_v29 = vld [vmem:[#allocation64_spill] sm:$0xff]  ;;  %v10891_v10 = vld [vmem:[#allocation63_spill] sm:$0xff] }
 0x496   :  { %v9895_v62 = vpop.f32.mrf.mxu2  ;;  %v4258_v5 = vpop.f32.mrf.mxu3  ;;  %v3388_v50 = vadd.f32 %v10869_v37, %v3349_v23  ;;  %v10884_v20 = vld [vmem:[#allocation33_spill] sm:$0xff]  ;;  %v10889_v23 = vld [vmem:[#allocation70_spill] sm:$0xff] }
 0x497   :  { %v3496_v52 = vadd.f32 %v10879_v25, %v3462_v36  ;;  %v3976_v45 = vadd.f32 %v10882_v32, %v3938_v31  ;;  %v4154_v35 = vadd.f32 %v4153_v26, %v4116_v57  ;;  %v4017_v49 = vadd.f32 %v4006_v63, %v3760_v27  ;;  %v10895_v25 = vld [vmem:[#allocation41_spill] sm:$0xff] }
 0x498   :  { %v3430_v7 = vadd.f32 %v10880_v4, %v3388_v50  ;;  %v3753_v11 = vadd.f32 %v10884_v20, %v3719_v34  ;;  %v3944_v15 = vadd.f32 %v10889_v23, %v3902_v61  ;;  %v4120_v36 = vadd.f32 %v9885_v58, %v9895_v62  ;;  %v10890_v50 = vld [vmem:[#allocation67_spill] sm:$0xff] }
 0x499   :  { %v4158_v60 = vpop.f32.mrf.mxu0 }
 0x49a   :  { %v3466_v18 = vadd.f32 %v10886_v29, %v3430_v7  ;;  %v4159_v62 = vadd.f32 %v4158_v60, %v4120_v36 }
 0x49c   :  { %v3500_v31 = vadd.f32 %v10891_v10, %v3466_v18 }
 0x49e   :  { %v4224_v24 = vpop.f32.mrf.mxu2  ;;  %v4262_v55 = vpop.f32.mrf.mxu3  ;;  %v3505_v34 = vadd.f32 %v3500_v31, %v10894_v48 }
 0x49f   :  { %v4225_v47 = vadd.f32 %v4224_v24, %v4183_v30  ;;  %v4194_v24 = vpop.f32.mrf.mxu1 }
 0x4a0   :  { %v4195_v16 = vadd.f32 %v4194_v24, %v4154_v35 }
 0x4a1   :  { %v4259_v19 = vadd.f32 %v4258_v5, %v4225_v47  ;;  %v3504_v47 = vadd.f32 %v3496_v52, %v10885_v6 }
 0x4a3   :  { %v4273_v28 = vadd.f32 %v4259_v19, %v4016_v39  ;;  %v3687_v39 = vadd.f32 %v10887_v54, %v3645_v44  ;;  %v10888_v19 = vld [vmem:[#allocation39_spill] sm:$0xff]  ;;  %v3761_v33 = vadd.f32 %v3753_v11, %v3504_v47 }
 0x4a4   :  { %v4010_v51 = vadd.f32 %v10888_v19, %v3976_v45 }
 0x4a5   :  { %v4281_v43 = vadd.f32 %v9928_v53, %v4273_v28  ;;  %v3723_v3 = vadd.f32 %v10890_v50, %v3687_v39 }
 0x4a6   :  { %v4228_v42 = vpop.f32.mrf.mxu2  ;;  %v4266_v28 = vpop.f32.mrf.mxu3  ;;  %v4018_v58 = vadd.f32 %v4010_v51, %v3761_v33 }
 0x4a7   :  { %v4285_v5 = vadd.f32 3.0, %v4281_v43  ;;  %v4229_v8 = vadd.f32 %v4228_v42, %v4189_v59  ;;  %v10893_v59 = vld [vmem:[#allocation68_spill] sm:$0xff]  ;;  %v4200_v26 = vpop.f32.mrf.mxu1 }
 0x4a8   :  { %v3757_v1 = vadd.f32 %v10893_v59, %v3723_v3 }
 0x4a9   :  { %v4289_v30 = vmax.f32 %v4285_v5, 0.0  ;;  %v4263_v13 = vadd.f32 %v4262_v55, %v4229_v8  ;;  %v10892_v55 = vld [vmem:[#allocation38_spill] sm:$0xff]  ;;  %v4201_v8 = vadd.f32 %v4200_v26, %v4159_v62 }
 0x4aa   :  { %v3980_v46 = vadd.f32 %v10892_v55, %v3944_v15  ;;  %v3762_v56 = vadd.f32 %v3757_v1, %v3505_v34 }
 0x4ab   :  { %v4293_v12 = vmin.f32 %v4289_v30, 6.0  ;;  %v4274_v9 = vadd.f32 %v4263_v13, %v4017_v49 }
 0x4ac   :  { %v4014_v52 = vadd.f32 %v10895_v25, %v3980_v46 }
 0x4ad   :  { %v4297_v40 = vmul.f32 %v4293_v12, %v4281_v43  ;;  %v4282_v14 = vadd.f32 %v9928_v53, %v4274_v9 }
 0x4ae   :  { %v4232_v37 = vpop.f32.mrf.mxu2  ;;  %v4270_v2 = vpop.f32.mrf.mxu3  ;;  %v4019_v30 = vadd.f32 %v4014_v52, %v3762_v56 }
 0x4af   :  { %v9962_v41 = vmul.f32 0.16666667, %v4297_v40  ;;  %v4286_v22 = vadd.f32 3.0, %v4282_v14  ;;  %v4233_v38 = vadd.f32 %v4232_v37, %v4195_v16 }
 0x4b1   :  { %v4313_v63 = vsel %vm4311_vm2, %v9962_v41, 0  ;;  %v4290_v17 = vmax.f32 %v4286_v22, 0.0  ;;  %v4267_v57 = vadd.f32 %v4266_v28, %v4233_v38 }
 0x4b2   :  { %v9968_v43 = vand.u32 4294901760, %v4313_v63 }
 0x4b3   :  { %v4294_v0 = vmin.f32 %v4290_v17, 6.0  ;;  %v4275_v21 = vadd.f32 %v4267_v57, %v4018_v58 }
 0x4b4   :  { %4402 = vmatmul.f32.vlgmr.msrb.gmra.mxu1 %v9968_v43  ;;  %v4343_v42 = vsub.f32 %v4313_v63, %v9968_v43 }
 0x4b5   :  { %v4298_v27 = vmul.f32 %v4294_v0, %v4282_v14  ;;  %v4283_v5 = vadd.f32 %v9928_v53, %v4275_v21 }
 0x4b6   :  { %v4236_v4 = vpop.f32.mrf.mxu2  ;;  %4440 = vmatmul.f32.vlgmr.msrb.gmra.mxu2 %v4343_v42  ;;  %v4344_v7 = vand.u32 4294901760, %v4343_v42 }
 0x4b7   :  { %v9976_v44 = vmul.f32 0.16666667, %v4298_v27  ;;  %v4287_v32 = vadd.f32 3.0, %v4283_v5  ;;  %v4237_v45 = vadd.f32 %v4236_v4, %v4201_v8 }
 0x4b8   :  { %4480 = vmatmul.f32.vlgmr.msrb.gmra.mxu3 %v4344_v7  ;;  %v4345_v61 = vsub.f32 %v4343_v42, %v4344_v7 }
 0x4b9   :  { %v4291_v35 = vmax.f32 %v4287_v32, 0.0  ;;  %v4271_v49 = vadd.f32 %v4270_v2, %v4237_v45  ;;  %v4316_v13 = vsel %vm4311_vm2, %v9976_v44, 0 }
 0x4ba   :  { %v4346_v24 = vand.u32 4294901760, %v4345_v61  ;;  %v4350_v20 = vand.u32 4294901760, %v4316_v13 }
 0x4bb   :  { %v4295_v11 = vmin.f32 %v4291_v35, 6.0  ;;  %v4276_v6 = vadd.f32 %v4271_v49, %v4019_v30 }
 0x4bc   :  { %4347 = vmatmul.f32.vlgmr.msrb.gmra.mxu0 %v4346_v24  ;;  %4406 = vmatmul.f32.gmra.mxu1 %v4350_v20  ;;  %v4351_v47 = vsub.f32 %v4316_v13, %v4350_v20 }
 0x4bd   :  { %v4299_v12 = vmul.f32 %v4295_v11, %v4283_v5  ;;  %v4284_v9 = vadd.f32 %v9928_v53, %v4276_v6 }
 0x4be   :  { %4445 = vmatmul.f32.gmra.mxu2 %v4351_v47  ;;  %v4352_v29 = vand.u32 4294901760, %v4351_v47 }
 0x4bf   :  { %v9981_v18 = vmul.f32 0.16666667, %v4299_v12  ;;  %v4288_v54 = vadd.f32 3.0, %v4284_v9 }
 0x4c0   :  { %4486 = vmatmul.f32.gmra.mxu3 %v4352_v29  ;;  %v4353_v39 = vsub.f32 %v4351_v47, %v4352_v29 }
 0x4c1   :  { %v4292_v19 = vmax.f32 %v4288_v54, 0.0  ;;  %v4319_v51 = vsel %vm4311_vm2, %v9981_v18, 0 }
 0x4c2   :  { %v4354_v23 = vand.u32 4294901760, %v4353_v39  ;;  %v4358_v15 = vand.u32 4294901760, %v4319_v51 }
 0x4c3   :  { %v4296_v36 = vmin.f32 %v4292_v19, 6.0 }
 0x4c4   :  { %4355 = vmatmul.f32.gmra.mxu0 %v4354_v23  ;;  %4410 = vmatmul.f32.gmra.mxu1 %v4358_v15  ;;  %v4359_v40 = vsub.f32 %v4319_v51, %v4358_v15 }
 0x4c5   :  { %v4300_v14 = vmul.f32 %v4296_v36, %v4284_v9 }
 0x4c6   :  { %4450 = vmatmul.f32.gmra.mxu2 %v4359_v40  ;;  %v4360_v53 = vand.u32 4294901760, %v4359_v40 }
 0x4c7   :  { %v9985_v16 = vmul.f32 0.16666667, %v4300_v14 }
 0x4c8   :  { %4492 = vmatmul.f32.gmra.mxu3 %v4360_v53  ;;  %v4361_v33 = vsub.f32 %v4359_v40, %v4360_v53 }
 0x4c9   :  { %v4322_v28 = vsel %vm4311_vm2, %v9985_v16, 0 }
 0x4ca   :  { %v4362_v37 = vand.u32 4294901760, %v4361_v33  ;;  %v4366_v50 = vand.u32 4294901760, %v4322_v28 }
 0x4cc   :  { %4363 = vmatmul.f32.gmra.mxu0 %v4362_v37  ;;  %4414 = vmatmul.f32.gmra.mxu1 %v4366_v50  ;;  %v4367_v3 = vsub.f32 %v4322_v28, %v4366_v50 }
 0x4ce   :  { %4455 = vmatmul.f32.gmra.mxu2 %v4367_v3  ;;  %v4368_v22 = vand.u32 4294901760, %v4367_v3 }
 0x4d0   :  { %4498 = vmatmul.f32.gmra.mxu3 %v4368_v22  ;;  %v4369_v38 = vsub.f32 %v4367_v3, %v4368_v22 }
 0x4d2   :  { %v4370_v60 = vand.u32 4294901760, %v4369_v38 }
 0x4d4   :  { %4371 = vmatmul.f32.gmra.mxu0 %v4370_v60  ;;  %4560 = vmatmul.f32.vlgmr.msra.gmra.mxu1 %v9968_v43 }
 0x4dc   :  { %4525 = vmatmul.f32.vlgmr.msra.gmra.mxu0 %v9968_v43  ;;  %4564 = vmatmul.f32.gmra.mxu1 %v4350_v20  ;;  %v7508_v43 = vld [vmem:[%s10476_s7] ss:$0 sm:$0xff]  ;;  %s7548_s7 = smov 112  }
 0x4e4   :  { %4529 = vmatmul.f32.gmra.mxu0 %v4350_v20  ;;  %4568 = vmatmul.f32.gmra.mxu1 %v4358_v15 }
 0x4ec   :  { %4533 = vmatmul.f32.gmra.mxu0 %v4358_v15  ;;  %4572 = vmatmul.f32.gmra.mxu1 %v4366_v50 }
 0x4f4   :  { %4537 = vmatmul.f32.gmra.mxu0 %v4366_v50 }
 0x531   :  { %v4403_v10 = vpop.f32.mrf.mxu1 }
 0x539   :  { %v4348_v31 = vpop.f32.mrf.mxu0  ;;  %v4407_v55 = vpop.f32.mrf.mxu1 }
 0x53a   :  { %v4441_v17 = vpop.f32.mrf.mxu2  ;;  %v4349_v13 = vadd.f32 %v7508_v43, %v4348_v31 }
 0x53b   :  { %v4481_v57 = vpop.f32.mrf.mxu3 }
 0x53c   :  { %v4404_v47 = vadd.f32 %v4403_v10, %v4349_v13 }
 0x53e   :  { %v4442_v54 = vadd.f32 %v4441_v17, %v4404_v47 }
 0x540   :  { %v4482_v23 = vadd.f32 %v4481_v57, %v4442_v54 }
 0x541   :  { %v4356_v46 = vpop.f32.mrf.mxu0  ;;  %v4411_v58 = vpop.f32.mrf.mxu1 }
 0x542   :  { %v4357_v1 = vadd.f32 %v7508_v43, %v4356_v46  ;;  %v4446_v21 = vpop.f32.mrf.mxu2 }
 0x543   :  { %v4487_v34 = vpop.f32.mrf.mxu3 }
 0x544   :  { %v4408_v26 = vadd.f32 %v4407_v55, %v4357_v1 }
 0x546   :  { %v4447_v42 = vadd.f32 %v4446_v21, %v4408_v26 }
 0x548   :  { %v4488_v27 = vadd.f32 %v4487_v34, %v4447_v42 }
 0x549   :  { %v4364_v62 = vpop.f32.mrf.mxu0  ;;  %v4415_v63 = vpop.f32.mrf.mxu1 }
 0x54a   :  { %v4365_v25 = vadd.f32 %v7508_v43, %v4364_v62  ;;  %v4451_v8 = vpop.f32.mrf.mxu2 }
 0x54b   :  { %v4493_v2 = vpop.f32.mrf.mxu3 }
 0x54c   :  { %v4412_v5 = vadd.f32 %v4411_v58, %v4365_v25 }
 0x54e   :  { %v4452_v56 = vadd.f32 %v4451_v8, %v4412_v5 }
 0x550   :  { %v4494_v61 = vadd.f32 %v4493_v2, %v4452_v56 }
 0x551   :  { %v4372_v59 = vpop.f32.mrf.mxu0  ;;  %v4561_v0 = vpop.f32.mrf.mxu1 }
 0x552   :  { %v4373_v32 = vadd.f32 %v7508_v43, %v4372_v59  ;;  %v4456_v20 = vpop.f32.mrf.mxu2 }
 0x553   :  { %v4499_v12 = vpop.f32.mrf.mxu3 }
 0x554   :  { %v4416_v35 = vadd.f32 %v4415_v63, %v4373_v32 }
 0x556   :  { %v4457_v11 = vadd.f32 %v4456_v20, %v4416_v35 }
 0x558   :  { %v4500_v9 = vadd.f32 %v4499_v12, %v4457_v11 }
 0x559   :  { %v4526_v48 = vpop.f32.mrf.mxu0  ;;  %v4565_v52 = vpop.f32.mrf.mxu1 }
 0x55a   :  { %v4527_v15 = vadd.f32 %v4526_v48, %v4482_v23 }
 0x55c   :  { %v10005_v36 = vadd.f32 %v4561_v0, %v4527_v15 }
 0x55e   :  { %v4588_v37 = vsel %vm1975_vm1, %v10005_v36, 0 }
 0x55f   :  { %v10017_v60 = vand.u32 4294901760, %v4588_v37 }
 0x561   :  { %v4530_v4 = vpop.f32.mrf.mxu0  ;;  %v4569_v30 = vpop.f32.mrf.mxu1  ;;  %v4625_v62 = vsub.f32 %v4588_v37, %v10017_v60 }
 0x562   :  { %v4531_v7 = vadd.f32 %v4530_v4, %v4488_v27 }
 0x563   :  { %v4626_v26 = vand.u32 4294901760, %v4625_v62 }
 0x564   :  { %v9994_v45 = vadd.f32 %v4565_v52, %v4531_v7 }
 0x565   :  { %v4627_v8 = vsub.f32 %v4625_v62, %v4626_v26 }
 0x566   :  { %4582 = vrot.lane.b32.xlu2 %v9994_v45, %s7548_s7  ;;  %v4590_v59 = vsel %vm1975_vm1, %v9994_v45, 0 }
 0x567   :  { %v10033_v48 = vand.u32 4294901760, %v4590_v59  ;;  %v4628_v35 = vand.u32 4294901760, %v4627_v8 }
 0x569   :  { %v4534_v49 = vpop.f32.mrf.mxu0  ;;  %v4573_v19 = vpop.f32.mrf.mxu1  ;;  %v4633_v4 = vsub.f32 %v4590_v59, %v10033_v48 }
 0x56a   :  { %v4535_v24 = vadd.f32 %v4534_v49, %v4494_v61 }
 0x56c   :  { %v9997_v6 = vadd.f32 %v4569_v30, %v4535_v24  ;;  %v4634_v30 = vand.u32 4294901760, %v4633_v4 }
 0x56e   :  { %4584 = vrot.lane.b32.xlu1 %v9997_v6, %s7548_s7  ;;  %v4592_v2 = vsel %vm1975_vm1, %v9997_v6, 0  ;;  %v4635_v20 = vsub.f32 %v4633_v4, %v4634_v30 }
 0x56f   :  { %v4640_v49 = vand.u32 4294901760, %v4592_v2 }
 0x571   :  { %v4538_v29 = vpop.f32.mrf.mxu0  ;;  %v4641_v11 = vsub.f32 %v4592_v2, %v4640_v49  ;;  %v4887_v2 = vld [vmem:[%s10477_s8 + $0x8] sm:$0xff] }
 0x572   :  { %v4539_v39 = vadd.f32 %v4538_v29, %v4500_v9  ;;  %v4636_v9 = vand.u32 4294901760, %v4635_v20 }
 0x573   :  { %v4642_v29 = vand.u32 4294901760, %v4641_v11 }
 0x574   :  { %v10000_v51 = vadd.f32 %v4573_v19, %v4539_v39 }
 0x575   :  { %v4643_v39 = vsub.f32 %v4641_v11, %v4642_v29 }
 0x576   :  { %4586 = vrot.lane.b32.xlu0 %v10000_v51, %s7548_s7  ;;  %4945 = vrot.lane.b32.xlu2 %v10000_v51, %s7549_s22  ;;  %v4594_v12 = vsel %vm1975_vm1, %v10000_v51, 0 }
 0x577   :  { %v4648_v54 = vand.u32 4294901760, %v4594_v12  ;;  %v4644_v23 = vand.u32 4294901760, %v4643_v39 }
 0x579   :  { %v4649_v19 = vsub.f32 %v4594_v12, %v4648_v54  ;;  %v4888_v12 = vld [vmem:[%s10477_s8 + $0x10] sm:$0xff] }
 0x57b   :  { %v4650_v15 = vand.u32 4294901760, %v4649_v19 }
 0x57e   :  { %4580 = vrot.lane.b32.xlu0 %v10005_v36, %s7548_s7 }
 0x5c0   :  { %v4583_v40 = vpop.permute.xlu2 %4582 }
 0x5c1   :  { %v4598_v50 = vsel %vm1975_vm1, %v4583_v40, 0  ;;  %v4651_v40 = vsub.f32 %v4649_v19, %v4650_v15 }
 0x5c2   :  { %v10019_v10 = vand.u32 4294901760, %v4598_v50 }
 0x5c4   :  { %v4682_v63 = vsub.f32 %v4598_v50, %v10019_v10 }
 0x5c6   :  { %v4683_v34 = vand.u32 4294901760, %v4682_v63 }
 0x5c8   :  { %v4684_v32 = vsub.f32 %v4682_v63, %v4683_v34 }
 0x5ca   :  { %v4685_v13 = vand.u32 4294901760, %v4684_v32 }
 0x5d0   :  { %v4946_v33 = vpop.permute.xlu2 %4945 }
 0x5d1   :  { %v10014_v3 = vand.u32 4294901760, %v4946_v33 }
 0x5d3   :  { %v10023_v46 = vsub.f32 %v4946_v33, %v10014_v3 }
 0x5d5   :  { %v5030_v43 = vand.u32 4294901760, %v10023_v46 }
 0x5d7   :  { %v5031_v27 = vsub.f32 %v10023_v46, %v5030_v43 }
 0x5d9   :  { %v5032_v61 = vand.u32 4294901760, %v5031_v27 }
 0x5e0   :  { %v4585_v14 = vpop.permute.xlu1 %4584 }
 0x5e1   :  { %v4600_v53 = vsel %vm1975_vm1, %v4585_v14, 0  ;;  %v4652_v14 = vand.u32 4294901760, %v4651_v40 }
 0x5e2   :  { %v10009_v28 = vand.u32 4294901760, %v4600_v53 }
 0x5e4   :  { %v4676_v31 = vsub.f32 %v4600_v53, %v10009_v28 }
 0x5e6   :  { %v4677_v17 = vand.u32 4294901760, %v4676_v31 }
 0x5e8   :  { %v4587_v22 = vpop.permute.xlu0 %4586  ;;  %v4678_v52 = vsub.f32 %v4676_v31, %v4677_v17 }
 0x5e9   :  { %v4602_v38 = vsel %vm1975_vm1, %v4587_v22, 0 }
 0x5ea   :  { %v4616_v55 = vand.u32 4294901760, %v4602_v38  ;;  %v4679_v56 = vand.u32 4294901760, %v4678_v52 }
 0x5ec   :  { %v4670_v58 = vsub.f32 %v4602_v38, %v4616_v55  ;;  %4617 = vmatpush.xpose.msra.mxu2 %v4616_v55  ;;  %4768 = vmatpush.xpose.msrb.mxu1 %v4616_v55 }
 0x5ee   :  { %v4671_v57 = vand.u32 4294901760, %v4670_v58  ;;  %4724 = vmatpush.xpose.msrb.mxu0 %v4670_v58 }
 0x5f0   :  { %v4672_v1 = vsub.f32 %v4670_v58, %v4671_v57  ;;  %4619 = vmatpush.xpose.msra.mxu2 %v10009_v28  ;;  %4770 = vmatpush.xpose.msrb.mxu1 %v10009_v28  ;;  %v4581_v0 = vpop.permute.xlu0 %4580 }
 0x5f1   :  { %v4596_v21 = vsel %vm1975_vm1, %v4581_v0, 0 }
 0x5f2   :  { %v4673_v42 = vand.u32 4294901760, %v4672_v1  ;;  %v4622_v25 = vand.u32 4294901760, %v4596_v21  ;;  %4727 = vmatpush.xpose.msrb.mxu0 %v4676_v31 }
 0x5f4   :  { %v4688_v5 = vsub.f32 %v4596_v21, %v4622_v25  ;;  %4621 = vmatpush.xpose.msra.mxu2 %v10019_v10  ;;  %4674 = vmatpush.xpose.msra.mxu3 %v4673_v42 }
 0x5f5   :  { %4772 = vmatpush.xpose.msrb.mxu1 %v10019_v10 }
 0x5f6   :  { %v4689_v7 = vand.u32 4294901760, %v4688_v5  ;;  %4730 = vmatpush.xpose.msrb.mxu0 %v4682_v63 }
 0x5f8   :  { %4623 = vmatpush.xpose.msra.mxu2 %v4622_v25  ;;  %4680 = vmatpush.xpose.msra.mxu3 %v4679_v56  ;;  %v4690_v24 = vsub.f32 %v4688_v5, %v4689_v7 }
 0x5f9   :  { %4774 = vmatpush.xpose.msrb.mxu1 %v4622_v25 }
 0x5fa   :  { %4733 = vmatpush.xpose.msrb.mxu0 %v4688_v5  ;;  %v4691_v47 = vand.u32 4294901760, %v4690_v24 }
 0x5fb   :  { %4629 = vmatmul.f32.vlgmr.msra.gmra.mxu2 %v4628_v35 }
 0x5fc   :  { %4815 = vmatpush.xpose.msrb.mxu2 %v4671_v57  ;;  %4778 = vmatmul.f32.vlgmr.msrb.gmra.mxu1 %v4626_v26 }
 0x5fd   :  { %5033 = vmatpush.msra.mxu1 %v5032_v61  ;;  %4686 = vmatpush.xpose.msra.mxu3 %v4685_v13 }
 0x5fe   :  { %4976 = vmatpush.msra.mxu0 %v10014_v3 }
 0x5ff   :  { %4736 = vmatmul.f32.vlgmr.msrb.gmra.mxu0 %v4625_v62 }
 0x600   :  { %4819 = vmatpush.xpose.msrb.mxu2 %v4677_v17 }
 0x601   :  { %4692 = vmatpush.xpose.msra.mxu3 %v4691_v47 }
 0x603   :  { %4637 = vmatmul.f32.gmra.mxu2 %v4636_v9 }
 0x604   :  { %4823 = vmatpush.xpose.msrb.mxu2 %v4683_v34  ;;  %4694 = vmatmul.f32.vlgmr.msra.gmra.mxu3 %v10017_v60  ;;  %v4886_v34 = vld [vmem:[%s10477_s8] sm:$0xff] }
 0x605   :  { %4858 = vmatpush.xpose.msrb.mxu3 %v4616_v55  ;;  %4784 = vmatmul.f32.gmra.mxu1 %v4634_v30 }
 0x607   :  { %4741 = vmatmul.f32.gmra.mxu0 %v4633_v4 }
 0x608   :  { %4827 = vmatpush.xpose.msrb.mxu2 %v4689_v7 }
 0x609   :  { %4860 = vmatpush.xpose.msrb.mxu3 %v10009_v28 }
 0x60b   :  { %4645 = vmatmul.f32.gmra.mxu2 %v4644_v23 }
 0x60c   :  { %5083 = vmatpush.msra.mxu2 %v10023_v46  ;;  %4698 = vmatmul.f32.gmra.mxu3 %v10033_v48 }
 0x60d   :  { %4862 = vmatpush.xpose.msrb.mxu3 %v10019_v10  ;;  %4790 = vmatmul.f32.gmra.mxu1 %v4642_v29 }
 0x60f   :  { %4746 = vmatmul.f32.gmra.mxu0 %v4641_v11 }
 0x611   :  { %4864 = vmatpush.xpose.msrb.mxu3 %v4622_v25 }
 0x613   :  { %4653 = vmatmul.f32.gmra.mxu2 %v4652_v14 }
 0x614   :  { %4702 = vmatmul.f32.gmra.mxu3 %v4640_v49 }
 0x615   :  { %5127 = vmatpush.msra.mxu3 %v10014_v3  ;;  %4796 = vmatmul.f32.gmra.mxu1 %v4650_v15 }
 0x617   :  { %4751 = vmatmul.f32.gmra.mxu0 %v4649_v19 }
 0x61b   :  { %4829 = vmatmul.f32.vlgmr.msrb.gmra.mxu2 %v10017_v60 }
 0x61c   :  { %4706 = vmatmul.f32.gmra.mxu3 %v4648_v54 }
 0x623   :  { %4833 = vmatmul.f32.gmra.mxu2 %v10033_v48 }
 0x624   :  { %4866 = vmatmul.f32.vlgmr.msrb.gmra.mxu3 %v10017_v60 }
 0x62b   :  { %4837 = vmatmul.f32.gmra.mxu2 %v4640_v49 }
 0x62c   :  { %4870 = vmatmul.f32.gmra.mxu3 %v10033_v48 }
 0x633   :  { %4841 = vmatmul.f32.gmra.mxu2 %v4648_v54 }
 0x634   :  { %4874 = vmatmul.f32.gmra.mxu3 %v4640_v49 }
 0x63c   :  { %4878 = vmatmul.f32.gmra.mxu3 %v4648_v54 }
 0x679   :  { %v4779_v55 = vpop.f32.mrf.mxu1 }
 0x67c   :  { %v4737_v10 = vpop.f32.mrf.mxu0 }
 0x67e   :  { %v4630_v53 = vpop.f32.mrf.mxu2 }
 0x682   :  { %v4785_v26 = vpop.f32.mrf.mxu1 }
 0x684   :  { %v4742_v57 = vpop.f32.mrf.mxu0 }
 0x686   :  { %v4638_v33 = vpop.f32.mrf.mxu2 }
 0x687   :  { %v4695_v28 = vpop.f32.mrf.mxu3 }
 0x688   :  { %v4696_v31 = vadd.f32 %v4695_v28, %v4630_v53 }
 0x68a   :  { %v4738_v63 = vadd.f32 %v4737_v10, %v4696_v31  ;;  %v4791_v35 = vpop.f32.mrf.mxu1 }
 0x68c   :  { %v4780_v17 = vadd.f32 %v4779_v55, %v4738_v63  ;;  %v4747_v4 = vpop.f32.mrf.mxu0 }
 0x68e   :  { %v4646_v37 = vpop.f32.mrf.mxu2 }
 0x68f   :  { %v4699_v50 = vpop.f32.mrf.mxu3 }
 0x690   :  { %v4700_v60 = vadd.f32 %v4699_v50, %v4638_v33  ;;  %v4889_v50 = vld [vmem:[%s10477_s8 + $0x18] sm:$0xff] }
 0x692   :  { %v4743_v0 = vadd.f32 %v4742_v57, %v4700_v60  ;;  %v4797_v15 = vpop.f32.mrf.mxu1 }
 0x694   :  { %v4786_v52 = vadd.f32 %v4785_v26, %v4743_v0  ;;  %v4752_v19 = vpop.f32.mrf.mxu0 }
 0x696   :  { %v4654_v22 = vpop.f32.mrf.mxu2 }
 0x697   :  { %v4703_v38 = vpop.f32.mrf.mxu3 }
 0x698   :  { %v4704_v25 = vadd.f32 %v4703_v38, %v4646_v37 }
 0x69a   :  { %v4748_v56 = vadd.f32 %v4747_v4, %v4704_v25 }
 0x69c   :  { %v4792_v49 = vadd.f32 %v4791_v35, %v4748_v56 }
 0x69e   :  { %v4830_v62 = vpop.f32.mrf.mxu2 }
 0x69f   :  { %v4707_v58 = vpop.f32.mrf.mxu3  ;;  %v4831_v59 = vadd.f32 %v4830_v62, %v4780_v17 }
 0x6a0   :  { %v4708_v39 = vadd.f32 %v4707_v58, %v4654_v22 }
 0x6a2   :  { %v4753_v23 = vadd.f32 %v4752_v19, %v4708_v39 }
 0x6a4   :  { %v4798_v14 = vadd.f32 %v4797_v15, %v4753_v23 }
 0x6a6   :  { %v4834_v48 = vpop.f32.mrf.mxu2 }
 0x6a7   :  { %v4867_v1 = vpop.f32.mrf.mxu3  ;;  %v4835_v5 = vadd.f32 %v4834_v48, %v4786_v52 }
 0x6a8   :  { %v4868_v21 = vadd.f32 %v4867_v1, %v4831_v59 }
 0x6aa   :  { %v4882_v42 = vmul.f32 0.35355338, %v4868_v21 }
 0x6ac   :  { %v4890_v27 = vadd.f32 %v4886_v34, %v4882_v42 }
 0x6ae   :  { %v4895_v8 = vsel %vm4894_vm3, %v4890_v27, -inf  ;;  %v4838_v30 = vpop.f32.mrf.mxu2 }
 0x6af   :  { %v4871_v7 = vpop.f32.mrf.mxu3  ;;  %4896 = vmax.xlane.f32.xlu1 %v4895_v8  ;;  %v4839_v24 = vadd.f32 %v4838_v30, %v4792_v49 }
 0x6b0   :  { %v4872_v32 = vadd.f32 %v4871_v7, %v4835_v5 }
 0x6b2   :  { %v4883_v61 = vmul.f32 0.35355338, %v4872_v32 }
 0x6b4   :  { %v4891_v13 = vadd.f32 %v4887_v2, %v4883_v61 }
 0x6b6   :  { %v4898_v20 = vsel %vm4894_vm3, %v4891_v13, -inf  ;;  %v4842_v40 = vpop.f32.mrf.mxu2 }
 0x6b7   :  { %v4875_v11 = vpop.f32.mrf.mxu3  ;;  %4899 = vmax.xlane.f32.xlu2 %v4898_v20  ;;  %v4843_v33 = vadd.f32 %v4842_v40, %v4798_v14 }
 0x6b8   :  { %v4876_v47 = vadd.f32 %v4875_v11, %v4839_v24 }
 0x6ba   :  { %v4884_v9 = vmul.f32 0.35355338, %v4876_v47 }
 0x6bc   :  { %v4892_v29 = vadd.f32 %v4888_v12, %v4884_v9 }
 0x6be   :  { %v4901_v54 = vsel %vm4894_vm3, %v4892_v29, -inf }
 0x6bf   :  { %4902 = vmax.xlane.f32.xlu0 %v4901_v54  ;;  %v4879_v53 = vpop.f32.mrf.mxu3 }
 0x6c0   :  { %v4880_v28 = vadd.f32 %v4879_v53, %v4843_v33 }
 0x6c2   :  { %v4885_v37 = vmul.f32 0.35355338, %v4880_v28 }
 0x6c4   :  { %v10077_v38 = vadd.f32 %v4889_v50, %v4885_v37 }
 0x6c6   :  { %v4904_v10 = vsel %vm4894_vm3, %v10077_v38, -inf }
 0x6c8   :  { %4943 = vrot.lane.b32.xlu1 %v9997_v6, %s7549_s22 }
 0x6cf   :  { %4939 = vrot.lane.b32.xlu2 %v10005_v36, %s7549_s22 }
 0x6d3   :  { %4941 = vrot.lane.b32.xlu0 %v9994_v45, %s7549_s22 }
 0x6f8   :  { %4905 = vmax.xlane.f32.xlu2 %v4904_v10 }
 0x710   :  { %5256 = vrot.lane.b32.xlu2 %v10000_v51, %s7550_s28 }
 0x718   :  { %5254 = vrot.lane.b32.xlu2 %v9997_v6, %s7550_s28 }
 0x720   :  { %5252 = vrot.lane.b32.xlu2 %v9994_v45, %s7550_s28 }
 0x722   :  { %v4897_v22 = vpop.xlane.xlu1 %4896 }
 0x723   :  { %v4907_v31 = vsub.f32 %v4890_v27, %v4897_v22 }
 0x725   :  { %v4911_v55 = vmul.f32 1.442695, %v4907_v31 }
 0x727   :  { %7513 = vpow2.f32 %v4911_v55 }
 0x728   :  { %5250 = vrot.lane.b32.xlu2 %v10005_v36, %s7550_s28 }
 0x72a   :  { %v4900_v58 = vpop.xlane.xlu2 %4899 }
 0x72b   :  { %v4908_v62 = vsub.f32 %v4891_v13, %v4900_v58 }
 0x72d   :  { %v10085_v63 = vpop.eup %7513  ;;  %v4913_v60 = vmul.f32 1.442695, %v4908_v62 }
 0x72e   :  { %v4919_v17 = vsel %vm4894_vm3, %v10085_v63, 0.0 }
 0x72f   :  { %7515 = vpow2.f32 %v4913_v60  ;;  %4920 = vadd.xlane.f32.xlu1 %v4919_v17 }
 0x730   :  { %5242 = vrot.lane.b32.xlu2 %v10005_v36, %s7551_s30 }
 0x732   :  { %v4903_v57 = vpop.xlane.xlu0 %4902  ;;  %v4940_v42 = vpop.permute.xlu2 %4939 }
 0x733   :  { %v4909_v59 = vsub.f32 %v4892_v29, %v4903_v57  ;;  %v4981_v5 = vand.u32 4294901760, %v4940_v42 }
 0x735   :  { %v10091_v1 = vpop.eup %7515  ;;  %v4915_v0 = vmul.f32 1.442695, %v4909_v59  ;;  %v5047_v7 = vsub.f32 %v4940_v42, %v4981_v5 }
 0x736   :  { %v4922_v21 = vsel %vm4894_vm3, %v10091_v1, 0.0 }
 0x737   :  { %7517 = vpow2.f32 %v4915_v0  ;;  %4923 = vadd.xlane.f32.xlu0 %v4922_v21  ;;  %v5048_v61 = vand.u32 4294901760, %v5047_v7 }
 0x738   :  { %5248 = vrot.lane.b32.xlu2 %v10000_v51, %s7551_s30 }
 0x739   :  { %v5049_v49 = vsub.f32 %v5047_v7, %v5048_v61 }
 0x73a   :  { %v4944_v26 = vpop.permute.xlu1 %4943 }
 0x73b   :  { %v4977_v48 = vand.u32 4294901760, %v4944_v26  ;;  %v5050_v24 = vand.u32 4294901760, %v5049_v49 }
 0x73d   :  { %v10097_v34 = vpop.eup %7517  ;;  %v5035_v25 = vsub.f32 %v4944_v26, %v4977_v48  ;;  %4978 = vmatpush.msra.mxu0 %v4977_v48  ;;  %5129 = vmatpush.msra.mxu3 %v4977_v48 }
 0x73e   :  { %v4925_v52 = vsel %vm4894_vm3, %v10097_v34, 0.0 }
 0x73f   :  { %v5036_v27 = vand.u32 4294901760, %v5035_v25  ;;  %4926 = vadd.xlane.f32.xlu1 %v4925_v52  ;;  %5086 = vmatpush.msra.mxu2 %v5035_v25 }
 0x741   :  { %v5037_v8 = vsub.f32 %v5035_v25, %v5036_v27 }
 0x743   :  { %v5038_v4 = vand.u32 4294901760, %v5037_v8 }
 0x745   :  { %v4942_v56 = vpop.permute.xlu0 %4941  ;;  %5039 = vmatpush.msra.mxu1 %v5038_v4 }
 0x746   :  { %v4979_v32 = vand.u32 4294901760, %v4942_v56 }
 0x748   :  { %v5041_v2 = vsub.f32 %v4942_v56, %v4979_v32  ;;  %4980 = vmatpush.msra.mxu0 %v4979_v32  ;;  %5131 = vmatpush.msra.mxu3 %v4979_v32 }
 0x74a   :  { %4982 = vmatpush.msra.mxu0 %v4981_v5  ;;  %5089 = vmatpush.msra.mxu2 %v5041_v2  ;;  %v5042_v35 = vand.u32 4294901760, %v5041_v2 }
 0x74b   :  { %5133 = vmatpush.msra.mxu3 %v4981_v5 }
 0x74c   :  { %5174 = vmatpush.msrb.mxu0 %v5030_v43  ;;  %5092 = vmatpush.msra.mxu2 %v5047_v7  ;;  %v5043_v30 = vsub.f32 %v5041_v2, %v5042_v35 }
 0x74e   :  { %5178 = vmatpush.msrb.mxu0 %v5036_v27  ;;  %v5044_v13 = vand.u32 4294901760, %v5043_v30 }
 0x750   :  { %5182 = vmatpush.msrb.mxu0 %v5042_v35  ;;  %5045 = vmatpush.msra.mxu1 %v5044_v13 }
 0x752   :  { %5186 = vmatpush.msrb.mxu0 %v5048_v61  ;;  %5051 = vmatpush.msra.mxu1 %v5050_v24 }
 0x754   :  { %5217 = vmatpush.msrb.mxu1 %v10014_v3 }
 0x756   :  { %5219 = vmatpush.msrb.mxu1 %v4977_v48 }
 0x758   :  { %5221 = vmatpush.msrb.mxu1 %v4979_v32  ;;  %5244 = vrot.lane.b32.xlu1 %v9994_v45, %s7551_s30 }
 0x75a   :  { %5223 = vmatpush.msrb.mxu1 %v4981_v5 }
 0x76b   :  { %v4906_v46 = vpop.xlane.xlu2 %4905 }
 0x76c   :  { %v4910_v43 = vsub.f32 %v10077_v38, %v4906_v46 }
 0x76e   :  { %v4917_v20 = vmul.f32 1.442695, %v4910_v43 }
 0x770   :  { %7519 = vpow2.f32 %v4917_v20 }
 0x773   :  { %v5257_v11 = vpop.permute.xlu2 %5256 }
 0x774   :  { %v5272_v47 = vsel %vm1975_vm1, %v5257_v11, 0 }
 0x775   :  { %v5286_v12 = vand.u32 4294901760, %v5272_v47 }
 0x776   :  { %v10108_v9 = vpop.eup %7519 }
 0x777   :  { %v10110_v29 = vsub.f32 %v5272_v47, %v5286_v12  ;;  %5287 = vmatpush.xpose.msrb.mxu2 %v5286_v12  ;;  %v4928_v3 = vsel %vm4894_vm3, %v10108_v9, 0.0 }
 0x778   :  { %4929 = vadd.xlane.f32.xlu0 %v4928_v3 }
 0x779   :  { %v5341_v54 = vand.u32 4294901760, %v10110_v29 }
 0x77b   :  { %v5342_v39 = vsub.f32 %v10110_v29, %v5341_v54  ;;  %v5255_v19 = vpop.permute.xlu2 %5254 }
 0x77c   :  { %v5270_v23 = vsel %vm1975_vm1, %v5255_v19, 0 }
 0x77d   :  { %v5343_v15 = vand.u32 4294901760, %v5342_v39  ;;  %v5288_v40 = vand.u32 4294901760, %v5270_v23 }
 0x77f   :  { %v10117_v14 = vsub.f32 %v5270_v23, %v5288_v40  ;;  %5289 = vmatpush.xpose.msrb.mxu2 %v5288_v40  ;;  %5344 = vmatpush.xpose.msrb.mxu3 %v5343_v15 }
 0x781   :  { %v5347_v53 = vand.u32 4294901760, %v10117_v14 }
 0x783   :  { %v5253_v33 = vpop.permute.xlu2 %5252  ;;  %v5348_v28 = vsub.f32 %v10117_v14, %v5347_v53 }
 0x784   :  { %v5268_v37 = vsel %vm1975_vm1, %v5253_v33, 0 }
 0x785   :  { %v10122_v50 = vand.u32 4294901760, %v5268_v37  ;;  %v5349_v38 = vand.u32 4294901760, %v5348_v28 }
 0x787   :  { %v10125_v10 = vsub.f32 %v5268_v37, %v10122_v50  ;;  %5291 = vmatpush.xpose.msrb.mxu2 %v10122_v50  ;;  %5350 = vmatpush.xpose.msrb.mxu3 %v5349_v38 }
 0x789   :  { %v5353_v22 = vand.u32 4294901760, %v10125_v10 }
 0x78b   :  { %v5251_v31 = vpop.permute.xlu2 %5250  ;;  %v5354_v55 = vsub.f32 %v10125_v10, %v5353_v22 }
 0x78c   :  { %v5266_v58 = vsel %vm1975_vm1, %v5251_v31, 0  ;;  %5246 = vrot.lane.b32.xlu0 %v9997_v6, %s7551_s30 }
 0x78d   :  { %v5292_v62 = vand.u32 4294901760, %v5266_v58  ;;  %v5355_v60 = vand.u32 4294901760, %v5354_v55 }
 0x78f   :  { %v10133_v17 = vsub.f32 %v5266_v58, %v5292_v62  ;;  %5293 = vmatpush.xpose.msrb.mxu2 %v5292_v62  ;;  %5356 = vmatpush.xpose.msrb.mxu3 %v5355_v60 }
 0x791   :  { %v5359_v57 = vand.u32 4294901760, %v10133_v17 }
 0x793   :  { %v5360_v59 = vsub.f32 %v10133_v17, %v5359_v57  ;;  %v5243_v11 = vpop.permute.xlu2 %5242 }
 0x794   :  { %5615 = vrot.lane.b32.xlu0 %v10000_v51, %s7552_s4 }
 0x795   :  { %v5361_v0 = vand.u32 4294901760, %v5360_v59 }
 0x797   :  { %5362 = vmatpush.xpose.msrb.mxu3 %v5361_v0 }
 0x7a2   :  { %v4921_v21 = vpop.xlane.xlu1 %4920 }
 0x7a3   :  { %7521 = vrcp.f32 %v4921_v21 }
 0x7a9   :  { %v7522_v26 = vpop.eup %7521 }
 0x7aa   :  { %v4935_v48 = vmul.f32 %v7522_v26, %v10085_v63  ;;  %v4924_v42 = vpop.xlane.xlu0 %4923 }
 0x7ab   :  { %7523 = vrcp.f32 %v4924_v42 }
 0x7ac   :  { %v4952_v25 = vsel %vm4894_vm3, %v4935_v48, 0 }
 0x7ad   :  { %v10141_v52 = vand.u32 4294901760, %v4952_v25 }
 0x7af   :  { %v4984_v27 = vsub.f32 %v4952_v25, %v10141_v52  ;;  %5053 = vmatmul.f32.vlgmr.msra.gmra.mxu1 %v10141_v52 }
 0x7b0   :  { %5438 = vmatpush.xpose.msra.mxu1 %v5286_v12 }
 0x7b1   :  { %v7524_v5 = vpop.eup %7523  ;;  %5095 = vmatmul.f32.vlgmr.msra.gmra.mxu2 %v4984_v27  ;;  %v4985_v51 = vand.u32 4294901760, %v4984_v27 }
 0x7b2   :  { %v4936_v8 = vmul.f32 %v7524_v5, %v10091_v1  ;;  %5485 = vmatpush.xpose.msra.mxu2 %v5341_v54  ;;  %v4927_v4 = vpop.xlane.xlu1 %4926 }
 0x7b3   :  { %7525 = vrcp.f32 %v4927_v4  ;;  %5137 = vmatmul.f32.vlgmr.msra.gmra.mxu3 %v4985_v51  ;;  %v4986_v63 = vsub.f32 %v4984_v27, %v4985_v51 }
 0x7b4   :  { %5440 = vmatpush.xpose.msra.mxu1 %v5288_v40  ;;  %5528 = vmatpush.xpose.msra.mxu3 %v5286_v12  ;;  %v4955_v7 = vsel %vm4894_vm3, %v4936_v8, 0  ;;  %v5258_v12 = vsel %vm1975_vm1, %v5243_v11, 0 }
 0x7b5   :  { %v4987_v56 = vand.u32 4294901760, %v4986_v63  ;;  %v10147_v32 = vand.u32 4294901760, %v4955_v7 }
 0x7b6   :  { %5489 = vmatpush.xpose.msra.mxu2 %v5347_v53 }
 0x7b7   :  { %4988 = vmatmul.f32.vlgmr.msra.gmra.mxu0 %v4987_v56  ;;  %5057 = vmatmul.f32.gmra.mxu1 %v10147_v32  ;;  %v4992_v2 = vsub.f32 %v4955_v7, %v10147_v32 }
 0x7b8   :  { %5394 = vmatpush.xpose.msra.mxu0 %v10110_v29  ;;  %5442 = vmatpush.xpose.msra.mxu1 %v10122_v50  ;;  %v10164_v29 = vand.u32 4294901760, %v5258_v12 }
 0x7b9   :  { %v7526_v1 = vpop.eup %7525  ;;  %5530 = vmatpush.xpose.msra.mxu3 %v5288_v40  ;;  %5100 = vmatmul.f32.gmra.mxu2 %v4992_v2  ;;  %v4993_v61 = vand.u32 4294901760, %v4992_v2 }
 0x7ba   :  { %v4937_v35 = vmul.f32 %v7526_v1, %v10097_v34  ;;  %5493 = vmatpush.xpose.msra.mxu2 %v5353_v22  ;;  %v5295_v19 = vsub.f32 %v5258_v12, %v10164_v29 }
 0x7bb   :  { %5143 = vmatmul.f32.gmra.mxu3 %v4993_v61  ;;  %v4994_v30 = vsub.f32 %v4992_v2, %v4993_v61 }
 0x7bc   :  { %5397 = vmatpush.xpose.msra.mxu0 %v10117_v14  ;;  %5444 = vmatpush.xpose.msra.mxu1 %v5292_v62  ;;  %v4958_v49 = vsel %vm4894_vm3, %v4937_v35, 0  ;;  %v5296_v14 = vand.u32 4294901760, %v5295_v19 }
 0x7bd   :  { %5532 = vmatpush.xpose.msra.mxu3 %v10122_v50  ;;  %v4995_v13 = vand.u32 4294901760, %v4994_v30  ;;  %v10157_v24 = vand.u32 4294901760, %v4958_v49 }
 0x7be   :  { %5497 = vmatpush.xpose.msra.mxu2 %v5359_v57  ;;  %v5297_v37 = vsub.f32 %v5295_v19, %v5296_v14 }
 0x7bf   :  { %4996 = vmatmul.f32.gmra.mxu0 %v4995_v13  ;;  %5061 = vmatmul.f32.gmra.mxu1 %v10157_v24  ;;  %v5000_v46 = vsub.f32 %v4958_v49, %v10157_v24 }
 0x7c0   :  { %5400 = vmatpush.xpose.msra.mxu0 %v10125_v10  ;;  %v5298_v31 = vand.u32 4294901760, %v5297_v37 }
 0x7c1   :  { %5534 = vmatpush.xpose.msra.mxu3 %v5292_v62  ;;  %5105 = vmatmul.f32.gmra.mxu2 %v5000_v46  ;;  %v5001_v34 = vand.u32 4294901760, %v5000_v46  ;;  %v5249_v62 = vpop.permute.xlu2 %5248 }
 0x7c2   :  { %v5264_v57 = vsel %vm1975_vm1, %v5249_v62, 0 }
 0x7c3   :  { %5149 = vmatmul.f32.gmra.mxu3 %v5001_v34  ;;  %v5002_v43 = vsub.f32 %v5000_v46, %v5001_v34  ;;  %v5318_v21 = vand.u32 4294901760, %v5264_v57 }
 0x7c4   :  { %5403 = vmatpush.xpose.msra.mxu0 %v10133_v17 }
 0x7c5   :  { %v5003_v20 = vand.u32 4294901760, %v5002_v43  ;;  %v5319_v27 = vsub.f32 %v5264_v57, %v5318_v21 }
 0x7c7   :  { %5004 = vmatmul.f32.gmra.mxu0 %v5003_v20  ;;  %v5320_v8 = vand.u32 4294901760, %v5319_v27 }
 0x7c9   :  { %v5321_v63 = vsub.f32 %v5319_v27, %v5320_v8 }
 0x7ca   :  { %v5245_v54 = vpop.permute.xlu1 %5244 }
 0x7cb   :  { %v5260_v23 = vsel %vm1975_vm1, %v5245_v54, 0  ;;  %v5322_v7 = vand.u32 4294901760, %v5321_v63 }
 0x7cc   :  { %v5302_v53 = vand.u32 4294901760, %v5260_v23 }
 0x7ce   :  { %v5303_v50 = vsub.f32 %v5260_v23, %v5302_v53 }
 0x7d0   :  { %v5304_v55 = vand.u32 4294901760, %v5303_v50 }
 0x7d2   :  { %v5305_v17 = vsub.f32 %v5303_v50, %v5304_v55 }
 0x7d4   :  { %v5306_v48 = vand.u32 4294901760, %v5305_v17 }
 0x7eb   :  { %v4930_v47 = vpop.xlane.xlu0 %4929 }
 0x7ec   :  { %7527 = vrcp.f32 %v4930_v47 }
 0x7f2   :  { %v7528_v3 = vpop.eup %7527 }
 0x7f3   :  { %v4938_v39 = vmul.f32 %v7528_v3, %v10108_v9 }
 0x7f5   :  { %v4961_v15 = vsel %vm4894_vm3, %v4938_v39, 0 }
 0x7f6   :  { %v5007_v40 = vand.u32 4294901760, %v4961_v15 }
 0x7f8   :  { %5065 = vmatmul.f32.gmra.mxu1 %v5007_v40  ;;  %v5008_v33 = vsub.f32 %v4961_v15, %v5007_v40 }
 0x7fa   :  { %5110 = vmatmul.f32.gmra.mxu2 %v5008_v33  ;;  %v5009_v28 = vand.u32 4294901760, %v5008_v33 }
 0x7fc   :  { %5155 = vmatmul.f32.gmra.mxu3 %v5009_v28  ;;  %v5010_v38 = vsub.f32 %v5008_v33, %v5009_v28 }
 0x7fe   :  { %v5247_v10 = vpop.permute.xlu0 %5246  ;;  %v5011_v22 = vand.u32 4294901760, %v5010_v38 }
 0x7ff   :  { %v5262_v9 = vsel %vm1975_vm1, %v5247_v10, 0 }
 0x800   :  { %v5310_v58 = vand.u32 4294901760, %v5262_v9  ;;  %5012 = vmatmul.f32.gmra.mxu0 %v5011_v22  ;;  %5225 = vmatmul.f32.vlgmr.msrb.gmra.mxu1 %v10141_v52 }
 0x802   :  { %5299 = vmatmul.f32.vlgmr.msrb.gmra.mxu2 %v5298_v31  ;;  %v5311_v60 = vsub.f32 %v5262_v9, %v5310_v58 }
 0x804   :  { %5364 = vmatmul.f32.vlgmr.msrb.gmra.mxu3 %v10164_v29  ;;  %v5312_v26 = vand.u32 4294901760, %v5311_v60 }
 0x806   :  { %v5616_v59 = vpop.permute.xlu0 %5615  ;;  %v5313_v5 = vsub.f32 %v5311_v60, %v5312_v26 }
 0x807   :  { %v10174_v0 = vand.u32 4294901760, %v5616_v59 }
 0x808   :  { %5188 = vmatmul.f32.vlgmr.msrb.gmra.mxu0 %v10141_v52  ;;  %5229 = vmatmul.f32.gmra.mxu1 %v10147_v32  ;;  %v5314_v4 = vand.u32 4294901760, %v5313_v5 }
 0x809   :  { %v10179_v42 = vsub.f32 %v5616_v59, %v10174_v0  ;;  %5646 = vmatpush.msrb.mxu0 %v10174_v0  ;;  %5797 = vmatpush.msrb.mxu3 %v10174_v0 }
 0x80a   :  { %5307 = vmatmul.f32.gmra.mxu2 %v5306_v48  ;;  %v7492_v48 = vld [vmem:[%s10477_s8 + $0x20] sm:$0xff] }
 0x80b   :  { %v5700_v25 = vand.u32 4294901760, %v10179_v42  ;;  %5753 = vmatpush.msrb.mxu2 %v10179_v42 }
 0x80c   :  { %5368 = vmatmul.f32.gmra.mxu3 %v5302_v53 }
 0x80d   :  { %v5701_v52 = vsub.f32 %v10179_v42, %v5700_v25 }
 0x80f   :  { %v5702_v51 = vand.u32 4294901760, %v5701_v52 }
 0x810   :  { %5192 = vmatmul.f32.gmra.mxu0 %v10147_v32  ;;  %5233 = vmatmul.f32.gmra.mxu1 %v10157_v24 }
 0x811   :  { %5703 = vmatpush.msrb.mxu1 %v5702_v51 }
 0x812   :  { %5315 = vmatmul.f32.gmra.mxu2 %v5314_v4 }
 0x814   :  { %5372 = vmatmul.f32.gmra.mxu3 %v5310_v58 }
 0x818   :  { %5196 = vmatmul.f32.gmra.mxu0 %v10157_v24  ;;  %5237 = vmatmul.f32.gmra.mxu1 %v5007_v40 }
 0x81a   :  { %5323 = vmatmul.f32.gmra.mxu2 %v5322_v7 }
 0x81c   :  { %5376 = vmatmul.f32.gmra.mxu3 %v5318_v21 }
 0x820   :  { %5200 = vmatmul.f32.gmra.mxu0 %v5007_v40  ;;  %5448 = vmatmul.f32.vlgmr.msra.gmra.mxu1 %v5296_v14 }
 0x822   :  { %5499 = vmatmul.f32.vlgmr.msra.gmra.mxu2 %v10164_v29 }
 0x824   :  { %5536 = vmatmul.f32.vlgmr.msra.gmra.mxu3 %v10164_v29 }
 0x828   :  { %5406 = vmatmul.f32.vlgmr.msra.gmra.mxu0 %v5295_v19  ;;  %5454 = vmatmul.f32.gmra.mxu1 %v5304_v55 }
 0x82a   :  { %5503 = vmatmul.f32.gmra.mxu2 %v5302_v53 }
 0x82c   :  { %5540 = vmatmul.f32.gmra.mxu3 %v5302_v53  ;;  %v10193_v56 = vpop.f32.mrf.mxu1 }
 0x830   :  { %5411 = vmatmul.f32.gmra.mxu0 %v5303_v50  ;;  %5460 = vmatmul.f32.gmra.mxu1 %v5312_v26 }
 0x832   :  { %5507 = vmatmul.f32.gmra.mxu2 %v5310_v58 }
 0x834   :  { %5544 = vmatmul.f32.gmra.mxu3 %v5310_v58  ;;  %v10195_v32 = vpop.f32.mrf.mxu0  ;;  %v10197_v2 = vpop.f32.mrf.mxu2 }
 0x835   :  { %v10199_v1 = vpop.f32.mrf.mxu1 }
 0x836   :  { %v10201_v61 = vpop.f32.mrf.mxu3 }
 0x838   :  { %5416 = vmatmul.f32.gmra.mxu0 %v5311_v60  ;;  %5466 = vmatmul.f32.gmra.mxu1 %v5320_v8 }
 0x83a   :  { %5511 = vmatmul.f32.gmra.mxu2 %v5318_v21 }
 0x83c   :  { %5548 = vmatmul.f32.gmra.mxu3 %v5318_v21  ;;  %v10203_v35 = vpop.f32.mrf.mxu0  ;;  %v10205_v30 = vpop.f32.mrf.mxu2 }
 0x83d   :  { %v10207_v49 = vpop.f32.mrf.mxu1 }
 0x83e   :  { %v10209_v13 = vpop.f32.mrf.mxu3 }
 0x840   :  { %5421 = vmatmul.f32.gmra.mxu0 %v5319_v27 }
 0x844   :  { %v10211_v24 = vpop.f32.mrf.mxu0  ;;  %v10213_v46 = vpop.f32.mrf.mxu2 }
 0x846   :  { %v10217_v43 = vpop.f32.mrf.mxu3 }
 0x875   :  { %v10215_v34 = vpop.f32.mrf.mxu1 }
 0x87d   :  { %v10219_v20 = vpop.f32.mrf.mxu0  ;;  %v10221_v11 = vpop.f32.mrf.mxu2 }
 0x87e   :  { %v10223_v47 = vpop.f32.mrf.mxu1 }
 0x87f   :  { %v10225_v12 = vpop.f32.mrf.mxu3 }
 0x885   :  { %v10227_v29 = vpop.f32.mrf.mxu0  ;;  %v5300_v3 = vpop.f32.mrf.mxu2 }
 0x886   :  { %v10229_v54 = vpop.f32.mrf.mxu1 }
 0x887   :  { %v5365_v39 = vpop.f32.mrf.mxu3 }
 0x888   :  { %v5366_v22 = vadd.f32 %v5365_v39, %v5300_v3 }
 0x88d   :  { %v10231_v19 = vpop.f32.mrf.mxu0  ;;  %v5308_v23 = vpop.f32.mrf.mxu2 }
 0x88e   :  { %v10233_v15 = vpop.f32.mrf.mxu1 }
 0x88f   :  { %v5369_v40 = vpop.f32.mrf.mxu3 }
 0x890   :  { %v5370_v57 = vadd.f32 %v5369_v40, %v5308_v23  ;;  %v7493_v40 = vld [vmem:[%s10477_s8 + $0x28] sm:$0xff] }
 0x895   :  { %v10235_v14 = vpop.f32.mrf.mxu0  ;;  %v5316_v53 = vpop.f32.mrf.mxu2 }
 0x896   :  { %v10237_v33 = vpop.f32.mrf.mxu1 }
 0x897   :  { %v5373_v28 = vpop.f32.mrf.mxu3 }
 0x898   :  { %v5374_v7 = vadd.f32 %v5373_v28, %v5316_v53  ;;  %v7494_v28 = vld [vmem:[%s10477_s8 + $0x30] sm:$0xff] }
 0x89d   :  { %v10239_v37 = vpop.f32.mrf.mxu0  ;;  %v5324_v50 = vpop.f32.mrf.mxu2 }
 0x89e   :  { %v5449_v10 = vpop.f32.mrf.mxu1 }
 0x89f   :  { %v5377_v38 = vpop.f32.mrf.mxu3 }
 0x8a5   :  { %v5407_v9 = vpop.f32.mrf.mxu0  ;;  %v5500_v31 = vpop.f32.mrf.mxu2 }
 0x8a6   :  { %v5408_v55 = vadd.f32 %v5407_v9, %v5366_v22  ;;  %v5455_v17 = vpop.f32.mrf.mxu1 }
 0x8a7   :  { %v5537_v58 = vpop.f32.mrf.mxu3 }
 0x8a8   :  { %v5450_v62 = vadd.f32 %v5449_v10, %v5408_v55 }
 0x8aa   :  { %v5501_v60 = vadd.f32 %v5500_v31, %v5450_v62 }
 0x8ac   :  { %v5538_v59 = vadd.f32 %v5537_v58, %v5501_v60 }
 0x8ad   :  { %v5412_v21 = vpop.f32.mrf.mxu0  ;;  %v5504_v26 = vpop.f32.mrf.mxu2 }
 0x8ae   :  { %v5552_v27 = vmul.f32 0.35355338, %v5538_v59  ;;  %v5413_v5 = vadd.f32 %v5412_v21, %v5370_v57  ;;  %v5461_v39 = vpop.f32.mrf.mxu1 }
 0x8af   :  { %v5541_v52 = vpop.f32.mrf.mxu3 }
 0x8b0   :  { %v5456_v51 = vadd.f32 %v5455_v17, %v5413_v5  ;;  %v5561_v8 = vadd.f32 %v7492_v48, %v5552_v27  ;;  %v5378_v17 = vadd.f32 %v5377_v38, %v5324_v50  ;;  %v7495_v50 = vld [vmem:[%s10477_s8 + $0x38] sm:$0xff] }
 0x8b2   :  { %v5505_v4 = vadd.f32 %v5504_v26, %v5456_v51  ;;  %v5565_v63 = vsel %vm4894_vm3, %v5561_v8, -inf }
 0x8b3   :  { %5566 = vmax.xlane.f32.xlu2 %v5565_v63 }
 0x8b4   :  { %v5542_v3 = vadd.f32 %v5541_v52, %v5505_v4 }
 0x8b5   :  { %v5417_v23 = vpop.f32.mrf.mxu0  ;;  %v5508_v9 = vpop.f32.mrf.mxu2 }
 0x8b6   :  { %v5553_v10 = vmul.f32 0.35355338, %v5542_v3  ;;  %v5418_v22 = vadd.f32 %v5417_v23, %v5374_v7  ;;  %v5467_v26 = vpop.f32.mrf.mxu1 }
 0x8b7   :  { %v5545_v58 = vpop.f32.mrf.mxu3 }
 0x8b8   :  { %v5462_v31 = vadd.f32 %v5461_v39, %v5418_v22  ;;  %v5562_v55 = vadd.f32 %v7493_v40, %v5553_v10 }
 0x8ba   :  { %v5509_v62 = vadd.f32 %v5508_v9, %v5462_v31  ;;  %v5568_v60 = vsel %vm4894_vm3, %v5562_v55, -inf }
 0x8bb   :  { %5569 = vmax.xlane.f32.xlu0 %v5568_v60 }
 0x8bc   :  { %v5546_v57 = vadd.f32 %v5545_v58, %v5509_v62 }
 0x8bd   :  { %v5422_v53 = vpop.f32.mrf.mxu0  ;;  %v5512_v5 = vpop.f32.mrf.mxu2 }
 0x8be   :  { %v5554_v59 = vmul.f32 0.35355338, %v5546_v57  ;;  %v5423_v21 = vadd.f32 %v5422_v53, %v5378_v17 }
 0x8bf   :  { %v5549_v4 = vpop.f32.mrf.mxu3 }
 0x8c0   :  { %v5468_v48 = vadd.f32 %v5467_v26, %v5423_v21  ;;  %v5563_v27 = vadd.f32 %v7494_v28, %v5554_v59 }
 0x8c2   :  { %v5513_v52 = vadd.f32 %v5512_v5, %v5468_v48  ;;  %v5571_v51 = vsel %vm4894_vm3, %v5563_v27, -inf }
 0x8c3   :  { %5572 = vmax.xlane.f32.xlu1 %v5571_v51 }
 0x8c4   :  { %v5550_v63 = vadd.f32 %v5549_v4, %v5513_v52 }
 0x8c6   :  { %v5555_v38 = vmul.f32 0.35355338, %v5550_v63 }
 0x8c8   :  { %v5564_v7 = vadd.f32 %v7495_v50, %v5555_v38 }
 0x8ca   :  { %v5574_v3 = vsel %vm4894_vm3, %v5564_v7, -inf }
 0x8cb   :  { %5575 = vmax.xlane.f32.xlu2 %v5574_v3 }
 0x8cf   :  { %5609 = vrot.lane.b32.xlu0 %v10005_v36, %s7552_s4 }
 0x926   :  { %v5567_v39 = vpop.xlane.xlu2 %5566 }
 0x927   :  { %v5577_v23 = vsub.f32 %v5561_v8, %v5567_v39 }
 0x929   :  { %v5581_v40 = vmul.f32 1.442695, %v5577_v23 }
 0x92b   :  { %7529 = vpow2.f32 %v5581_v40 }
 0x92e   :  { %v5570_v10 = vpop.xlane.xlu0 %5569 }
 0x92f   :  { %v5578_v22 = vsub.f32 %v5562_v55, %v5570_v10 }
 0x931   :  { %v7530_v9 = vpop.eup %7529  ;;  %v5583_v31 = vmul.f32 1.442695, %v5578_v22 }
 0x932   :  { %v5589_v58 = vsel %vm4894_vm3, %v7530_v9, 0.0 }
 0x933   :  { %7531 = vpow2.f32 %v5583_v31  ;;  %5590 = vadd.xlane.f32.xlu2 %v5589_v58 }
 0x936   :  { %v5573_v62 = vpop.xlane.xlu1 %5572 }
 0x937   :  { %v5579_v60 = vsub.f32 %v5563_v27, %v5573_v62 }
 0x939   :  { %v7532_v17 = vpop.eup %7531  ;;  %v5585_v57 = vmul.f32 1.442695, %v5579_v60 }
 0x93a   :  { %v5592_v53 = vsel %vm4894_vm3, %v7532_v17, 0.0 }
 0x93b   :  { %7533 = vpow2.f32 %v5585_v57  ;;  %5593 = vadd.xlane.f32.xlu1 %v5592_v53 }
 0x93e   :  { %v5576_v55 = vpop.xlane.xlu2 %5575 }
 0x93f   :  { %v5580_v28 = vsub.f32 %v5564_v7, %v5576_v55 }
 0x941   :  { %v7534_v36 = vpop.eup %7533  ;;  %v5587_v59 = vmul.f32 1.442695, %v5580_v28  ;;  %v5610_v5 = vpop.permute.xlu0 %5609 }
 0x942   :  { %v5595_v8 = vsel %vm4894_vm3, %v7534_v36, 0.0  ;;  %v5651_v58 = vand.u32 4294901760, %v5610_v5 }
 0x943   :  { %5596 = vadd.xlane.f32.xlu0 %v5595_v8  ;;  %7535 = vpow2.f32 %v5587_v59 }
 0x944   :  { %v5717_v57 = vsub.f32 %v5610_v5, %v5651_v58 }
 0x949   :  { %v10266_v21 = vpop.eup %7535 }
 0x94a   :  { %v5598_v26 = vsel %vm4894_vm3, %v10266_v21, 0.0 }
 0x94b   :  { %5613 = vrot.lane.b32.xlu2 %v9997_v6, %s7552_s4 }
 0x954   :  { %5611 = vrot.lane.b32.xlu1 %v9994_v45, %s7552_s4 }
 0x974   :  { %5599 = vadd.xlane.f32.xlu2 %v5598_v26 }
 0x9a6   :  { %v5591_v48 = vpop.xlane.xlu2 %5590 }
 0x9a7   :  { %7537 = vrcp.f32 %v5591_v48 }
 0x9ad   :  { %v7538_v6 = vpop.eup %7537 }
 0x9ae   :  { %v5614_v27 = vpop.permute.xlu2 %5613  ;;  %v5594_v52 = vpop.xlane.xlu1 %5593  ;;  %v5605_v4 = vmul.f32 %v7538_v6, %v7530_v9 }
 0x9af   :  { %v10270_v51 = vand.u32 4294901760, %v5614_v27  ;;  %7539 = vrcp.f32 %v5594_v52 }
 0x9b0   :  { %v5622_v38 = vsel %vm4894_vm3, %v5605_v4, 0 }
 0x9b1   :  { %v5705_v45 = vsub.f32 %v5614_v27, %v10270_v51  ;;  %5648 = vmatpush.msrb.mxu0 %v10270_v51  ;;  %5799 = vmatpush.msrb.mxu3 %v10270_v51  ;;  %v10276_v23 = vand.u32 4294901760, %v5622_v38 }
 0x9b3   :  { %v5706_v63 = vand.u32 4294901760, %v5705_v45  ;;  %5756 = vmatpush.msrb.mxu2 %v5705_v45  ;;  %v5654_v10 = vsub.f32 %v5622_v38, %v10276_v23 }
 0x9b5   :  { %v5707_v50 = vsub.f32 %v5705_v45, %v5706_v63  ;;  %v7540_v39 = vpop.eup %7539  ;;  %v5655_v62 = vand.u32 4294901760, %v5654_v10 }
 0x9b6   :  { %v5597_v7 = vpop.xlane.xlu0 %5596  ;;  %v5606_v40 = vmul.f32 %v7540_v39, %v7532_v17  ;;  %v5718_v17 = vand.u32 4294901760, %v5717_v57 }
 0x9b7   :  { %v5708_v3 = vand.u32 4294901760, %v5707_v50  ;;  %7541 = vrcp.f32 %v5597_v7  ;;  %v5656_v8 = vsub.f32 %v5654_v10, %v5655_v62 }
 0x9b8   :  { %v5625_v22 = vsel %vm4894_vm3, %v5606_v40, 0  ;;  %v5719_v5 = vsub.f32 %v5717_v57, %v5718_v17 }
 0x9b9   :  { %5709 = vmatpush.msrb.mxu1 %v5708_v3  ;;  %v10280_v9 = vand.u32 4294901760, %v5625_v22  ;;  %v5657_v27 = vand.u32 4294901760, %v5656_v8 }
 0x9ba   :  { %v5720_v38 = vand.u32 4294901760, %v5719_v5 }
 0x9bb   :  { %v5662_v55 = vsub.f32 %v5625_v22, %v10280_v9 }
 0x9bd   :  { %v7542_v31 = vpop.eup %7541  ;;  %v5663_v52 = vand.u32 4294901760, %v5662_v55 }
 0x9be   :  { %v5607_v60 = vmul.f32 %v7542_v31, %v7534_v36 }
 0x9bf   :  { %v5664_v45 = vsub.f32 %v5662_v55, %v5663_v52 }
 0x9c0   :  { %v5628_v28 = vsel %vm4894_vm3, %v5607_v60, 0  ;;  %v7496_v60 = vld [vmem:[%s10478_s9 + $0x8] sm:$0xff] }
 0x9c1   :  { %v5669_v48 = vand.u32 4294901760, %v5628_v28  ;;  %v5665_v7 = vand.u32 4294901760, %v5664_v45 }
 0x9c3   :  { %v5670_v4 = vsub.f32 %v5628_v28, %v5669_v48 }
 0x9c5   :  { %v5671_v3 = vand.u32 4294901760, %v5670_v4 }
 0x9c6   :  { %v5612_v53 = vpop.permute.xlu1 %5611 }
 0x9c7   :  { %v5649_v59 = vand.u32 4294901760, %v5612_v53  ;;  %v5672_v42 = vsub.f32 %v5670_v4, %v5671_v3 }
 0x9c9   :  { %v5711_v26 = vsub.f32 %v5612_v53, %v5649_v59  ;;  %5650 = vmatpush.msrb.mxu0 %v5649_v59  ;;  %5801 = vmatpush.msrb.mxu3 %v5649_v59 }
 0x9cb   :  { %5652 = vmatpush.msrb.mxu0 %v5651_v58  ;;  %5759 = vmatpush.msrb.mxu2 %v5711_v26  ;;  %v5712_v6 = vand.u32 4294901760, %v5711_v26 }
 0x9cc   :  { %5803 = vmatpush.msrb.mxu3 %v5651_v58  ;;  %5658 = vmatmul.f32.vlgmr.msrb.gmra.mxu0 %v5657_v27 }
 0x9cd   :  { %5807 = vmatmul.f32.vlgmr.msrb.gmra.mxu3 %v5655_v62  ;;  %5844 = vmatpush.msra.mxu0 %v5700_v25  ;;  %v5713_v36 = vsub.f32 %v5711_v26, %v5712_v6  ;;  %v5673_v25 = vand.u32 4294901760, %v5672_v42  ;;  %v5241_v42 = vld [vmem:[%s10478_s9] sm:$0xff] }
 0x9ce   :  { %5762 = vmatpush.msrb.mxu2 %v5717_v57  ;;  %v5940_v57 = vand.u32 4294901760, %v7496_v60 }
 0x9cf   :  { %5765 = vmatmul.f32.vlgmr.msrb.gmra.mxu2 %v5654_v10  ;;  %5848 = vmatpush.msra.mxu0 %v5706_v63  ;;  %v5714_v50 = vand.u32 4294901760, %v5713_v36 }
 0x9d0   :  { %v5991_v8 = vsub.f32 %v7496_v60, %v5940_v57  ;;  %5941 = vmatpush.msra.mxu2 %v5940_v57 }
 0x9d1   :  { %5852 = vmatpush.msra.mxu0 %v5712_v6  ;;  %5715 = vmatpush.msrb.mxu1 %v5714_v50 }
 0x9d3   :  { %5856 = vmatpush.msra.mxu0 %v5718_v17  ;;  %5721 = vmatpush.msrb.mxu1 %v5720_v38 }
 0x9d4   :  { %5666 = vmatmul.f32.gmra.mxu0 %v5665_v7  ;;  %5723 = vmatmul.f32.vlgmr.msrb.gmra.mxu1 %v10276_v23 }
 0x9d5   :  { %5813 = vmatmul.f32.gmra.mxu3 %v5663_v52  ;;  %5887 = vmatpush.msra.mxu1 %v10174_v0 }
 0x9d6   :  { %6030 = vmatpush.msrb.mxu0 %v5991_v8 }
 0x9d7   :  { %5770 = vmatmul.f32.gmra.mxu2 %v5662_v55  ;;  %5889 = vmatpush.msra.mxu1 %v10270_v51 }
 0x9d9   :  { %5891 = vmatpush.msra.mxu1 %v5649_v59 }
 0x9db   :  { %5893 = vmatpush.msra.mxu1 %v5651_v58 }
 0x9dc   :  { %5674 = vmatmul.f32.gmra.mxu0 %v5673_v25  ;;  %5727 = vmatmul.f32.gmra.mxu1 %v10280_v9 }
 0x9dd   :  { %5819 = vmatmul.f32.gmra.mxu3 %v5671_v3  ;;  %6068 = vmatpush.msrb.mxu1 %v5940_v57  ;;  %v5055_v3 = vadd.f32 %v10193_v56, %v10195_v32 }
 0x9df   :  { %5775 = vmatmul.f32.gmra.mxu2 %v5670_v4 }
 0x9e4   :  { %5731 = vmatmul.f32.gmra.mxu1 %v5669_v48 }
 0x9e7   :  { %v5600_v63 = vpop.xlane.xlu2 %5599 }
 0x9e8   :  { %7543 = vrcp.f32 %v5600_v63 }
 0x9ee   :  { %v7544_v39 = vpop.eup %7543 }
 0x9ef   :  { %v5608_v40 = vmul.f32 %v7544_v39, %v10266_v21  ;;  %v6191_v39 = vand.u32 4294901760, %v5241_v42 }
 0x9f1   :  { %v5631_v0 = vsel %vm4894_vm3, %v5608_v40, 0 }
 0x9f2   :  { %v5677_v10 = vand.u32 4294901760, %v5631_v0 }
 0x9f4   :  { %5735 = vmatmul.f32.gmra.mxu1 %v5677_v10  ;;  %v5678_v22 = vsub.f32 %v5631_v0, %v5677_v10 }
 0x9f6   :  { %5780 = vmatmul.f32.gmra.mxu2 %v5678_v22  ;;  %v5679_v51 = vand.u32 4294901760, %v5678_v22 }
 0x9f8   :  { %5825 = vmatmul.f32.gmra.mxu3 %v5679_v51  ;;  %v5680_v31 = vsub.f32 %v5678_v22, %v5679_v51  ;;  %v5097_v22 = vadd.f32 %v10197_v2, %v5055_v3  ;;  %v5059_v2 = vadd.f32 %v10199_v1, %v10203_v35 }
 0x9fa   :  { %v5681_v58 = vand.u32 4294901760, %v5680_v31 }
 0x9fc   :  { %5682 = vmatmul.f32.gmra.mxu0 %v5681_v58  ;;  %5895 = vmatmul.f32.vlgmr.msra.gmra.mxu1 %v10276_v23 }
 0xa04   :  { %5858 = vmatmul.f32.vlgmr.msra.gmra.mxu0 %v10276_v23  ;;  %5899 = vmatmul.f32.gmra.mxu1 %v10280_v9  ;;  %v5992_v23 = vand.u32 4294901760, %v5991_v8 }
 0xa05   :  { %6192 = vmatpush.msra.mxu0 %v6191_v39 }
 0xa06   :  { %v5993_v55 = vsub.f32 %v5991_v8, %v5992_v23  ;;  %6112 = vmatpush.msrb.mxu2 %v5992_v23 }
 0xa08   :  { %v5994_v28 = vand.u32 4294901760, %v5993_v55 }
 0xa0a   :  { %5995 = vmatpush.msra.mxu3 %v5994_v28 }
 0xa0c   :  { %5862 = vmatmul.f32.gmra.mxu0 %v10280_v9  ;;  %5903 = vmatmul.f32.gmra.mxu1 %v5669_v48 }
 0xa0d   :  { %6146 = vmatpush.msrb.mxu3 %v5940_v57 }
 0xa14   :  { %5866 = vmatmul.f32.gmra.mxu0 %v5669_v48  ;;  %5907 = vmatmul.f32.gmra.mxu1 %v5677_v10 }
 0xa1c   :  { %5870 = vmatmul.f32.gmra.mxu0 %v5677_v10  ;;  %v6242_v10 = vsub.f32 %v5241_v42, %v6191_v39 }
 0xa1e   :  { %v6243_v56 = vand.u32 4294901760, %v6242_v10 }
 0xa20   :  { %v6244_v57 = vsub.f32 %v6242_v10, %v6243_v56 }
 0xa22   :  { %v6245_v28 = vand.u32 4294901760, %v6244_v57 }
 0xa24   :  { %6246 = vmatpush.msra.mxu1 %v6245_v28 }
 0xa49   :  { %v5659_v62 = vpop.f32.mrf.mxu0 }
 0xa50   :  { %v5808_v6 = vpop.f32.mrf.mxu3 }
 0xa51   :  { %v5724_v21 = vpop.f32.mrf.mxu1  ;;  %v5667_v9 = vpop.f32.mrf.mxu0 }
 0xa52   :  { %v5766_v48 = vpop.f32.mrf.mxu2  ;;  %v5725_v27 = vadd.f32 %v5724_v21, %v5659_v62 }
 0xa54   :  { %v5767_v36 = vadd.f32 %v5766_v48, %v5725_v27 }
 0xa56   :  { %v5809_v4 = vadd.f32 %v5808_v6, %v5767_v36  ;;  %v5102_v36 = vadd.f32 %v10205_v30, %v5059_v2  ;;  %v5063_v30 = vadd.f32 %v10207_v49, %v10211_v24 }
 0xa58   :  { %v5814_v40 = vpop.f32.mrf.mxu3  ;;  %v5145_v3 = vadd.f32 %v10209_v13, %v5102_v36 }
 0xa59   :  { %v5728_v53 = vpop.f32.mrf.mxu1  ;;  %v5675_v26 = vpop.f32.mrf.mxu0 }
 0xa5a   :  { %v5729_v45 = vadd.f32 %v5728_v53, %v5667_v9  ;;  %v5771_v50 = vpop.f32.mrf.mxu2  ;;  %v5139_v53 = vadd.f32 %v10201_v61, %v5097_v22 }
 0xa5c   :  { %v5772_v25 = vadd.f32 %v5771_v50, %v5729_v45 }
 0xa5e   :  { %v5815_v21 = vadd.f32 %v5814_v40, %v5772_v25 }
 0xa60   :  { %v5820_v27 = vpop.f32.mrf.mxu3 }
 0xa61   :  { %v5732_v59 = vpop.f32.mrf.mxu1 }
 0xa62   :  { %v5733_v58 = vadd.f32 %v5732_v59, %v5675_v26  ;;  %v5776_v8 = vpop.f32.mrf.mxu2  ;;  %v5190_v26 = vadd.f32 %v10227_v29, %v5139_v53 }
 0xa64   :  { %v5777_v55 = vadd.f32 %v5776_v8, %v5733_v58  ;;  %v5227_v29 = vadd.f32 %v10223_v47, %v5190_v26 }
 0xa66   :  { %v5821_v1 = vadd.f32 %v5820_v27, %v5777_v55  ;;  %v6165_v25 = vsel %vm1975_vm1, %v5227_v29, 0 }
 0xa67   :  { %v10330_v22 = vand.u32 4294901760, %v6165_v25 }
 0xa71   :  { %v5736_v17 = vpop.f32.mrf.mxu1 }
 0xa79   :  { %v5683_v52 = vpop.f32.mrf.mxu0  ;;  %v5896_v5 = vpop.f32.mrf.mxu1 }
 0xa81   :  { %v5859_v38 = vpop.f32.mrf.mxu0  ;;  %v5900_v31 = vpop.f32.mrf.mxu1 }
 0xa82   :  { %v5860_v7 = vadd.f32 %v5859_v38, %v5809_v4  ;;  %v5781_v38 = vpop.f32.mrf.mxu2 }
 0xa84   :  { %v5897_v63 = vadd.f32 %v5896_v5, %v5860_v7  ;;  %v5737_v5 = vadd.f32 %v5736_v17, %v5683_v52 }
 0xa86   :  { %v5914_v0 = vsel %vm1975_vm1, %v5897_v63, 0  ;;  %v5782_v17 = vadd.f32 %v5781_v38, %v5737_v5  ;;  %v5194_v63 = vadd.f32 %v10231_v19, %v5145_v3 }
 0xa87   :  { %v10306_v51 = vand.u32 4294901760, %v5914_v0 }
 0xa89   :  { %v5943_v32 = vsub.f32 %v5914_v0, %v10306_v51  ;;  %v5863_v62 = vpop.f32.mrf.mxu0  ;;  %5997 = vmatmul.f32.vlgmr.msra.gmra.mxu3 %v10306_v51  ;;  %v5904_v35 = vpop.f32.mrf.mxu1 }
 0xa8a   :  { %v5864_v60 = vadd.f32 %v5863_v62, %v5815_v21  ;;  %6319 = vmatpush.msra.mxu3 %v6191_v39  ;;  %v6194_v62 = vsub.f32 %v6165_v25, %v10330_v22 }
 0xa8b   :  { %v5944_v23 = vand.u32 4294901760, %v5943_v32  ;;  %6033 = vmatmul.f32.vlgmr.msrb.gmra.mxu0 %v5943_v32 }
 0xa8c   :  { %v5901_v9 = vadd.f32 %v5900_v31, %v5864_v60  ;;  %6363 = vmatpush.msrb.mxu0 %v6243_v56  ;;  %v5231_v31 = vadd.f32 %v10229_v54, %v5194_v63  ;;  %v6195_v55 = vand.u32 4294901760, %v6194_v62 }
 0xa8d   :  { %v5945_v59 = vsub.f32 %v5943_v32, %v5944_v23  ;;  %6072 = vmatmul.f32.vlgmr.msrb.gmra.mxu1 %v5944_v23 }
 0xa8e   :  { %v5917_v48 = vsel %vm1975_vm1, %v5901_v9, 0  ;;  %6397 = vmatpush.msrb.mxu1 %v6191_v39  ;;  %v5826_v39 = vpop.f32.mrf.mxu3  ;;  %v6168_v57 = vsel %vm1975_vm1, %v5231_v31, 0 }
 0xa8f   :  { %v5946_v6 = vand.u32 4294901760, %v5945_v59  ;;  %v10315_v61 = vand.u32 4294901760, %v5917_v48  ;;  %v5827_v13 = vadd.f32 %v5826_v39, %v5782_v17  ;;  %v6196_v59 = vsub.f32 %v6194_v62, %v6195_v55 }
 0xa91   :  { %v5867_v45 = vpop.f32.mrf.mxu0  ;;  %5947 = vmatmul.f32.vlgmr.msra.gmra.mxu2 %v5946_v6  ;;  %6001 = vmatmul.f32.gmra.mxu3 %v10315_v61  ;;  %v5951_v4 = vsub.f32 %v5917_v48, %v10315_v61  ;;  %v5908_v58 = vpop.f32.mrf.mxu1  ;;  %v6197_v6 = vand.u32 4294901760, %v6196_v59 }
 0xa92   :  { %v5868_v50 = vadd.f32 %v5867_v45, %v5821_v1  ;;  %6281 = vmatpush.msra.mxu2 %v6242_v10  ;;  %v5107_v10 = vadd.f32 %v10213_v46, %v5063_v30  ;;  %v5067_v46 = vadd.f32 %v10215_v34, %v10219_v20 }
 0xa93   :  { %6038 = vmatmul.f32.gmra.mxu0 %v5951_v4  ;;  %v5952_v7 = vand.u32 4294901760, %v5951_v4 }
 0xa94   :  { %v5905_v52 = vadd.f32 %v5904_v35, %v5868_v50  ;;  %v5151_v56 = vadd.f32 %v10217_v43, %v5107_v10  ;;  %v5112_v2 = vadd.f32 %v10221_v11, %v5067_v46  ;;  %v6201_v43 = vand.u32 4294901760, %v6168_v57 }
 0xa95   :  { %6078 = vmatmul.f32.gmra.mxu1 %v5952_v7  ;;  %v5953_v42 = vsub.f32 %v5951_v4, %v5952_v7 }
 0xa96   :  { %v5920_v47 = vsel %vm1975_vm1, %v5905_v52, 0  ;;  %v5198_v53 = vadd.f32 %v10235_v14, %v5151_v56  ;;  %v5157_v28 = vadd.f32 %v10225_v12, %v5112_v2  ;;  %v6202_v26 = vsub.f32 %v6168_v57, %v6201_v43 }
 0xa97   :  { %v10327_v40 = vand.u32 4294901760, %v5920_v47  ;;  %v5954_v0 = vand.u32 4294901760, %v5953_v42 }
 0xa98   :  { %v5235_v20 = vadd.f32 %v10233_v15, %v5198_v53  ;;  %v5202_v27 = vadd.f32 %v10239_v37, %v5157_v28  ;;  %v6203_v5 = vand.u32 4294901760, %v6202_v26 }
 0xa99   :  { %v5871_v49 = vpop.f32.mrf.mxu0  ;;  %5955 = vmatmul.f32.gmra.mxu2 %v5954_v0  ;;  %6005 = vmatmul.f32.gmra.mxu3 %v10327_v40  ;;  %v5959_v24 = vsub.f32 %v5920_v47, %v10327_v40 }
 0xa9a   :  { %v5872_v19 = vadd.f32 %v5871_v49, %v5827_v13  ;;  %v6171_v48 = vsel %vm1975_vm1, %v5235_v20, 0  ;;  %v5239_v15 = vadd.f32 %v10237_v33, %v5202_v27  ;;  %v6204_v12 = vsub.f32 %v6202_v26, %v6203_v5 }
 0xa9b   :  { %6043 = vmatmul.f32.gmra.mxu0 %v5959_v24  ;;  %v5960_v21 = vand.u32 4294901760, %v5959_v24  ;;  %v6209_v36 = vand.u32 4294901760, %v6171_v48 }
 0xa9c   :  { %v5909_v32 = vadd.f32 %v5908_v58, %v5872_v19  ;;  %v6174_v35 = vsel %vm1975_vm1, %v5239_v15, 0  ;;  %v6205_v37 = vand.u32 4294901760, %v6204_v12 }
 0xa9d   :  { %6084 = vmatmul.f32.gmra.mxu1 %v5960_v21  ;;  %v5961_v60 = vsub.f32 %v5959_v24, %v5960_v21  ;;  %v6210_v1 = vsub.f32 %v6171_v48, %v6209_v36  ;;  %v6217_v45 = vand.u32 4294901760, %v6174_v35 }
 0xa9e   :  { %v5923_v54 = vsel %vm1975_vm1, %v5909_v32, 0  ;;  %v6428_v32 = vld [vmem:[%s10480_s11 + $0x8] sm:$0xff] }
 0xa9f   :  { %v5966_v8 = vand.u32 4294901760, %v5923_v54  ;;  %v5962_v23 = vand.u32 4294901760, %v5961_v60  ;;  %v6211_v4 = vand.u32 4294901760, %v6210_v1  ;;  %v6218_v29 = vsub.f32 %v6174_v35, %v6217_v45  ;;  %v6427_v60 = vld [vmem:[%s10480_s11] sm:$0xff] }
 0xaa0   :  { %v6461_v53 = vand.u32 4294901760, %v6427_v60 }
 0xaa1   :  { %5963 = vmatmul.f32.gmra.mxu2 %v5962_v23  ;;  %6009 = vmatmul.f32.gmra.mxu3 %v5966_v8  ;;  %v5967_v34 = vsub.f32 %v5923_v54, %v5966_v8  ;;  %v6212_v50 = vsub.f32 %v6210_v1, %v6211_v4  ;;  %v6219_v38 = vand.u32 4294901760, %v6218_v29 }
 0xaa3   :  { %6048 = vmatmul.f32.gmra.mxu0 %v5967_v34  ;;  %v5968_v9 = vand.u32 4294901760, %v5967_v34  ;;  %v6213_v33 = vand.u32 4294901760, %v6212_v50  ;;  %v6220_v7 = vsub.f32 %v6218_v29, %v6219_v38 }
 0xaa5   :  { %6090 = vmatmul.f32.gmra.mxu1 %v5968_v9  ;;  %v5969_v14 = vsub.f32 %v5967_v34, %v5968_v9 }
 0xaa7   :  { %v5970_v11 = vand.u32 4294901760, %v5969_v14 }
 0xaa9   :  { %5971 = vmatmul.f32.gmra.mxu2 %v5970_v11  ;;  %6148 = vmatmul.f32.vlgmr.msrb.gmra.mxu3 %v10306_v51 }
 0xaab   :  { %6198 = vmatmul.f32.vlgmr.msra.gmra.mxu0 %v6197_v6 }
 0xaad   :  { %6248 = vmatmul.f32.vlgmr.msra.gmra.mxu1 %v10330_v22 }
 0xab1   :  { %6114 = vmatmul.f32.vlgmr.msrb.gmra.mxu2 %v10306_v51  ;;  %6152 = vmatmul.f32.gmra.mxu3 %v10315_v61  ;;  %v6221_v51 = vand.u32 4294901760, %v6220_v7 }
 0xab3   :  { %6206 = vmatmul.f32.gmra.mxu0 %v6205_v37 }
 0xab5   :  { %6252 = vmatmul.f32.gmra.mxu1 %v6201_v43 }
 0xab9   :  { %6118 = vmatmul.f32.gmra.mxu2 %v10315_v61  ;;  %6156 = vmatmul.f32.gmra.mxu3 %v10327_v40 }
 0xabb   :  { %6214 = vmatmul.f32.gmra.mxu0 %v6213_v33 }
 0xabd   :  { %6256 = vmatmul.f32.gmra.mxu1 %v6209_v36 }
 0xac1   :  { %6122 = vmatmul.f32.gmra.mxu2 %v10327_v40  ;;  %6160 = vmatmul.f32.gmra.mxu3 %v5966_v8 }
 0xac3   :  { %6222 = vmatmul.f32.gmra.mxu0 %v6221_v51 }
 0xac5   :  { %6260 = vmatmul.f32.gmra.mxu1 %v6217_v45 }
 0xac9   :  { %6126 = vmatmul.f32.gmra.mxu2 %v5966_v8  ;;  %6323 = vmatmul.f32.vlgmr.msra.gmra.mxu3 %v6195_v55  ;;  %v6517_v55 = vsub.f32 %v6427_v60, %v6461_v53 }
 0xacb   :  { %6365 = vmatmul.f32.vlgmr.msrb.gmra.mxu0 %v10330_v22  ;;  %v6518_v20 = vand.u32 4294901760, %v6517_v55 }
 0xacd   :  { %6399 = vmatmul.f32.vlgmr.msrb.gmra.mxu1 %v10330_v22 }
 0xad1   :  { %6284 = vmatmul.f32.vlgmr.msra.gmra.mxu2 %v6194_v62  ;;  %6329 = vmatmul.f32.gmra.mxu3 %v6203_v5  ;;  %v6459_v62 = vand.u32 4294901760, %v6428_v32 }
 0xad3   :  { %6369 = vmatmul.f32.gmra.mxu0 %v6201_v43  ;;  %v6511_v57 = vsub.f32 %v6428_v32, %v6459_v62  ;;  %6460 = vmatpush.msrb.mxu2 %v6459_v62 }
 0xad4   :  { %6595 = vmatpush.msra.mxu1 %v6459_v62 }
 0xad5   :  { %6403 = vmatmul.f32.gmra.mxu1 %v6201_v43  ;;  %v6512_v2 = vand.u32 4294901760, %v6511_v57  ;;  %6555 = vmatpush.msra.mxu0 %v6511_v57 }
 0xad6   :  { %6597 = vmatpush.msra.mxu1 %v6461_v53  ;;  %6462 = vmatpush.msrb.mxu2 %v6461_v53 }
 0xad7   :  { %v6513_v34 = vsub.f32 %v6511_v57, %v6512_v2  ;;  %6558 = vmatpush.msra.mxu0 %v6517_v55 }
 0xad8   :  { %6640 = vmatpush.msra.mxu2 %v6512_v2 }
 0xad9   :  { %6289 = vmatmul.f32.gmra.mxu2 %v6202_v26  ;;  %6335 = vmatmul.f32.gmra.mxu3 %v6211_v4  ;;  %v6514_v59 = vand.u32 4294901760, %v6513_v34  ;;  %v6519_v26 = vsub.f32 %v6517_v55, %v6518_v20 }
 0xada   :  { %6644 = vmatpush.msra.mxu2 %v6518_v20 }
 0xadb   :  { %6373 = vmatmul.f32.gmra.mxu0 %v6209_v36  ;;  %6515 = vmatpush.msrb.mxu3 %v6514_v59  ;;  %v6520_v14 = vand.u32 4294901760, %v6519_v26 }
 0xadd   :  { %6407 = vmatmul.f32.gmra.mxu1 %v6209_v36  ;;  %6521 = vmatpush.msrb.mxu3 %v6520_v14 }
 0xadf   :  { %6677 = vmatpush.msra.mxu3 %v6459_v62 }
 0xae1   :  { %6294 = vmatmul.f32.gmra.mxu2 %v6210_v1  ;;  %6341 = vmatmul.f32.gmra.mxu3 %v6219_v38 }
 0xae2   :  { %6679 = vmatpush.msra.mxu3 %v6461_v53 }
 0xae3   :  { %6377 = vmatmul.f32.gmra.mxu0 %v6217_v45 }
 0xae5   :  { %6411 = vmatmul.f32.gmra.mxu1 %v6217_v45 }
 0xae9   :  { %6299 = vmatmul.f32.gmra.mxu2 %v6218_v29 }
 0xb08   :  { %v6034_v61 = vpop.f32.mrf.mxu0 }
 0xb0a   :  { %v6073_v3 = vpop.f32.mrf.mxu1 }
 0xb0c   :  { %v5998_v30 = vpop.f32.mrf.mxu3 }
 0xb10   :  { %v6039_v17 = vpop.f32.mrf.mxu0 }
 0xb12   :  { %v6079_v52 = vpop.f32.mrf.mxu1 }
 0xb14   :  { %v5948_v42 = vpop.f32.mrf.mxu2  ;;  %v6002_v25 = vpop.f32.mrf.mxu3 }
 0xb15   :  { %v5999_v23 = vadd.f32 %v5998_v30, %v5948_v42 }
 0xb17   :  { %v6035_v28 = vadd.f32 %v6034_v61, %v5999_v23 }
 0xb18   :  { %v6044_v63 = vpop.f32.mrf.mxu0 }
 0xb19   :  { %v6074_v11 = vadd.f32 %v6073_v3, %v6035_v28 }
 0xb1a   :  { %v10358_v47 = vpop.f32.mrf.mxu1 }
 0xb1c   :  { %v5956_v39 = vpop.f32.mrf.mxu2  ;;  %v6006_v40 = vpop.f32.mrf.mxu3 }
 0xb1d   :  { %v6003_v27 = vadd.f32 %v6002_v25, %v5956_v39 }
 0xb1f   :  { %v6040_v15 = vadd.f32 %v6039_v17, %v6003_v27 }
 0xb20   :  { %v10360_v0 = vpop.f32.mrf.mxu0 }
 0xb21   :  { %v6080_v37 = vadd.f32 %v6079_v52, %v6040_v15  ;;  %v10379_v52 = vld [vmem:[%s10479_s10] ss:$0 sm:$0xff] }
 0xb22   :  { %v10362_v10 = vpop.f32.mrf.mxu1 }
 0xb24   :  { %v5964_v13 = vpop.f32.mrf.mxu2  ;;  %v6010_v22 = vpop.f32.mrf.mxu3 }
 0xb25   :  { %v6007_v45 = vadd.f32 %v6006_v40, %v5964_v13 }
 0xb27   :  { %v6045_v33 = vadd.f32 %v6044_v63, %v6007_v45 }
 0xb28   :  { %v6199_v49 = vpop.f32.mrf.mxu0 }
 0xb29   :  { %v6086_v42 = vadd.f32 %v10358_v47, %v6045_v33 }
 0xb2a   :  { %v6249_v24 = vpop.f32.mrf.mxu1 }
 0xb2c   :  { %v5972_v31 = vpop.f32.mrf.mxu2  ;;  %v6149_v19 = vpop.f32.mrf.mxu3 }
 0xb2d   :  { %v6011_v30 = vadd.f32 %v6010_v22, %v5972_v31 }
 0xb30   :  { %v6207_v58 = vpop.f32.mrf.mxu0 }
 0xb32   :  { %v10364_v46 = vpop.f32.mrf.mxu1 }
 0xb34   :  { %v6115_v21 = vpop.f32.mrf.mxu2  ;;  %v6153_v56 = vpop.f32.mrf.mxu3 }
 0xb35   :  { %v6116_v36 = vadd.f32 %v6115_v21, %v6074_v11 }
 0xb37   :  { %v6150_v12 = vadd.f32 %v6149_v19, %v6116_v36  ;;  %v6050_v19 = vadd.f32 %v10360_v0, %v6011_v30 }
 0xb38   :  { %v6215_v43 = vpop.f32.mrf.mxu0 }
 0xb39   :  { %v6200_v29 = vadd.f32 %v6199_v49, %v6150_v12  ;;  %v6092_v47 = vadd.f32 %v10362_v10, %v6050_v19 }
 0xb3a   :  { %v6257_v9 = vpop.f32.mrf.mxu1 }
 0xb3b   :  { %v6250_v51 = vadd.f32 %v6249_v24, %v6200_v29 }
 0xb3c   :  { %v6119_v54 = vpop.f32.mrf.mxu2  ;;  %v6157_v8 = vpop.f32.mrf.mxu3 }
 0xb3d   :  { %v6120_v4 = vadd.f32 %v6119_v54, %v6080_v37 }
 0xb3f   :  { %v6154_v7 = vadd.f32 %v6153_v56, %v6120_v4 }
 0xb40   :  { %v6223_v5 = vpop.f32.mrf.mxu0 }
 0xb41   :  { %v6208_v21 = vadd.f32 %v6207_v58, %v6154_v7 }
 0xb42   :  { %v10372_v1 = vpop.f32.mrf.mxu1 }
 0xb43   :  { %v6254_v24 = vadd.f32 %v10364_v46, %v6208_v21 }
 0xb44   :  { %v6123_v48 = vpop.f32.mrf.mxu2  ;;  %v6161_v6 = vpop.f32.mrf.mxu3 }
 0xb45   :  { %v6124_v17 = vadd.f32 %v6123_v48, %v6086_v42 }
 0xb47   :  { %v6158_v13 = vadd.f32 %v6157_v8, %v6124_v17 }
 0xb48   :  { %v6366_v38 = vpop.f32.mrf.mxu0 }
 0xb49   :  { %v6216_v57 = vadd.f32 %v6215_v43, %v6158_v13 }
 0xb4a   :  { %v6400_v61 = vpop.f32.mrf.mxu1 }
 0xb4b   :  { %v6258_v2 = vadd.f32 %v6257_v9, %v6216_v57 }
 0xb4c   :  { %v6127_v35 = vpop.f32.mrf.mxu2  ;;  %v6324_v50 = vpop.f32.mrf.mxu3 }
 0xb4d   :  { %v6128_v0 = vadd.f32 %v6127_v35, %v6092_v47 }
 0xb4f   :  { %v6162_v46 = vadd.f32 %v6161_v6, %v6128_v0  ;;  %v6718_v0 = vld [vmem:[%s10482_s13 + $0x8] sm:$0xff] }
 0xb50   :  { %v6370_v22 = vpop.f32.mrf.mxu0 }
 0xb51   :  { %v6224_v26 = vadd.f32 %v6223_v5, %v6162_v46  ;;  %v6717_v46 = vld [vmem:[%s10482_s13] sm:$0xff] }
 0xb52   :  { %v6404_v32 = vpop.f32.mrf.mxu1 }
 0xb53   :  { %v6262_v12 = vadd.f32 %v10372_v1, %v6224_v26 }
 0xb54   :  { %v6285_v3 = vpop.f32.mrf.mxu2  ;;  %v6330_v63 = vpop.f32.mrf.mxu3 }
 0xb55   :  { %v6286_v25 = vadd.f32 %v6285_v3, %v6250_v51 }
 0xb57   :  { %v6325_v39 = vadd.f32 %v6324_v50, %v6286_v25 }
 0xb58   :  { %v6374_v28 = vpop.f32.mrf.mxu0 }
 0xb59   :  { %v6367_v40 = vadd.f32 %v6366_v38, %v6325_v39 }
 0xb5a   :  { %v6408_v48 = vpop.f32.mrf.mxu1 }
 0xb5b   :  { %v6401_v49 = vadd.f32 %v6400_v61, %v6367_v40 }
 0xb5c   :  { %v6290_v31 = vpop.f32.mrf.mxu2  ;;  %v6336_v10 = vpop.f32.mrf.mxu3 }
 0xb5d   :  { %v6419_v56 = vadd.f32 %v10379_v52, %v6401_v49  ;;  %v6291_v58 = vadd.f32 %v6290_v31, %v6254_v24  ;;  %v6720_v31 = vld [vmem:[%s10482_s13 + $0x18] sm:$0xff] }
 0xb5e   :  { %v6749_v47 = vand.u32 4294901760, %v6720_v31 }
 0xb5f   :  { %v10385_v62 = vadd.f32 %v6419_v56, %v9962_v41  ;;  %v6331_v60 = vadd.f32 %v6330_v63, %v6291_v58  ;;  %v6719_v56 = vld [vmem:[%s10482_s13 + $0x10] sm:$0xff] }
 0xb60   :  { %v6378_v33 = vpop.f32.mrf.mxu0  ;;  %v6803_v58 = vsub.f32 %v6720_v31, %v6749_v47  ;;  %6750 = vmatpush.msrb.mxu0 %v6749_v47 }
 0xb61   :  { %v6371_v53 = vadd.f32 %v6370_v22, %v6331_v60  ;;  %v6434_v54 = vsel %vm4311_vm2, %v10385_v62, 0 }
 0xb62   :  { %v10389_v8 = vand.u32 4294901760, %v6434_v54  ;;  %v6412_v51 = vpop.f32.mrf.mxu1  ;;  %v6804_v60 = vand.u32 4294901760, %v6803_v58 }
 0xb63   :  { %v6405_v23 = vadd.f32 %v6404_v32, %v6371_v53  ;;  %v6751_v32 = vand.u32 4294901760, %v6719_v56  ;;  %v6753_v53 = vand.u32 4294901760, %v6718_v0 }
 0xb64   :  { %v6295_v55 = vpop.f32.mrf.mxu2  ;;  %6523 = vmatmul.f32.vlgmr.msrb.gmra.mxu3 %v10389_v8  ;;  %v6464_v34 = vsub.f32 %v6434_v54, %v10389_v8  ;;  %v6342_v37 = vpop.f32.mrf.mxu3 }
 0xb65   :  { %v6420_v41 = vadd.f32 %v10379_v52, %v6405_v23  ;;  %v6296_v20 = vadd.f32 %v6295_v55, %v6258_v2  ;;  %6901 = vmatpush.msrb.mxu3 %v6749_v47  ;;  %v6809_v57 = vsub.f32 %v6719_v56, %v6751_v32  ;;  %6752 = vmatpush.msrb.mxu0 %v6751_v32  ;;  %v6755_v55 = vand.u32 4294901760, %v6717_v46 }
 0xb66   :  { %6561 = vmatmul.f32.vlgmr.msra.gmra.mxu0 %v6464_v34  ;;  %v6465_v43 = vand.u32 4294901760, %v6464_v34  ;;  %v6805_v23 = vsub.f32 %v6803_v58, %v6804_v60 }
 0xb67   :  { %v6337_v59 = vadd.f32 %v6336_v10, %v6296_v20  ;;  %v10395_v14 = vadd.f32 %v6420_v41, %v9976_v44  ;;  %6903 = vmatpush.msrb.mxu3 %v6751_v32  ;;  %v6810_v2 = vand.u32 4294901760, %v6809_v57  ;;  %v6815_v10 = vsub.f32 %v6718_v0, %v6753_v53  ;;  %6754 = vmatpush.msrb.mxu0 %v6753_v53 }
 0xb68   :  { %6601 = vmatmul.f32.vlgmr.msra.gmra.mxu1 %v6465_v43  ;;  %v6466_v9 = vsub.f32 %v6464_v34, %v6465_v43  ;;  %v6806_v34 = vand.u32 4294901760, %v6805_v23 }
 0xb69   :  { %v6375_v27 = vadd.f32 %v6374_v28, %v6337_v59  ;;  %v6437_v11 = vsel %vm4311_vm2, %v10395_v14, 0  ;;  %6905 = vmatpush.msrb.mxu3 %v6753_v53  ;;  %v6811_v41 = vsub.f32 %v6809_v57, %v6810_v2  ;;  %v6816_v20 = vand.u32 4294901760, %v6815_v10  ;;  %6756 = vmatpush.msrb.mxu0 %v6755_v55 }
 0xb6a   :  { %v6467_v6 = vand.u32 4294901760, %v6466_v9  ;;  %v6471_v36 = vand.u32 4294901760, %v6437_v11  ;;  %v6821_v28 = vsub.f32 %v6717_v46, %v6755_v55  ;;  %6807 = vmatpush.msrb.mxu1 %v6806_v34 }
 0xb6b   :  { %v6409_v15 = vadd.f32 %v6408_v48, %v6375_v27  ;;  %6907 = vmatpush.msrb.mxu3 %v6755_v55  ;;  %v6812_v43 = vand.u32 4294901760, %v6811_v41  ;;  %v6817_v59 = vsub.f32 %v6815_v10, %v6816_v20  ;;  %6948 = vmatpush.msra.mxu0 %v6804_v60  ;;  %v7510_v48 = vld [vmem:[%s10481_s12] ss:$0 sm:$0xff] }
 0xb6c   :  { %v6300_v35 = vpop.f32.mrf.mxu2  ;;  %6468 = vmatmul.f32.vlgmr.msrb.gmra.mxu2 %v6467_v6  ;;  %6527 = vmatmul.f32.gmra.mxu3 %v6471_v36  ;;  %v6472_v45 = vsub.f32 %v6437_v11, %v6471_v36  ;;  %v6822_v26 = vand.u32 4294901760, %v6821_v28 }
 0xb6d   :  { %v6421_v5 = vadd.f32 %v10379_v52, %v6409_v15  ;;  %v6301_v44 = vadd.f32 %v6300_v35, %v6262_v12  ;;  %6857 = vmatpush.msrb.mxu2 %v6803_v58  ;;  %6813 = vmatpush.msrb.mxu1 %v6812_v43  ;;  %v6818_v9 = vand.u32 4294901760, %v6817_v59 }
 0xb6e   :  { %6566 = vmatmul.f32.gmra.mxu0 %v6472_v45  ;;  %v6473_v4 = vand.u32 4294901760, %v6472_v45  ;;  %v6823_v11 = vsub.f32 %v6821_v28, %v6822_v26 }
 0xb6f   :  { %v6343_v29 = vadd.f32 %v6342_v37, %v6301_v44  ;;  %v10402_v50 = vadd.f32 %v6421_v5, %v9981_v18  ;;  %6860 = vmatpush.msrb.mxu2 %v6809_v57  ;;  %6952 = vmatpush.msra.mxu0 %v6810_v2 }
 0xb70   :  { %6607 = vmatmul.f32.gmra.mxu1 %v6473_v4  ;;  %v6474_v38 = vsub.f32 %v6472_v45, %v6473_v4 }
 0xb71   :  { %v6379_v7 = vadd.f32 %v6378_v33, %v6343_v29  ;;  %v6440_v1 = vsel %vm4311_vm2, %v10402_v50, 0  ;;  %6863 = vmatpush.msrb.mxu2 %v6815_v10  ;;  %6819 = vmatpush.msrb.mxu1 %v6818_v9 }
 0xb72   :  { %v6475_v61 = vand.u32 4294901760, %v6474_v38  ;;  %v6479_v3 = vand.u32 4294901760, %v6440_v1  ;;  %6956 = vmatpush.msra.mxu0 %v6816_v20 }
 0xb73   :  { %v6413_v30 = vadd.f32 %v6412_v51, %v6379_v7  ;;  %6866 = vmatpush.msrb.mxu2 %v6821_v28 }
 0xb74   :  { %6476 = vmatmul.f32.gmra.mxu2 %v6475_v61  ;;  %6531 = vmatmul.f32.gmra.mxu3 %v6479_v3  ;;  %v6480_v42 = vsub.f32 %v6440_v1, %v6479_v3 }
 0xb75   :  { %v6422_v25 = vadd.f32 %v10379_v52, %v6413_v30  ;;  %6960 = vmatpush.msra.mxu0 %v6822_v26 }
 0xb76   :  { %6571 = vmatmul.f32.gmra.mxu0 %v6480_v42  ;;  %v6481_v17 = vand.u32 4294901760, %v6480_v42 }
 0xb77   :  { %v10408_v18 = vadd.f32 %v6422_v25, %v9985_v16 }
 0xb78   :  { %6613 = vmatmul.f32.gmra.mxu1 %v6481_v17  ;;  %v6482_v39 = vsub.f32 %v6480_v42, %v6481_v17 }
 0xb79   :  { %v6443_v21 = vsel %vm4311_vm2, %v10408_v18, 0 }
 0xb7a   :  { %v6483_v19 = vand.u32 4294901760, %v6482_v39  ;;  %v6487_v40 = vand.u32 4294901760, %v6443_v21 }
 0xb7c   :  { %6484 = vmatmul.f32.gmra.mxu2 %v6483_v19  ;;  %6535 = vmatmul.f32.gmra.mxu3 %v6487_v40  ;;  %v6488_v63 = vsub.f32 %v6443_v21, %v6487_v40 }
 0xb7e   :  { %6576 = vmatmul.f32.gmra.mxu0 %v6488_v63  ;;  %v6489_v13 = vand.u32 4294901760, %v6488_v63 }
 0xb80   :  { %6619 = vmatmul.f32.gmra.mxu1 %v6489_v13  ;;  %v6490_v49 = vsub.f32 %v6488_v63, %v6489_v13 }
 0xb82   :  { %v6491_v52 = vand.u32 4294901760, %v6490_v49 }
 0xb84   :  { %6492 = vmatmul.f32.gmra.mxu2 %v6491_v52  ;;  %6681 = vmatmul.f32.vlgmr.msra.gmra.mxu3 %v10389_v8 }
 0xb8c   :  { %6646 = vmatmul.f32.vlgmr.msra.gmra.mxu2 %v10389_v8  ;;  %6685 = vmatmul.f32.gmra.mxu3 %v6471_v36 }
 0xb94   :  { %6650 = vmatmul.f32.gmra.mxu2 %v6471_v36  ;;  %6689 = vmatmul.f32.gmra.mxu3 %v6479_v3  ;;  %v6824_v36 = vand.u32 4294901760, %v6823_v11 }
 0xb96   :  { %6825 = vmatpush.msrb.mxu1 %v6824_v36 }
 0xb98   :  { %6991 = vmatpush.msra.mxu1 %v6749_v47 }
 0xb9a   :  { %6993 = vmatpush.msra.mxu1 %v6751_v32 }
 0xb9c   :  { %6654 = vmatmul.f32.gmra.mxu2 %v6479_v3  ;;  %6693 = vmatmul.f32.gmra.mxu3 %v6487_v40 }
 0xb9d   :  { %6995 = vmatpush.msra.mxu1 %v6753_v53 }
 0xb9f   :  { %6997 = vmatpush.msra.mxu1 %v6755_v55 }
 0xba4   :  { %6658 = vmatmul.f32.gmra.mxu2 %v6487_v40 }
 0xbe3   :  { %v6562_v12 = vpop.f32.mrf.mxu0 }
 0xbe5   :  { %v6602_v45 = vpop.f32.mrf.mxu1 }
 0xbe7   :  { %v6524_v16 = vpop.f32.mrf.mxu3 }
 0xbeb   :  { %v6567_v29 = vpop.f32.mrf.mxu0 }
 0xbed   :  { %v6608_v51 = vpop.f32.mrf.mxu1 }
 0xbef   :  { %v6469_v24 = vpop.f32.mrf.mxu2  ;;  %v10414_v22 = vpop.f32.mrf.mxu3 }
 0xbf0   :  { %v6470_v15 = vadd.f32 %v7510_v48, %v6469_v24 }
 0xbf2   :  { %v6525_v35 = vadd.f32 %v6524_v16, %v6470_v15 }
 0xbf3   :  { %v6572_v19 = vpop.f32.mrf.mxu0 }
 0xbf4   :  { %v6563_v37 = vadd.f32 %v6562_v12, %v6525_v35 }
 0xbf6   :  { %v6603_v38 = vadd.f32 %v6602_v45, %v6563_v37 }
 0xbf7   :  { %v6477_v54 = vpop.f32.mrf.mxu2  ;;  %v6532_v8 = vpop.f32.mrf.mxu3 }
 0xbf8   :  { %v6478_v44 = vadd.f32 %v7510_v48, %v6477_v54 }
 0xbfa   :  { %v6529_v33 = vadd.f32 %v10414_v22, %v6478_v44  ;;  %v6614_v22 = vpop.f32.mrf.mxu1 }
 0xbfb   :  { %v6577_v46 = vpop.f32.mrf.mxu0 }
 0xbfc   :  { %v6568_v30 = vadd.f32 %v6567_v29, %v6529_v33 }
 0xbfe   :  { %v6609_v21 = vadd.f32 %v6608_v51, %v6568_v30 }
 0xbff   :  { %v6485_v27 = vpop.f32.mrf.mxu2  ;;  %v6536_v6 = vpop.f32.mrf.mxu3 }
 0xc00   :  { %v6486_v61 = vadd.f32 %v7510_v48, %v6485_v27 }
 0xc02   :  { %v6533_v17 = vadd.f32 %v6532_v8, %v6486_v61  ;;  %v6620_v28 = vpop.f32.mrf.mxu1 }
 0xc04   :  { %v6573_v24 = vadd.f32 %v6572_v19, %v6533_v17 }
 0xc06   :  { %v6615_v0 = vadd.f32 %v6614_v22, %v6573_v24  ;;  %v7019_v22 = vld [vmem:[%s10484_s16] sm:$0xff] }
 0xc07   :  { %v6493_v5 = vpop.f32.mrf.mxu2  ;;  %v6682_v4 = vpop.f32.mrf.mxu3 }
 0xc08   :  { %v6494_v49 = vadd.f32 %v7510_v48, %v6493_v5 }
 0xc0a   :  { %v6537_v56 = vadd.f32 %v6536_v6, %v6494_v49  ;;  %v7020_v49 = vld [vmem:[%s10484_s16 + $0x8] sm:$0xff] }
 0xc0c   :  { %v6578_v55 = vadd.f32 %v6577_v46, %v6537_v56  ;;  %v7511_v46 = vld [vmem:[%s10483_s14] ss:$0 sm:$0xff] }
 0xc0e   :  { %v6621_v48 = vadd.f32 %v6620_v28, %v6578_v55 }
 0xc0f   :  { %v6647_v7 = vpop.f32.mrf.mxu2  ;;  %v6686_v25 = vpop.f32.mrf.mxu3 }
 0xc10   :  { %v6648_v1 = vadd.f32 %v6647_v7, %v6603_v38 }
 0xc12   :  { %v6683_v3 = vadd.f32 %v6682_v4, %v6648_v1 }
 0xc14   :  { %v6697_v42 = vadd.f32 3.0, %v6683_v3 }
 0xc16   :  { %v6701_v39 = vmax.f32 %v6697_v42, 0.0 }
 0xc17   :  { %v6651_v40 = vpop.f32.mrf.mxu2  ;;  %v6690_v57 = vpop.f32.mrf.mxu3 }
 0xc18   :  { %v6705_v63 = vmin.f32 %v6701_v39, 6.0  ;;  %v6652_v13 = vadd.f32 %v6651_v40, %v6609_v21 }
 0xc1a   :  { %v6709_v52 = vmul.f32 %v6705_v63, %v6683_v3  ;;  %v6687_v16 = vadd.f32 %v6686_v25, %v6652_v13 }
 0xc1c   :  { %v6713_v31 = vmul.f32 0.16666667, %v6709_v52  ;;  %v6698_v47 = vadd.f32 3.0, %v6687_v16  ;;  %v7047_v52 = vand.u32 4294901760, %v7020_v49 }
 0xc1e   :  { %v6726_v58 = vsel %vm4894_vm3, %v6713_v31, 0  ;;  %v6702_v32 = vmax.f32 %v6698_v47, 0.0  ;;  %v7099_v31 = vsub.f32 %v7020_v49, %v7047_v52  ;;  %v7049_v47 = vand.u32 4294901760, %v7019_v22  ;;  %7048 = vmatpush.msra.mxu2 %v7047_v52 }
 0xc1f   :  { %v10433_v60 = vand.u32 4294901760, %v6726_v58  ;;  %v6655_v53 = vpop.f32.mrf.mxu2  ;;  %v6694_v15 = vpop.f32.mrf.mxu3 }
 0xc20   :  { %v6706_v54 = vmin.f32 %v6702_v32, 6.0  ;;  %v6656_v8 = vadd.f32 %v6655_v53, %v6615_v0  ;;  %v7100_v56 = vand.u32 4294901760, %v7099_v31  ;;  %7050 = vmatpush.msra.mxu2 %v7049_v47 }
 0xc21   :  { %v6758_v23 = vsub.f32 %v6726_v58, %v10433_v60  ;;  %6827 = vmatmul.f32.vlgmr.msrb.gmra.mxu1 %v10433_v60  ;;  %v7105_v58 = vsub.f32 %v7019_v22, %v7049_v47 }
 0xc22   :  { %v6710_v2 = vmul.f32 %v6706_v54, %v6687_v16  ;;  %v6691_v10 = vadd.f32 %v6690_v57, %v6656_v8  ;;  %7183 = vmatpush.msrb.mxu1 %v7047_v52  ;;  %v7101_v32 = vsub.f32 %v7099_v31, %v7100_v56 }
 0xc23   :  { %6869 = vmatmul.f32.vlgmr.msrb.gmra.mxu2 %v6758_v23  ;;  %v6759_v34 = vand.u32 4294901760, %v6758_v23  ;;  %v7106_v0 = vand.u32 4294901760, %v7105_v58 }
 0xc24   :  { %v6714_v41 = vmul.f32 0.16666667, %v6710_v2  ;;  %v6699_v20 = vadd.f32 3.0, %v6691_v10  ;;  %7185 = vmatpush.msrb.mxu1 %v7049_v47  ;;  %7228 = vmatpush.msrb.mxu2 %v7100_v56 }
 0xc25   :  { %6911 = vmatmul.f32.vlgmr.msrb.gmra.mxu3 %v6759_v34  ;;  %v6760_v43 = vsub.f32 %v6758_v23, %v6759_v34  ;;  %v7107_v57 = vsub.f32 %v7105_v58, %v7106_v0 }
 0xc26   :  { %v6729_v59 = vsel %vm4894_vm3, %v6714_v41, 0  ;;  %v6703_v26 = vmax.f32 %v6699_v20, 0.0  ;;  %7232 = vmatpush.msrb.mxu2 %v7106_v0 }
 0xc27   :  { %v6659_v9 = vpop.f32.mrf.mxu2  ;;  %v6761_v27 = vand.u32 4294901760, %v6760_v43  ;;  %v6765_v11 = vand.u32 4294901760, %v6729_v59  ;;  %v7108_v8 = vand.u32 4294901760, %v7107_v57 }
 0xc28   :  { %v6707_v6 = vmin.f32 %v6703_v26, 6.0  ;;  %v6660_v36 = vadd.f32 %v6659_v9, %v6621_v48 }
 0xc29   :  { %6762 = vmatmul.f32.vlgmr.msrb.gmra.mxu0 %v6761_v27  ;;  %6831 = vmatmul.f32.gmra.mxu1 %v6765_v11  ;;  %v6766_v12 = vsub.f32 %v6729_v59, %v6765_v11 }
 0xc2a   :  { %v6711_v35 = vmul.f32 %v6707_v6, %v6691_v10  ;;  %v6695_v45 = vadd.f32 %v6694_v15, %v6660_v36  ;;  %7143 = vmatpush.msrb.mxu0 %v7099_v31 }
 0xc2b   :  { %6874 = vmatmul.f32.gmra.mxu2 %v6766_v12  ;;  %v6767_v5 = vand.u32 4294901760, %v6766_v12 }
 0xc2c   :  { %v6715_v44 = vmul.f32 0.16666667, %v6711_v35  ;;  %v6700_v37 = vadd.f32 3.0, %v6695_v45  ;;  %7146 = vmatpush.msrb.mxu0 %v7105_v58 }
 0xc2d   :  { %6917 = vmatmul.f32.gmra.mxu3 %v6767_v5  ;;  %v6768_v4 = vsub.f32 %v6766_v12, %v6767_v5 }
 0xc2e   :  { %v6732_v29 = vsel %vm4894_vm3, %v6715_v44, 0  ;;  %v6704_v33 = vmax.f32 %v6700_v37, 0.0 }
 0xc2f   :  { %v6769_v38 = vand.u32 4294901760, %v6768_v4  ;;  %v6773_v7 = vand.u32 4294901760, %v6732_v29 }
 0xc30   :  { %v6708_v1 = vmin.f32 %v6704_v33, 6.0 }
 0xc31   :  { %6770 = vmatmul.f32.gmra.mxu0 %v6769_v38  ;;  %6835 = vmatmul.f32.gmra.mxu1 %v6773_v7  ;;  %v6774_v51 = vsub.f32 %v6732_v29, %v6773_v7 }
 0xc32   :  { %v6712_v61 = vmul.f32 %v6708_v1, %v6695_v45 }
 0xc33   :  { %6879 = vmatmul.f32.gmra.mxu2 %v6774_v51  ;;  %v6775_v3 = vand.u32 4294901760, %v6774_v51 }
 0xc34   :  { %v6716_v30 = vmul.f32 0.16666667, %v6712_v61 }
 0xc35   :  { %6923 = vmatmul.f32.gmra.mxu3 %v6775_v3  ;;  %v6776_v42 = vsub.f32 %v6774_v51, %v6775_v3 }
 0xc36   :  { %v6735_v25 = vsel %vm4894_vm3, %v6716_v30, 0 }
 0xc37   :  { %v6777_v17 = vand.u32 4294901760, %v6776_v42  ;;  %v6781_v39 = vand.u32 4294901760, %v6735_v25 }
 0xc39   :  { %6778 = vmatmul.f32.gmra.mxu0 %v6777_v17  ;;  %6839 = vmatmul.f32.gmra.mxu1 %v6781_v39  ;;  %v6782_v21 = vsub.f32 %v6735_v25, %v6781_v39 }
 0xc3b   :  { %6884 = vmatmul.f32.gmra.mxu2 %v6782_v21  ;;  %v6783_v19 = vand.u32 4294901760, %v6782_v21 }
 0xc3d   :  { %6929 = vmatmul.f32.gmra.mxu3 %v6783_v19  ;;  %v6784_v40 = vsub.f32 %v6782_v21, %v6783_v19 }
 0xc3f   :  { %v6785_v63 = vand.u32 4294901760, %v6784_v40 }
 0xc41   :  { %6786 = vmatmul.f32.gmra.mxu0 %v6785_v63  ;;  %6999 = vmatmul.f32.vlgmr.msra.gmra.mxu1 %v10433_v60 }
 0xc49   :  { %6962 = vmatmul.f32.vlgmr.msra.gmra.mxu0 %v10433_v60  ;;  %7003 = vmatmul.f32.gmra.mxu1 %v6765_v11  ;;  %v7102_v60 = vand.u32 4294901760, %v7101_v32 }
 0xc4b   :  { %7103 = vmatpush.msra.mxu3 %v7102_v60 }
 0xc4d   :  { %7109 = vmatpush.msra.mxu3 %v7108_v8 }
 0xc4f   :  { %7265 = vmatpush.msrb.mxu3 %v7047_v52 }
 0xc51   :  { %6966 = vmatmul.f32.gmra.mxu0 %v6765_v11  ;;  %7007 = vmatmul.f32.gmra.mxu1 %v6773_v7 }
 0xc52   :  { %7267 = vmatpush.msrb.mxu3 %v7049_v47 }
 0xc59   :  { %6970 = vmatmul.f32.gmra.mxu0 %v6773_v7  ;;  %7011 = vmatmul.f32.gmra.mxu1 %v6781_v39 }
 0xc61   :  { %6974 = vmatmul.f32.gmra.mxu0 %v6781_v39 }
 0xc9e   :  { %v6828_v13 = vpop.f32.mrf.mxu1 }
 0xca6   :  { %v6763_v16 = vpop.f32.mrf.mxu0  ;;  %v6832_v24 = vpop.f32.mrf.mxu1 }
 0xca7   :  { %v6764_v10 = vadd.f32 %v7511_v46, %v6763_v16  ;;  %v6870_v55 = vpop.f32.mrf.mxu2 }
 0xca8   :  { %v6912_v41 = vpop.f32.mrf.mxu3 }
 0xca9   :  { %v6829_v34 = vadd.f32 %v6828_v13, %v6764_v10 }
 0xcab   :  { %v6871_v28 = vadd.f32 %v6870_v55, %v6829_v34 }
 0xcad   :  { %v6913_v48 = vadd.f32 %v6912_v41, %v6871_v28 }
 0xcae   :  { %v6771_v53 = vpop.f32.mrf.mxu0  ;;  %v6836_v54 = vpop.f32.mrf.mxu1 }
 0xcaf   :  { %v6772_v43 = vadd.f32 %v7511_v46, %v6771_v53  ;;  %v6875_v26 = vpop.f32.mrf.mxu2 }
 0xcb0   :  { %v6918_v6 = vpop.f32.mrf.mxu3 }
 0xcb1   :  { %v6833_v9 = vadd.f32 %v6832_v24, %v6772_v43 }
 0xcb3   :  { %v6876_v36 = vadd.f32 %v6875_v26, %v6833_v9 }
 0xcb5   :  { %v6919_v5 = vadd.f32 %v6918_v6, %v6876_v36 }
 0xcb6   :  { %v6779_v23 = vpop.f32.mrf.mxu0  ;;  %v6840_v2 = vpop.f32.mrf.mxu1 }
 0xcb7   :  { %v6780_v15 = vadd.f32 %v7511_v46, %v6779_v23  ;;  %v6880_v4 = vpop.f32.mrf.mxu2 }
 0xcb8   :  { %v6924_v3 = vpop.f32.mrf.mxu3 }
 0xcb9   :  { %v6837_v44 = vadd.f32 %v6836_v54, %v6780_v15 }
 0xcbb   :  { %v6881_v1 = vadd.f32 %v6880_v4, %v6837_v44 }
 0xcbd   :  { %v6925_v25 = vadd.f32 %v6924_v3, %v6881_v1 }
 0xcbe   :  { %v6787_v20 = vpop.f32.mrf.mxu0  ;;  %v7000_v59 = vpop.f32.mrf.mxu1 }
 0xcbf   :  { %v6788_v51 = vadd.f32 %v7511_v46, %v6787_v20  ;;  %v6885_v49 = vpop.f32.mrf.mxu2 }
 0xcc0   :  { %v6930_v31 = vpop.f32.mrf.mxu3 }
 0xcc1   :  { %v6841_v17 = vadd.f32 %v6840_v2, %v6788_v51 }
 0xcc3   :  { %v6886_v16 = vadd.f32 %v6885_v49, %v6841_v17 }
 0xcc5   :  { %v6931_v56 = vadd.f32 %v6930_v31, %v6886_v16 }
 0xcc6   :  { %v6963_v27 = vpop.f32.mrf.mxu0  ;;  %v7004_v45 = vpop.f32.mrf.mxu1 }
 0xcc7   :  { %v6964_v11 = vadd.f32 %v6963_v27, %v6913_v48 }
 0xcc9   :  { %v7001_v12 = vadd.f32 %v7000_v59, %v6964_v11 }
 0xccb   :  { %v7015_v35 = vadd.f32 %v7001_v12, %v10385_v62 }
 0xccd   :  { %v7022_v37 = vsel %vm4311_vm2, %v7015_v35, 0 }
 0xcce   :  { %v7051_v29 = vand.u32 4294901760, %v7022_v37  ;;  %v6967_v33 = vpop.f32.mrf.mxu0  ;;  %v7008_v21 = vpop.f32.mrf.mxu1 }
 0xccf   :  { %v6968_v38 = vadd.f32 %v6967_v33, %v6919_v5 }
 0xcd0   :  { %v7052_v7 = vsub.f32 %v7022_v37, %v7051_v29  ;;  %7111 = vmatmul.f32.vlgmr.msra.gmra.mxu3 %v7051_v29 }
 0xcd1   :  { %v7005_v61 = vadd.f32 %v7004_v45, %v6968_v38 }
 0xcd2   :  { %v7053_v30 = vand.u32 4294901760, %v7052_v7  ;;  %7149 = vmatmul.f32.vlgmr.msrb.gmra.mxu0 %v7052_v7 }
 0xcd3   :  { %v7016_v42 = vadd.f32 %v7005_v61, %v10395_v14 }
 0xcd4   :  { %v7054_v62 = vsub.f32 %v7052_v7, %v7053_v30  ;;  %7189 = vmatmul.f32.vlgmr.msrb.gmra.mxu1 %v7053_v30 }
 0xcd5   :  { %v7025_v39 = vsel %vm4311_vm2, %v7016_v42, 0  ;;  %v7285_v42 = vld [vmem:[%s10485_s15] sm:$0x3] }
 0xcd6   :  { %v6971_v19 = vpop.f32.mrf.mxu0  ;;  %v7055_v40 = vand.u32 4294901760, %v7054_v62  ;;  %v7059_v63 = vand.u32 4294901760, %v7025_v39  ;;  %v7012_v53 = vpop.f32.mrf.mxu1 }
 0xcd7   :  { %v6972_v13 = vadd.f32 %v6971_v19, %v6925_v25 }
 0xcd8   :  { %7056 = vmatmul.f32.vlgmr.msra.gmra.mxu2 %v7055_v40  ;;  %7115 = vmatmul.f32.gmra.mxu3 %v7059_v63  ;;  %v7060_v52 = vsub.f32 %v7025_v39, %v7059_v63  ;;  %v7291_v40 = vsel %vm4894_vm3, %v7285_v42, 0 }
 0xcd9   :  { %v7009_v24 = vadd.f32 %v7008_v21, %v6972_v13  ;;  %v7313_v16 = vand.u32 4294901760, %v7291_v40 }
 0xcda   :  { %7154 = vmatmul.f32.gmra.mxu0 %v7060_v52  ;;  %v7061_v22 = vand.u32 4294901760, %v7060_v52 }
 0xcdb   :  { %v7017_v14 = vadd.f32 %v7009_v24, %v10402_v50 }
 0xcdc   :  { %7195 = vmatmul.f32.gmra.mxu1 %v7061_v22  ;;  %v7062_v47 = vsub.f32 %v7060_v52, %v7061_v22 }
 0xcdd   :  { %v7028_v58 = vsel %vm4311_vm2, %v7017_v14, 0 }
 0xcde   :  { %v6975_v32 = vpop.f32.mrf.mxu0  ;;  %v7063_v0 = vand.u32 4294901760, %v7062_v47  ;;  %v7067_v60 = vand.u32 4294901760, %v7028_v58  ;;  %v23_v47 = vstv %s10486_s17 }
 0xcdf   :  { %v6976_v57 = vadd.f32 %v6975_v32, %v6931_v56  ;;  %24 = vst [vmem:[#allocation2] sm:$0x1] %v23_v47 }
 0xce0   :  { %7064 = vmatmul.f32.gmra.mxu2 %v7063_v0  ;;  %7119 = vmatmul.f32.gmra.mxu3 %v7067_v60  ;;  %v7068_v54 = vsub.f32 %v7028_v58, %v7067_v60  ;;  %v7314_v0 = vsub.f32 %v7291_v40, %v7313_v16 }
 0xce1   :  { %v7013_v8 = vadd.f32 %v7012_v53, %v6976_v57 }
 0xce2   :  { %7159 = vmatmul.f32.gmra.mxu0 %v7068_v54  ;;  %v7069_v46 = vand.u32 4294901760, %v7068_v54 }
 0xce3   :  { %v7018_v23 = vadd.f32 %v7013_v8, %v10408_v18 }
 0xce4   :  { %7201 = vmatmul.f32.gmra.mxu1 %v7069_v46  ;;  %v7070_v50 = vsub.f32 %v7068_v54, %v7069_v46 }
 0xce5   :  { %v7031_v2 = vsel %vm4311_vm2, %v7018_v23, 0  ;;  %v7315_v23 = vand.u32 4294901760, %v7314_v0 }
 0xce6   :  { %v7071_v10 = vand.u32 4294901760, %v7070_v50  ;;  %v7075_v55 = vand.u32 4294901760, %v7031_v2 }
 0xce8   :  { %7072 = vmatmul.f32.gmra.mxu2 %v7071_v10  ;;  %7123 = vmatmul.f32.gmra.mxu3 %v7075_v55  ;;  %v7076_v34 = vsub.f32 %v7031_v2, %v7075_v55 }
 0xcea   :  { %7164 = vmatmul.f32.gmra.mxu0 %v7076_v34  ;;  %v7077_v41 = vand.u32 4294901760, %v7076_v34 }
 0xcec   :  { %7207 = vmatmul.f32.gmra.mxu1 %v7077_v41  ;;  %v7078_v20 = vsub.f32 %v7076_v34, %v7077_v41  ;;  %v7316_v41 = vsub.f32 %v7314_v0, %v7315_v23 }
 0xcee   :  { %v7079_v28 = vand.u32 4294901760, %v7078_v20 }
 0xcf0   :  { %7080 = vmatmul.f32.gmra.mxu2 %v7079_v28  ;;  %7269 = vmatmul.f32.vlgmr.msrb.gmra.mxu3 %v7051_v29 }
 0xcf8   :  { %7234 = vmatmul.f32.vlgmr.msrb.gmra.mxu2 %v7051_v29  ;;  %7273 = vmatmul.f32.gmra.mxu3 %v7059_v63 }
 0xd00   :  { %7238 = vmatmul.f32.gmra.mxu2 %v7059_v63  ;;  %7277 = vmatmul.f32.gmra.mxu3 %v7067_v60 }
 0xd08   :  { %7242 = vmatmul.f32.gmra.mxu2 %v7067_v60  ;;  %7281 = vmatmul.f32.gmra.mxu3 %v7075_v55 }
 0xd10   :  { %7246 = vmatmul.f32.gmra.mxu2 %v7075_v55 }
 0xd4f   :  { %v7150_v11 = vpop.f32.mrf.mxu0 }
 0xd51   :  { %v7190_v6 = vpop.f32.mrf.mxu1 }
 0xd53   :  { %v7112_v18 = vpop.f32.mrf.mxu3 }
 0xd57   :  { %v7155_v12 = vpop.f32.mrf.mxu0 }
 0xd59   :  { %v7196_v45 = vpop.f32.mrf.mxu1 }
 0xd5b   :  { %v7057_v43 = vpop.f32.mrf.mxu2  ;;  %v7116_v59 = vpop.f32.mrf.mxu3 }
 0xd5c   :  { %v7113_v33 = vadd.f32 %v7112_v18, %v7057_v43 }
 0xd5e   :  { %v7151_v51 = vadd.f32 %v7150_v11, %v7113_v33 }
 0xd5f   :  { %v7160_v4 = vpop.f32.mrf.mxu0 }
 0xd60   :  { %v7191_v17 = vadd.f32 %v7190_v6, %v7151_v51  ;;  %v7512_v6 = vld [vmem:[#allocation2] ss:$0 sm:$0xff] }
 0xd61   :  { %v7202_v1 = vpop.f32.mrf.mxu1 }
 0xd63   :  { %v7065_v26 = vpop.f32.mrf.mxu2  ;;  %v7120_v48 = vpop.f32.mrf.mxu3 }
 0xd64   :  { %v7117_v44 = vadd.f32 %v7116_v59, %v7065_v26  ;;  %v7317_v26 = vand.u32 4294901760, %v7316_v41 }
 0xd66   :  { %v7156_v38 = vadd.f32 %v7155_v12, %v7117_v44 }
 0xd67   :  { %v7165_v19 = vpop.f32.mrf.mxu0 }
 0xd68   :  { %v7197_v3 = vadd.f32 %v7196_v45, %v7156_v38 }
 0xd69   :  { %v7208_v24 = vpop.f32.mrf.mxu1 }
 0xd6b   :  { %v7073_v9 = vpop.f32.mrf.mxu2  ;;  %v7124_v27 = vpop.f32.mrf.mxu3 }
 0xd6c   :  { %v7121_v37 = vadd.f32 %v7120_v48, %v7073_v9 }
 0xd6e   :  { %v7161_v7 = vadd.f32 %v7160_v4, %v7121_v37 }
 0xd70   :  { %v7203_v30 = vadd.f32 %v7202_v1, %v7161_v7 }
 0xd73   :  { %v7081_v36 = vpop.f32.mrf.mxu2  ;;  %v7270_v15 = vpop.f32.mrf.mxu3 }
 0xd74   :  { %v7125_v61 = vadd.f32 %v7124_v27, %v7081_v36 }
 0xd76   :  { %v7166_v63 = vadd.f32 %v7165_v19, %v7125_v61 }
 0xd78   :  { %v7209_v31 = vadd.f32 %v7208_v24, %v7166_v63 }
 0xd7b   :  { %v7235_v35 = vpop.f32.mrf.mxu2  ;;  %v7274_v5 = vpop.f32.mrf.mxu3 }
 0xd7c   :  { %v7236_v13 = vadd.f32 %v7235_v35, %v7191_v17 }
 0xd7e   :  { %v7271_v22 = vadd.f32 %v7270_v15, %v7236_v13 }
 0xd80   :  { %v7311_v57 = vand.u32 4294901760, %v7271_v22 }
 0xd82   :  { %v7353_v2 = vsub.f32 %v7271_v22, %v7311_v57 }
 0xd83   :  { %v7239_v29 = vpop.f32.mrf.mxu2  ;;  %v7278_v62 = vpop.f32.mrf.mxu3 }
 0xd84   :  { %v7240_v39 = vadd.f32 %v7239_v29, %v7197_v3  ;;  %v7354_v18 = vand.u32 4294901760, %v7353_v2 }
 0xd86   :  { %v7275_v52 = vadd.f32 %v7274_v5, %v7240_v39  ;;  %v7355_v9 = vsub.f32 %v7353_v2, %v7354_v18 }
 0xd88   :  { %v7309_v58 = vand.u32 4294901760, %v7275_v52  ;;  %v7356_v11 = vand.u32 4294901760, %v7355_v9 }
 0xd8a   :  { %v7347_v46 = vsub.f32 %v7275_v52, %v7309_v58 }
 0xd8b   :  { %v7243_v25 = vpop.f32.mrf.mxu2  ;;  %v7282_v60 = vpop.f32.mrf.mxu3 }
 0xd8c   :  { %v7244_v21 = vadd.f32 %v7243_v25, %v7203_v30  ;;  %v7348_v34 = vand.u32 4294901760, %v7347_v46 }
 0xd8e   :  { %v7279_v49 = vadd.f32 %v7278_v62, %v7244_v21  ;;  %v7349_v59 = vsub.f32 %v7347_v46, %v7348_v34 }
 0xd90   :  { %v7307_v14 = vand.u32 4294901760, %v7279_v49  ;;  %v7350_v27 = vand.u32 4294901760, %v7349_v59 }
 0xd92   :  { %v7341_v54 = vsub.f32 %v7279_v49, %v7307_v14 }
 0xd93   :  { %v7247_v56 = vpop.f32.mrf.mxu2 }
 0xd94   :  { %v7248_v32 = vadd.f32 %v7247_v56, %v7209_v31  ;;  %v7342_v10 = vand.u32 4294901760, %v7341_v54 }
 0xd96   :  { %v7283_v53 = vadd.f32 %v7282_v60, %v7248_v32  ;;  %v7343_v28 = vsub.f32 %v7341_v54, %v7342_v10 }
 0xd98   :  { %v7305_v8 = vand.u32 4294901760, %v7283_v53  ;;  %v7344_v48 = vand.u32 4294901760, %v7343_v28 }
 0xd9a   :  { %v7335_v50 = vsub.f32 %v7283_v53, %v7305_v8  ;;  %7306 = vmatpush.msra.mxu0 %v7305_v8  ;;  %7406 = vmatpush.msra.mxu3 %v7305_v8 }
 0xd9c   :  { %7308 = vmatpush.msra.mxu0 %v7307_v14  ;;  %7377 = vmatpush.msra.mxu2 %v7335_v50  ;;  %v7336_v55 = vand.u32 4294901760, %v7335_v50 }
 0xd9d   :  { %7408 = vmatpush.msra.mxu3 %v7307_v14 }
 0xd9e   :  { %7310 = vmatpush.msra.mxu0 %v7309_v58  ;;  %7380 = vmatpush.msra.mxu2 %v7341_v54  ;;  %v7337_v20 = vsub.f32 %v7335_v50, %v7336_v55 }
 0xd9f   :  { %7410 = vmatpush.msra.mxu3 %v7309_v58 }
 0xda0   :  { %7312 = vmatpush.msra.mxu0 %v7311_v57  ;;  %7383 = vmatpush.msra.mxu2 %v7347_v46  ;;  %v7338_v43 = vand.u32 4294901760, %v7337_v20 }
 0xda1   :  { %7412 = vmatpush.msra.mxu3 %v7311_v57  ;;  %7318 = vmatmul.f32.vlgmr.msra.gmra.mxu0 %v7317_v26 }
 0xda2   :  { %7435 = vmatpush.msrb.mxu0 %v7336_v55  ;;  %7339 = vmatpush.msra.mxu1 %v7338_v43 }
 0xda3   :  { %7386 = vmatpush.msra.mxu2 %v7353_v2  ;;  %7416 = vmatmul.f32.vlgmr.msra.gmra.mxu3 %v7315_v23 }
 0xda4   :  { %7439 = vmatpush.msrb.mxu0 %v7342_v10  ;;  %7389 = vmatmul.f32.vlgmr.msra.gmra.mxu2 %v7314_v0 }
 0xda5   :  { %7345 = vmatpush.msra.mxu1 %v7344_v48 }
 0xda6   :  { %7443 = vmatpush.msrb.mxu0 %v7348_v34 }
 0xda7   :  { %7351 = vmatpush.msra.mxu1 %v7350_v27 }
 0xda8   :  { %7447 = vmatpush.msrb.mxu0 %v7354_v18 }
 0xda9   :  { %7357 = vmatpush.msra.mxu1 %v7356_v11  ;;  %7449 = vmatmul.f32.vlgmr.msrb.gmra.mxu0 %v7313_v16 }
 0xdaa   :  { %7359 = vmatmul.f32.vlgmr.msra.gmra.mxu1 %v7313_v16 }
 0xdab   :  { %7466 = vmatpush.msrb.mxu1 %v7305_v8 }
 0xdad   :  { %7468 = vmatpush.msrb.mxu1 %v7307_v14 }
 0xdaf   :  { %7470 = vmatpush.msrb.mxu1 %v7309_v58 }
 0xdb1   :  { %7472 = vmatpush.msrb.mxu1 %v7311_v57 }
 0xdb2   :  { %7474 = vmatmul.f32.vlgmr.msrb.gmra.mxu1 %v7313_v16 }
 0xe1e   :  { %v7319_v36 = vpop.f32.mrf.mxu0 }
 0xe1f   :  { %v7320_v15 = vadd.f32 %v7512_v6, %v7319_v36 }
 0xe26   :  { %v7417_v5 = vpop.f32.mrf.mxu3  ;;  %v7450_v37 = vpop.f32.mrf.mxu0 }
 0xe27   :  { %v7360_v12 = vpop.f32.mrf.mxu1  ;;  %v7390_v35 = vpop.f32.mrf.mxu2 }
 0xe28   :  { %v7361_v45 = vadd.f32 %v7360_v12, %v7320_v15 }
 0xe2a   :  { %v7391_v44 = vadd.f32 %v7390_v35, %v7361_v45 }
 0xe2c   :  { %v7418_v4 = vadd.f32 %v7417_v5, %v7391_v44 }
 0xe2e   :  { %v7451_v29 = vadd.f32 %v7450_v37, %v7418_v4 }
 0xe2f   :  { %v7475_v33 = vpop.f32.mrf.mxu1 }
 0xe30   :  { %v7476_v38 = vadd.f32 %v7475_v33, %v7451_v29 }
 0xe32   :  { %7479 = vst.msk [vmem:[%s10487_s18] sm:$0x3] %vm7478_vm4, %v7476_v38 }

</bundles_post_ra>
